<compile_context>
chip_gen: v6e
topology: v6e:2x2x1
jax: 0.10.0
libtpu: 0.0.40
codegen_flags: <defaults>
</compile_context>

<pallas_src>
import jax
import jax.numpy as jnp
from jax import lax
from jax.experimental import pallas as pl
from jax.experimental.pallas import tpu as pltpu

D_MODEL = 200
N_HEAD = 4
D_HEAD = D_MODEL // N_HEAD      # 50
D_FF = 2048                     # nn.TransformerEncoderLayer default dim_feedforward
N_LAYERS = 2
N_CLASSES = 7
LN_EPS = 1e-5
WGT_DTYPE = jnp.bfloat16        # MXU operand dtype for the large weight matrices
PER_LAYER = 16                  # number of parameter arrays per encoder layer


def _layer_norm(x, w, b):
    mu = jnp.mean(x, axis=-1, keepdims=True)
    xc = x - mu
    var = jnp.mean(xc * xc, axis=-1, keepdims=True)
    return xc * lax.rsqrt(var + LN_EPS) * w + b


def fused_transformer_kernel(x_ref, *refs):
    # x_ref: (N, S, 200). refs = [2 * PER_LAYER layer params, w_cls, b_cls, o_ref].
    o_ref = refs[-1]
    w_cls_ref, b_cls_ref = refs[-3], refs[-2]

    N, S, E = x_ref.shape
    M = N * S
    scale = 1.0 / (D_HEAD ** 0.5)

    # Fold batch into the matmul M dimension (cheap leading-dim merge).
    x = x_ref[...].reshape(M, E)                                          # (M, 200) f32

    for layer in range(N_LAYERS):
        (wq, bq, wk, bk, wv, bv, wo, bo,
         ln1w, ln1b, w1, b1, w2, b2, ln2w, ln2b) = refs[layer * PER_LAYER:(layer + 1) * PER_LAYER]

        xm = x.astype(WGT_DTYPE)

        # ---- multi-head self-attention (per-head weights; no unaligned lane slicing) ----
        attn = jnp.zeros((M, E), jnp.float32)
        for h in range(N_HEAD):                                           # static loop
            qh = jnp.dot(xm, wq[h], preferred_element_type=jnp.float32) + bq[h]   # (M, 50)
            kh = jnp.dot(xm, wk[h], preferred_element_type=jnp.float32) + bk[h]
            vh = jnp.dot(xm, wv[h], preferred_element_type=jnp.float32) + bv[h]
            qh = qh.reshape(N, S, D_HEAD)
            kh = kh.reshape(N, S, D_HEAD)
            vh = vh.reshape(N, S, D_HEAD)
            s = jnp.einsum('nqd,nkd->nqk', qh, kh,
                           preferred_element_type=jnp.float32) * scale            # (N, S, S)
            m = jnp.max(s, axis=-1, keepdims=True)
            e = jnp.exp(s - m)
            p = e * pl.reciprocal(jnp.sum(e, axis=-1, keepdims=True), approx=True)
            ctx = jnp.einsum('nqk,nkd->nqd', p, vh,
                             preferred_element_type=jnp.float32).reshape(M, D_HEAD)
            attn = attn + jnp.dot(ctx.astype(WGT_DTYPE), wo[h],
                                  preferred_element_type=jnp.float32)             # (M, 200)
        attn = attn + bo[...]

        x = _layer_norm(x + attn, ln1w[...], ln1b[...])

        # ---- feed-forward (ReLU) ----
        h1 = jnp.maximum(
            jnp.dot(x.astype(WGT_DTYPE), w1[...], preferred_element_type=jnp.float32) + b1[...],
            0.0)
        ff = jnp.dot(h1.astype(WGT_DTYPE), w2[...], preferred_element_type=jnp.float32) + b2[...]
        x = _layer_norm(x + ff, ln2w[...], ln2b[...])

    # ---- classifier head: mean over batch (torch.mean(feature, dim=1)) then Linear(200, 7) ----
    feat = jnp.mean(x.reshape(N, S, E), axis=0)                                   # (S, 200)
    o_ref[...] = (jnp.dot(feat, w_cls_ref[...], preferred_element_type=jnp.float32)
                  + b_cls_ref[...])                                               # (S, 7)


def _flatten_params(layer_params, w_cls, b_cls):
    flat = []
    for lp in layer_params:
        flat.extend(lp)
    flat.extend([w_cls, b_cls])
    return flat


@jax.jit
def transformer_classifier(x_snb, layer_params, w_cls, b_cls):
    # x_snb: (seq, batch, d_model), matching the PyTorch module's (batch_first=False) layout.
    S, N, E = x_snb.shape
    x = jnp.transpose(x_snb, (1, 0, 2))                   # (batch, seq, d_model) for the kernel
    flat = _flatten_params(layer_params, w_cls, b_cls)

    def full_spec(a):
        nd = a.ndim
        return pl.BlockSpec(a.shape, lambda i, _nd=nd: (0,) * _nd)

    return pl.pallas_call(
        fused_transformer_kernel,
        out_shape=jax.ShapeDtypeStruct((S, N_CLASSES), jnp.float32),
        grid=(1,),
        in_specs=[pl.BlockSpec((N, S, E), lambda i: (0, 0, 0))]
                 + [full_spec(p) for p in flat],
        out_specs=pl.BlockSpec((S, N_CLASSES), lambda i: (0, 0)),
        compiler_params=pltpu.CompilerParams(
            dimension_semantics=("arbitrary",),
            vmem_limit_bytes=32 * 1024 * 1024),
    )(x, *flat)


def init_params(key):
    layer_params = []
    for _ in range(N_LAYERS):
        key, *ks = jax.random.split(key, 9)
        wq = (0.02 * jax.random.normal(ks[0], (N_HEAD, D_MODEL, D_HEAD))).astype(WGT_DTYPE)
        wk = (0.02 * jax.random.normal(ks[1], (N_HEAD, D_MODEL, D_HEAD))).astype(WGT_DTYPE)
        wv = (0.02 * jax.random.normal(ks[2], (N_HEAD, D_MODEL, D_HEAD))).astype(WGT_DTYPE)
        bq = 0.02 * jax.random.normal(ks[3], (N_HEAD, 1, D_HEAD), jnp.float32)
        bk = jnp.zeros((N_HEAD, 1, D_HEAD), jnp.float32)
        bv = jnp.zeros((N_HEAD, 1, D_HEAD), jnp.float32)
        wo = (0.02 * jax.random.normal(ks[4], (N_HEAD, D_HEAD, D_MODEL))).astype(WGT_DTYPE)
        bo = 0.02 * jax.random.normal(ks[5], (1, D_MODEL), jnp.float32)
        ln1w = jnp.ones((1, D_MODEL), jnp.float32)
        ln1b = jnp.zeros((1, D_MODEL), jnp.float32)
        w1 = (0.02 * jax.random.normal(ks[6], (D_MODEL, D_FF))).astype(WGT_DTYPE)
        b1 = jnp.zeros((1, D_FF), jnp.float32)
        w2 = (0.02 * jax.random.normal(ks[7], (D_FF, D_MODEL))).astype(WGT_DTYPE)
        b2 = jnp.zeros((1, D_MODEL), jnp.float32)
        ln2w = jnp.ones((1, D_MODEL), jnp.float32)
        ln2b = jnp.zeros((1, D_MODEL), jnp.float32)
        layer_params.append((wq, bq, wk, bk, wv, bv, wo, bo,
                             ln1w, ln1b, w1, b1, w2, b2, ln2w, ln2b))
    key, k1, k2 = jax.random.split(key, 3)
    w_cls = 0.02 * jax.random.normal(k1, (D_MODEL, N_CLASSES), jnp.float32)
    b_cls = 0.02 * jax.random.normal(k2, (1, N_CLASSES), jnp.float32)
    return tuple(layer_params), w_cls, b_cls


if __name__ == "__main__":
    key = jax.random.PRNGKey(0)
    key, pkey, xkey = jax.random.split(key, 3)
    layer_params, w_cls, b_cls = init_params(pkey)

    SEQ, BATCH = 8, 2
    x = jax.random.normal(xkey, (SEQ, BATCH, D_MODEL), jnp.float32)   # PyTorch (S, N, E) layout

    logits = transformer_classifier(x, layer_params, w_cls, b_cls)
    logits = jax.block_until_ready(logits)
    assert logits.shape == (SEQ, N_CLASSES)
    assert bool(jnp.all(jnp.isfinite(logits)))
    print("KERNEL_OK")
</pallas_src>

<mosaic_0001>
module attributes {stable_mosaic.version = 11 : i64} {
  func.func @fused_transformer_kernel(%arg0: i32, %arg1: memref<2x8x200xf32, #tpu.memory_space<vmem>>, %arg2: memref<4x200x50xbf16, #tpu.memory_space<vmem>>, %arg3: memref<4x1x50xf32, #tpu.memory_space<vmem>>, %arg4: memref<4x200x50xbf16, #tpu.memory_space<vmem>>, %arg5: memref<4x1x50xf32, #tpu.memory_space<vmem>>, %arg6: memref<4x200x50xbf16, #tpu.memory_space<vmem>>, %arg7: memref<4x1x50xf32, #tpu.memory_space<vmem>>, %arg8: memref<4x50x200xbf16, #tpu.memory_space<vmem>>, %arg9: memref<1x200xf32, #tpu.memory_space<vmem>>, %arg10: memref<1x200xf32, #tpu.memory_space<vmem>>, %arg11: memref<1x200xf32, #tpu.memory_space<vmem>>, %arg12: memref<200x2048xbf16, #tpu.memory_space<vmem>>, %arg13: memref<1x2048xf32, #tpu.memory_space<vmem>>, %arg14: memref<2048x200xbf16, #tpu.memory_space<vmem>>, %arg15: memref<1x200xf32, #tpu.memory_space<vmem>>, %arg16: memref<1x200xf32, #tpu.memory_space<vmem>>, %arg17: memref<1x200xf32, #tpu.memory_space<vmem>>, %arg18: memref<4x200x50xbf16, #tpu.memory_space<vmem>>, %arg19: memref<4x1x50xf32, #tpu.memory_space<vmem>>, %arg20: memref<4x200x50xbf16, #tpu.memory_space<vmem>>, %arg21: memref<4x1x50xf32, #tpu.memory_space<vmem>>, %arg22: memref<4x200x50xbf16, #tpu.memory_space<vmem>>, %arg23: memref<4x1x50xf32, #tpu.memory_space<vmem>>, %arg24: memref<4x50x200xbf16, #tpu.memory_space<vmem>>, %arg25: memref<1x200xf32, #tpu.memory_space<vmem>>, %arg26: memref<1x200xf32, #tpu.memory_space<vmem>>, %arg27: memref<1x200xf32, #tpu.memory_space<vmem>>, %arg28: memref<200x2048xbf16, #tpu.memory_space<vmem>>, %arg29: memref<1x2048xf32, #tpu.memory_space<vmem>>, %arg30: memref<2048x200xbf16, #tpu.memory_space<vmem>>, %arg31: memref<1x200xf32, #tpu.memory_space<vmem>>, %arg32: memref<1x200xf32, #tpu.memory_space<vmem>>, %arg33: memref<1x200xf32, #tpu.memory_space<vmem>>, %arg34: memref<200x7xf32, #tpu.memory_space<vmem>>, %arg35: memref<1x7xf32, #tpu.memory_space<vmem>>, %arg36: memref<8x7xf32, #tpu.memory_space<vmem>>) attributes {dimension_semantics = [#tpu.dimension_semantics<arbitrary>], iteration_bounds = array<i64: 1>, scalar_prefetch = 0 : i64, scratch_operands = 0 : i64, tpu.core_type = #tpu.core_type<tc>, window_params = [{pipeline_mode = #tpu.pipeline_mode<synchronous>, transform_indices = @transform_0, window_bounds = array<i64: 2, 8, 200>}, {pipeline_mode = #tpu.pipeline_mode<synchronous>, transform_indices = @transform_1, window_bounds = array<i64: 4, 200, 50>}, {pipeline_mode = #tpu.pipeline_mode<synchronous>, transform_indices = @transform_2, window_bounds = array<i64: 4, 1, 50>}, {pipeline_mode = #tpu.pipeline_mode<synchronous>, transform_indices = @transform_3, window_bounds = array<i64: 4, 200, 50>}, {pipeline_mode = #tpu.pipeline_mode<synchronous>, transform_indices = @transform_4, window_bounds = array<i64: 4, 1, 50>}, {pipeline_mode = #tpu.pipeline_mode<synchronous>, transform_indices = @transform_5, window_bounds = array<i64: 4, 200, 50>}, {pipeline_mode = #tpu.pipeline_mode<synchronous>, transform_indices = @transform_6, window_bounds = array<i64: 4, 1, 50>}, {pipeline_mode = #tpu.pipeline_mode<synchronous>, transform_indices = @transform_7, window_bounds = array<i64: 4, 50, 200>}, {pipeline_mode = #tpu.pipeline_mode<synchronous>, transform_indices = @transform_8, window_bounds = array<i64: 1, 200>}, {pipeline_mode = #tpu.pipeline_mode<synchronous>, transform_indices = @transform_9, window_bounds = array<i64: 1, 200>}, {pipeline_mode = #tpu.pipeline_mode<synchronous>, transform_indices = @transform_10, window_bounds = array<i64: 1, 200>}, {pipeline_mode = #tpu.pipeline_mode<synchronous>, transform_indices = @transform_11, window_bounds = array<i64: 200, 2048>}, {pipeline_mode = #tpu.pipeline_mode<synchronous>, transform_indices = @transform_12, window_bounds = array<i64: 1, 2048>}, {pipeline_mode = #tpu.pipeline_mode<synchronous>, transform_indices = @transform_13, window_bounds = array<i64: 2048, 200>}, {pipeline_mode = #tpu.pipeline_mode<synchronous>, transform_indices = @transform_14, window_bounds = array<i64: 1, 200>}, {pipeline_mode = #tpu.pipeline_mode<synchronous>, transform_indices = @transform_15, window_bounds = array<i64: 1, 200>}, {pipeline_mode = #tpu.pipeline_mode<synchronous>, transform_indices = @transform_16, window_bounds = array<i64: 1, 200>}, {pipeline_mode = #tpu.pipeline_mode<synchronous>, transform_indices = @transform_17, window_bounds = array<i64: 4, 200, 50>}, {pipeline_mode = #tpu.pipeline_mode<synchronous>, transform_indices = @transform_18, window_bounds = array<i64: 4, 1, 50>}, {pipeline_mode = #tpu.pipeline_mode<synchronous>, transform_indices = @transform_19, window_bounds = array<i64: 4, 200, 50>}, {pipeline_mode = #tpu.pipeline_mode<synchronous>, transform_indices = @transform_20, window_bounds = array<i64: 4, 1, 50>}, {pipeline_mode = #tpu.pipeline_mode<synchronous>, transform_indices = @transform_21, window_bounds = array<i64: 4, 200, 50>}, {pipeline_mode = #tpu.pipeline_mode<synchronous>, transform_indices = @transform_22, window_bounds = array<i64: 4, 1, 50>}, {pipeline_mode = #tpu.pipeline_mode<synchronous>, transform_indices = @transform_23, window_bounds = array<i64: 4, 50, 200>}, {pipeline_mode = #tpu.pipeline_mode<synchronous>, transform_indices = @transform_24, window_bounds = array<i64: 1, 200>}, {pipeline_mode = #tpu.pipeline_mode<synchronous>, transform_indices = @transform_25, window_bounds = array<i64: 1, 200>}, {pipeline_mode = #tpu.pipeline_mode<synchronous>, transform_indices = @transform_26, window_bounds = array<i64: 1, 200>}, {pipeline_mode = #tpu.pipeline_mode<synchronous>, transform_indices = @transform_27, window_bounds = array<i64: 200, 2048>}, {pipeline_mode = #tpu.pipeline_mode<synchronous>, transform_indices = @transform_28, window_bounds = array<i64: 1, 2048>}, {pipeline_mode = #tpu.pipeline_mode<synchronous>, transform_indices = @transform_29, window_bounds = array<i64: 2048, 200>}, {pipeline_mode = #tpu.pipeline_mode<synchronous>, transform_indices = @transform_30, window_bounds = array<i64: 1, 200>}, {pipeline_mode = #tpu.pipeline_mode<synchronous>, transform_indices = @transform_31, window_bounds = array<i64: 1, 200>}, {pipeline_mode = #tpu.pipeline_mode<synchronous>, transform_indices = @transform_32, window_bounds = array<i64: 1, 200>}, {pipeline_mode = #tpu.pipeline_mode<synchronous>, transform_indices = @transform_33, window_bounds = array<i64: 200, 7>}, {pipeline_mode = #tpu.pipeline_mode<synchronous>, transform_indices = @transform_34, window_bounds = array<i64: 1, 7>}, {pipeline_mode = #tpu.pipeline_mode<synchronous>, transform_indices = @transform_35, window_bounds = array<i64: 8, 7>}]} {
    %c0 = arith.constant 0 : index
    %c0_0 = arith.constant 0 : index
    %c0_1 = arith.constant 0 : index
    %0 = vector.load %arg1[%c0, %c0_0, %c0_1] : memref<2x8x200xf32, #tpu.memory_space<vmem>>, vector<2x8x200xf32>
    %1 = vector.shape_cast %0 : vector<2x8x200xf32> to vector<16x200xf32>
    %2 = arith.truncf %1 : vector<16x200xf32> to vector<16x200xbf16>
    %cst = arith.constant 0.000000e+00 : f32
    %3 = vector.broadcast %cst : f32 to vector<16x200xf32>
    %c0_2 = arith.constant 0 : index
    %c0_3 = arith.constant 0 : index
    %c0_4 = arith.constant 0 : index
    %4 = vector.load %arg2[%c0_2, %c0_3, %c0_4] : memref<4x200x50xbf16, #tpu.memory_space<vmem>>, vector<1x200x50xbf16>
    %5 = vector.shape_cast %4 : vector<1x200x50xbf16> to vector<200x50xbf16>
    %cst_5 = arith.constant dense<0.000000e+00> : vector<16x50xf32>
    %6 = tpu.matmul %2, %5, %cst_5 {dimension_numbers = #tpu.dot_dimension_numbers<[1], [0], [0], [1], [0, 0, 1, 1], [], []>} : vector<16x200xbf16>, vector<200x50xbf16>, vector<16x50xf32> -> vector<16x50xf32>
    %c0_6 = arith.constant 0 : index
    %c0_7 = arith.constant 0 : index
    %c0_8 = arith.constant 0 : index
    %7 = vector.load %arg3[%c0_6, %c0_7, %c0_8] : memref<4x1x50xf32, #tpu.memory_space<vmem>>, vector<1x1x50xf32>
    %8 = vector.shape_cast %7 : vector<1x1x50xf32> to vector<1x50xf32>
    %9 = vector.broadcast %8 : vector<1x50xf32> to vector<16x50xf32>
    %10 = arith.addf %6, %9 : vector<16x50xf32>
    %c0_9 = arith.constant 0 : index
    %c0_10 = arith.constant 0 : index
    %c0_11 = arith.constant 0 : index
    %11 = vector.load %arg4[%c0_9, %c0_10, %c0_11] : memref<4x200x50xbf16, #tpu.memory_space<vmem>>, vector<1x200x50xbf16>
    %12 = vector.shape_cast %11 : vector<1x200x50xbf16> to vector<200x50xbf16>
    %cst_12 = arith.constant dense<0.000000e+00> : vector<16x50xf32>
    %13 = tpu.matmul %2, %12, %cst_12 {dimension_numbers = #tpu.dot_dimension_numbers<[1], [0], [0], [1], [0, 0, 1, 1], [], []>} : vector<16x200xbf16>, vector<200x50xbf16>, vector<16x50xf32> -> vector<16x50xf32>
    %c0_13 = arith.constant 0 : index
    %c0_14 = arith.constant 0 : index
    %c0_15 = arith.constant 0 : index
    %14 = vector.load %arg5[%c0_13, %c0_14, %c0_15] : memref<4x1x50xf32, #tpu.memory_space<vmem>>, vector<1x1x50xf32>
    %15 = vector.shape_cast %14 : vector<1x1x50xf32> to vector<1x50xf32>
    %16 = vector.broadcast %15 : vector<1x50xf32> to vector<16x50xf32>
    %17 = arith.addf %13, %16 : vector<16x50xf32>
    %c0_16 = arith.constant 0 : index
    %c0_17 = arith.constant 0 : index
    %c0_18 = arith.constant 0 : index
    %18 = vector.load %arg6[%c0_16, %c0_17, %c0_18] : memref<4x200x50xbf16, #tpu.memory_space<vmem>>, vector<1x200x50xbf16>
    %19 = vector.shape_cast %18 : vector<1x200x50xbf16> to vector<200x50xbf16>
    %cst_19 = arith.constant dense<0.000000e+00> : vector<16x50xf32>
    %20 = tpu.matmul %2, %19, %cst_19 {dimension_numbers = #tpu.dot_dimension_numbers<[1], [0], [0], [1], [0, 0, 1, 1], [], []>} : vector<16x200xbf16>, vector<200x50xbf16>, vector<16x50xf32> -> vector<16x50xf32>
    %c0_20 = arith.constant 0 : index
    %c0_21 = arith.constant 0 : index
    %c0_22 = arith.constant 0 : index
    %21 = vector.load %arg7[%c0_20, %c0_21, %c0_22] : memref<4x1x50xf32, #tpu.memory_space<vmem>>, vector<1x1x50xf32>
    %22 = vector.shape_cast %21 : vector<1x1x50xf32> to vector<1x50xf32>
    %23 = vector.broadcast %22 : vector<1x50xf32> to vector<16x50xf32>
    %24 = arith.addf %20, %23 : vector<16x50xf32>
    %25 = vector.shape_cast %10 : vector<16x50xf32> to vector<2x8x50xf32>
    %26 = vector.shape_cast %17 : vector<16x50xf32> to vector<2x8x50xf32>
    %27 = vector.shape_cast %24 : vector<16x50xf32> to vector<2x8x50xf32>
    "tpu.trace_start"() <{level = 10 : i32, message = "nqd,nkd->nqk"}> : () -> ()
    %cst_23 = arith.constant dense<0.000000e+00> : vector<2x8x8xf32>
    %28 = tpu.matmul %25, %26, %cst_23 {dimension_numbers = #tpu.dot_dimension_numbers<[2], [2], [1], [1], [0, 0, 0, 1, 1, 1], [0], [0]>} : vector<2x8x50xf32>, vector<2x8x50xf32>, vector<2x8x8xf32> -> vector<2x8x8xf32>
    "tpu.trace_stop"() : () -> ()
    %cst_24 = arith.constant 0.141421363 : f32
    %29 = vector.broadcast %cst_24 : f32 to vector<2x8x8xf32>
    %30 = arith.mulf %28, %29 : vector<2x8x8xf32>
    %cst_25 = arith.constant dense<0xFF800000> : vector<2x8xf32>
    %31 = vector.multi_reduction <maximumf>, %30, %cst_25 [2] : vector<2x8x8xf32> to vector<2x8xf32>
    %32 = vector.shape_cast %31 : vector<2x8xf32> to vector<2x8x1xf32>
    %33 = vector.broadcast %32 : vector<2x8x1xf32> to vector<2x8x8xf32>
    %34 = arith.subf %30, %33 : vector<2x8x8xf32>
    %35 = math.exp %34 : vector<2x8x8xf32>
    %cst_26 = arith.constant dense<0.000000e+00> : vector<2x8xf32>
    %36 = vector.multi_reduction <add>, %35, %cst_26 [2] : vector<2x8x8xf32> to vector<2x8xf32>
    %37 = vector.shape_cast %36 : vector<2x8xf32> to vector<2x8x1xf32>
    %38 = tpu.reciprocal %37 {approx = true} : vector<2x8x1xf32> -> vector<2x8x1xf32>
    %39 = vector.broadcast %38 : vector<2x8x1xf32> to vector<2x8x8xf32>
    %40 = arith.mulf %35, %39 : vector<2x8x8xf32>
    "tpu.trace_start"() <{level = 10 : i32, message = "nqk,nkd->nqd"}> : () -> ()
    %cst_27 = arith.constant dense<0.000000e+00> : vector<2x8x50xf32>
    %41 = tpu.matmul %40, %27, %cst_27 {dimension_numbers = #tpu.dot_dimension_numbers<[2], [1], [1], [2], [0, 0, 0, 1, 1, 2], [0], [0]>} : vector<2x8x8xf32>, vector<2x8x50xf32>, vector<2x8x50xf32> -> vector<2x8x50xf32>
    "tpu.trace_stop"() : () -> ()
    %42 = vector.shape_cast %41 : vector<2x8x50xf32> to vector<16x50xf32>
    %43 = arith.truncf %42 : vector<16x50xf32> to vector<16x50xbf16>
    %c0_28 = arith.constant 0 : index
    %c0_29 = arith.constant 0 : index
    %c0_30 = arith.constant 0 : index
    %44 = vector.load %arg8[%c0_28, %c0_29, %c0_30] : memref<4x50x200xbf16, #tpu.memory_space<vmem>>, vector<1x50x200xbf16>
    %45 = vector.shape_cast %44 : vector<1x50x200xbf16> to vector<50x200xbf16>
    %cst_31 = arith.constant dense<0.000000e+00> : vector<16x200xf32>
    %46 = tpu.matmul %43, %45, %cst_31 {dimension_numbers = #tpu.dot_dimension_numbers<[1], [0], [0], [1], [0, 0, 1, 1], [], []>} : vector<16x50xbf16>, vector<50x200xbf16>, vector<16x200xf32> -> vector<16x200xf32>
    %47 = arith.addf %3, %46 : vector<16x200xf32>
    %c1 = arith.constant 1 : index
    %c0_32 = arith.constant 0 : index
    %c0_33 = arith.constant 0 : index
    %48 = vector.load %arg2[%c1, %c0_32, %c0_33] : memref<4x200x50xbf16, #tpu.memory_space<vmem>>, vector<1x200x50xbf16>
    %49 = vector.shape_cast %48 : vector<1x200x50xbf16> to vector<200x50xbf16>
    %cst_34 = arith.constant dense<0.000000e+00> : vector<16x50xf32>
    %50 = tpu.matmul %2, %49, %cst_34 {dimension_numbers = #tpu.dot_dimension_numbers<[1], [0], [0], [1], [0, 0, 1, 1], [], []>} : vector<16x200xbf16>, vector<200x50xbf16>, vector<16x50xf32> -> vector<16x50xf32>
    %c1_35 = arith.constant 1 : index
    %c0_36 = arith.constant 0 : index
    %c0_37 = arith.constant 0 : index
    %51 = vector.load %arg3[%c1_35, %c0_36, %c0_37] : memref<4x1x50xf32, #tpu.memory_space<vmem>>, vector<1x1x50xf32>
    %52 = vector.shape_cast %51 : vector<1x1x50xf32> to vector<1x50xf32>
    %53 = vector.broadcast %52 : vector<1x50xf32> to vector<16x50xf32>
    %54 = arith.addf %50, %53 : vector<16x50xf32>
    %c1_38 = arith.constant 1 : index
    %c0_39 = arith.constant 0 : index
    %c0_40 = arith.constant 0 : index
    %55 = vector.load %arg4[%c1_38, %c0_39, %c0_40] : memref<4x200x50xbf16, #tpu.memory_space<vmem>>, vector<1x200x50xbf16>
    %56 = vector.shape_cast %55 : vector<1x200x50xbf16> to vector<200x50xbf16>
    %cst_41 = arith.constant dense<0.000000e+00> : vector<16x50xf32>
    %57 = tpu.matmul %2, %56, %cst_41 {dimension_numbers = #tpu.dot_dimension_numbers<[1], [0], [0], [1], [0, 0, 1, 1], [], []>} : vector<16x200xbf16>, vector<200x50xbf16>, vector<16x50xf32> -> vector<16x50xf32>
    %c1_42 = arith.constant 1 : index
    %c0_43 = arith.constant 0 : index
    %c0_44 = arith.constant 0 : index
    %58 = vector.load %arg5[%c1_42, %c0_43, %c0_44] : memref<4x1x50xf32, #tpu.memory_space<vmem>>, vector<1x1x50xf32>
    %59 = vector.shape_cast %58 : vector<1x1x50xf32> to vector<1x50xf32>
    %60 = vector.broadcast %59 : vector<1x50xf32> to vector<16x50xf32>
    %61 = arith.addf %57, %60 : vector<16x50xf32>
    %c1_45 = arith.constant 1 : index
    %c0_46 = arith.constant 0 : index
    %c0_47 = arith.constant 0 : index
    %62 = vector.load %arg6[%c1_45, %c0_46, %c0_47] : memref<4x200x50xbf16, #tpu.memory_space<vmem>>, vector<1x200x50xbf16>
    %63 = vector.shape_cast %62 : vector<1x200x50xbf16> to vector<200x50xbf16>
    %cst_48 = arith.constant dense<0.000000e+00> : vector<16x50xf32>
    %64 = tpu.matmul %2, %63, %cst_48 {dimension_numbers = #tpu.dot_dimension_numbers<[1], [0], [0], [1], [0, 0, 1, 1], [], []>} : vector<16x200xbf16>, vector<200x50xbf16>, vector<16x50xf32> -> vector<16x50xf32>
    %c1_49 = arith.constant 1 : index
    %c0_50 = arith.constant 0 : index
    %c0_51 = arith.constant 0 : index
    %65 = vector.load %arg7[%c1_49, %c0_50, %c0_51] : memref<4x1x50xf32, #tpu.memory_space<vmem>>, vector<1x1x50xf32>
    %66 = vector.shape_cast %65 : vector<1x1x50xf32> to vector<1x50xf32>
    %67 = vector.broadcast %66 : vector<1x50xf32> to vector<16x50xf32>
    %68 = arith.addf %64, %67 : vector<16x50xf32>
    %69 = vector.shape_cast %54 : vector<16x50xf32> to vector<2x8x50xf32>
    %70 = vector.shape_cast %61 : vector<16x50xf32> to vector<2x8x50xf32>
    %71 = vector.shape_cast %68 : vector<16x50xf32> to vector<2x8x50xf32>
    "tpu.trace_start"() <{level = 10 : i32, message = "nqd,nkd->nqk"}> : () -> ()
    %cst_52 = arith.constant dense<0.000000e+00> : vector<2x8x8xf32>
    %72 = tpu.matmul %69, %70, %cst_52 {dimension_numbers = #tpu.dot_dimension_numbers<[2], [2], [1], [1], [0, 0, 0, 1, 1, 1], [0], [0]>} : vector<2x8x50xf32>, vector<2x8x50xf32>, vector<2x8x8xf32> -> vector<2x8x8xf32>
    "tpu.trace_stop"() : () -> ()
    %cst_53 = arith.constant 0.141421363 : f32
    %73 = vector.broadcast %cst_53 : f32 to vector<2x8x8xf32>
    %74 = arith.mulf %72, %73 : vector<2x8x8xf32>
    %cst_54 = arith.constant dense<0xFF800000> : vector<2x8xf32>
    %75 = vector.multi_reduction <maximumf>, %74, %cst_54 [2] : vector<2x8x8xf32> to vector<2x8xf32>
    %76 = vector.shape_cast %75 : vector<2x8xf32> to vector<2x8x1xf32>
    %77 = vector.broadcast %76 : vector<2x8x1xf32> to vector<2x8x8xf32>
    %78 = arith.subf %74, %77 : vector<2x8x8xf32>
    %79 = math.exp %78 : vector<2x8x8xf32>
    %cst_55 = arith.constant dense<0.000000e+00> : vector<2x8xf32>
    %80 = vector.multi_reduction <add>, %79, %cst_55 [2] : vector<2x8x8xf32> to vector<2x8xf32>
    %81 = vector.shape_cast %80 : vector<2x8xf32> to vector<2x8x1xf32>
    %82 = tpu.reciprocal %81 {approx = true} : vector<2x8x1xf32> -> vector<2x8x1xf32>
    %83 = vector.broadcast %82 : vector<2x8x1xf32> to vector<2x8x8xf32>
    %84 = arith.mulf %79, %83 : vector<2x8x8xf32>
    "tpu.trace_start"() <{level = 10 : i32, message = "nqk,nkd->nqd"}> : () -> ()
    %cst_56 = arith.constant dense<0.000000e+00> : vector<2x8x50xf32>
    %85 = tpu.matmul %84, %71, %cst_56 {dimension_numbers = #tpu.dot_dimension_numbers<[2], [1], [1], [2], [0, 0, 0, 1, 1, 2], [0], [0]>} : vector<2x8x8xf32>, vector<2x8x50xf32>, vector<2x8x50xf32> -> vector<2x8x50xf32>
    "tpu.trace_stop"() : () -> ()
    %86 = vector.shape_cast %85 : vector<2x8x50xf32> to vector<16x50xf32>
    %87 = arith.truncf %86 : vector<16x50xf32> to vector<16x50xbf16>
    %c1_57 = arith.constant 1 : index
    %c0_58 = arith.constant 0 : index
    %c0_59 = arith.constant 0 : index
    %88 = vector.load %arg8[%c1_57, %c0_58, %c0_59] : memref<4x50x200xbf16, #tpu.memory_space<vmem>>, vector<1x50x200xbf16>
    %89 = vector.shape_cast %88 : vector<1x50x200xbf16> to vector<50x200xbf16>
    %cst_60 = arith.constant dense<0.000000e+00> : vector<16x200xf32>
    %90 = tpu.matmul %87, %89, %cst_60 {dimension_numbers = #tpu.dot_dimension_numbers<[1], [0], [0], [1], [0, 0, 1, 1], [], []>} : vector<16x50xbf16>, vector<50x200xbf16>, vector<16x200xf32> -> vector<16x200xf32>
    %91 = arith.addf %47, %90 : vector<16x200xf32>
    %c2 = arith.constant 2 : index
    %c0_61 = arith.constant 0 : index
    %c0_62 = arith.constant 0 : index
    %92 = vector.load %arg2[%c2, %c0_61, %c0_62] : memref<4x200x50xbf16, #tpu.memory_space<vmem>>, vector<1x200x50xbf16>
    %93 = vector.shape_cast %92 : vector<1x200x50xbf16> to vector<200x50xbf16>
    %cst_63 = arith.constant dense<0.000000e+00> : vector<16x50xf32>
    %94 = tpu.matmul %2, %93, %cst_63 {dimension_numbers = #tpu.dot_dimension_numbers<[1], [0], [0], [1], [0, 0, 1, 1], [], []>} : vector<16x200xbf16>, vector<200x50xbf16>, vector<16x50xf32> -> vector<16x50xf32>
    %c2_64 = arith.constant 2 : index
    %c0_65 = arith.constant 0 : index
    %c0_66 = arith.constant 0 : index
    %95 = vector.load %arg3[%c2_64, %c0_65, %c0_66] : memref<4x1x50xf32, #tpu.memory_space<vmem>>, vector<1x1x50xf32>
    %96 = vector.shape_cast %95 : vector<1x1x50xf32> to vector<1x50xf32>
    %97 = vector.broadcast %96 : vector<1x50xf32> to vector<16x50xf32>
    %98 = arith.addf %94, %97 : vector<16x50xf32>
    %c2_67 = arith.constant 2 : index
    %c0_68 = arith.constant 0 : index
    %c0_69 = arith.constant 0 : index
    %99 = vector.load %arg4[%c2_67, %c0_68, %c0_69] : memref<4x200x50xbf16, #tpu.memory_space<vmem>>, vector<1x200x50xbf16>
    %100 = vector.shape_cast %99 : vector<1x200x50xbf16> to vector<200x50xbf16>
    %cst_70 = arith.constant dense<0.000000e+00> : vector<16x50xf32>
    %101 = tpu.matmul %2, %100, %cst_70 {dimension_numbers = #tpu.dot_dimension_numbers<[1], [0], [0], [1], [0, 0, 1, 1], [], []>} : vector<16x200xbf16>, vector<200x50xbf16>, vector<16x50xf32> -> vector<16x50xf32>
    %c2_71 = arith.constant 2 : index
    %c0_72 = arith.constant 0 : index
    %c0_73 = arith.constant 0 : index
    %102 = vector.load %arg5[%c2_71, %c0_72, %c0_73] : memref<4x1x50xf32, #tpu.memory_space<vmem>>, vector<1x1x50xf32>
    %103 = vector.shape_cast %102 : vector<1x1x50xf32> to vector<1x50xf32>
    %104 = vector.broadcast %103 : vector<1x50xf32> to vector<16x50xf32>
    %105 = arith.addf %101, %104 : vector<16x50xf32>
    %c2_74 = arith.constant 2 : index
    %c0_75 = arith.constant 0 : index
    %c0_76 = arith.constant 0 : index
    %106 = vector.load %arg6[%c2_74, %c0_75, %c0_76] : memref<4x200x50xbf16, #tpu.memory_space<vmem>>, vector<1x200x50xbf16>
    %107 = vector.shape_cast %106 : vector<1x200x50xbf16> to vector<200x50xbf16>
    %cst_77 = arith.constant dense<0.000000e+00> : vector<16x50xf32>
    %108 = tpu.matmul %2, %107, %cst_77 {dimension_numbers = #tpu.dot_dimension_numbers<[1], [0], [0], [1], [0, 0, 1, 1], [], []>} : vector<16x200xbf16>, vector<200x50xbf16>, vector<16x50xf32> -> vector<16x50xf32>
    %c2_78 = arith.constant 2 : index
    %c0_79 = arith.constant 0 : index
    %c0_80 = arith.constant 0 : index
    %109 = vector.load %arg7[%c2_78, %c0_79, %c0_80] : memref<4x1x50xf32, #tpu.memory_space<vmem>>, vector<1x1x50xf32>
    %110 = vector.shape_cast %109 : vector<1x1x50xf32> to vector<1x50xf32>
    %111 = vector.broadcast %110 : vector<1x50xf32> to vector<16x50xf32>
    %112 = arith.addf %108, %111 : vector<16x50xf32>
    %113 = vector.shape_cast %98 : vector<16x50xf32> to vector<2x8x50xf32>
    %114 = vector.shape_cast %105 : vector<16x50xf32> to vector<2x8x50xf32>
    %115 = vector.shape_cast %112 : vector<16x50xf32> to vector<2x8x50xf32>
    "tpu.trace_start"() <{level = 10 : i32, message = "nqd,nkd->nqk"}> : () -> ()
    %cst_81 = arith.constant dense<0.000000e+00> : vector<2x8x8xf32>
    %116 = tpu.matmul %113, %114, %cst_81 {dimension_numbers = #tpu.dot_dimension_numbers<[2], [2], [1], [1], [0, 0, 0, 1, 1, 1], [0], [0]>} : vector<2x8x50xf32>, vector<2x8x50xf32>, vector<2x8x8xf32> -> vector<2x8x8xf32>
    "tpu.trace_stop"() : () -> ()
    %cst_82 = arith.constant 0.141421363 : f32
    %117 = vector.broadcast %cst_82 : f32 to vector<2x8x8xf32>
    %118 = arith.mulf %116, %117 : vector<2x8x8xf32>
    %cst_83 = arith.constant dense<0xFF800000> : vector<2x8xf32>
    %119 = vector.multi_reduction <maximumf>, %118, %cst_83 [2] : vector<2x8x8xf32> to vector<2x8xf32>
    %120 = vector.shape_cast %119 : vector<2x8xf32> to vector<2x8x1xf32>
    %121 = vector.broadcast %120 : vector<2x8x1xf32> to vector<2x8x8xf32>
    %122 = arith.subf %118, %121 : vector<2x8x8xf32>
    %123 = math.exp %122 : vector<2x8x8xf32>
    %cst_84 = arith.constant dense<0.000000e+00> : vector<2x8xf32>
    %124 = vector.multi_reduction <add>, %123, %cst_84 [2] : vector<2x8x8xf32> to vector<2x8xf32>
    %125 = vector.shape_cast %124 : vector<2x8xf32> to vector<2x8x1xf32>
    %126 = tpu.reciprocal %125 {approx = true} : vector<2x8x1xf32> -> vector<2x8x1xf32>
    %127 = vector.broadcast %126 : vector<2x8x1xf32> to vector<2x8x8xf32>
    %128 = arith.mulf %123, %127 : vector<2x8x8xf32>
    "tpu.trace_start"() <{level = 10 : i32, message = "nqk,nkd->nqd"}> : () -> ()
    %cst_85 = arith.constant dense<0.000000e+00> : vector<2x8x50xf32>
    %129 = tpu.matmul %128, %115, %cst_85 {dimension_numbers = #tpu.dot_dimension_numbers<[2], [1], [1], [2], [0, 0, 0, 1, 1, 2], [0], [0]>} : vector<2x8x8xf32>, vector<2x8x50xf32>, vector<2x8x50xf32> -> vector<2x8x50xf32>
    "tpu.trace_stop"() : () -> ()
    %130 = vector.shape_cast %129 : vector<2x8x50xf32> to vector<16x50xf32>
    %131 = arith.truncf %130 : vector<16x50xf32> to vector<16x50xbf16>
    %c2_86 = arith.constant 2 : index
    %c0_87 = arith.constant 0 : index
    %c0_88 = arith.constant 0 : index
    %132 = vector.load %arg8[%c2_86, %c0_87, %c0_88] : memref<4x50x200xbf16, #tpu.memory_space<vmem>>, vector<1x50x200xbf16>
    %133 = vector.shape_cast %132 : vector<1x50x200xbf16> to vector<50x200xbf16>
    %cst_89 = arith.constant dense<0.000000e+00> : vector<16x200xf32>
    %134 = tpu.matmul %131, %133, %cst_89 {dimension_numbers = #tpu.dot_dimension_numbers<[1], [0], [0], [1], [0, 0, 1, 1], [], []>} : vector<16x50xbf16>, vector<50x200xbf16>, vector<16x200xf32> -> vector<16x200xf32>
    %135 = arith.addf %91, %134 : vector<16x200xf32>
    %c3 = arith.constant 3 : index
    %c0_90 = arith.constant 0 : index
    %c0_91 = arith.constant 0 : index
    %136 = vector.load %arg2[%c3, %c0_90, %c0_91] : memref<4x200x50xbf16, #tpu.memory_space<vmem>>, vector<1x200x50xbf16>
    %137 = vector.shape_cast %136 : vector<1x200x50xbf16> to vector<200x50xbf16>
    %cst_92 = arith.constant dense<0.000000e+00> : vector<16x50xf32>
    %138 = tpu.matmul %2, %137, %cst_92 {dimension_numbers = #tpu.dot_dimension_numbers<[1], [0], [0], [1], [0, 0, 1, 1], [], []>} : vector<16x200xbf16>, vector<200x50xbf16>, vector<16x50xf32> -> vector<16x50xf32>
    %c3_93 = arith.constant 3 : index
    %c0_94 = arith.constant 0 : index
    %c0_95 = arith.constant 0 : index
    %139 = vector.load %arg3[%c3_93, %c0_94, %c0_95] : memref<4x1x50xf32, #tpu.memory_space<vmem>>, vector<1x1x50xf32>
    %140 = vector.shape_cast %139 : vector<1x1x50xf32> to vector<1x50xf32>
    %141 = vector.broadcast %140 : vector<1x50xf32> to vector<16x50xf32>
    %142 = arith.addf %138, %141 : vector<16x50xf32>
    %c3_96 = arith.constant 3 : index
    %c0_97 = arith.constant 0 : index
    %c0_98 = arith.constant 0 : index
    %143 = vector.load %arg4[%c3_96, %c0_97, %c0_98] : memref<4x200x50xbf16, #tpu.memory_space<vmem>>, vector<1x200x50xbf16>
    %144 = vector.shape_cast %143 : vector<1x200x50xbf16> to vector<200x50xbf16>
    %cst_99 = arith.constant dense<0.000000e+00> : vector<16x50xf32>
    %145 = tpu.matmul %2, %144, %cst_99 {dimension_numbers = #tpu.dot_dimension_numbers<[1], [0], [0], [1], [0, 0, 1, 1], [], []>} : vector<16x200xbf16>, vector<200x50xbf16>, vector<16x50xf32> -> vector<16x50xf32>
    %c3_100 = arith.constant 3 : index
    %c0_101 = arith.constant 0 : index
    %c0_102 = arith.constant 0 : index
    %146 = vector.load %arg5[%c3_100, %c0_101, %c0_102] : memref<4x1x50xf32, #tpu.memory_space<vmem>>, vector<1x1x50xf32>
    %147 = vector.shape_cast %146 : vector<1x1x50xf32> to vector<1x50xf32>
    %148 = vector.broadcast %147 : vector<1x50xf32> to vector<16x50xf32>
    %149 = arith.addf %145, %148 : vector<16x50xf32>
    %c3_103 = arith.constant 3 : index
    %c0_104 = arith.constant 0 : index
    %c0_105 = arith.constant 0 : index
    %150 = vector.load %arg6[%c3_103, %c0_104, %c0_105] : memref<4x200x50xbf16, #tpu.memory_space<vmem>>, vector<1x200x50xbf16>
    %151 = vector.shape_cast %150 : vector<1x200x50xbf16> to vector<200x50xbf16>
    %cst_106 = arith.constant dense<0.000000e+00> : vector<16x50xf32>
    %152 = tpu.matmul %2, %151, %cst_106 {dimension_numbers = #tpu.dot_dimension_numbers<[1], [0], [0], [1], [0, 0, 1, 1], [], []>} : vector<16x200xbf16>, vector<200x50xbf16>, vector<16x50xf32> -> vector<16x50xf32>
    %c3_107 = arith.constant 3 : index
    %c0_108 = arith.constant 0 : index
    %c0_109 = arith.constant 0 : index
    %153 = vector.load %arg7[%c3_107, %c0_108, %c0_109] : memref<4x1x50xf32, #tpu.memory_space<vmem>>, vector<1x1x50xf32>
    %154 = vector.shape_cast %153 : vector<1x1x50xf32> to vector<1x50xf32>
    %155 = vector.broadcast %154 : vector<1x50xf32> to vector<16x50xf32>
    %156 = arith.addf %152, %155 : vector<16x50xf32>
    %157 = vector.shape_cast %142 : vector<16x50xf32> to vector<2x8x50xf32>
    %158 = vector.shape_cast %149 : vector<16x50xf32> to vector<2x8x50xf32>
    %159 = vector.shape_cast %156 : vector<16x50xf32> to vector<2x8x50xf32>
    "tpu.trace_start"() <{level = 10 : i32, message = "nqd,nkd->nqk"}> : () -> ()
    %cst_110 = arith.constant dense<0.000000e+00> : vector<2x8x8xf32>
    %160 = tpu.matmul %157, %158, %cst_110 {dimension_numbers = #tpu.dot_dimension_numbers<[2], [2], [1], [1], [0, 0, 0, 1, 1, 1], [0], [0]>} : vector<2x8x50xf32>, vector<2x8x50xf32>, vector<2x8x8xf32> -> vector<2x8x8xf32>
    "tpu.trace_stop"() : () -> ()
    %cst_111 = arith.constant 0.141421363 : f32
    %161 = vector.broadcast %cst_111 : f32 to vector<2x8x8xf32>
    %162 = arith.mulf %160, %161 : vector<2x8x8xf32>
    %cst_112 = arith.constant dense<0xFF800000> : vector<2x8xf32>
    %163 = vector.multi_reduction <maximumf>, %162, %cst_112 [2] : vector<2x8x8xf32> to vector<2x8xf32>
    %164 = vector.shape_cast %163 : vector<2x8xf32> to vector<2x8x1xf32>
    %165 = vector.broadcast %164 : vector<2x8x1xf32> to vector<2x8x8xf32>
    %166 = arith.subf %162, %165 : vector<2x8x8xf32>
    %167 = math.exp %166 : vector<2x8x8xf32>
    %cst_113 = arith.constant dense<0.000000e+00> : vector<2x8xf32>
    %168 = vector.multi_reduction <add>, %167, %cst_113 [2] : vector<2x8x8xf32> to vector<2x8xf32>
    %169 = vector.shape_cast %168 : vector<2x8xf32> to vector<2x8x1xf32>
    %170 = tpu.reciprocal %169 {approx = true} : vector<2x8x1xf32> -> vector<2x8x1xf32>
    %171 = vector.broadcast %170 : vector<2x8x1xf32> to vector<2x8x8xf32>
    %172 = arith.mulf %167, %171 : vector<2x8x8xf32>
    "tpu.trace_start"() <{level = 10 : i32, message = "nqk,nkd->nqd"}> : () -> ()
    %cst_114 = arith.constant dense<0.000000e+00> : vector<2x8x50xf32>
    %173 = tpu.matmul %172, %159, %cst_114 {dimension_numbers = #tpu.dot_dimension_numbers<[2], [1], [1], [2], [0, 0, 0, 1, 1, 2], [0], [0]>} : vector<2x8x8xf32>, vector<2x8x50xf32>, vector<2x8x50xf32> -> vector<2x8x50xf32>
    "tpu.trace_stop"() : () -> ()
    %174 = vector.shape_cast %173 : vector<2x8x50xf32> to vector<16x50xf32>
    %175 = arith.truncf %174 : vector<16x50xf32> to vector<16x50xbf16>
    %c3_115 = arith.constant 3 : index
    %c0_116 = arith.constant 0 : index
    %c0_117 = arith.constant 0 : index
    %176 = vector.load %arg8[%c3_115, %c0_116, %c0_117] : memref<4x50x200xbf16, #tpu.memory_space<vmem>>, vector<1x50x200xbf16>
    %177 = vector.shape_cast %176 : vector<1x50x200xbf16> to vector<50x200xbf16>
    %cst_118 = arith.constant dense<0.000000e+00> : vector<16x200xf32>
    %178 = tpu.matmul %175, %177, %cst_118 {dimension_numbers = #tpu.dot_dimension_numbers<[1], [0], [0], [1], [0, 0, 1, 1], [], []>} : vector<16x50xbf16>, vector<50x200xbf16>, vector<16x200xf32> -> vector<16x200xf32>
    %179 = arith.addf %135, %178 : vector<16x200xf32>
    %c0_119 = arith.constant 0 : index
    %c0_120 = arith.constant 0 : index
    %180 = vector.load %arg9[%c0_119, %c0_120] : memref<1x200xf32, #tpu.memory_space<vmem>>, vector<1x200xf32>
    %181 = vector.broadcast %180 : vector<1x200xf32> to vector<16x200xf32>
    %182 = arith.addf %179, %181 : vector<16x200xf32>
    %183 = arith.addf %1, %182 : vector<16x200xf32>
    %c0_121 = arith.constant 0 : index
    %c0_122 = arith.constant 0 : index
    %184 = vector.load %arg10[%c0_121, %c0_122] : memref<1x200xf32, #tpu.memory_space<vmem>>, vector<1x200xf32>
    %c0_123 = arith.constant 0 : index
    %c0_124 = arith.constant 0 : index
    %185 = vector.load %arg11[%c0_123, %c0_124] : memref<1x200xf32, #tpu.memory_space<vmem>>, vector<1x200xf32>
    %cst_125 = arith.constant dense<0.000000e+00> : vector<16xf32>
    %186 = vector.multi_reduction <add>, %183, %cst_125 [1] : vector<16x200xf32> to vector<16xf32>
    %187 = vector.shape_cast %186 : vector<16xf32> to vector<16x1xf32>
    %cst_126 = arith.constant 2.000000e+02 : f32
    %188 = vector.broadcast %cst_126 : f32 to vector<16x1xf32>
    %189 = arith.divf %187, %188 : vector<16x1xf32>
    %190 = vector.broadcast %189 : vector<16x1xf32> to vector<16x200xf32>
    %191 = arith.subf %183, %190 : vector<16x200xf32>
    %192 = arith.mulf %191, %191 : vector<16x200xf32>
    %cst_127 = arith.constant dense<0.000000e+00> : vector<16xf32>
    %193 = vector.multi_reduction <add>, %192, %cst_127 [1] : vector<16x200xf32> to vector<16xf32>
    %194 = vector.shape_cast %193 : vector<16xf32> to vector<16x1xf32>
    %cst_128 = arith.constant 2.000000e+02 : f32
    %195 = vector.broadcast %cst_128 : f32 to vector<16x1xf32>
    %196 = arith.divf %194, %195 : vector<16x1xf32>
    %cst_129 = arith.constant 9.99999974E-6 : f32
    %197 = vector.broadcast %cst_129 : f32 to vector<16x1xf32>
    %198 = arith.addf %196, %197 : vector<16x1xf32>
    %199 = math.rsqrt %198 : vector<16x1xf32>
    %200 = vector.broadcast %199 : vector<16x1xf32> to vector<16x200xf32>
    %201 = arith.mulf %191, %200 : vector<16x200xf32>
    %202 = vector.broadcast %184 : vector<1x200xf32> to vector<16x200xf32>
    %203 = arith.mulf %201, %202 : vector<16x200xf32>
    %204 = vector.broadcast %185 : vector<1x200xf32> to vector<16x200xf32>
    %205 = arith.addf %203, %204 : vector<16x200xf32>
    %206 = arith.truncf %205 : vector<16x200xf32> to vector<16x200xbf16>
    %c0_130 = arith.constant 0 : index
    %c0_131 = arith.constant 0 : index
    %207 = vector.load %arg12[%c0_130, %c0_131] : memref<200x2048xbf16, #tpu.memory_space<vmem>>, vector<200x2048xbf16>
    %cst_132 = arith.constant dense<0.000000e+00> : vector<16x2048xf32>
    %208 = tpu.matmul %206, %207, %cst_132 {dimension_numbers = #tpu.dot_dimension_numbers<[1], [0], [0], [1], [0, 0, 1, 1], [], []>} : vector<16x200xbf16>, vector<200x2048xbf16>, vector<16x2048xf32> -> vector<16x2048xf32>
    %c0_133 = arith.constant 0 : index
    %c0_134 = arith.constant 0 : index
    %209 = vector.load %arg13[%c0_133, %c0_134] : memref<1x2048xf32, #tpu.memory_space<vmem>>, vector<1x2048xf32>
    %210 = vector.broadcast %209 : vector<1x2048xf32> to vector<16x2048xf32>
    %211 = arith.addf %208, %210 : vector<16x2048xf32>
    %cst_135 = arith.constant 0.000000e+00 : f32
    %212 = vector.broadcast %cst_135 : f32 to vector<16x2048xf32>
    %213 = arith.maximumf %211, %212 : vector<16x2048xf32>
    %214 = arith.truncf %213 : vector<16x2048xf32> to vector<16x2048xbf16>
    %c0_136 = arith.constant 0 : index
    %c0_137 = arith.constant 0 : index
    %215 = vector.load %arg14[%c0_136, %c0_137] : memref<2048x200xbf16, #tpu.memory_space<vmem>>, vector<2048x200xbf16>
    %cst_138 = arith.constant dense<0.000000e+00> : vector<16x200xf32>
    %216 = tpu.matmul %214, %215, %cst_138 {dimension_numbers = #tpu.dot_dimension_numbers<[1], [0], [0], [1], [0, 0, 1, 1], [], []>} : vector<16x2048xbf16>, vector<2048x200xbf16>, vector<16x200xf32> -> vector<16x200xf32>
    %c0_139 = arith.constant 0 : index
    %c0_140 = arith.constant 0 : index
    %217 = vector.load %arg15[%c0_139, %c0_140] : memref<1x200xf32, #tpu.memory_space<vmem>>, vector<1x200xf32>
    %218 = vector.broadcast %217 : vector<1x200xf32> to vector<16x200xf32>
    %219 = arith.addf %216, %218 : vector<16x200xf32>
    %220 = arith.addf %205, %219 : vector<16x200xf32>
    %c0_141 = arith.constant 0 : index
    %c0_142 = arith.constant 0 : index
    %221 = vector.load %arg16[%c0_141, %c0_142] : memref<1x200xf32, #tpu.memory_space<vmem>>, vector<1x200xf32>
    %c0_143 = arith.constant 0 : index
    %c0_144 = arith.constant 0 : index
    %222 = vector.load %arg17[%c0_143, %c0_144] : memref<1x200xf32, #tpu.memory_space<vmem>>, vector<1x200xf32>
    %cst_145 = arith.constant dense<0.000000e+00> : vector<16xf32>
    %223 = vector.multi_reduction <add>, %220, %cst_145 [1] : vector<16x200xf32> to vector<16xf32>
    %224 = vector.shape_cast %223 : vector<16xf32> to vector<16x1xf32>
    %cst_146 = arith.constant 2.000000e+02 : f32
    %225 = vector.broadcast %cst_146 : f32 to vector<16x1xf32>
    %226 = arith.divf %224, %225 : vector<16x1xf32>
    %227 = vector.broadcast %226 : vector<16x1xf32> to vector<16x200xf32>
    %228 = arith.subf %220, %227 : vector<16x200xf32>
    %229 = arith.mulf %228, %228 : vector<16x200xf32>
    %cst_147 = arith.constant dense<0.000000e+00> : vector<16xf32>
    %230 = vector.multi_reduction <add>, %229, %cst_147 [1] : vector<16x200xf32> to vector<16xf32>
    %231 = vector.shape_cast %230 : vector<16xf32> to vector<16x1xf32>
    %cst_148 = arith.constant 2.000000e+02 : f32
    %232 = vector.broadcast %cst_148 : f32 to vector<16x1xf32>
    %233 = arith.divf %231, %232 : vector<16x1xf32>
    %cst_149 = arith.constant 9.99999974E-6 : f32
    %234 = vector.broadcast %cst_149 : f32 to vector<16x1xf32>
    %235 = arith.addf %233, %234 : vector<16x1xf32>
    %236 = math.rsqrt %235 : vector<16x1xf32>
    %237 = vector.broadcast %236 : vector<16x1xf32> to vector<16x200xf32>
    %238 = arith.mulf %228, %237 : vector<16x200xf32>
    %239 = vector.broadcast %221 : vector<1x200xf32> to vector<16x200xf32>
    %240 = arith.mulf %238, %239 : vector<16x200xf32>
    %241 = vector.broadcast %222 : vector<1x200xf32> to vector<16x200xf32>
    %242 = arith.addf %240, %241 : vector<16x200xf32>
    %243 = arith.truncf %242 : vector<16x200xf32> to vector<16x200xbf16>
    %cst_150 = arith.constant 0.000000e+00 : f32
    %244 = vector.broadcast %cst_150 : f32 to vector<16x200xf32>
    %c0_151 = arith.constant 0 : index
    %c0_152 = arith.constant 0 : index
    %c0_153 = arith.constant 0 : index
    %245 = vector.load %arg18[%c0_151, %c0_152, %c0_153] : memref<4x200x50xbf16, #tpu.memory_space<vmem>>, vector<1x200x50xbf16>
    %246 = vector.shape_cast %245 : vector<1x200x50xbf16> to vector<200x50xbf16>
    %cst_154 = arith.constant dense<0.000000e+00> : vector<16x50xf32>
    %247 = tpu.matmul %243, %246, %cst_154 {dimension_numbers = #tpu.dot_dimension_numbers<[1], [0], [0], [1], [0, 0, 1, 1], [], []>} : vector<16x200xbf16>, vector<200x50xbf16>, vector<16x50xf32> -> vector<16x50xf32>
    %c0_155 = arith.constant 0 : index
    %c0_156 = arith.constant 0 : index
    %c0_157 = arith.constant 0 : index
    %248 = vector.load %arg19[%c0_155, %c0_156, %c0_157] : memref<4x1x50xf32, #tpu.memory_space<vmem>>, vector<1x1x50xf32>
    %249 = vector.shape_cast %248 : vector<1x1x50xf32> to vector<1x50xf32>
    %250 = vector.broadcast %249 : vector<1x50xf32> to vector<16x50xf32>
    %251 = arith.addf %247, %250 : vector<16x50xf32>
    %c0_158 = arith.constant 0 : index
    %c0_159 = arith.constant 0 : index
    %c0_160 = arith.constant 0 : index
    %252 = vector.load %arg20[%c0_158, %c0_159, %c0_160] : memref<4x200x50xbf16, #tpu.memory_space<vmem>>, vector<1x200x50xbf16>
    %253 = vector.shape_cast %252 : vector<1x200x50xbf16> to vector<200x50xbf16>
    %cst_161 = arith.constant dense<0.000000e+00> : vector<16x50xf32>
    %254 = tpu.matmul %243, %253, %cst_161 {dimension_numbers = #tpu.dot_dimension_numbers<[1], [0], [0], [1], [0, 0, 1, 1], [], []>} : vector<16x200xbf16>, vector<200x50xbf16>, vector<16x50xf32> -> vector<16x50xf32>
    %c0_162 = arith.constant 0 : index
    %c0_163 = arith.constant 0 : index
    %c0_164 = arith.constant 0 : index
    %255 = vector.load %arg21[%c0_162, %c0_163, %c0_164] : memref<4x1x50xf32, #tpu.memory_space<vmem>>, vector<1x1x50xf32>
    %256 = vector.shape_cast %255 : vector<1x1x50xf32> to vector<1x50xf32>
    %257 = vector.broadcast %256 : vector<1x50xf32> to vector<16x50xf32>
    %258 = arith.addf %254, %257 : vector<16x50xf32>
    %c0_165 = arith.constant 0 : index
    %c0_166 = arith.constant 0 : index
    %c0_167 = arith.constant 0 : index
    %259 = vector.load %arg22[%c0_165, %c0_166, %c0_167] : memref<4x200x50xbf16, #tpu.memory_space<vmem>>, vector<1x200x50xbf16>
    %260 = vector.shape_cast %259 : vector<1x200x50xbf16> to vector<200x50xbf16>
    %cst_168 = arith.constant dense<0.000000e+00> : vector<16x50xf32>
    %261 = tpu.matmul %243, %260, %cst_168 {dimension_numbers = #tpu.dot_dimension_numbers<[1], [0], [0], [1], [0, 0, 1, 1], [], []>} : vector<16x200xbf16>, vector<200x50xbf16>, vector<16x50xf32> -> vector<16x50xf32>
    %c0_169 = arith.constant 0 : index
    %c0_170 = arith.constant 0 : index
    %c0_171 = arith.constant 0 : index
    %262 = vector.load %arg23[%c0_169, %c0_170, %c0_171] : memref<4x1x50xf32, #tpu.memory_space<vmem>>, vector<1x1x50xf32>
    %263 = vector.shape_cast %262 : vector<1x1x50xf32> to vector<1x50xf32>
    %264 = vector.broadcast %263 : vector<1x50xf32> to vector<16x50xf32>
    %265 = arith.addf %261, %264 : vector<16x50xf32>
    %266 = vector.shape_cast %251 : vector<16x50xf32> to vector<2x8x50xf32>
    %267 = vector.shape_cast %258 : vector<16x50xf32> to vector<2x8x50xf32>
    %268 = vector.shape_cast %265 : vector<16x50xf32> to vector<2x8x50xf32>
    "tpu.trace_start"() <{level = 10 : i32, message = "nqd,nkd->nqk"}> : () -> ()
    %cst_172 = arith.constant dense<0.000000e+00> : vector<2x8x8xf32>
    %269 = tpu.matmul %266, %267, %cst_172 {dimension_numbers = #tpu.dot_dimension_numbers<[2], [2], [1], [1], [0, 0, 0, 1, 1, 1], [0], [0]>} : vector<2x8x50xf32>, vector<2x8x50xf32>, vector<2x8x8xf32> -> vector<2x8x8xf32>
    "tpu.trace_stop"() : () -> ()
    %cst_173 = arith.constant 0.141421363 : f32
    %270 = vector.broadcast %cst_173 : f32 to vector<2x8x8xf32>
    %271 = arith.mulf %269, %270 : vector<2x8x8xf32>
    %cst_174 = arith.constant dense<0xFF800000> : vector<2x8xf32>
    %272 = vector.multi_reduction <maximumf>, %271, %cst_174 [2] : vector<2x8x8xf32> to vector<2x8xf32>
    %273 = vector.shape_cast %272 : vector<2x8xf32> to vector<2x8x1xf32>
    %274 = vector.broadcast %273 : vector<2x8x1xf32> to vector<2x8x8xf32>
    %275 = arith.subf %271, %274 : vector<2x8x8xf32>
    %276 = math.exp %275 : vector<2x8x8xf32>
    %cst_175 = arith.constant dense<0.000000e+00> : vector<2x8xf32>
    %277 = vector.multi_reduction <add>, %276, %cst_175 [2] : vector<2x8x8xf32> to vector<2x8xf32>
    %278 = vector.shape_cast %277 : vector<2x8xf32> to vector<2x8x1xf32>
    %279 = tpu.reciprocal %278 {approx = true} : vector<2x8x1xf32> -> vector<2x8x1xf32>
    %280 = vector.broadcast %279 : vector<2x8x1xf32> to vector<2x8x8xf32>
    %281 = arith.mulf %276, %280 : vector<2x8x8xf32>
    "tpu.trace_start"() <{level = 10 : i32, message = "nqk,nkd->nqd"}> : () -> ()
    %cst_176 = arith.constant dense<0.000000e+00> : vector<2x8x50xf32>
    %282 = tpu.matmul %281, %268, %cst_176 {dimension_numbers = #tpu.dot_dimension_numbers<[2], [1], [1], [2], [0, 0, 0, 1, 1, 2], [0], [0]>} : vector<2x8x8xf32>, vector<2x8x50xf32>, vector<2x8x50xf32> -> vector<2x8x50xf32>
    "tpu.trace_stop"() : () -> ()
    %283 = vector.shape_cast %282 : vector<2x8x50xf32> to vector<16x50xf32>
    %284 = arith.truncf %283 : vector<16x50xf32> to vector<16x50xbf16>
    %c0_177 = arith.constant 0 : index
    %c0_178 = arith.constant 0 : index
    %c0_179 = arith.constant 0 : index
    %285 = vector.load %arg24[%c0_177, %c0_178, %c0_179] : memref<4x50x200xbf16, #tpu.memory_space<vmem>>, vector<1x50x200xbf16>
    %286 = vector.shape_cast %285 : vector<1x50x200xbf16> to vector<50x200xbf16>
    %cst_180 = arith.constant dense<0.000000e+00> : vector<16x200xf32>
    %287 = tpu.matmul %284, %286, %cst_180 {dimension_numbers = #tpu.dot_dimension_numbers<[1], [0], [0], [1], [0, 0, 1, 1], [], []>} : vector<16x50xbf16>, vector<50x200xbf16>, vector<16x200xf32> -> vector<16x200xf32>
    %288 = arith.addf %244, %287 : vector<16x200xf32>
    %c1_181 = arith.constant 1 : index
    %c0_182 = arith.constant 0 : index
    %c0_183 = arith.constant 0 : index
    %289 = vector.load %arg18[%c1_181, %c0_182, %c0_183] : memref<4x200x50xbf16, #tpu.memory_space<vmem>>, vector<1x200x50xbf16>
    %290 = vector.shape_cast %289 : vector<1x200x50xbf16> to vector<200x50xbf16>
    %cst_184 = arith.constant dense<0.000000e+00> : vector<16x50xf32>
    %291 = tpu.matmul %243, %290, %cst_184 {dimension_numbers = #tpu.dot_dimension_numbers<[1], [0], [0], [1], [0, 0, 1, 1], [], []>} : vector<16x200xbf16>, vector<200x50xbf16>, vector<16x50xf32> -> vector<16x50xf32>
    %c1_185 = arith.constant 1 : index
    %c0_186 = arith.constant 0 : index
    %c0_187 = arith.constant 0 : index
    %292 = vector.load %arg19[%c1_185, %c0_186, %c0_187] : memref<4x1x50xf32, #tpu.memory_space<vmem>>, vector<1x1x50xf32>
    %293 = vector.shape_cast %292 : vector<1x1x50xf32> to vector<1x50xf32>
    %294 = vector.broadcast %293 : vector<1x50xf32> to vector<16x50xf32>
    %295 = arith.addf %291, %294 : vector<16x50xf32>
    %c1_188 = arith.constant 1 : index
    %c0_189 = arith.constant 0 : index
    %c0_190 = arith.constant 0 : index
    %296 = vector.load %arg20[%c1_188, %c0_189, %c0_190] : memref<4x200x50xbf16, #tpu.memory_space<vmem>>, vector<1x200x50xbf16>
    %297 = vector.shape_cast %296 : vector<1x200x50xbf16> to vector<200x50xbf16>
    %cst_191 = arith.constant dense<0.000000e+00> : vector<16x50xf32>
    %298 = tpu.matmul %243, %297, %cst_191 {dimension_numbers = #tpu.dot_dimension_numbers<[1], [0], [0], [1], [0, 0, 1, 1], [], []>} : vector<16x200xbf16>, vector<200x50xbf16>, vector<16x50xf32> -> vector<16x50xf32>
    %c1_192 = arith.constant 1 : index
    %c0_193 = arith.constant 0 : index
    %c0_194 = arith.constant 0 : index
    %299 = vector.load %arg21[%c1_192, %c0_193, %c0_194] : memref<4x1x50xf32, #tpu.memory_space<vmem>>, vector<1x1x50xf32>
    %300 = vector.shape_cast %299 : vector<1x1x50xf32> to vector<1x50xf32>
    %301 = vector.broadcast %300 : vector<1x50xf32> to vector<16x50xf32>
    %302 = arith.addf %298, %301 : vector<16x50xf32>
    %c1_195 = arith.constant 1 : index
    %c0_196 = arith.constant 0 : index
    %c0_197 = arith.constant 0 : index
    %303 = vector.load %arg22[%c1_195, %c0_196, %c0_197] : memref<4x200x50xbf16, #tpu.memory_space<vmem>>, vector<1x200x50xbf16>
    %304 = vector.shape_cast %303 : vector<1x200x50xbf16> to vector<200x50xbf16>
    %cst_198 = arith.constant dense<0.000000e+00> : vector<16x50xf32>
    %305 = tpu.matmul %243, %304, %cst_198 {dimension_numbers = #tpu.dot_dimension_numbers<[1], [0], [0], [1], [0, 0, 1, 1], [], []>} : vector<16x200xbf16>, vector<200x50xbf16>, vector<16x50xf32> -> vector<16x50xf32>
    %c1_199 = arith.constant 1 : index
    %c0_200 = arith.constant 0 : index
    %c0_201 = arith.constant 0 : index
    %306 = vector.load %arg23[%c1_199, %c0_200, %c0_201] : memref<4x1x50xf32, #tpu.memory_space<vmem>>, vector<1x1x50xf32>
    %307 = vector.shape_cast %306 : vector<1x1x50xf32> to vector<1x50xf32>
    %308 = vector.broadcast %307 : vector<1x50xf32> to vector<16x50xf32>
    %309 = arith.addf %305, %308 : vector<16x50xf32>
    %310 = vector.shape_cast %295 : vector<16x50xf32> to vector<2x8x50xf32>
    %311 = vector.shape_cast %302 : vector<16x50xf32> to vector<2x8x50xf32>
    %312 = vector.shape_cast %309 : vector<16x50xf32> to vector<2x8x50xf32>
    "tpu.trace_start"() <{level = 10 : i32, message = "nqd,nkd->nqk"}> : () -> ()
    %cst_202 = arith.constant dense<0.000000e+00> : vector<2x8x8xf32>
    %313 = tpu.matmul %310, %311, %cst_202 {dimension_numbers = #tpu.dot_dimension_numbers<[2], [2], [1], [1], [0, 0, 0, 1, 1, 1], [0], [0]>} : vector<2x8x50xf32>, vector<2x8x50xf32>, vector<2x8x8xf32> -> vector<2x8x8xf32>
    "tpu.trace_stop"() : () -> ()
    %cst_203 = arith.constant 0.141421363 : f32
    %314 = vector.broadcast %cst_203 : f32 to vector<2x8x8xf32>
    %315 = arith.mulf %313, %314 : vector<2x8x8xf32>
    %cst_204 = arith.constant dense<0xFF800000> : vector<2x8xf32>
    %316 = vector.multi_reduction <maximumf>, %315, %cst_204 [2] : vector<2x8x8xf32> to vector<2x8xf32>
    %317 = vector.shape_cast %316 : vector<2x8xf32> to vector<2x8x1xf32>
    %318 = vector.broadcast %317 : vector<2x8x1xf32> to vector<2x8x8xf32>
    %319 = arith.subf %315, %318 : vector<2x8x8xf32>
    %320 = math.exp %319 : vector<2x8x8xf32>
    %cst_205 = arith.constant dense<0.000000e+00> : vector<2x8xf32>
    %321 = vector.multi_reduction <add>, %320, %cst_205 [2] : vector<2x8x8xf32> to vector<2x8xf32>
    %322 = vector.shape_cast %321 : vector<2x8xf32> to vector<2x8x1xf32>
    %323 = tpu.reciprocal %322 {approx = true} : vector<2x8x1xf32> -> vector<2x8x1xf32>
    %324 = vector.broadcast %323 : vector<2x8x1xf32> to vector<2x8x8xf32>
    %325 = arith.mulf %320, %324 : vector<2x8x8xf32>
    "tpu.trace_start"() <{level = 10 : i32, message = "nqk,nkd->nqd"}> : () -> ()
    %cst_206 = arith.constant dense<0.000000e+00> : vector<2x8x50xf32>
    %326 = tpu.matmul %325, %312, %cst_206 {dimension_numbers = #tpu.dot_dimension_numbers<[2], [1], [1], [2], [0, 0, 0, 1, 1, 2], [0], [0]>} : vector<2x8x8xf32>, vector<2x8x50xf32>, vector<2x8x50xf32> -> vector<2x8x50xf32>
    "tpu.trace_stop"() : () -> ()
    %327 = vector.shape_cast %326 : vector<2x8x50xf32> to vector<16x50xf32>
    %328 = arith.truncf %327 : vector<16x50xf32> to vector<16x50xbf16>
    %c1_207 = arith.constant 1 : index
    %c0_208 = arith.constant 0 : index
    %c0_209 = arith.constant 0 : index
    %329 = vector.load %arg24[%c1_207, %c0_208, %c0_209] : memref<4x50x200xbf16, #tpu.memory_space<vmem>>, vector<1x50x200xbf16>
    %330 = vector.shape_cast %329 : vector<1x50x200xbf16> to vector<50x200xbf16>
    %cst_210 = arith.constant dense<0.000000e+00> : vector<16x200xf32>
    %331 = tpu.matmul %328, %330, %cst_210 {dimension_numbers = #tpu.dot_dimension_numbers<[1], [0], [0], [1], [0, 0, 1, 1], [], []>} : vector<16x50xbf16>, vector<50x200xbf16>, vector<16x200xf32> -> vector<16x200xf32>
    %332 = arith.addf %288, %331 : vector<16x200xf32>
    %c2_211 = arith.constant 2 : index
    %c0_212 = arith.constant 0 : index
    %c0_213 = arith.constant 0 : index
    %333 = vector.load %arg18[%c2_211, %c0_212, %c0_213] : memref<4x200x50xbf16, #tpu.memory_space<vmem>>, vector<1x200x50xbf16>
    %334 = vector.shape_cast %333 : vector<1x200x50xbf16> to vector<200x50xbf16>
    %cst_214 = arith.constant dense<0.000000e+00> : vector<16x50xf32>
    %335 = tpu.matmul %243, %334, %cst_214 {dimension_numbers = #tpu.dot_dimension_numbers<[1], [0], [0], [1], [0, 0, 1, 1], [], []>} : vector<16x200xbf16>, vector<200x50xbf16>, vector<16x50xf32> -> vector<16x50xf32>
    %c2_215 = arith.constant 2 : index
    %c0_216 = arith.constant 0 : index
    %c0_217 = arith.constant 0 : index
    %336 = vector.load %arg19[%c2_215, %c0_216, %c0_217] : memref<4x1x50xf32, #tpu.memory_space<vmem>>, vector<1x1x50xf32>
    %337 = vector.shape_cast %336 : vector<1x1x50xf32> to vector<1x50xf32>
    %338 = vector.broadcast %337 : vector<1x50xf32> to vector<16x50xf32>
    %339 = arith.addf %335, %338 : vector<16x50xf32>
    %c2_218 = arith.constant 2 : index
    %c0_219 = arith.constant 0 : index
    %c0_220 = arith.constant 0 : index
    %340 = vector.load %arg20[%c2_218, %c0_219, %c0_220] : memref<4x200x50xbf16, #tpu.memory_space<vmem>>, vector<1x200x50xbf16>
    %341 = vector.shape_cast %340 : vector<1x200x50xbf16> to vector<200x50xbf16>
    %cst_221 = arith.constant dense<0.000000e+00> : vector<16x50xf32>
    %342 = tpu.matmul %243, %341, %cst_221 {dimension_numbers = #tpu.dot_dimension_numbers<[1], [0], [0], [1], [0, 0, 1, 1], [], []>} : vector<16x200xbf16>, vector<200x50xbf16>, vector<16x50xf32> -> vector<16x50xf32>
    %c2_222 = arith.constant 2 : index
    %c0_223 = arith.constant 0 : index
    %c0_224 = arith.constant 0 : index
    %343 = vector.load %arg21[%c2_222, %c0_223, %c0_224] : memref<4x1x50xf32, #tpu.memory_space<vmem>>, vector<1x1x50xf32>
    %344 = vector.shape_cast %343 : vector<1x1x50xf32> to vector<1x50xf32>
    %345 = vector.broadcast %344 : vector<1x50xf32> to vector<16x50xf32>
    %346 = arith.addf %342, %345 : vector<16x50xf32>
    %c2_225 = arith.constant 2 : index
    %c0_226 = arith.constant 0 : index
    %c0_227 = arith.constant 0 : index
    %347 = vector.load %arg22[%c2_225, %c0_226, %c0_227] : memref<4x200x50xbf16, #tpu.memory_space<vmem>>, vector<1x200x50xbf16>
    %348 = vector.shape_cast %347 : vector<1x200x50xbf16> to vector<200x50xbf16>
    %cst_228 = arith.constant dense<0.000000e+00> : vector<16x50xf32>
    %349 = tpu.matmul %243, %348, %cst_228 {dimension_numbers = #tpu.dot_dimension_numbers<[1], [0], [0], [1], [0, 0, 1, 1], [], []>} : vector<16x200xbf16>, vector<200x50xbf16>, vector<16x50xf32> -> vector<16x50xf32>
    %c2_229 = arith.constant 2 : index
    %c0_230 = arith.constant 0 : index
    %c0_231 = arith.constant 0 : index
    %350 = vector.load %arg23[%c2_229, %c0_230, %c0_231] : memref<4x1x50xf32, #tpu.memory_space<vmem>>, vector<1x1x50xf32>
    %351 = vector.shape_cast %350 : vector<1x1x50xf32> to vector<1x50xf32>
    %352 = vector.broadcast %351 : vector<1x50xf32> to vector<16x50xf32>
    %353 = arith.addf %349, %352 : vector<16x50xf32>
    %354 = vector.shape_cast %339 : vector<16x50xf32> to vector<2x8x50xf32>
    %355 = vector.shape_cast %346 : vector<16x50xf32> to vector<2x8x50xf32>
    %356 = vector.shape_cast %353 : vector<16x50xf32> to vector<2x8x50xf32>
    "tpu.trace_start"() <{level = 10 : i32, message = "nqd,nkd->nqk"}> : () -> ()
    %cst_232 = arith.constant dense<0.000000e+00> : vector<2x8x8xf32>
    %357 = tpu.matmul %354, %355, %cst_232 {dimension_numbers = #tpu.dot_dimension_numbers<[2], [2], [1], [1], [0, 0, 0, 1, 1, 1], [0], [0]>} : vector<2x8x50xf32>, vector<2x8x50xf32>, vector<2x8x8xf32> -> vector<2x8x8xf32>
    "tpu.trace_stop"() : () -> ()
    %cst_233 = arith.constant 0.141421363 : f32
    %358 = vector.broadcast %cst_233 : f32 to vector<2x8x8xf32>
    %359 = arith.mulf %357, %358 : vector<2x8x8xf32>
    %cst_234 = arith.constant dense<0xFF800000> : vector<2x8xf32>
    %360 = vector.multi_reduction <maximumf>, %359, %cst_234 [2] : vector<2x8x8xf32> to vector<2x8xf32>
    %361 = vector.shape_cast %360 : vector<2x8xf32> to vector<2x8x1xf32>
    %362 = vector.broadcast %361 : vector<2x8x1xf32> to vector<2x8x8xf32>
    %363 = arith.subf %359, %362 : vector<2x8x8xf32>
    %364 = math.exp %363 : vector<2x8x8xf32>
    %cst_235 = arith.constant dense<0.000000e+00> : vector<2x8xf32>
    %365 = vector.multi_reduction <add>, %364, %cst_235 [2] : vector<2x8x8xf32> to vector<2x8xf32>
    %366 = vector.shape_cast %365 : vector<2x8xf32> to vector<2x8x1xf32>
    %367 = tpu.reciprocal %366 {approx = true} : vector<2x8x1xf32> -> vector<2x8x1xf32>
    %368 = vector.broadcast %367 : vector<2x8x1xf32> to vector<2x8x8xf32>
    %369 = arith.mulf %364, %368 : vector<2x8x8xf32>
    "tpu.trace_start"() <{level = 10 : i32, message = "nqk,nkd->nqd"}> : () -> ()
    %cst_236 = arith.constant dense<0.000000e+00> : vector<2x8x50xf32>
    %370 = tpu.matmul %369, %356, %cst_236 {dimension_numbers = #tpu.dot_dimension_numbers<[2], [1], [1], [2], [0, 0, 0, 1, 1, 2], [0], [0]>} : vector<2x8x8xf32>, vector<2x8x50xf32>, vector<2x8x50xf32> -> vector<2x8x50xf32>
    "tpu.trace_stop"() : () -> ()
    %371 = vector.shape_cast %370 : vector<2x8x50xf32> to vector<16x50xf32>
    %372 = arith.truncf %371 : vector<16x50xf32> to vector<16x50xbf16>
    %c2_237 = arith.constant 2 : index
    %c0_238 = arith.constant 0 : index
    %c0_239 = arith.constant 0 : index
    %373 = vector.load %arg24[%c2_237, %c0_238, %c0_239] : memref<4x50x200xbf16, #tpu.memory_space<vmem>>, vector<1x50x200xbf16>
    %374 = vector.shape_cast %373 : vector<1x50x200xbf16> to vector<50x200xbf16>
    %cst_240 = arith.constant dense<0.000000e+00> : vector<16x200xf32>
    %375 = tpu.matmul %372, %374, %cst_240 {dimension_numbers = #tpu.dot_dimension_numbers<[1], [0], [0], [1], [0, 0, 1, 1], [], []>} : vector<16x50xbf16>, vector<50x200xbf16>, vector<16x200xf32> -> vector<16x200xf32>
    %376 = arith.addf %332, %375 : vector<16x200xf32>
    %c3_241 = arith.constant 3 : index
    %c0_242 = arith.constant 0 : index
    %c0_243 = arith.constant 0 : index
    %377 = vector.load %arg18[%c3_241, %c0_242, %c0_243] : memref<4x200x50xbf16, #tpu.memory_space<vmem>>, vector<1x200x50xbf16>
    %378 = vector.shape_cast %377 : vector<1x200x50xbf16> to vector<200x50xbf16>
    %cst_244 = arith.constant dense<0.000000e+00> : vector<16x50xf32>
    %379 = tpu.matmul %243, %378, %cst_244 {dimension_numbers = #tpu.dot_dimension_numbers<[1], [0], [0], [1], [0, 0, 1, 1], [], []>} : vector<16x200xbf16>, vector<200x50xbf16>, vector<16x50xf32> -> vector<16x50xf32>
    %c3_245 = arith.constant 3 : index
    %c0_246 = arith.constant 0 : index
    %c0_247 = arith.constant 0 : index
    %380 = vector.load %arg19[%c3_245, %c0_246, %c0_247] : memref<4x1x50xf32, #tpu.memory_space<vmem>>, vector<1x1x50xf32>
    %381 = vector.shape_cast %380 : vector<1x1x50xf32> to vector<1x50xf32>
    %382 = vector.broadcast %381 : vector<1x50xf32> to vector<16x50xf32>
    %383 = arith.addf %379, %382 : vector<16x50xf32>
    %c3_248 = arith.constant 3 : index
    %c0_249 = arith.constant 0 : index
    %c0_250 = arith.constant 0 : index
    %384 = vector.load %arg20[%c3_248, %c0_249, %c0_250] : memref<4x200x50xbf16, #tpu.memory_space<vmem>>, vector<1x200x50xbf16>
    %385 = vector.shape_cast %384 : vector<1x200x50xbf16> to vector<200x50xbf16>
    %cst_251 = arith.constant dense<0.000000e+00> : vector<16x50xf32>
    %386 = tpu.matmul %243, %385, %cst_251 {dimension_numbers = #tpu.dot_dimension_numbers<[1], [0], [0], [1], [0, 0, 1, 1], [], []>} : vector<16x200xbf16>, vector<200x50xbf16>, vector<16x50xf32> -> vector<16x50xf32>
    %c3_252 = arith.constant 3 : index
    %c0_253 = arith.constant 0 : index
    %c0_254 = arith.constant 0 : index
    %387 = vector.load %arg21[%c3_252, %c0_253, %c0_254] : memref<4x1x50xf32, #tpu.memory_space<vmem>>, vector<1x1x50xf32>
    %388 = vector.shape_cast %387 : vector<1x1x50xf32> to vector<1x50xf32>
    %389 = vector.broadcast %388 : vector<1x50xf32> to vector<16x50xf32>
    %390 = arith.addf %386, %389 : vector<16x50xf32>
    %c3_255 = arith.constant 3 : index
    %c0_256 = arith.constant 0 : index
    %c0_257 = arith.constant 0 : index
    %391 = vector.load %arg22[%c3_255, %c0_256, %c0_257] : memref<4x200x50xbf16, #tpu.memory_space<vmem>>, vector<1x200x50xbf16>
    %392 = vector.shape_cast %391 : vector<1x200x50xbf16> to vector<200x50xbf16>
    %cst_258 = arith.constant dense<0.000000e+00> : vector<16x50xf32>
    %393 = tpu.matmul %243, %392, %cst_258 {dimension_numbers = #tpu.dot_dimension_numbers<[1], [0], [0], [1], [0, 0, 1, 1], [], []>} : vector<16x200xbf16>, vector<200x50xbf16>, vector<16x50xf32> -> vector<16x50xf32>
    %c3_259 = arith.constant 3 : index
    %c0_260 = arith.constant 0 : index
    %c0_261 = arith.constant 0 : index
    %394 = vector.load %arg23[%c3_259, %c0_260, %c0_261] : memref<4x1x50xf32, #tpu.memory_space<vmem>>, vector<1x1x50xf32>
    %395 = vector.shape_cast %394 : vector<1x1x50xf32> to vector<1x50xf32>
    %396 = vector.broadcast %395 : vector<1x50xf32> to vector<16x50xf32>
    %397 = arith.addf %393, %396 : vector<16x50xf32>
    %398 = vector.shape_cast %383 : vector<16x50xf32> to vector<2x8x50xf32>
    %399 = vector.shape_cast %390 : vector<16x50xf32> to vector<2x8x50xf32>
    %400 = vector.shape_cast %397 : vector<16x50xf32> to vector<2x8x50xf32>
    "tpu.trace_start"() <{level = 10 : i32, message = "nqd,nkd->nqk"}> : () -> ()
    %cst_262 = arith.constant dense<0.000000e+00> : vector<2x8x8xf32>
    %401 = tpu.matmul %398, %399, %cst_262 {dimension_numbers = #tpu.dot_dimension_numbers<[2], [2], [1], [1], [0, 0, 0, 1, 1, 1], [0], [0]>} : vector<2x8x50xf32>, vector<2x8x50xf32>, vector<2x8x8xf32> -> vector<2x8x8xf32>
    "tpu.trace_stop"() : () -> ()
    %cst_263 = arith.constant 0.141421363 : f32
    %402 = vector.broadcast %cst_263 : f32 to vector<2x8x8xf32>
    %403 = arith.mulf %401, %402 : vector<2x8x8xf32>
    %cst_264 = arith.constant dense<0xFF800000> : vector<2x8xf32>
    %404 = vector.multi_reduction <maximumf>, %403, %cst_264 [2] : vector<2x8x8xf32> to vector<2x8xf32>
    %405 = vector.shape_cast %404 : vector<2x8xf32> to vector<2x8x1xf32>
    %406 = vector.broadcast %405 : vector<2x8x1xf32> to vector<2x8x8xf32>
    %407 = arith.subf %403, %406 : vector<2x8x8xf32>
    %408 = math.exp %407 : vector<2x8x8xf32>
    %cst_265 = arith.constant dense<0.000000e+00> : vector<2x8xf32>
    %409 = vector.multi_reduction <add>, %408, %cst_265 [2] : vector<2x8x8xf32> to vector<2x8xf32>
    %410 = vector.shape_cast %409 : vector<2x8xf32> to vector<2x8x1xf32>
    %411 = tpu.reciprocal %410 {approx = true} : vector<2x8x1xf32> -> vector<2x8x1xf32>
    %412 = vector.broadcast %411 : vector<2x8x1xf32> to vector<2x8x8xf32>
    %413 = arith.mulf %408, %412 : vector<2x8x8xf32>
    "tpu.trace_start"() <{level = 10 : i32, message = "nqk,nkd->nqd"}> : () -> ()
    %cst_266 = arith.constant dense<0.000000e+00> : vector<2x8x50xf32>
    %414 = tpu.matmul %413, %400, %cst_266 {dimension_numbers = #tpu.dot_dimension_numbers<[2], [1], [1], [2], [0, 0, 0, 1, 1, 2], [0], [0]>} : vector<2x8x8xf32>, vector<2x8x50xf32>, vector<2x8x50xf32> -> vector<2x8x50xf32>
    "tpu.trace_stop"() : () -> ()
    %415 = vector.shape_cast %414 : vector<2x8x50xf32> to vector<16x50xf32>
    %416 = arith.truncf %415 : vector<16x50xf32> to vector<16x50xbf16>
    %c3_267 = arith.constant 3 : index
    %c0_268 = arith.constant 0 : index
    %c0_269 = arith.constant 0 : index
    %417 = vector.load %arg24[%c3_267, %c0_268, %c0_269] : memref<4x50x200xbf16, #tpu.memory_space<vmem>>, vector<1x50x200xbf16>
    %418 = vector.shape_cast %417 : vector<1x50x200xbf16> to vector<50x200xbf16>
    %cst_270 = arith.constant dense<0.000000e+00> : vector<16x200xf32>
    %419 = tpu.matmul %416, %418, %cst_270 {dimension_numbers = #tpu.dot_dimension_numbers<[1], [0], [0], [1], [0, 0, 1, 1], [], []>} : vector<16x50xbf16>, vector<50x200xbf16>, vector<16x200xf32> -> vector<16x200xf32>
    %420 = arith.addf %376, %419 : vector<16x200xf32>
    %c0_271 = arith.constant 0 : index
    %c0_272 = arith.constant 0 : index
    %421 = vector.load %arg25[%c0_271, %c0_272] : memref<1x200xf32, #tpu.memory_space<vmem>>, vector<1x200xf32>
    %422 = vector.broadcast %421 : vector<1x200xf32> to vector<16x200xf32>
    %423 = arith.addf %420, %422 : vector<16x200xf32>
    %424 = arith.addf %242, %423 : vector<16x200xf32>
    %c0_273 = arith.constant 0 : index
    %c0_274 = arith.constant 0 : index
    %425 = vector.load %arg26[%c0_273, %c0_274] : memref<1x200xf32, #tpu.memory_space<vmem>>, vector<1x200xf32>
    %c0_275 = arith.constant 0 : index
    %c0_276 = arith.constant 0 : index
    %426 = vector.load %arg27[%c0_275, %c0_276] : memref<1x200xf32, #tpu.memory_space<vmem>>, vector<1x200xf32>
    %cst_277 = arith.constant dense<0.000000e+00> : vector<16xf32>
    %427 = vector.multi_reduction <add>, %424, %cst_277 [1] : vector<16x200xf32> to vector<16xf32>
    %428 = vector.shape_cast %427 : vector<16xf32> to vector<16x1xf32>
    %cst_278 = arith.constant 2.000000e+02 : f32
    %429 = vector.broadcast %cst_278 : f32 to vector<16x1xf32>
    %430 = arith.divf %428, %429 : vector<16x1xf32>
    %431 = vector.broadcast %430 : vector<16x1xf32> to vector<16x200xf32>
    %432 = arith.subf %424, %431 : vector<16x200xf32>
    %433 = arith.mulf %432, %432 : vector<16x200xf32>
    %cst_279 = arith.constant dense<0.000000e+00> : vector<16xf32>
    %434 = vector.multi_reduction <add>, %433, %cst_279 [1] : vector<16x200xf32> to vector<16xf32>
    %435 = vector.shape_cast %434 : vector<16xf32> to vector<16x1xf32>
    %cst_280 = arith.constant 2.000000e+02 : f32
    %436 = vector.broadcast %cst_280 : f32 to vector<16x1xf32>
    %437 = arith.divf %435, %436 : vector<16x1xf32>
    %cst_281 = arith.constant 9.99999974E-6 : f32
    %438 = vector.broadcast %cst_281 : f32 to vector<16x1xf32>
    %439 = arith.addf %437, %438 : vector<16x1xf32>
    %440 = math.rsqrt %439 : vector<16x1xf32>
    %441 = vector.broadcast %440 : vector<16x1xf32> to vector<16x200xf32>
    %442 = arith.mulf %432, %441 : vector<16x200xf32>
    %443 = vector.broadcast %425 : vector<1x200xf32> to vector<16x200xf32>
    %444 = arith.mulf %442, %443 : vector<16x200xf32>
    %445 = vector.broadcast %426 : vector<1x200xf32> to vector<16x200xf32>
    %446 = arith.addf %444, %445 : vector<16x200xf32>
    %447 = arith.truncf %446 : vector<16x200xf32> to vector<16x200xbf16>
    %c0_282 = arith.constant 0 : index
    %c0_283 = arith.constant 0 : index
    %448 = vector.load %arg28[%c0_282, %c0_283] : memref<200x2048xbf16, #tpu.memory_space<vmem>>, vector<200x2048xbf16>
    %cst_284 = arith.constant dense<0.000000e+00> : vector<16x2048xf32>
    %449 = tpu.matmul %447, %448, %cst_284 {dimension_numbers = #tpu.dot_dimension_numbers<[1], [0], [0], [1], [0, 0, 1, 1], [], []>} : vector<16x200xbf16>, vector<200x2048xbf16>, vector<16x2048xf32> -> vector<16x2048xf32>
    %c0_285 = arith.constant 0 : index
    %c0_286 = arith.constant 0 : index
    %450 = vector.load %arg29[%c0_285, %c0_286] : memref<1x2048xf32, #tpu.memory_space<vmem>>, vector<1x2048xf32>
    %451 = vector.broadcast %450 : vector<1x2048xf32> to vector<16x2048xf32>
    %452 = arith.addf %449, %451 : vector<16x2048xf32>
    %cst_287 = arith.constant 0.000000e+00 : f32
    %453 = vector.broadcast %cst_287 : f32 to vector<16x2048xf32>
    %454 = arith.maximumf %452, %453 : vector<16x2048xf32>
    %455 = arith.truncf %454 : vector<16x2048xf32> to vector<16x2048xbf16>
    %c0_288 = arith.constant 0 : index
    %c0_289 = arith.constant 0 : index
    %456 = vector.load %arg30[%c0_288, %c0_289] : memref<2048x200xbf16, #tpu.memory_space<vmem>>, vector<2048x200xbf16>
    %cst_290 = arith.constant dense<0.000000e+00> : vector<16x200xf32>
    %457 = tpu.matmul %455, %456, %cst_290 {dimension_numbers = #tpu.dot_dimension_numbers<[1], [0], [0], [1], [0, 0, 1, 1], [], []>} : vector<16x2048xbf16>, vector<2048x200xbf16>, vector<16x200xf32> -> vector<16x200xf32>
    %c0_291 = arith.constant 0 : index
    %c0_292 = arith.constant 0 : index
    %458 = vector.load %arg31[%c0_291, %c0_292] : memref<1x200xf32, #tpu.memory_space<vmem>>, vector<1x200xf32>
    %459 = vector.broadcast %458 : vector<1x200xf32> to vector<16x200xf32>
    %460 = arith.addf %457, %459 : vector<16x200xf32>
    %461 = arith.addf %446, %460 : vector<16x200xf32>
    %c0_293 = arith.constant 0 : index
    %c0_294 = arith.constant 0 : index
    %462 = vector.load %arg32[%c0_293, %c0_294] : memref<1x200xf32, #tpu.memory_space<vmem>>, vector<1x200xf32>
    %c0_295 = arith.constant 0 : index
    %c0_296 = arith.constant 0 : index
    %463 = vector.load %arg33[%c0_295, %c0_296] : memref<1x200xf32, #tpu.memory_space<vmem>>, vector<1x200xf32>
    %cst_297 = arith.constant dense<0.000000e+00> : vector<16xf32>
    %464 = vector.multi_reduction <add>, %461, %cst_297 [1] : vector<16x200xf32> to vector<16xf32>
    %465 = vector.shape_cast %464 : vector<16xf32> to vector<16x1xf32>
    %cst_298 = arith.constant 2.000000e+02 : f32
    %466 = vector.broadcast %cst_298 : f32 to vector<16x1xf32>
    %467 = arith.divf %465, %466 : vector<16x1xf32>
    %468 = vector.broadcast %467 : vector<16x1xf32> to vector<16x200xf32>
    %469 = arith.subf %461, %468 : vector<16x200xf32>
    %470 = arith.mulf %469, %469 : vector<16x200xf32>
    %cst_299 = arith.constant dense<0.000000e+00> : vector<16xf32>
    %471 = vector.multi_reduction <add>, %470, %cst_299 [1] : vector<16x200xf32> to vector<16xf32>
    %472 = vector.shape_cast %471 : vector<16xf32> to vector<16x1xf32>
    %cst_300 = arith.constant 2.000000e+02 : f32
    %473 = vector.broadcast %cst_300 : f32 to vector<16x1xf32>
    %474 = arith.divf %472, %473 : vector<16x1xf32>
    %cst_301 = arith.constant 9.99999974E-6 : f32
    %475 = vector.broadcast %cst_301 : f32 to vector<16x1xf32>
    %476 = arith.addf %474, %475 : vector<16x1xf32>
    %477 = math.rsqrt %476 : vector<16x1xf32>
    %478 = vector.broadcast %477 : vector<16x1xf32> to vector<16x200xf32>
    %479 = arith.mulf %469, %478 : vector<16x200xf32>
    %480 = vector.broadcast %462 : vector<1x200xf32> to vector<16x200xf32>
    %481 = arith.mulf %479, %480 : vector<16x200xf32>
    %482 = vector.broadcast %463 : vector<1x200xf32> to vector<16x200xf32>
    %483 = arith.addf %481, %482 : vector<16x200xf32>
    %484 = vector.shape_cast %483 : vector<16x200xf32> to vector<2x8x200xf32>
    %cst_302 = arith.constant dense<0.000000e+00> : vector<8x200xf32>
    %485 = vector.multi_reduction <add>, %484, %cst_302 [0] : vector<2x8x200xf32> to vector<8x200xf32>
    %cst_303 = arith.constant 2.000000e+00 : f32
    %486 = vector.broadcast %cst_303 : f32 to vector<8x200xf32>
    %487 = arith.divf %485, %486 : vector<8x200xf32>
    %c0_304 = arith.constant 0 : index
    %c0_305 = arith.constant 0 : index
    %488 = vector.load %arg34[%c0_304, %c0_305] : memref<200x7xf32, #tpu.memory_space<vmem>>, vector<200x7xf32>
    %cst_306 = arith.constant dense<0.000000e+00> : vector<8x7xf32>
    %489 = tpu.matmul %487, %488, %cst_306 {dimension_numbers = #tpu.dot_dimension_numbers<[1], [0], [0], [1], [0, 0, 1, 1], [], []>} : vector<8x200xf32>, vector<200x7xf32>, vector<8x7xf32> -> vector<8x7xf32>
    %c0_307 = arith.constant 0 : index
    %c0_308 = arith.constant 0 : index
    %490 = vector.load %arg35[%c0_307, %c0_308] : memref<1x7xf32, #tpu.memory_space<vmem>>, vector<1x7xf32>
    %491 = vector.broadcast %490 : vector<1x7xf32> to vector<8x7xf32>
    %492 = arith.addf %489, %491 : vector<8x7xf32>
    %c0_309 = arith.constant 0 : index
    %c0_310 = arith.constant 0 : index
    %493 = vector.load %arg36[%c0_309, %c0_310] : memref<8x7xf32, #tpu.memory_space<vmem>>, vector<8x7xf32>
    tpu.vector_store %arg36[%c0_309, %c0_310], %492 {strides = array<i32>} : memref<8x7xf32, #tpu.memory_space<vmem>>, vector<8x7xf32>,
    return
  }
  func.func @transform_0(%arg0: i32) -> (i32, i32, i32) {
    %c0_i32 = arith.constant 0 : i32
    %c0_i32_0 = arith.constant 0 : i32
    %c0_i32_1 = arith.constant 0 : i32
    %c0_i32_2 = arith.constant 0 : i32
    return %c0_i32, %c0_i32_0, %c0_i32_1 : i32, i32, i32
  }
  func.func @transform_1(%arg0: i32) -> (i32, i32, i32) {
    %c0_i32 = arith.constant 0 : i32
    %c0_i32_0 = arith.constant 0 : i32
    %c0_i32_1 = arith.constant 0 : i32
    %c0_i32_2 = arith.constant 0 : i32
    return %c0_i32, %c0_i32_0, %c0_i32_1 : i32, i32, i32
  }
  func.func @transform_2(%arg0: i32) -> (i32, i32, i32) {
    %c0_i32 = arith.constant 0 : i32
    %c0_i32_0 = arith.constant 0 : i32
    %c0_i32_1 = arith.constant 0 : i32
    %c0_i32_2 = arith.constant 0 : i32
    return %c0_i32, %c0_i32_0, %c0_i32_1 : i32, i32, i32
  }
  func.func @transform_3(%arg0: i32) -> (i32, i32, i32) {
    %c0_i32 = arith.constant 0 : i32
    %c0_i32_0 = arith.constant 0 : i32
    %c0_i32_1 = arith.constant 0 : i32
    %c0_i32_2 = arith.constant 0 : i32
    return %c0_i32, %c0_i32_0, %c0_i32_1 : i32, i32, i32
  }
  func.func @transform_4(%arg0: i32) -> (i32, i32, i32) {
    %c0_i32 = arith.constant 0 : i32
    %c0_i32_0 = arith.constant 0 : i32
    %c0_i32_1 = arith.constant 0 : i32
    %c0_i32_2 = arith.constant 0 : i32
    return %c0_i32, %c0_i32_0, %c0_i32_1 : i32, i32, i32
  }
  func.func @transform_5(%arg0: i32) -> (i32, i32, i32) {
    %c0_i32 = arith.constant 0 : i32
    %c0_i32_0 = arith.constant 0 : i32
    %c0_i32_1 = arith.constant 0 : i32
    %c0_i32_2 = arith.constant 0 : i32
    return %c0_i32, %c0_i32_0, %c0_i32_1 : i32, i32, i32
  }
  func.func @transform_6(%arg0: i32) -> (i32, i32, i32) {
    %c0_i32 = arith.constant 0 : i32
    %c0_i32_0 = arith.constant 0 : i32
    %c0_i32_1 = arith.constant 0 : i32
    %c0_i32_2 = arith.constant 0 : i32
    return %c0_i32, %c0_i32_0, %c0_i32_1 : i32, i32, i32
  }
  func.func @transform_7(%arg0: i32) -> (i32, i32, i32) {
    %c0_i32 = arith.constant 0 : i32
    %c0_i32_0 = arith.constant 0 : i32
    %c0_i32_1 = arith.constant 0 : i32
    %c0_i32_2 = arith.constant 0 : i32
    return %c0_i32, %c0_i32_0, %c0_i32_1 : i32, i32, i32
  }
  func.func @transform_8(%arg0: i32) -> (i32, i32) {
    %c0_i32 = arith.constant 0 : i32
    %c0_i32_0 = arith.constant 0 : i32
    %c0_i32_1 = arith.constant 0 : i32
    return %c0_i32, %c0_i32_0 : i32, i32
  }
  func.func @transform_9(%arg0: i32) -> (i32, i32) {
    %c0_i32 = arith.constant 0 : i32
    %c0_i32_0 = arith.constant 0 : i32
    %c0_i32_1 = arith.constant 0 : i32
    return %c0_i32, %c0_i32_0 : i32, i32
  }
  func.func @transform_10(%arg0: i32) -> (i32, i32) {
    %c0_i32 = arith.constant 0 : i32
    %c0_i32_0 = arith.constant 0 : i32
    %c0_i32_1 = arith.constant 0 : i32
    return %c0_i32, %c0_i32_0 : i32, i32
  }
  func.func @transform_11(%arg0: i32) -> (i32, i32) {
    %c0_i32 = arith.constant 0 : i32
    %c0_i32_0 = arith.constant 0 : i32
    %c0_i32_1 = arith.constant 0 : i32
    return %c0_i32, %c0_i32_0 : i32, i32
  }
  func.func @transform_12(%arg0: i32) -> (i32, i32) {
    %c0_i32 = arith.constant 0 : i32
    %c0_i32_0 = arith.constant 0 : i32
    %c0_i32_1 = arith.constant 0 : i32
    return %c0_i32, %c0_i32_0 : i32, i32
  }
  func.func @transform_13(%arg0: i32) -> (i32, i32) {
    %c0_i32 = arith.constant 0 : i32
    %c0_i32_0 = arith.constant 0 : i32
    %c0_i32_1 = arith.constant 0 : i32
    return %c0_i32, %c0_i32_0 : i32, i32
  }
  func.func @transform_14(%arg0: i32) -> (i32, i32) {
    %c0_i32 = arith.constant 0 : i32
    %c0_i32_0 = arith.constant 0 : i32
    %c0_i32_1 = arith.constant 0 : i32
    return %c0_i32, %c0_i32_0 : i32, i32
  }
  func.func @transform_15(%arg0: i32) -> (i32, i32) {
    %c0_i32 = arith.constant 0 : i32
    %c0_i32_0 = arith.constant 0 : i32
    %c0_i32_1 = arith.constant 0 : i32
    return %c0_i32, %c0_i32_0 : i32, i32
  }
  func.func @transform_16(%arg0: i32) -> (i32, i32) {
    %c0_i32 = arith.constant 0 : i32
    %c0_i32_0 = arith.constant 0 : i32
    %c0_i32_1 = arith.constant 0 : i32
    return %c0_i32, %c0_i32_0 : i32, i32
  }
  func.func @transform_17(%arg0: i32) -> (i32, i32, i32) {
    %c0_i32 = arith.constant 0 : i32
    %c0_i32_0 = arith.constant 0 : i32
    %c0_i32_1 = arith.constant 0 : i32
    %c0_i32_2 = arith.constant 0 : i32
    return %c0_i32, %c0_i32_0, %c0_i32_1 : i32, i32, i32
  }
  func.func @transform_18(%arg0: i32) -> (i32, i32, i32) {
    %c0_i32 = arith.constant 0 : i32
    %c0_i32_0 = arith.constant 0 : i32
    %c0_i32_1 = arith.constant 0 : i32
    %c0_i32_2 = arith.constant 0 : i32
    return %c0_i32, %c0_i32_0, %c0_i32_1 : i32, i32, i32
  }
  func.func @transform_19(%arg0: i32) -> (i32, i32, i32) {
    %c0_i32 = arith.constant 0 : i32
    %c0_i32_0 = arith.constant 0 : i32
    %c0_i32_1 = arith.constant 0 : i32
    %c0_i32_2 = arith.constant 0 : i32
    return %c0_i32, %c0_i32_0, %c0_i32_1 : i32, i32, i32
  }
  func.func @transform_20(%arg0: i32) -> (i32, i32, i32) {
    %c0_i32 = arith.constant 0 : i32
    %c0_i32_0 = arith.constant 0 : i32
    %c0_i32_1 = arith.constant 0 : i32
    %c0_i32_2 = arith.constant 0 : i32
    return %c0_i32, %c0_i32_0, %c0_i32_1 : i32, i32, i32
  }
  func.func @transform_21(%arg0: i32) -> (i32, i32, i32) {
    %c0_i32 = arith.constant 0 : i32
    %c0_i32_0 = arith.constant 0 : i32
    %c0_i32_1 = arith.constant 0 : i32
    %c0_i32_2 = arith.constant 0 : i32
    return %c0_i32, %c0_i32_0, %c0_i32_1 : i32, i32, i32
  }
  func.func @transform_22(%arg0: i32) -> (i32, i32, i32) {
    %c0_i32 = arith.constant 0 : i32
    %c0_i32_0 = arith.constant 0 : i32
    %c0_i32_1 = arith.constant 0 : i32
    %c0_i32_2 = arith.constant 0 : i32
    return %c0_i32, %c0_i32_0, %c0_i32_1 : i32, i32, i32
  }
  func.func @transform_23(%arg0: i32) -> (i32, i32, i32) {
    %c0_i32 = arith.constant 0 : i32
    %c0_i32_0 = arith.constant 0 : i32
    %c0_i32_1 = arith.constant 0 : i32
    %c0_i32_2 = arith.constant 0 : i32
    return %c0_i32, %c0_i32_0, %c0_i32_1 : i32, i32, i32
  }
  func.func @transform_24(%arg0: i32) -> (i32, i32) {
    %c0_i32 = arith.constant 0 : i32
    %c0_i32_0 = arith.constant 0 : i32
    %c0_i32_1 = arith.constant 0 : i32
    return %c0_i32, %c0_i32_0 : i32, i32
  }
  func.func @transform_25(%arg0: i32) -> (i32, i32) {
    %c0_i32 = arith.constant 0 : i32
    %c0_i32_0 = arith.constant 0 : i32
    %c0_i32_1 = arith.constant 0 : i32
    return %c0_i32, %c0_i32_0 : i32, i32
  }
  func.func @transform_26(%arg0: i32) -> (i32, i32) {
    %c0_i32 = arith.constant 0 : i32
    %c0_i32_0 = arith.constant 0 : i32
    %c0_i32_1 = arith.constant 0 : i32
    return %c0_i32, %c0_i32_0 : i32, i32
  }
  func.func @transform_27(%arg0: i32) -> (i32, i32) {
    %c0_i32 = arith.constant 0 : i32
    %c0_i32_0 = arith.constant 0 : i32
    %c0_i32_1 = arith.constant 0 : i32
    return %c0_i32, %c0_i32_0 : i32, i32
  }
  func.func @transform_28(%arg0: i32) -> (i32, i32) {
    %c0_i32 = arith.constant 0 : i32
    %c0_i32_0 = arith.constant 0 : i32
    %c0_i32_1 = arith.constant 0 : i32
    return %c0_i32, %c0_i32_0 : i32, i32
  }
  func.func @transform_29(%arg0: i32) -> (i32, i32) {
    %c0_i32 = arith.constant 0 : i32
    %c0_i32_0 = arith.constant 0 : i32
    %c0_i32_1 = arith.constant 0 : i32
    return %c0_i32, %c0_i32_0 : i32, i32
  }
  func.func @transform_30(%arg0: i32) -> (i32, i32) {
    %c0_i32 = arith.constant 0 : i32
    %c0_i32_0 = arith.constant 0 : i32
    %c0_i32_1 = arith.constant 0 : i32
    return %c0_i32, %c0_i32_0 : i32, i32
  }
  func.func @transform_31(%arg0: i32) -> (i32, i32) {
    %c0_i32 = arith.constant 0 : i32
    %c0_i32_0 = arith.constant 0 : i32
    %c0_i32_1 = arith.constant 0 : i32
    return %c0_i32, %c0_i32_0 : i32, i32
  }
  func.func @transform_32(%arg0: i32) -> (i32, i32) {
    %c0_i32 = arith.constant 0 : i32
    %c0_i32_0 = arith.constant 0 : i32
    %c0_i32_1 = arith.constant 0 : i32
    return %c0_i32, %c0_i32_0 : i32, i32
  }
  func.func @transform_33(%arg0: i32) -> (i32, i32) {
    %c0_i32 = arith.constant 0 : i32
    %c0_i32_0 = arith.constant 0 : i32
    %c0_i32_1 = arith.constant 0 : i32
    return %c0_i32, %c0_i32_0 : i32, i32
  }
  func.func @transform_34(%arg0: i32) -> (i32, i32) {
    %c0_i32 = arith.constant 0 : i32
    %c0_i32_0 = arith.constant 0 : i32
    %c0_i32_1 = arith.constant 0 : i32
    return %c0_i32, %c0_i32_0 : i32, i32
  }
  func.func @transform_35(%arg0: i32) -> (i32, i32) {
    %c0_i32 = arith.constant 0 : i32
    %c0_i32_0 = arith.constant 0 : i32
    %c0_i32_1 = arith.constant 0 : i32
    return %c0_i32, %c0_i32_0 : i32, i32
  }
}

</mosaic_0001>

<bundles_post_ra>
// kernel: transformer_classifier.1
= control target key start
LH: loop header
LB: loop body
LE: loop exit
PB: predicated region body
PF: predicated region fallthrough
CT: control target
= control target key end

     0   :  { %s18440_s6 = smov 1   ;;  %s18441_s10 = smov 2   ;;  %s21226_s0 = inlined_call_operand.smem [shape: u32[36], index: -1, kind: input, shape index: {}] }
   0x1   :  { %s18487_s5 = sld [smem:[%s21226_s0]]   ;;  %s18442_s14 = smov 3  }
   0x2   :  { %s18492_s9 = sld [smem:[%s21226_s0 + %s18440_s6]]   ;;  %s18443_s18 = smov 4  }
   0x3   :  { %s18497_s13 = sld [smem:[%s21226_s0 + %s18441_s10]]   ;;  %s18444_s22 = smov 5  }
   0x4   :  { %s18502_s17 = sld [smem:[%s21226_s0 + %s18442_s14]]   ;;  %s18445_s26 = smov 6  }
   0x5   :  { %s18507_s21 = sld [smem:[%s21226_s0 + %s18443_s18]]   ;;  %s18446_s30 = smov 7  }
   0x6   :  { %s18512_s25 = sld [smem:[%s21226_s0 + %s18444_s22]]   ;;  %s18447_s4 = smov 8  }
   0x7   :  { %s18517_s29 = sld [smem:[%s21226_s0 + %s18445_s26]]   ;;  %s18448_s10 = smov 9  }
   0x8   :  { %s18522_s3 = sld [smem:[%s21226_s0 + %s18446_s30]]   ;;  %s18449_s15 = smov 10  }
   0x9   :  { %s18527_s8 = sld [smem:[%s21226_s0 + %s18447_s4]]   ;;  %s18450_s20 = smov 11  }
   0xa   :  { %s18532_s14 = sld [smem:[%s21226_s0 + %s18448_s10]]   ;;  %s18451_s26 = smov 12  }
   0xb   :  { %s18537_s19 = sld [smem:[%s21226_s0 + %s18449_s15]]   ;;  %s18452_s1 = smov 13  }
   0xc   :  { %s18542_s24 = sld [smem:[%s21226_s0 + %s18450_s20]]   ;;  %s18453_s7 = smov 14  }
   0xd   :  { %s18547_s30 = sld [smem:[%s21226_s0 + %s18451_s26]]   ;;  %s18454_s15 = smov 15  }
   0xe   :  { %s18552_s6 = sld [smem:[%s21226_s0 + %s18452_s1]]   ;;  %s18455_s22 = smov 16  }
   0xf   :  { %s18557_s12 = sld [smem:[%s21226_s0 + %s18453_s7]]   ;;  %s18456_s28 = smov 17  }
  0x10   :  { %s18562_s20 = sld [smem:[%s21226_s0 + %s18454_s15]]   ;;  %s18457_s7 = smov 18  }
  0x11   :  { %s18567_s27 = sld [smem:[%s21226_s0 + %s18455_s22]]   ;;  %s18458_s15 = smov 19  }
  0x12   :  { %s18572_s4 = sld [smem:[%s21226_s0 + %s18456_s28]]   ;;  %s18459_s22 = smov 20  }
  0x13   :  { %s18460_s28 = smov 21  }
  0x15   :  { %21237 = sst [smem:[#allocation5_spill]] %s18557_s12 }
  0x16   :  { %21238 = sst [smem:[#allocation6_spill]] %s18562_s20 }
  0x17   :  { %21239 = sst [smem:[#allocation7_spill]] %s18567_s27 }
  0x18   :  { %21240 = sst [smem:[#allocation8_spill]] %s18572_s4 }
  0x19   :  { %s18577_s12 = sld [smem:[%s21226_s0 + %s18457_s7]]   ;;  %s18461_s7 = smov 22  }
  0x1a   :  { %s18582_s20 = sld [smem:[%s21226_s0 + %s18458_s15]]   ;;  %s18462_s15 = smov 23  }
  0x1b   :  { %s18587_s27 = sld [smem:[%s21226_s0 + %s18459_s22]]   ;;  %s18463_s22 = smov 24  }
  0x1c   :  { %s18592_s4 = sld [smem:[%s21226_s0 + %s18460_s28]]   ;;  %s18464_s28 = smov 25  }
  0x1f   :  { %21241 = sst [smem:[#allocation9_spill]] %s18577_s12 }
  0x20   :  { %21242 = sst [smem:[#allocation10_spill]] %s18582_s20 }
  0x21   :  { %21243 = sst [smem:[#allocation11_spill]] %s18587_s27 }
  0x22   :  { %21244 = sst [smem:[#allocation12_spill]] %s18592_s4 }
  0x23   :  { %s18597_s12 = sld [smem:[%s21226_s0 + %s18461_s7]]   ;;  %s18465_s7 = smov 26  }
  0x24   :  { %s18602_s20 = sld [smem:[%s21226_s0 + %s18462_s15]]   ;;  %s18466_s15 = smov 27  }
  0x25   :  { %s18607_s27 = sld [smem:[%s21226_s0 + %s18463_s22]]   ;;  %s18467_s22 = smov 28  }
  0x26   :  { %s18612_s4 = sld [smem:[%s21226_s0 + %s18464_s28]]   ;;  %s18468_s28 = smov 29  }
  0x29   :  { %21245 = sst [smem:[#allocation13_spill]] %s18597_s12 }
  0x2a   :  { %21246 = sst [smem:[#allocation14_spill]] %s18602_s20 }
  0x2b   :  { %21247 = sst [smem:[#allocation15_spill]] %s18607_s27 }
  0x2c   :  { %21248 = sst [smem:[#allocation16_spill]] %s18612_s4 }
  0x2d   :  { %s18617_s12 = sld [smem:[%s21226_s0 + %s18465_s7]]   ;;  %s18469_s7 = smov 30  }
  0x2e   :  { %s18622_s20 = sld [smem:[%s21226_s0 + %s18466_s15]]   ;;  %s18470_s15 = smov 31  }
  0x2f   :  { %s18627_s27 = sld [smem:[%s21226_s0 + %s18467_s22]]   ;;  %s18471_s22 = smov 32  }
  0x30   :  { %s18632_s4 = sld [smem:[%s21226_s0 + %s18468_s28]]   ;;  %s18472_s28 = smov 33  }
  0x33   :  { %21249 = sst [smem:[#allocation17_spill]] %s18617_s12 }
  0x34   :  { %21250 = sst [smem:[#allocation18_spill]] %s18622_s20 }
  0x35   :  { %21251 = sst [smem:[#allocation19_spill]] %s18627_s27 }
  0x36   :  { %21252 = sst [smem:[#allocation20_spill]] %s18632_s4 }
  0x37   :  { %s18637_s12 = sld [smem:[%s21226_s0 + %s18469_s7]]   ;;  %s18473_s7 = smov 34  }
  0x38   :  { %s18642_s20 = sld [smem:[%s21226_s0 + %s18470_s15]]   ;;  %s18474_s15 = smov 35  }
  0x39   :  { %s18647_s27 = sld [smem:[%s21226_s0 + %s18471_s22]]  }
  0x3a   :  { %s18652_s4 = sld [smem:[%s21226_s0 + %s18472_s28]]  }
  0x3d   :  { %21253 = sst [smem:[#allocation21_spill]] %s18637_s12 }
  0x3e   :  { %21254 = sst [smem:[#allocation22_spill]] %s18642_s20 }
  0x3f   :  { %s18657_s12 = sld [smem:[%s21226_s0 + %s18473_s7]]  }
  0x40   :  { %s18662_s20 = sld [smem:[%s21226_s0 + %s18474_s15]]  }
  0x41   :  { %v17134_v0 = vld [vmem:[%s18492_s9 + $0x38] sm:$0xff]   ;;  %v18475_v1 = vmov 0   ;;  %v17136_v3 = vld [vmem:[%s18492_s9 + $0x30] sm:$0xff]   ;;  %v17138_v5 = vld [vmem:[%s18492_s9 + $0x28] sm:$0xff]   ;;  %vm265_vm0 = vcmask 1043456   ;;  %vm261_vm1 = vcmask 588800  }
  0x42   :  { %269 = vmatprep.subr.bf16.mxu0 %v18475_v1  ;;  %420 = vmatprep.subr.bf16.mxu1 %v18475_v1  ;;  %v17135_v2 = vld [vmem:[%s18502_s17 + $0x38] sm:$0xff]   ;;  %v17137_v4 = vld [vmem:[%s18502_s17 + $0x30] sm:$0xff]   ;;  %v17139_v6 = vld [vmem:[%s18502_s17 + $0x28] sm:$0xff]   ;;  %v18476_v35 = vmov 0.0   ;;  %vm18477_vm2 = vmmov 0   ;;  %vm612_vm3 = vcmask 408576  }
  0x43   :  { %270 = vmatpush1.bf16.msra.mxu0 %v17134_v0  ;;  %421 = vmatpush1.bf16.msra.mxu1 %v17135_v2  ;;  %v17140_v7 = vld [vmem:[%s18492_s9 + $0x20] sm:$0xff]   ;;  %v17142_v9 = vld [vmem:[%s18492_s9 + $0x18] sm:$0xff]   ;;  %v17144_v11 = vld [vmem:[%s18492_s9 + $0x10] sm:$0xff]  }
  0x44   :  { %271 = vmatprep.subr.bf16.mxu0 %v18475_v1  ;;  %422 = vmatprep.subr.bf16.mxu1 %v18475_v1  ;;  %v17141_v8 = vld [vmem:[%s18502_s17 + $0x20] sm:$0xff]   ;;  %v17143_v10 = vld [vmem:[%s18502_s17 + $0x18] sm:$0xff]   ;;  %v17145_v12 = vld [vmem:[%s18502_s17 + $0x10] sm:$0xff]  }
  0x45   :  { %v17146_v13 = vld [vmem:[%s18492_s9 + $0x8] sm:$0xff]   ;;  %v17150_v14 = vld [vmem:[%s18492_s9 + $0x60] ss:$0 sps:$4 sm:$0xff]   ;;  %v151_v18 = vld [vmem:[%s18487_s5 + $0x18] sm:$0xff] }
  0x46   :  { %v17151_v15 = vld [vmem:[%s18502_s17 + $0x60] ss:$0 sps:$4 sm:$0xff]   ;;  %v17147_v16 = vld [vmem:[%s18502_s17 + $0x8] sm:$0xff]   ;;  %v267_v21 = vsel %vm265_vm0, %v17150_v14, 0  ;;  %v17152_v24 = vld [vmem:[%s18492_s9 + $0x58] sm:$0xff]  }
  0x47   :  { %272 = vmatpush1.bf16.msra.mxu0 %v17136_v3  ;;  %423 = vmatpush1.bf16.msra.mxu1 %v17137_v4  ;;  %v149_v17 = vld [vmem:[%s18487_s5 + $0x8] sm:$0xff]  ;;  %v17148_v19 = vld [vmem:[%s18492_s9] sm:$0xff]   ;;  %v418_v22 = vsel %vm265_vm0, %v17151_v15, 0  ;;  %v17153_v25 = vld [vmem:[%s18502_s17 + $0x58] sm:$0xff]  }
  0x48   :  { %273 = vmatprep.subr.bf16.mxu0 %v18475_v1  ;;  %424 = vmatprep.subr.bf16.mxu1 %v18475_v1  ;;  %v17149_v20 = vld [vmem:[%s18502_s17] sm:$0xff]   ;;  %v18700_v23 = vpack.c.bf16 %v151_v18, %v149_v17  ;;  %v17154_v26 = vld [vmem:[%s18492_s9 + $0x50] sm:$0xff]   ;;  %v17156_v28 = vld [vmem:[%s18492_s9 + $0x48] sm:$0xff]  }
  0x49   :  { %v17155_v27 = vld [vmem:[%s18502_s17 + $0x50] sm:$0xff]   ;;  %v17157_v29 = vld [vmem:[%s18502_s17 + $0x48] sm:$0xff]   ;;  %v17158_v30 = vld [vmem:[%s18492_s9 + $0x40] sm:$0xff]  }
  0x4a   :  { %14925 = vmatprep.mubr.msk.bf16.mxu0 %vm261_vm1, %v18700_v23  ;;  %14940 = vmatprep.mubr.msk.bf16.mxu1 %vm261_vm1, %v18700_v23  ;;  %v148_v31 = vld [vmem:[%s18487_s5] sm:$0xff]  ;;  %v150_v32 = vld [vmem:[%s18487_s5 + $0x10] sm:$0xff]  ;;  %v17160_v50 = vld [vmem:[%s18512_s25 + $0x38] sm:$0xff]  }
  0x4b   :  { %274 = vmatpush1.bf16.msra.mxu0 %v17138_v5  ;;  %425 = vmatpush1.bf16.msra.mxu1 %v17139_v6  ;;  %v17159_v33 = vld [vmem:[%s18502_s17 + $0x40] sm:$0xff]   ;;  %v18728_v34 = vpack.c.bf16 %v150_v32, %v148_v31  ;;  %v17161_v51 = vld [vmem:[%s18512_s25 + $0x30] sm:$0xff]   ;;  %v17162_v52 = vld [vmem:[%s18512_s25 + $0x28] sm:$0xff]  }
  0x4c   :  { %275 = vmatprep.subr.bf16.mxu0 %v18475_v1  ;;  %426 = vmatprep.subr.bf16.mxu1 %v18475_v1  ;;  %v14926_v36 = vld [vmem:[%s18507_s21] ss:$0 sm:$0xff]  ;;  %v17164_v54 = vld [vmem:[%s18512_s25 + $0x18] sm:$0xff]   ;;  %v17165_v55 = vld [vmem:[%s18512_s25 + $0x10] sm:$0xff]  }
  0x4d   :  { %v14911_v37 = vld [vmem:[%s18497_s13] ss:$0 sm:$0xff]  ;;  %v17166_v56 = vld [vmem:[%s18512_s25 + $0x8] sm:$0xff]   ;;  %v17169_v60 = vld [vmem:[%s18512_s25 + $0x58] sm:$0xff]  }
  0x4e   :  { %v17163_v53 = vld [vmem:[%s18512_s25 + $0x20] sm:$0xff]   ;;  %v17170_v61 = vld [vmem:[%s18512_s25 + $0x50] sm:$0xff]   ;;  %v17171_v62 = vld [vmem:[%s18512_s25 + $0x48] sm:$0xff]  }
  0x4f   :  { %276 = vmatpush1.bf16.msra.mxu0 %v17140_v7  ;;  %427 = vmatpush1.bf16.msra.mxu1 %v17141_v8  ;;  %v17167_v57 = vld [vmem:[%s18512_s25] sm:$0xff]  }
  0x50   :  { %277 = vmatprep.subr.bf16.mxu0 %v18475_v1  ;;  %428 = vmatprep.subr.bf16.mxu1 %v18475_v1  ;;  %v17168_v58 = vld [vmem:[%s18512_s25 + $0x60] ss:$0 sps:$4 sm:$0xff]  }
  0x51   :  { %v569_v59 = vsel %vm265_vm0, %v17168_v58, 0  ;;  %v17172_v63 = vld [vmem:[%s18512_s25 + $0x40] sm:$0xff]  }
  0x53   :  { %278 = vmatpush1.bf16.msra.mxu0 %v17142_v9  ;;  %429 = vmatpush1.bf16.msra.mxu1 %v17143_v10 }
  0x54   :  { %279 = vmatprep.subr.bf16.mxu0 %v18475_v1  ;;  %430 = vmatprep.subr.bf16.mxu1 %v18475_v1 }
  0x57   :  { %280 = vmatpush1.bf16.msra.mxu0 %v17144_v11  ;;  %431 = vmatpush1.bf16.msra.mxu1 %v17145_v12 }
  0x58   :  { %281 = vmatprep.subr.bf16.mxu0 %v18475_v1  ;;  %432 = vmatprep.subr.bf16.mxu1 %v18475_v1 }
  0x5b   :  { %282 = vmatpush1.bf16.msra.mxu0 %v17146_v13  ;;  %433 = vmatpush1.bf16.msra.mxu1 %v17147_v16 }
  0x5c   :  { %283 = vmatprep.subr.bf16.mxu0 %v18475_v1  ;;  %434 = vmatprep.subr.bf16.mxu1 %v18475_v1 }
  0x5f   :  { %284 = vmatpush1.bf16.msra.mxu0 %v17148_v19  ;;  %435 = vmatpush1.bf16.msra.mxu1 %v17149_v20 }
  0x60   :  { %291 = vmatprep.subr.bf16.mxu0 %v18475_v1  ;;  %442 = vmatprep.subr.bf16.mxu1 %v18475_v1 }
  0x63   :  { %292 = vmatpush2.bf16.msra.mxu0 %v267_v21  ;;  %443 = vmatpush2.bf16.msra.mxu1 %v418_v22 }
  0x64   :  { %293 = vmatprep.subr.bf16.mxu0 %v18475_v1  ;;  %444 = vmatprep.subr.bf16.mxu1 %v18475_v1 }
  0x67   :  { %294 = vmatpush2.bf16.msra.mxu0 %v17152_v24  ;;  %445 = vmatpush2.bf16.msra.mxu1 %v17153_v25 }
  0x68   :  { %295 = vmatprep.subr.bf16.mxu0 %v18475_v1  ;;  %446 = vmatprep.subr.bf16.mxu1 %v18475_v1 }
  0x6b   :  { %296 = vmatpush2.bf16.msra.mxu0 %v17154_v26  ;;  %447 = vmatpush2.bf16.msra.mxu1 %v17155_v27 }
  0x6c   :  { %297 = vmatprep.subr.bf16.mxu0 %v18475_v1  ;;  %448 = vmatprep.subr.bf16.mxu1 %v18475_v1 }
  0x6f   :  { %298 = vmatpush2.bf16.msra.mxu0 %v17156_v28  ;;  %449 = vmatpush2.bf16.msra.mxu1 %v17157_v29 }
  0x70   :  { %299 = vmatprep.subr.bf16.mxu0 %v18475_v1  ;;  %450 = vmatprep.subr.bf16.mxu1 %v18475_v1 }
  0x73   :  { %300 = vmatpush2.bf16.msra.mxu0 %v17158_v30  ;;  %451 = vmatpush2.bf16.msra.mxu1 %v17159_v33 }
  0x74   :  { %571 = vmatprep.subr.bf16.mxu0 %v18475_v1  ;;  %16935 = vmatprep.subr.mxu1 %v18476_v35 }
  0x76   :  { %302 = vmatmul.mubr.bf16.vlgmr.msra.gmra.mxu0 %v18728_v34  ;;  %453 = vmatmul.mubr.bf16.vlgmr.msra.gmra.mxu1 %v18728_v34 }
  0x77   :  { %14955 = vmatprep.mubr.msk.bf16.mxu0 %vm261_vm1, %v18700_v23  ;;  %16937 = vmatprep.mubr.msk.f32.mxu1 %vm18477_vm2, %v18476_v35 }
  0x78   :  { %572 = vmatpush1.bf16.msra.mxu0 %v17160_v50 }
  0x79   :  { %573 = vmatprep.subr.bf16.mxu0 %v18475_v1 }
  0x7c   :  { %574 = vmatpush1.bf16.msra.mxu0 %v17161_v51 }
  0x7d   :  { %575 = vmatprep.subr.bf16.mxu0 %v18475_v1 }
  0x80   :  { %576 = vmatpush1.bf16.msra.mxu0 %v17162_v52 }
  0x81   :  { %577 = vmatprep.subr.bf16.mxu0 %v18475_v1 }
  0x84   :  { %578 = vmatpush1.bf16.msra.mxu0 %v17163_v53 }
  0x85   :  { %579 = vmatprep.subr.bf16.mxu0 %v18475_v1 }
  0x88   :  { %580 = vmatpush1.bf16.msra.mxu0 %v17164_v54 }
  0x89   :  { %581 = vmatprep.subr.bf16.mxu0 %v18475_v1 }
  0x8c   :  { %582 = vmatpush1.bf16.msra.mxu0 %v17165_v55 }
  0x8d   :  { %583 = vmatprep.subr.bf16.mxu0 %v18475_v1 }
  0x90   :  { %584 = vmatpush1.bf16.msra.mxu0 %v17166_v56 }
  0x91   :  { %585 = vmatprep.subr.bf16.mxu0 %v18475_v1 }
  0x94   :  { %586 = vmatpush1.bf16.msra.mxu0 %v17167_v57 }
  0x95   :  { %593 = vmatprep.subr.bf16.mxu0 %v18475_v1 }
  0x98   :  { %594 = vmatpush2.bf16.msra.mxu0 %v569_v59 }
  0x99   :  { %595 = vmatprep.subr.bf16.mxu0 %v18475_v1 }
  0x9c   :  { %596 = vmatpush2.bf16.msra.mxu0 %v17169_v60 }
  0x9d   :  { %597 = vmatprep.subr.bf16.mxu0 %v18475_v1 }
  0xa0   :  { %598 = vmatpush2.bf16.msra.mxu0 %v17170_v61 }
  0xa1   :  { %599 = vmatprep.subr.bf16.mxu0 %v18475_v1 }
  0xa4   :  { %600 = vmatpush2.bf16.msra.mxu0 %v17171_v62 }
  0xa5   :  { %601 = vmatprep.subr.bf16.mxu0 %v18475_v1 }
  0xa8   :  { %602 = vmatpush2.bf16.msra.mxu0 %v17172_v63 }
  0xa9   :  { %1209 = vmatprep.subr.bf16.mxu0 %v18475_v1 }
  0xab   :  { %604 = vmatmul.mubr.bf16.vlgmr.msra.gmra.mxu0 %v18728_v34 }
  0xac   :  { %15043 = vmatprep.mubr.msk.bf16.mxu0 %vm261_vm1, %v18700_v23 }
 0x136   :  { %v303_v38 = vpop.f32.mrf.mxu0  ;;  %v454_v39 = vpop.f32.mrf.mxu1 }
 0x137   :  { %v455_v40 = vadd.f32 %v14926_v36, %v454_v39  ;;  %v304_v42 = vadd.f32 %v14911_v37, %v303_v38 }
 0x138   :  { %v305_v41 = vpop.f32.mrf.mxu0  ;;  %v456_v43 = vpop.f32.mrf.mxu1 }
 0x139   :  { %16936 = vmatpush3.xpose.msk.msra.mxu1 %vm612_vm3, %v455_v40 }
 0x13a   :  { %v306_v44 = vpop.f32.mrf.mxu0  ;;  %v457_v45 = vpop.f32.mrf.mxu1  ;;  %16940 = vmatprep.subr.mxu1 %v18476_v35 }
 0x13b   :  { %v458_v46 = vadd.f32 %v14926_v36, %v457_v45  ;;  %v307_v49 = vadd.f32 %v14911_v37, %v306_v44 }
 0x13c   :  { %v308_v47 = vpop.f32.mrf.mxu0  ;;  %v459_v48 = vpop.f32.mrf.mxu1  ;;  %16938 = vmatmul.mubr.msk.f32.vlgmr.msra.gmra.mxu1 %vm612_vm3, %v304_v42 }
 0x13d   :  { %16941 = vmatpush3.xpose.msk.msra.mxu1 %vm612_vm3, %v458_v46  ;;  %16942 = vmatprep.mubr.msk.f32.mxu1 %vm18477_vm2, %v18476_v35 }
 0x13e   :  { %16945 = vmatprep.subr.mxu1 %v18476_v35 }
 0x140   :  { %16943 = vmatmul.mubr.msk.f32.vlgmr.msra.gmra.mxu1 %vm612_vm3, %v307_v49 }
 0x141   :  { %16947 = vmatprep.mubr.msk.f32.mxu1 %vm18477_vm2, %v18476_v35 }
 0x142   :  { %76 = vsyncpa [#allocation3], 0  ;;  %vm767_vm4 = vcmask 64512   ;;  %v14941_v19 = vld [vmem:[%s18517_s29] ss:$0 sm:$0xff]  ;;  %v17174_v25 = vld [vmem:[%s18502_s17 + $0x94] sm:$0xff]  }
 0x143   :  { %v17173_v21 = vld [vmem:[%s18502_s17 + $0x9c] sm:$0xff]   ;;  %v17175_v29 = vld [vmem:[%s18502_s17 + $0x8c] sm:$0xff]   ;;  %v17177_v30 = vld [vmem:[%s18502_s17 + $0x84] sm:$0xff]   ;;  %vm1772_vm5 = vcmask 1040384   ;;  %s21255_s0 = sld [smem:[#allocation5_spill]]  ;;  %vm14860_vm6 = vcmask 56320  }
 0x144   :  { %1210 = vmatpush1.bf16.msra.mxu0 %v17173_v21  ;;  %v17179_v31 = vld [vmem:[%s18502_s17 + $0x7c] sm:$0xff]   ;;  %v17181_v32 = vld [vmem:[%s18502_s17 + $0x74] sm:$0xff]   ;;  %v17183_v33 = vld [vmem:[%s18502_s17 + $0x6c] sm:$0xff]   ;;  %s21270_s22 = sld [smem:[#allocation19_spill]] }
 0x145   :  { %1211 = vmatprep.subr.bf16.mxu0 %v18475_v1  ;;  %v17185_v36 = vld [vmem:[%s18502_s17 + $0x64] sm:$0xff]   ;;  %v17189_v39 = vld [vmem:[%s18502_s17 + $0xbc] sm:$0xff]   ;;  %v17191_v40 = vld [vmem:[%s18502_s17 + $0xb4] sm:$0xff]   ;;  %s21271_s23 = sld [smem:[#allocation21_spill]] }
 0x146   :  { %v17187_v37 = vld [vmem:[%s18502_s17 + $0xc4] ss:$0 sps:$4 sm:$0xff]   ;;  %v17193_v41 = vld [vmem:[%s18502_s17 + $0xac] sm:$0xff]   ;;  %v17176_v48 = vld [vmem:[%s18492_s9 + $0x9c] sm:$0xff]   ;;  %s21272_s26 = sld [smem:[#allocation22_spill]] }
 0x147   :  { %v1207_v38 = vsel %vm265_vm0, %v17187_v37, 0  ;;  %v17195_v42 = vld [vmem:[%s18502_s17 + $0xa4] sm:$0xff]   ;;  %v17178_v50 = vld [vmem:[%s18492_s9 + $0x94] sm:$0xff]   ;;  %v17180_v51 = vld [vmem:[%s18492_s9 + $0x8c] sm:$0xff]  }
 0x148   :  { %1212 = vmatpush1.bf16.msra.mxu0 %v17174_v25  ;;  %v17182_v52 = vld [vmem:[%s18492_s9 + $0x84] sm:$0xff]   ;;  %v17184_v53 = vld [vmem:[%s18492_s9 + $0x7c] sm:$0xff]   ;;  %v17186_v54 = vld [vmem:[%s18492_s9 + $0x74] sm:$0xff]  }
 0x149   :  { %1213 = vmatprep.subr.bf16.mxu0 %v18475_v1  ;;  %v17188_v55 = vld [vmem:[%s18492_s9 + $0x6c] sm:$0xff]   ;;  %v17190_v56 = vld [vmem:[%s18492_s9 + $0x64] sm:$0xff]   ;;  %v17194_v59 = vld [vmem:[%s18492_s9 + $0xbc] sm:$0xff]  }
 0x14a   :  { %v17192_v57 = vld [vmem:[%s18492_s9 + $0xc4] ss:$0 sps:$4 sm:$0xff]   ;;  %v17196_v60 = vld [vmem:[%s18492_s9 + $0xb4] sm:$0xff]   ;;  %v17197_v61 = vld [vmem:[%s18492_s9 + $0xac] sm:$0xff]  }
 0x14b   :  { %v1054_v58 = vsel %vm265_vm0, %v17192_v57, 0  ;;  %v17198_v62 = vld [vmem:[%s18492_s9 + $0xa4] sm:$0xff]   ;;  %v17199_v63 = vld [vmem:[%s18512_s25 + $0x9c] sm:$0xff]  }
 0x14c   :  { %1214 = vmatpush1.bf16.msra.mxu0 %v17175_v29 }
 0x14d   :  { %1215 = vmatprep.subr.bf16.mxu0 %v18475_v1 }
 0x150   :  { %1216 = vmatpush1.bf16.msra.mxu0 %v17177_v30 }
 0x151   :  { %1217 = vmatprep.subr.bf16.mxu0 %v18475_v1 }
 0x154   :  { %1218 = vmatpush1.bf16.msra.mxu0 %v17179_v31 }
 0x155   :  { %1219 = vmatprep.subr.bf16.mxu0 %v18475_v1 }
 0x158   :  { %1220 = vmatpush1.bf16.msra.mxu0 %v17181_v32 }
 0x159   :  { %1221 = vmatprep.subr.bf16.mxu0 %v18475_v1 }
 0x15c   :  { %1222 = vmatpush1.bf16.msra.mxu0 %v17183_v33 }
 0x15d   :  { %1223 = vmatprep.subr.bf16.mxu0 %v18475_v1 }
 0x160   :  { %1224 = vmatpush1.bf16.msra.mxu0 %v17185_v36  ;;  %v15070_v36 = vld [vmem:[%s18517_s29 + $0x1] ss:$0 sm:$0xff] }
 0x161   :  { %1231 = vmatprep.subr.bf16.mxu0 %v18475_v1 }
 0x164   :  { %1232 = vmatpush2.bf16.msra.mxu0 %v1207_v38 }
 0x165   :  { %1233 = vmatprep.subr.bf16.mxu0 %v18475_v1 }
 0x168   :  { %1234 = vmatpush2.bf16.msra.mxu0 %v17189_v39 }
 0x169   :  { %1235 = vmatprep.subr.bf16.mxu0 %v18475_v1 }
 0x16b   :  { %v605_v20 = vpop.f32.mrf.mxu0 }
 0x16c   :  { %v606_v22 = vadd.f32 %v14941_v19, %v605_v20  ;;  %1236 = vmatpush2.bf16.msra.mxu0 %v17191_v40 }
 0x16d   :  { %v607_v24 = vpop.f32.mrf.mxu0  ;;  %1237 = vmatprep.subr.bf16.mxu0 %v18475_v1 }
 0x16e   :  { %16946 = vmatpush3.msra.mxu1 %v606_v22 }
 0x16f   :  { %v608_v26 = vpop.f32.mrf.mxu0  ;;  %16950 = vmatprep.subr.mxu1 %v18476_v35 }
 0x170   :  { %v609_v27 = vadd.f32 %v14941_v19, %v608_v26  ;;  %1238 = vmatpush2.bf16.msra.mxu0 %v17193_v41 }
 0x171   :  { %v610_v28 = vpop.f32.mrf.mxu0  ;;  %1239 = vmatprep.subr.bf16.mxu0 %v18475_v1 }
 0x174   :  { %1240 = vmatpush2.bf16.msra.mxu0 %v17195_v42 }
 0x175   :  { %16960 = vmatprep.subr.mxu0 %v18476_v35 }
 0x177   :  { %1242 = vmatmul.mubr.bf16.vlgmr.msra.gmra.mxu0 %v18728_v34 }
 0x178   :  { %16962 = vmatprep.mubr.msk.f32.mxu0 %vm18477_vm2, %v18476_v35 }
 0x1fc   :  { %v685_v0 = vpop.f32.mrf.mxu1 }
 0x1fd   :  { %v765_v2 = vmul.f32 0.14142136, %v685_v0  ;;  %v17200_v0 = vld [vmem:[%s18512_s25 + $0x94] sm:$0xff]  }
 0x1fe   :  { %v16939_v3 = vpop.f32.mrf.mxu1 }
 0x1ff   :  { %v768_v4 = vsel %vm767_vm4, %v765_v2, -inf  ;;  %v17202_v3 = vld [vmem:[%s18512_s25 + $0x84] sm:$0xff]  }
 0x200   :  { %769 = vmax.xlane.f32.xlu0 %v768_v4  ;;  %v761_v5 = vpop.f32.mrf.mxu1  ;;  %v17203_v4 = vld [vmem:[%s18512_s25 + $0x7c] sm:$0xff]  }
 0x201   :  { %v766_v6 = vmul.f32 0.14142136, %v761_v5  ;;  %v17204_v5 = vld [vmem:[%s18512_s25 + $0x74] sm:$0xff]  }
 0x202   :  { %v16944_v7 = vpop.f32.mrf.mxu1 }
 0x203   :  { %v771_v8 = vsel %vm767_vm4, %v766_v6, -inf  ;;  %v17206_v7 = vld [vmem:[%s18512_s25 + $0x64] sm:$0xff]  }
 0x204   :  { %772 = vmax.xlane.f32.xlu0 %v771_v8  ;;  %v17207_v8 = vld [vmem:[%s18512_s25 + $0xc4] ss:$0 sps:$4 sm:$0xff]  }
 0x289   :  { %v770_v9 = vpop.xlane.xlu0 %769 }
 0x28a   :  { %v774_v10 = vsub.f32 %v765_v2, %v770_v9  ;;  %v17201_v2 = vld [vmem:[%s18512_s25 + $0x8c] sm:$0xff]   ;;  %v1360_v9 = vsel %vm265_vm0, %v17207_v8, 0 }
 0x28c   :  { %v776_v11 = vmul.f32 1.442695, %v774_v10  ;;  %v17208_v10 = vld [vmem:[%s18512_s25 + $0xbc] sm:$0xff]  }
 0x28d   :  { %v773_v12 = vpop.xlane.xlu0 %772 }
 0x28e   :  { %18334 = vpow2.f32 %v776_v11  ;;  %v775_v13 = vsub.f32 %v766_v6, %v773_v12  ;;  %v17205_v6 = vld [vmem:[%s18512_s25 + $0x6c] sm:$0xff]   ;;  %v17209_v11 = vld [vmem:[%s18512_s25 + $0xb4] sm:$0xff]  }
 0x28f   :  { %v17210_v12 = vld [vmem:[%s18512_s25 + $0xac] sm:$0xff]  }
 0x290   :  { %v778_v14 = vmul.f32 1.442695, %v775_v13  ;;  %v17211_v13 = vld [vmem:[%s18512_s25 + $0xa4] sm:$0xff]  }
 0x292   :  { %18336 = vpow2.f32 %v778_v14  ;;  %v15029_v14 = vld [vmem:[%s18507_s21 + $0x1] ss:$0 sm:$0xff] }
 0x29b   :  { %v18335_v15 = vpop.eup %18334 }
 0x29c   :  { %v780_v16 = vsel %vm767_vm4, %v18335_v15, 0.0 }
 0x29d   :  { %781 = vadd.xlane.f32.xlu1 %v780_v16 }
 0x29f   :  { %v18783_v17 = vpop.eup %18336 }
 0x2a0   :  { %v783_v18 = vsel %vm767_vm4, %v18783_v17, 0.0 }
 0x2a1   :  { %784 = vadd.xlane.f32.xlu1 %v783_v18 }
 0x326   :  { %v782_v43 = vpop.xlane.xlu1 %781 }
 0x327   :  { %18338 = vrcp.f32 %v782_v43 }
 0x32a   :  { %v785_v44 = vpop.xlane.xlu1 %784 }
 0x32b   :  { %18340 = vrcp.f32 %v785_v44 }
 0x334   :  { %v18339_v45 = vpop.eup %18338 }
 0x335   :  { %v788_v46 = vmul.f32 %v18339_v45, %v18335_v15  ;;  %v1243_v15 = vpop.f32.mrf.mxu0 }
 0x336   :  { %v1244_v16 = vadd.f32 %v15029_v14, %v1243_v15 }
 0x337   :  { %16948 = vmatmul.mubr.msk.f32.vlgmr.msra.gmra.mxu1 %vm767_vm4, %v788_v46 }
 0x338   :  { %v18341_v47 = vpop.eup %18340  ;;  %16951 = vmatpush3.msra.mxu1 %v609_v27  ;;  %16952 = vmatprep.mubr.msk.f32.mxu1 %vm18477_vm2, %v18476_v35  ;;  %v14988_v27 = vld [vmem:[%s18497_s13 + $0x1] ss:$0 sm:$0xff] }
 0x339   :  { %1056 = vmatprep.subr.bf16.mxu1 %v18475_v1  ;;  %v789_v49 = vmul.f32 %v18341_v47, %v18783_v17  ;;  %v1245_v17 = vpop.f32.mrf.mxu0 }
 0x33a   :  { %v17236_v17 = vld [vmem:[%s18492_s9 + $0xf8] sm:$0xff]  }
 0x33b   :  { %16953 = vmatmul.mubr.msk.f32.vlgmr.msra.gmra.mxu1 %vm767_vm4, %v789_v49  ;;  %v1246_v18 = vpop.f32.mrf.mxu0 }
 0x33c   :  { %1057 = vmatpush1.bf16.msra.mxu1 %v17176_v48  ;;  %15002 = vmatprep.mubr.msk.bf16.mxu1 %vm261_vm1, %v18700_v23  ;;  %v1247_v19 = vadd.f32 %v15029_v14, %v1246_v18  ;;  %v943_v14 = vld [vmem:[%s18522_s3 + $0x30] sm:$0x11] }
 0x33d   :  { %1058 = vmatprep.subr.bf16.mxu1 %v18475_v1  ;;  %v1248_v20 = vpop.f32.mrf.mxu0  ;;  %v15115_v15 = vcombine.high %v943_v14, %v943_v14  ;;  %v17238_v18 = vld [vmem:[%s18492_s9 + $0xf0] sm:$0xff]  }
 0x33e   :  { %16961 = vmatpush3.xpose.msk.msra.mxu0 %vm612_vm3, %v1247_v19  ;;  %v17240_v19 = vld [vmem:[%s18492_s9 + $0xe8] sm:$0xff]   ;;  %v17242_v20 = vld [vmem:[%s18492_s9 + $0xe0] sm:$0xff]  }
 0x33f   :  { %16965 = vmatprep.subr.mxu0 %v18476_v35 }
 0x340   :  { %1059 = vmatpush1.bf16.msra.mxu1 %v17178_v50 }
 0x341   :  { %1060 = vmatprep.subr.bf16.mxu1 %v18475_v1 }
 0x344   :  { %1061 = vmatpush1.bf16.msra.mxu1 %v17180_v51 }
 0x345   :  { %1062 = vmatprep.subr.bf16.mxu1 %v18475_v1 }
 0x348   :  { %1063 = vmatpush1.bf16.msra.mxu1 %v17182_v52 }
 0x349   :  { %1064 = vmatprep.subr.bf16.mxu1 %v18475_v1 }
 0x34c   :  { %1065 = vmatpush1.bf16.msra.mxu1 %v17184_v53 }
 0x34d   :  { %1066 = vmatprep.subr.bf16.mxu1 %v18475_v1 }
 0x350   :  { %1067 = vmatpush1.bf16.msra.mxu1 %v17186_v54 }
 0x351   :  { %1068 = vmatprep.subr.bf16.mxu1 %v18475_v1 }
 0x354   :  { %1069 = vmatpush1.bf16.msra.mxu1 %v17188_v55 }
 0x355   :  { %1070 = vmatprep.subr.bf16.mxu1 %v18475_v1 }
 0x358   :  { %1071 = vmatpush1.bf16.msra.mxu1 %v17190_v56 }
 0x359   :  { %1078 = vmatprep.subr.bf16.mxu1 %v18475_v1 }
 0x35c   :  { %1079 = vmatpush2.bf16.msra.mxu1 %v1054_v58 }
 0x35d   :  { %1080 = vmatprep.subr.bf16.mxu1 %v18475_v1 }
 0x360   :  { %1081 = vmatpush2.bf16.msra.mxu1 %v17194_v59 }
 0x361   :  { %1082 = vmatprep.subr.bf16.mxu1 %v18475_v1 }
 0x364   :  { %1083 = vmatpush2.bf16.msra.mxu1 %v17196_v60 }
 0x365   :  { %1084 = vmatprep.subr.bf16.mxu1 %v18475_v1 }
 0x368   :  { %1085 = vmatpush2.bf16.msra.mxu1 %v17197_v61  ;;  %v15097_v61 = vld [vmem:[%s18522_s3 + $0x68] sm:$0x11] }
 0x369   :  { %1086 = vmatprep.subr.bf16.mxu1 %v18475_v1 }
 0x36c   :  { %1087 = vmatpush2.bf16.msra.mxu1 %v17198_v62  ;;  %v15105_v62 = vcombine.high %v15097_v61, %v15097_v61 }
 0x36d   :  { %1362 = vmatprep.subr.bf16.mxu1 %v18475_v1 }
 0x36f   :  { %1089 = vmatmul.mubr.bf16.vlgmr.msra.gmra.mxu1 %v18728_v34 }
 0x370   :  { %1363 = vmatpush1.bf16.msra.mxu1 %v17199_v63  ;;  %15084 = vmatprep.mubr.msk.bf16.mxu1 %vm261_vm1, %v18700_v23  ;;  %v15104_v63 = vcombine.low %v15097_v61, %v15097_v61 }
 0x371   :  { %1364 = vmatprep.subr.bf16.mxu1 %v18475_v1 }
 0x374   :  { %1365 = vmatpush1.bf16.msra.mxu1 %v17200_v0  ;;  %v17216_v0 = vld [vmem:[%s18522_s3 + $0x5c] ss:$8 sps:$4 sm:$0xff]  }
 0x375   :  { %1366 = vmatprep.subr.bf16.mxu1 %v18475_v1 }
 0x378   :  { %1367 = vmatpush1.bf16.msra.mxu1 %v17201_v2  ;;  %v1774_v2 = vsel %vm1772_vm5, %v15104_v63, 0 }
 0x379   :  { %1368 = vmatprep.subr.bf16.mxu1 %v18475_v1 }
 0x37c   :  { %1369 = vmatpush1.bf16.msra.mxu1 %v17202_v3  ;;  %v17214_v3 = vld [vmem:[%s18522_s3 + $0x58] ss:$8 sps:$4 sm:$0xff]  }
 0x37d   :  { %1370 = vmatprep.subr.bf16.mxu1 %v18475_v1 }
 0x380   :  { %1371 = vmatpush1.bf16.msra.mxu1 %v17203_v4  ;;  %v17219_v4 = vld [vmem:[%s18522_s3 + $0x4c] ss:$8 sps:$4 sm:$0xff]  }
 0x381   :  { %1372 = vmatprep.subr.bf16.mxu1 %v18475_v1 }
 0x384   :  { %1373 = vmatpush1.bf16.msra.mxu1 %v17204_v5  ;;  %v17217_v5 = vld [vmem:[%s18522_s3 + $0x48] ss:$8 sps:$4 sm:$0xff]  }
 0x385   :  { %1374 = vmatprep.subr.bf16.mxu1 %v18475_v1 }
 0x388   :  { %1375 = vmatpush1.bf16.msra.mxu1 %v17205_v6 }
 0x389   :  { %1376 = vmatprep.subr.bf16.mxu1 %v18475_v1 }
 0x38c   :  { %1377 = vmatpush1.bf16.msra.mxu1 %v17206_v7 }
 0x38d   :  { %1384 = vmatprep.subr.bf16.mxu1 %v18475_v1 }
 0x390   :  { %1385 = vmatpush2.bf16.msra.mxu1 %v1360_v9 }
 0x391   :  { %1386 = vmatprep.subr.bf16.mxu1 %v18475_v1 }
 0x394   :  { %1387 = vmatpush2.bf16.msra.mxu1 %v17208_v10 }
 0x395   :  { %1388 = vmatprep.subr.bf16.mxu1 %v18475_v1 }
 0x398   :  { %1389 = vmatpush2.bf16.msra.mxu1 %v17209_v11 }
 0x399   :  { %1390 = vmatprep.subr.bf16.mxu1 %v18475_v1 }
 0x39c   :  { %1391 = vmatpush2.bf16.msra.mxu1 %v17210_v12  ;;  %v17222_v12 = vld [vmem:[%s18522_s3 + $0x3c] ss:$8 sps:$4 sm:$0xff]  }
 0x39d   :  { %1392 = vmatprep.subr.bf16.mxu1 %v18475_v1 }
 0x3a0   :  { %1393 = vmatpush2.bf16.msra.mxu1 %v17211_v13  ;;  %v17220_v13 = vld [vmem:[%s18522_s3 + $0x38] ss:$8 sps:$4 sm:$0xff]  }
 0x3a1   :  { %16955 = vmatprep.subr.mxu1 %v18476_v35 }
 0x3a3   :  { %1395 = vmatmul.mubr.bf16.vlgmr.msra.gmra.mxu1 %v18728_v34 }
 0x3a4   :  { %16957 = vmatprep.mubr.msk.f32.mxu1 %vm18477_vm2, %v18476_v35  ;;  %16956 = vmatpush3.xpose.msk.msra.mxu1 %vm612_vm3, %v1244_v16  ;;  %v17234_v16 = vld [vmem:[%s18492_s9 + $0x100] sm:$0xff]  }
 0x3a5   :  { %15106 = vmatprep.subr.msk.bf16.mxu1 %vm1772_vm5, %v15105_v62 }
 0x3f7   :  { %v18891_v21 = vpop.f32.mrf.mxu1 }
 0x3f9   :  { %v16949_v22 = vpop.f32.mrf.mxu1 }
 0x3fa   :  { %v17244_v22 = vld [vmem:[%s18492_s9 + $0xd8] sm:$0xff]  }
 0x3fb   :  { %v18893_v24 = vpop.f32.mrf.mxu1 }
 0x3fc   :  { %v936_v25 = vpack.c.bf16 %v18893_v24, %v18891_v21  ;;  %v17243_v21 = vld [vmem:[%s18502_s17 + $0xe0] sm:$0xff]   ;;  %v17245_v24 = vld [vmem:[%s18502_s17 + $0xd8] sm:$0xff]  }
 0x3fd   :  { %v16954_v26 = vpop.f32.mrf.mxu1 }
 0x3fe   :  { %v17246_v26 = vld [vmem:[%s18492_s9 + $0xd0] sm:$0xff]  }
 0x42f   :  { %v1090_v28 = vpop.f32.mrf.mxu1 }
 0x430   :  { %v1091_v29 = vadd.f32 %v14988_v27, %v1090_v28  ;;  %v17250_v28 = vld [vmem:[%s18492_s9 + $0x128] ss:$0 sps:$4 sm:$0xff]  }
 0x431   :  { %v1092_v30 = vpop.f32.mrf.mxu1 }
 0x432   :  { %16958 = vmatmul.mubr.msk.f32.vlgmr.msra.gmra.mxu1 %vm612_vm3, %v1091_v29  ;;  %v2019_v29 = vsel %vm265_vm0, %v17250_v28, 0  ;;  %v17252_v30 = vld [vmem:[%s18492_s9 + $0x120] sm:$0xff]   ;;  %v17262_v28 = vld [vmem:[%s18512_s25 + $0xf0] sm:$0xff]  }
 0x433   :  { %v1093_v31 = vpop.f32.mrf.mxu1  ;;  %1811 = vmatprep.mubr.bf16.mxu1 %v18475_v1  ;;  %1788 = vmatpush1.bf16.msra.mxu1 %v1774_v2 }
 0x434   :  { %v1094_v32 = vadd.f32 %v14988_v27, %v1093_v31  ;;  %1789 = vmatprep.subr.bf16.mxu1 %v17216_v0  ;;  %v17248_v27 = vld [vmem:[%s18492_s9 + $0xc8] sm:$0xff]   ;;  %v17254_v31 = vld [vmem:[%s18492_s9 + $0x118] sm:$0xff]  }
 0x435   :  { %v1095_v33 = vpop.f32.mrf.mxu1 }
 0x436   :  { %16963 = vmatmul.mubr.msk.f32.vlgmr.msra.gmra.mxu0 %vm612_vm3, %v1094_v32  ;;  %v17256_v32 = vld [vmem:[%s18492_s9 + $0x110] sm:$0xff]   ;;  %v17258_v33 = vld [vmem:[%s18492_s9 + $0x108] sm:$0xff]  }
 0x437   :  { %16967 = vmatprep.mubr.msk.f32.mxu0 %vm18477_vm2, %v18476_v35  ;;  %1790 = vmatpush1.bf16.msra.mxu1 %v17214_v3 }
 0x438   :  { %1791 = vmatprep.subr.bf16.mxu1 %v17219_v4 }
 0x43b   :  { %1792 = vmatpush1.bf16.msra.mxu1 %v17217_v5 }
 0x43c   :  { %1793 = vmatprep.subr.bf16.mxu1 %v17222_v12  ;;  %v15185_v12 = vld [vmem:[%s18507_s21 + $0x2] ss:$0 sm:$0xff] }
 0x43f   :  { %1794 = vmatpush1.bf16.msra.mxu1 %v17220_v13  ;;  %v15144_v13 = vld [vmem:[%s18497_s13 + $0x2] ss:$0 sm:$0xff] }
 0x440   :  { %15116 = vmatprep.subr.msk.bf16.mxu1 %vm1772_vm5, %v15115_v15 }
 0x463   :  { %v1396_v37 = vpop.f32.mrf.mxu1 }
 0x464   :  { %v1397_v38 = vadd.f32 %v15070_v36, %v1396_v37  ;;  %v15114_v37 = vcombine.low %v943_v14, %v943_v14 }
 0x465   :  { %v1398_v39 = vpop.f32.mrf.mxu1 }
 0x466   :  { %16966 = vmatpush3.msra.mxu0 %v1397_v38 }
 0x467   :  { %v1399_v40 = vpop.f32.mrf.mxu1  ;;  %16970 = vmatprep.subr.mxu0 %v18476_v35 }
 0x468   :  { %v1400_v41 = vadd.f32 %v15070_v36, %v1399_v40 }
 0x469   :  { %v1401_v42 = vpop.f32.mrf.mxu1 }
 0x46a   :  { %v17227_v42 = vld [vmem:[%s18522_s3 + $0x24] ss:$8 sps:$4 sm:$0xff]  }
 0x4f2   :  { %v1475_v43 = vpop.f32.mrf.mxu1 }
 0x4f3   :  { %v1555_v44 = vmul.f32 0.14142136, %v1475_v43 }
 0x4f4   :  { %v16959_v45 = vpop.f32.mrf.mxu1 }
 0x4f5   :  { %v1557_v46 = vsel %vm767_vm4, %v1555_v44, -inf  ;;  %v17230_v45 = vld [vmem:[%s18522_s3 + $0x14] ss:$8 sps:$4 sm:$0xff]  }
 0x4f6   :  { %v1551_v47 = vpop.f32.mrf.mxu0  ;;  %1558 = vmax.xlane.f32.xlu0 %v1557_v46  ;;  %v17228_v46 = vld [vmem:[%s18522_s3 + $0x10] ss:$8 sps:$4 sm:$0xff]  }
 0x4f7   :  { %v1556_v48 = vmul.f32 0.14142136, %v1551_v47  ;;  %v17233_v47 = vld [vmem:[%s18522_s3 + $0x4] ss:$8 sps:$4 sm:$0xff]  }
 0x4f8   :  { %v16964_v49 = vpop.f32.mrf.mxu0 }
 0x4f9   :  { %v1560_v50 = vsel %vm767_vm4, %v1556_v48, -inf  ;;  %v17235_v49 = vld [vmem:[%s18502_s17 + $0x100] sm:$0xff]  }
 0x4fa   :  { %1561 = vmax.xlane.f32.xlu1 %v1560_v50  ;;  %v17237_v50 = vld [vmem:[%s18502_s17 + $0xf8] sm:$0xff]  }
 0x57f   :  { %v1559_v51 = vpop.xlane.xlu0 %1558 }
 0x580   :  { %v1563_v52 = vsub.f32 %v1555_v44, %v1559_v51  ;;  %v17225_v44 = vld [vmem:[%s18522_s3 + $0x20] ss:$8 sps:$4 sm:$0xff]   ;;  %v17239_v51 = vld [vmem:[%s18502_s17 + $0xf0] sm:$0xff]  }
 0x582   :  { %v1565_v53 = vmul.f32 1.442695, %v1563_v52  ;;  %v17241_v52 = vld [vmem:[%s18502_s17 + $0xe8] sm:$0xff]  }
 0x583   :  { %v1562_v54 = vpop.xlane.xlu1 %1561 }
 0x584   :  { %18342 = vpow2.f32 %v1565_v53  ;;  %v1564_v55 = vsub.f32 %v1556_v48, %v1562_v54  ;;  %v17231_v48 = vld [vmem:[%s18522_s3] ss:$8 sps:$4 sm:$0xff]  }
 0x585   :  { %v17249_v53 = vld [vmem:[%s18502_s17 + $0xc8] sm:$0xff]  }
 0x586   :  { %v1567_v56 = vmul.f32 1.442695, %v1564_v55  ;;  %v17251_v54 = vld [vmem:[%s18502_s17 + $0x128] ss:$0 sps:$4 sm:$0xff]  }
 0x587   :  { %v2172_v55 = vsel %vm265_vm0, %v17251_v54, 0 }
 0x588   :  { %18344 = vpow2.f32 %v1567_v56  ;;  %v17253_v56 = vld [vmem:[%s18502_s17 + $0x120] sm:$0xff]  }
 0x591   :  { %v18343_v57 = vpop.eup %18342 }
 0x592   :  { %v1569_v58 = vsel %vm767_vm4, %v18343_v57, 0.0 }
 0x593   :  { %1570 = vadd.xlane.f32.xlu0 %v1569_v58  ;;  %v17257_v58 = vld [vmem:[%s18502_s17 + $0x110] sm:$0xff]  }
 0x595   :  { %v18345_v59 = vpop.eup %18344 }
 0x596   :  { %v1572_v60 = vsel %vm767_vm4, %v18345_v59, 0.0 }
 0x597   :  { %1573 = vadd.xlane.f32.xlu1 %v1572_v60 }
 0x61c   :  { %v1571_v6 = vpop.xlane.xlu0 %1570 }
 0x61d   :  { %18346 = vrcp.f32 %v1571_v6 }
 0x620   :  { %v1574_v7 = vpop.xlane.xlu1 %1573 }
 0x621   :  { %18348 = vrcp.f32 %v1574_v7 }
 0x62a   :  { %v18347_v8 = vpop.eup %18346 }
 0x62b   :  { %v1577_v9 = vmul.f32 %v18347_v8, %v18343_v57  ;;  %v17255_v57 = vld [vmem:[%s18502_s17 + $0x118] sm:$0xff]  }
 0x62d   :  { %16968 = vmatmul.mubr.msk.f32.vlgmr.msra.gmra.mxu0 %vm767_vm4, %v1577_v9 }
 0x62e   :  { %v18349_v10 = vpop.eup %18348  ;;  %16971 = vmatpush3.msra.mxu0 %v1400_v41  ;;  %16972 = vmatprep.mubr.msk.f32.mxu0 %vm18477_vm2, %v18476_v35  ;;  %v1861_v41 = vsel %vm1772_vm5, %v15114_v37, 0 }
 0x62f   :  { %v1578_v11 = vmul.f32 %v18349_v10, %v18345_v59  ;;  %2021 = vmatprep.subr.bf16.mxu0 %v18475_v1  ;;  %v17259_v59 = vld [vmem:[%s18502_s17 + $0x108] sm:$0xff]  }
 0x631   :  { %16973 = vmatmul.mubr.msk.f32.vlgmr.msra.gmra.mxu0 %vm767_vm4, %v1578_v11 }
 0x632   :  { %15158 = vmatprep.mubr.msk.bf16.mxu0 %vm261_vm1, %v18700_v23  ;;  %2022 = vmatpush1.bf16.msra.mxu0 %v17234_v16 }
 0x633   :  { %2023 = vmatprep.subr.bf16.mxu0 %v18475_v1 }
 0x636   :  { %2024 = vmatpush1.bf16.msra.mxu0 %v17236_v17 }
 0x637   :  { %2025 = vmatprep.subr.bf16.mxu0 %v18475_v1 }
 0x63a   :  { %2026 = vmatpush1.bf16.msra.mxu0 %v17238_v18 }
 0x63b   :  { %2027 = vmatprep.subr.bf16.mxu0 %v18475_v1 }
 0x63e   :  { %2028 = vmatpush1.bf16.msra.mxu0 %v17240_v19 }
 0x63f   :  { %2029 = vmatprep.subr.bf16.mxu0 %v18475_v1 }
 0x642   :  { %2030 = vmatpush1.bf16.msra.mxu0 %v17242_v20 }
 0x643   :  { %2031 = vmatprep.subr.bf16.mxu0 %v18475_v1 }
 0x646   :  { %2032 = vmatpush1.bf16.msra.mxu0 %v17244_v22 }
 0x647   :  { %2033 = vmatprep.subr.bf16.mxu0 %v18475_v1 }
 0x64a   :  { %2034 = vmatpush1.bf16.msra.mxu0 %v17246_v26  ;;  %v17260_v26 = vld [vmem:[%s18512_s25 + $0x100] sm:$0xff]  }
 0x64b   :  { %2035 = vmatprep.subr.bf16.mxu0 %v18475_v1 }
 0x64e   :  { %2036 = vmatpush1.bf16.msra.mxu0 %v17248_v27  ;;  %v17261_v27 = vld [vmem:[%s18512_s25 + $0xf8] sm:$0xff]  }
 0x64f   :  { %2043 = vmatprep.subr.bf16.mxu0 %v18475_v1 }
 0x652   :  { %2044 = vmatpush2.bf16.msra.mxu0 %v2019_v29  ;;  %v17263_v29 = vld [vmem:[%s18512_s25 + $0xe8] sm:$0xff]  }
 0x653   :  { %2045 = vmatprep.subr.bf16.mxu0 %v18475_v1 }
 0x656   :  { %2046 = vmatpush2.bf16.msra.mxu0 %v17252_v30  ;;  %v17264_v30 = vld [vmem:[%s18512_s25 + $0xe0] sm:$0xff]  }
 0x657   :  { %2047 = vmatprep.subr.bf16.mxu0 %v18475_v1 }
 0x65a   :  { %2048 = vmatpush2.bf16.msra.mxu0 %v17254_v31  ;;  %v17265_v31 = vld [vmem:[%s18512_s25 + $0xd8] sm:$0xff]  }
 0x65b   :  { %2049 = vmatprep.subr.bf16.mxu0 %v18475_v1 }
 0x65e   :  { %2050 = vmatpush2.bf16.msra.mxu0 %v17256_v32  ;;  %v17266_v32 = vld [vmem:[%s18512_s25 + $0xd0] sm:$0xff]  }
 0x65f   :  { %2051 = vmatprep.subr.bf16.mxu0 %v18475_v1 }
 0x662   :  { %2052 = vmatpush2.bf16.msra.mxu0 %v17258_v33  ;;  %v17267_v33 = vld [vmem:[%s18512_s25 + $0xc8] sm:$0xff]  }
 0x663   :  { %2327 = vmatprep.subr.bf16.mxu0 %v18475_v1 }
 0x665   :  { %2054 = vmatmul.mubr.bf16.vlgmr.msra.gmra.mxu0 %v18728_v34 }
 0x666   :  { %15240 = vmatprep.mubr.msk.bf16.mxu0 %vm261_vm1, %v18700_v23  ;;  %2328 = vmatpush1.bf16.msra.mxu0 %v17260_v26  ;;  %v17285_v26 = vld [vmem:[%s18502_s17 + $0x15c] sm:$0xff]  }
 0x667   :  { %2329 = vmatprep.subr.bf16.mxu0 %v18475_v1 }
 0x66a   :  { %2330 = vmatpush1.bf16.msra.mxu0 %v17261_v27  ;;  %v17282_v27 = vld [vmem:[%s18522_s3 + $0x70] ss:$8 sps:$4 sm:$0xff]  }
 0x66b   :  { %2331 = vmatprep.subr.bf16.mxu0 %v18475_v1 }
 0x66e   :  { %2332 = vmatpush1.bf16.msra.mxu0 %v17262_v28  ;;  %v17286_v28 = vld [vmem:[%s18502_s17 + $0x154] sm:$0xff]  }
 0x66f   :  { %2333 = vmatprep.subr.bf16.mxu0 %v18475_v1 }
 0x672   :  { %2334 = vmatpush1.bf16.msra.mxu0 %v17263_v29  ;;  %v17288_v29 = vld [vmem:[%s18502_s17 + $0x14c] sm:$0xff]  }
 0x673   :  { %2335 = vmatprep.subr.bf16.mxu0 %v18475_v1 }
 0x676   :  { %2336 = vmatpush1.bf16.msra.mxu0 %v17264_v30  ;;  %v17290_v30 = vld [vmem:[%s18502_s17 + $0x144] sm:$0xff]  }
 0x677   :  { %2337 = vmatprep.subr.bf16.mxu0 %v18475_v1 }
 0x67a   :  { %2338 = vmatpush1.bf16.msra.mxu0 %v17265_v31  ;;  %v17292_v31 = vld [vmem:[%s18502_s17 + $0x13c] sm:$0xff]  }
 0x67b   :  { %2339 = vmatprep.subr.bf16.mxu0 %v18475_v1 }
 0x67e   :  { %2340 = vmatpush1.bf16.msra.mxu0 %v17266_v32  ;;  %v17294_v32 = vld [vmem:[%s18502_s17 + $0x134] sm:$0xff]  }
 0x67f   :  { %2341 = vmatprep.subr.bf16.mxu0 %v18475_v1 }
 0x682   :  { %2342 = vmatpush1.bf16.msra.mxu0 %v17267_v33  ;;  %v17296_v33 = vld [vmem:[%s18502_s17 + $0x12c] sm:$0xff]  }
 0x683   :  { %2349 = vmatprep.subr.bf16.mxu0 %v18475_v1 }
 0x6ed   :  { %v1648_v36 = vpop.f32.mrf.mxu0 }
 0x6ef   :  { %v16969_v38 = vpop.f32.mrf.mxu0 }
 0x6f0   :  { %v17269_v38 = vld [vmem:[%s18512_s25 + $0x120] sm:$0xff]  }
 0x6f1   :  { %v1721_v39 = vpop.f32.mrf.mxu0 }
 0x6f2   :  { %v1725_v40 = vpack.c.bf16 %v1721_v39, %v1648_v36  ;;  %v17268_v36 = vld [vmem:[%s18512_s25 + $0x128] ss:$0 sps:$4 sm:$0xff]   ;;  %v17270_v39 = vld [vmem:[%s18512_s25 + $0x118] sm:$0xff]  }
 0x6f3   :  { %v16974_v43 = vpop.f32.mrf.mxu0  ;;  %v2325_v37 = vsel %vm265_vm0, %v17268_v36, 0  ;;  %v17298_v36 = vld [vmem:[%s18502_s17 + $0x18c] ss:$0 sps:$4 sm:$0xff]  }
 0x6f4   :  { %15107 = vmatmul.mubr.msk.bf16.vlgmr.msra.gmra.mxu1 %vm612_vm3, %v1725_v40  ;;  %2350 = vmatpush2.bf16.msra.mxu0 %v2325_v37  ;;  %v17271_v40 = vld [vmem:[%s18512_s25 + $0x110] sm:$0xff]   ;;  %v3053_v37 = vsel %vm265_vm0, %v17298_v36, 0 }
 0x6f5   :  { %1875 = vmatpush1.bf16.msra.mxu1 %v1861_v41  ;;  %1898 = vmatprep.mubr.bf16.mxu1 %v18475_v1  ;;  %v17272_v41 = vld [vmem:[%s18512_s25 + $0x108] sm:$0xff]  }
 0x6f6   :  { %1876 = vmatprep.subr.bf16.mxu1 %v17227_v42  ;;  %2351 = vmatprep.subr.bf16.mxu0 %v18475_v1  ;;  %v17322_v36 = vld [vmem:[%s18512_s25 + $0x16c] sm:$0xff]  }
 0x6f8   :  { %2352 = vmatpush2.bf16.msra.mxu0 %v17269_v38  ;;  %v17300_v38 = vld [vmem:[%s18502_s17 + $0x184] sm:$0xff]  }
 0x6f9   :  { %1877 = vmatpush1.bf16.msra.mxu1 %v17225_v44  ;;  %2353 = vmatprep.subr.bf16.mxu0 %v18475_v1 }
 0x6fa   :  { %1878 = vmatprep.subr.bf16.mxu1 %v17230_v45 }
 0x6fc   :  { %2354 = vmatpush2.bf16.msra.mxu0 %v17270_v39  ;;  %v17302_v39 = vld [vmem:[%s18502_s17 + $0x17c] sm:$0xff]  }
 0x6fd   :  { %1879 = vmatpush1.bf16.msra.mxu1 %v17228_v46  ;;  %2355 = vmatprep.subr.bf16.mxu0 %v18475_v1 }
 0x6fe   :  { %1880 = vmatprep.subr.bf16.mxu1 %v17233_v47 }
 0x700   :  { %2356 = vmatpush2.bf16.msra.mxu0 %v17271_v40  ;;  %v17304_v40 = vld [vmem:[%s18502_s17 + $0x174] sm:$0xff]  }
 0x701   :  { %1881 = vmatpush1.bf16.msra.mxu1 %v17231_v48  ;;  %2357 = vmatprep.subr.bf16.mxu0 %v18475_v1 }
 0x702   :  { %2174 = vmatprep.subr.bf16.mxu1 %v18475_v1 }
 0x704   :  { %15117 = vmatmul.mubr.msk.bf16.vlgmr.msra.gmra.mxu1 %vm612_vm3, %v936_v25  ;;  %v17247_v25 = vld [vmem:[%s18502_s17 + $0xd0] sm:$0xff]   ;;  %2358 = vmatpush2.bf16.msra.mxu0 %v17272_v41 }
 0x705   :  { %2175 = vmatpush1.bf16.msra.mxu1 %v17235_v49  ;;  %15199 = vmatprep.mubr.msk.bf16.mxu1 %vm261_vm1, %v18700_v23  ;;  %v17306_v41 = vld [vmem:[%s18502_s17 + $0x16c] sm:$0xff]  }
 0x706   :  { %2176 = vmatprep.subr.bf16.mxu1 %v18475_v1  ;;  %3055 = vmatprep.subr.bf16.mxu0 %v18475_v1 }
 0x707   :  { %2360 = vmatmul.mubr.bf16.vlgmr.msra.gmra.mxu0 %v18728_v34 }
 0x708   :  { %15345 = vmatprep.mubr.msk.bf16.mxu0 %vm261_vm1, %v18700_v23 }
 0x709   :  { %2177 = vmatpush1.bf16.msra.mxu1 %v17237_v50 }
 0x70a   :  { %2178 = vmatprep.subr.bf16.mxu1 %v18475_v1 }
 0x70d   :  { %2179 = vmatpush1.bf16.msra.mxu1 %v17239_v51 }
 0x70e   :  { %2180 = vmatprep.subr.bf16.mxu1 %v18475_v1 }
 0x711   :  { %2181 = vmatpush1.bf16.msra.mxu1 %v17241_v52 }
 0x712   :  { %2182 = vmatprep.subr.bf16.mxu1 %v18475_v1 }
 0x715   :  { %2183 = vmatpush1.bf16.msra.mxu1 %v17243_v21 }
 0x716   :  { %2184 = vmatprep.subr.bf16.mxu1 %v18475_v1 }
 0x719   :  { %2185 = vmatpush1.bf16.msra.mxu1 %v17245_v24 }
 0x71a   :  { %2186 = vmatprep.subr.bf16.mxu1 %v18475_v1 }
 0x71d   :  { %2187 = vmatpush1.bf16.msra.mxu1 %v17247_v25 }
 0x71e   :  { %2188 = vmatprep.subr.bf16.mxu1 %v18475_v1 }
 0x721   :  { %2189 = vmatpush1.bf16.msra.mxu1 %v17249_v53 }
 0x722   :  { %2196 = vmatprep.subr.bf16.mxu1 %v18475_v1 }
 0x725   :  { %2197 = vmatpush2.bf16.msra.mxu1 %v2172_v55  ;;  %v2055_v60 = vpop.f32.mrf.mxu0 }
 0x726   :  { %2198 = vmatprep.subr.bf16.mxu1 %v18475_v1  ;;  %v2056_v16 = vadd.f32 %v15144_v13, %v2055_v60 }
 0x727   :  { %v2057_v61 = vpop.f32.mrf.mxu0 }
 0x729   :  { %2199 = vmatpush2.bf16.msra.mxu1 %v17253_v56  ;;  %v2058_v62 = vpop.f32.mrf.mxu0 }
 0x72a   :  { %2200 = vmatprep.subr.bf16.mxu1 %v18475_v1  ;;  %v2059_v22 = vadd.f32 %v15144_v13, %v2058_v62 }
 0x72b   :  { %v2060_v63 = vpop.f32.mrf.mxu0 }
 0x72d   :  { %2201 = vmatpush2.bf16.msra.mxu1 %v17255_v57  ;;  %v15226_v57 = vld [vmem:[%s18517_s29 + $0x2] ss:$0 sm:$0xff] }
 0x72e   :  { %2202 = vmatprep.subr.bf16.mxu1 %v18475_v1 }
 0x731   :  { %2203 = vmatpush2.bf16.msra.mxu1 %v17257_v58 }
 0x732   :  { %2204 = vmatprep.subr.bf16.mxu1 %v18475_v1 }
 0x735   :  { %2205 = vmatpush2.bf16.msra.mxu1 %v17259_v59 }
 0x736   :  { %16975 = vmatprep.subr.mxu1 %v18476_v35 }
 0x738   :  { %2207 = vmatmul.mubr.bf16.vlgmr.msra.gmra.mxu1 %v18728_v34 }
 0x739   :  { %16977 = vmatprep.mubr.msk.f32.mxu1 %vm18477_vm2, %v18476_v35 }
 0x7b4   :  { %v1813_v0 = vpop.f32.mrf.mxu1 }
 0x7b6   :  { %v1815_v2 = vpop.f32.mrf.mxu1 }
 0x7b8   :  { %v1817_v3 = vpop.f32.mrf.mxu1 }
 0x7ba   :  { %v19003_v4 = vpop.f32.mrf.mxu1 }
 0x7c4   :  { %v1900_v5 = vpop.f32.mrf.mxu1 }
 0x7c5   :  { %v19005_v6 = vadd.f32 %v1900_v5, %v1813_v0  ;;  %v17281_v0 = vld [vmem:[%s18502_s17 + $0x164] sm:$0xff]   ;;  %s21259_s17 = sld [smem:[#allocation7_spill]] }
 0x7c6   :  { %v1902_v7 = vpop.f32.mrf.mxu1  ;;  %3056 = vmatpush1.bf16.msra.mxu0 %v17281_v0  ;;  %v15253_v5 = vld [vmem:[%s18522_s3 + $0xa0] sm:$0x11] }
 0x7c7   :  { %v19007_v8 = vadd.f32 %v1902_v7, %v1815_v2  ;;  %v2361_v58 = vpop.f32.mrf.mxu0  ;;  %3057 = vmatprep.subr.bf16.mxu0 %v18475_v1  ;;  %v15260_v13 = vcombine.low %v15253_v5, %v15253_v5 }
 0x7c8   :  { %v1904_v9 = vpop.f32.mrf.mxu1  ;;  %v2362_v59 = vadd.f32 %v15226_v57, %v2361_v58  ;;  %v15331_v58 = vld [vmem:[%s18507_s21 + $0x3] ss:$0 sm:$0xff]  ;;  %s21260_s21 = sld [smem:[#allocation12_spill]] }
 0x7c9   :  { %v19009_v10 = vadd.f32 %v1904_v9, %v1817_v3  ;;  %v2363_v60 = vpop.f32.mrf.mxu0 }
 0x7ca   :  { %v19011_v11 = vpop.f32.mrf.mxu1  ;;  %3058 = vmatpush1.bf16.msra.mxu0 %v17285_v26  ;;  %v17315_v26 = vld [vmem:[%s18512_s25 + $0x13c] sm:$0xff]  }
 0x7cb   :  { %v2364_v61 = vpop.f32.mrf.mxu0  ;;  %3059 = vmatprep.subr.bf16.mxu0 %v18475_v1 }
 0x7cc   :  { %v2365_v62 = vadd.f32 %v15226_v57, %v2364_v61  ;;  %v17309_v57 = vld [vmem:[%s18492_s9 + $0x16c] sm:$0xff]  }
 0x7cd   :  { %v2366_v63 = vpop.f32.mrf.mxu0 }
 0x7ce   :  { %3060 = vmatpush1.bf16.msra.mxu0 %v17286_v28  ;;  %v17317_v28 = vld [vmem:[%s18512_s25 + $0x12c] sm:$0xff]  }
 0x7cf   :  { %3061 = vmatprep.subr.bf16.mxu0 %v18475_v1 }
 0x7d2   :  { %3062 = vmatpush1.bf16.msra.mxu0 %v17288_v29  ;;  %v17318_v29 = vld [vmem:[%s18512_s25 + $0x18c] ss:$0 sps:$4 sm:$0xff]  }
 0x7d3   :  { %3063 = vmatprep.subr.bf16.mxu0 %v18475_v1 }
 0x7d6   :  { %3064 = vmatpush1.bf16.msra.mxu0 %v17290_v30  ;;  %v3206_v30 = vsel %vm265_vm0, %v17318_v29, 0 }
 0x7d7   :  { %3065 = vmatprep.subr.bf16.mxu0 %v18475_v1 }
 0x7da   :  { %3066 = vmatpush1.bf16.msra.mxu0 %v17292_v31  ;;  %v17319_v31 = vld [vmem:[%s18512_s25 + $0x184] sm:$0xff]  }
 0x7db   :  { %3067 = vmatprep.subr.bf16.mxu0 %v18475_v1 }
 0x7de   :  { %3068 = vmatpush1.bf16.msra.mxu0 %v17294_v32  ;;  %v17320_v32 = vld [vmem:[%s18512_s25 + $0x17c] sm:$0xff]  }
 0x7df   :  { %3069 = vmatprep.subr.bf16.mxu0 %v18475_v1 }
 0x7e2   :  { %3070 = vmatpush1.bf16.msra.mxu0 %v17296_v33  ;;  %v17321_v33 = vld [vmem:[%s18512_s25 + $0x174] sm:$0xff]  }
 0x7e3   :  { %3077 = vmatprep.subr.bf16.mxu0 %v18475_v1 }
 0x7e6   :  { %3078 = vmatpush2.bf16.msra.mxu0 %v3053_v37 }
 0x7e7   :  { %3079 = vmatprep.subr.bf16.mxu0 %v18475_v1 }
 0x7ea   :  { %3080 = vmatpush2.bf16.msra.mxu0 %v17300_v38 }
 0x7eb   :  { %3081 = vmatprep.subr.bf16.mxu0 %v18475_v1 }
 0x7ee   :  { %3082 = vmatpush2.bf16.msra.mxu0 %v17302_v39 }
 0x7ef   :  { %3083 = vmatprep.subr.bf16.mxu0 %v18475_v1 }
 0x7f2   :  { %3084 = vmatpush2.bf16.msra.mxu0 %v17304_v40 }
 0x7f3   :  { %3085 = vmatprep.subr.bf16.mxu0 %v18475_v1 }
 0x7f6   :  { %3086 = vmatpush2.bf16.msra.mxu0 %v17306_v41 }
 0x7f7   :  { %16995 = vmatprep.subr.mxu0 %v18476_v35 }
 0x7f8   :  { %v2208_v14 = vpop.f32.mrf.mxu1 }
 0x7f9   :  { %v2209_v15 = vadd.f32 %v15185_v12, %v2208_v14  ;;  %3088 = vmatmul.mubr.bf16.vlgmr.msra.gmra.mxu0 %v18728_v34 }
 0x7fa   :  { %v2210_v17 = vpop.f32.mrf.mxu1  ;;  %16997 = vmatprep.mubr.msk.f32.mxu0 %vm18477_vm2, %v18476_v35 }
 0x7fb   :  { %16976 = vmatpush3.xpose.msk.msra.mxu1 %vm612_vm3, %v2209_v15  ;;  %v17277_v17 = vld [vmem:[%s18522_s3 + $0x94] ss:$8 sps:$4 sm:$0xff]  }
 0x7fc   :  { %v2211_v18 = vpop.f32.mrf.mxu1  ;;  %16980 = vmatprep.subr.mxu1 %v18476_v35 }
 0x7fd   :  { %v2212_v19 = vadd.f32 %v15185_v12, %v2211_v18  ;;  %v15261_v12 = vcombine.high %v15253_v5, %v15253_v5  ;;  %v17275_v18 = vld [vmem:[%s18522_s3 + $0x90] ss:$8 sps:$4 sm:$0xff]  }
 0x7fe   :  { %v2213_v20 = vpop.f32.mrf.mxu1  ;;  %16978 = vmatmul.mubr.msk.f32.vlgmr.msra.gmra.mxu1 %vm612_vm3, %v2056_v16  ;;  %v2738_v16 = vsel %vm1772_vm5, %v15260_v13, 0  ;;  %v15290_v13 = vld [vmem:[%s18497_s13 + $0x3] ss:$0 sm:$0xff]  ;;  %s21258_s13 = sld [smem:[#allocation6_spill]] }
 0x7ff   :  { %16981 = vmatpush3.xpose.msk.msra.mxu1 %vm612_vm3, %v2212_v19  ;;  %16982 = vmatprep.mubr.msk.f32.mxu1 %vm18477_vm2, %v18476_v35  ;;  %v17280_v19 = vld [vmem:[%s18522_s3 + $0x84] ss:$8 sps:$4 sm:$0xff]   ;;  %v17278_v20 = vld [vmem:[%s18522_s3 + $0x80] ss:$8 sps:$4 sm:$0xff]  }
 0x800   :  { %16985 = vmatprep.subr.mxu1 %v18476_v35 }
 0x802   :  { %16983 = vmatmul.mubr.msk.f32.vlgmr.msra.gmra.mxu1 %vm612_vm3, %v2059_v22  ;;  %v17284_v22 = vld [vmem:[%s18522_s3 + $0x74] ss:$8 sps:$4 sm:$0xff]  }
 0x803   :  { %16987 = vmatprep.mubr.msk.f32.mxu1 %vm18477_vm2, %v18476_v35  ;;  %16986 = vmatpush3.msra.mxu1 %v2362_v59 }
 0x804   :  { %16990 = vmatprep.subr.mxu1 %v18476_v35 }
 0x8b9   :  { %v3089_v59 = vpop.f32.mrf.mxu0 }
 0x8ba   :  { %v3090_v60 = vadd.f32 %v15331_v58, %v3089_v59 }
 0x8bb   :  { %v3091_v61 = vpop.f32.mrf.mxu0 }
 0x8bc   :  { %16996 = vmatpush3.xpose.msk.msra.mxu0 %vm612_vm3, %v3090_v60  ;;  %v15399_v60 = vld [vmem:[%s18522_s3 + $0xd8] sm:$0x11] }
 0x8bd   :  { %17000 = vmatprep.subr.mxu0 %v18476_v35 }
 0x8be   :  { %v2440_v42 = vpop.f32.mrf.mxu1 }
 0x8bf   :  { %v2520_v43 = vmul.f32 0.14142136, %v2440_v42 }
 0x8c0   :  { %v16979_v44 = vpop.f32.mrf.mxu1 }
 0x8c1   :  { %v2522_v45 = vsel %vm767_vm4, %v2520_v43, -inf }
 0x8c2   :  { %2523 = vmax.xlane.f32.xlu0 %v2522_v45  ;;  %v2516_v46 = vpop.f32.mrf.mxu1  ;;  %v17287_v45 = vld [vmem:[%s18492_s9 + $0x164] sm:$0xff]  }
 0x8c3   :  { %v2521_v47 = vmul.f32 0.14142136, %v2516_v46 }
 0x8c4   :  { %v16984_v48 = vpop.f32.mrf.mxu1 }
 0x8c5   :  { %v2525_v49 = vsel %vm767_vm4, %v2521_v47, -inf  ;;  %v17289_v48 = vld [vmem:[%s18492_s9 + $0x15c] sm:$0xff]  }
 0x8c6   :  { %2526 = vmax.xlane.f32.xlu1 %v2525_v49  ;;  %v17291_v49 = vld [vmem:[%s18492_s9 + $0x154] sm:$0xff]  }
 0x94b   :  { %v2524_v50 = vpop.xlane.xlu0 %2523 }
 0x94c   :  { %v2528_v51 = vsub.f32 %v2520_v43, %v2524_v50  ;;  %v17293_v50 = vld [vmem:[%s18492_s9 + $0x14c] sm:$0xff]  }
 0x94e   :  { %v2530_v52 = vmul.f32 1.442695, %v2528_v51  ;;  %v17295_v51 = vld [vmem:[%s18492_s9 + $0x144] sm:$0xff]  }
 0x94f   :  { %v2527_v21 = vpop.xlane.xlu1 %2526 }
 0x950   :  { %18350 = vpow2.f32 %v2530_v52  ;;  %v2529_v24 = vsub.f32 %v2521_v47, %v2527_v21  ;;  %v17297_v52 = vld [vmem:[%s18492_s9 + $0x13c] sm:$0xff]   ;;  %v17299_v21 = vld [vmem:[%s18492_s9 + $0x134] sm:$0xff]  }
 0x952   :  { %v2532_v25 = vmul.f32 1.442695, %v2529_v24  ;;  %v17301_v24 = vld [vmem:[%s18492_s9 + $0x12c] sm:$0xff]  }
 0x954   :  { %18352 = vpow2.f32 %v2532_v25  ;;  %v17303_v25 = vld [vmem:[%s18492_s9 + $0x18c] ss:$0 sps:$4 sm:$0xff]  }
 0x95d   :  { %v18351_v53 = vpop.eup %18350 }
 0x95e   :  { %v2534_v54 = vsel %vm767_vm4, %v18351_v53, 0.0 }
 0x95f   :  { %2535 = vadd.xlane.f32.xlu0 %v2534_v54  ;;  %v17305_v54 = vld [vmem:[%s18492_s9 + $0x184] sm:$0xff]  }
 0x961   :  { %v18353_v55 = vpop.eup %18352 }
 0x962   :  { %v2537_v56 = vsel %vm767_vm4, %v18353_v55, 0.0 }
 0x963   :  { %2538 = vadd.xlane.f32.xlu1 %v2537_v56  ;;  %v17308_v56 = vld [vmem:[%s18492_s9 + $0x174] sm:$0xff]  }
 0x9e8   :  { %v2536_v2 = vpop.xlane.xlu0 %2535 }
 0x9e9   :  { %18354 = vrcp.f32 %v2536_v2 }
 0x9ec   :  { %v2539_v3 = vpop.xlane.xlu1 %2538 }
 0x9ed   :  { %18356 = vrcp.f32 %v2539_v3 }
 0x9f6   :  { %v18355_v7 = vpop.eup %18354 }
 0x9f7   :  { %v2542_v9 = vmul.f32 %v18355_v7, %v18351_v53  ;;  %v2900_v53 = vsel %vm265_vm0, %v17303_v25, 0 }
 0x9f9   :  { %16988 = vmatmul.mubr.msk.f32.vlgmr.msra.gmra.mxu1 %vm767_vm4, %v2542_v9 }
 0x9fa   :  { %v18357_v14 = vpop.eup %18356  ;;  %16991 = vmatpush3.msra.mxu1 %v2365_v62  ;;  %16992 = vmatprep.mubr.msk.f32.mxu1 %vm18477_vm2, %v18476_v35  ;;  %v3092_v62 = vpop.f32.mrf.mxu0 }
 0x9fb   :  { %v2543_v15 = vmul.f32 %v18357_v14, %v18353_v55  ;;  %15262 = vmatprep.subr.msk.bf16.mxu1 %vm1772_vm5, %v15261_v12  ;;  %v17307_v55 = vld [vmem:[%s18492_s9 + $0x17c] sm:$0xff]   ;;  %v3093_v63 = vadd.f32 %v15331_v58, %v3092_v62  ;;  %s21257_s9 = sld [smem:[#allocation10_spill]] }
 0x9fc   :  { %v3094_v0 = vpop.f32.mrf.mxu0 }
 0x9fd   :  { %16993 = vmatmul.mubr.msk.f32.vlgmr.msra.gmra.mxu1 %vm767_vm4, %v2543_v15  ;;  %v15406_v0 = vcombine.low %v15399_v60, %v15399_v60 }
 0x9fe   :  { %2752 = vmatpush1.bf16.msra.mxu1 %v2738_v16  ;;  %2775 = vmatprep.mubr.bf16.mxu1 %v18475_v1 }
 0x9ff   :  { %2753 = vmatprep.subr.bf16.mxu1 %v17277_v17  ;;  %v17310_v17 = vld [vmem:[%s18512_s25 + $0x164] sm:$0xff]  }
 0xa02   :  { %2754 = vmatpush1.bf16.msra.mxu1 %v17275_v18  ;;  %v17311_v18 = vld [vmem:[%s18512_s25 + $0x15c] sm:$0xff]  }
 0xa03   :  { %2755 = vmatprep.subr.bf16.mxu1 %v17280_v19  ;;  %v17312_v19 = vld [vmem:[%s18512_s25 + $0x154] sm:$0xff]  }
 0xa06   :  { %2756 = vmatpush1.bf16.msra.mxu1 %v17278_v20  ;;  %v17313_v20 = vld [vmem:[%s18512_s25 + $0x14c] sm:$0xff]  }
 0xa07   :  { %2757 = vmatprep.subr.bf16.mxu1 %v17284_v22  ;;  %v17314_v22 = vld [vmem:[%s18512_s25 + $0x144] sm:$0xff]  }
 0xa0a   :  { %2758 = vmatpush1.bf16.msra.mxu1 %v17282_v27  ;;  %v17316_v27 = vld [vmem:[%s18512_s25 + $0x134] sm:$0xff]   ;;  %s21261_s25 = sld [smem:[#allocation11_spill]] }
 0xa0b   :  { %2902 = vmatprep.subr.bf16.mxu1 %v18475_v1 }
 0xab9   :  { %v2613_v42 = vpop.f32.mrf.mxu1 }
 0xabb   :  { %v16989_v43 = vpop.f32.mrf.mxu1 }
 0xabd   :  { %v2686_v44 = vpop.f32.mrf.mxu1 }
 0xabe   :  { %v2690_v46 = vpack.c.bf16 %v2686_v44, %v2613_v42 }
 0xabf   :  { %v16994_v47 = vpop.f32.mrf.mxu1 }
 0xac0   :  { %15263 = vmatmul.mubr.msk.bf16.vlgmr.msra.gmra.mxu1 %vm612_vm3, %v2690_v46 }
 0xac1   :  { %2903 = vmatpush1.bf16.msra.mxu1 %v17287_v45  ;;  %15304 = vmatprep.mubr.msk.bf16.mxu1 %vm261_vm1, %v18700_v23 }
 0xac2   :  { %2904 = vmatprep.subr.bf16.mxu1 %v18475_v1 }
 0xac5   :  { %2905 = vmatpush1.bf16.msra.mxu1 %v17289_v48 }
 0xac6   :  { %2906 = vmatprep.subr.bf16.mxu1 %v18475_v1 }
 0xac9   :  { %2907 = vmatpush1.bf16.msra.mxu1 %v17291_v49 }
 0xaca   :  { %2908 = vmatprep.subr.bf16.mxu1 %v18475_v1 }
 0xacd   :  { %2909 = vmatpush1.bf16.msra.mxu1 %v17293_v50 }
 0xace   :  { %2910 = vmatprep.subr.bf16.mxu1 %v18475_v1 }
 0xad1   :  { %2911 = vmatpush1.bf16.msra.mxu1 %v17295_v51 }
 0xad2   :  { %2912 = vmatprep.subr.bf16.mxu1 %v18475_v1 }
 0xad5   :  { %2913 = vmatpush1.bf16.msra.mxu1 %v17297_v52 }
 0xad6   :  { %2914 = vmatprep.subr.bf16.mxu1 %v18475_v1 }
 0xad9   :  { %2915 = vmatpush1.bf16.msra.mxu1 %v17299_v21 }
 0xada   :  { %2916 = vmatprep.subr.bf16.mxu1 %v18475_v1 }
 0xadd   :  { %2917 = vmatpush1.bf16.msra.mxu1 %v17301_v24  ;;  %v15372_v24 = vld [vmem:[%s18517_s29 + $0x3] ss:$0 sm:$0xff]  ;;  %s21262_s29 = sld [smem:[#allocation9_spill]] }
 0xade   :  { %2924 = vmatprep.subr.bf16.mxu1 %v18475_v1 }
 0xae1   :  { %2925 = vmatpush2.bf16.msra.mxu1 %v2900_v53 }
 0xae2   :  { %2926 = vmatprep.subr.bf16.mxu1 %v18475_v1 }
 0xae5   :  { %2927 = vmatpush2.bf16.msra.mxu1 %v17305_v54 }
 0xae6   :  { %2928 = vmatprep.subr.bf16.mxu1 %v18475_v1 }
 0xae9   :  { %2929 = vmatpush2.bf16.msra.mxu1 %v17307_v55 }
 0xaea   :  { %2930 = vmatprep.subr.bf16.mxu1 %v18475_v1 }
 0xaed   :  { %2931 = vmatpush2.bf16.msra.mxu1 %v17308_v56 }
 0xaee   :  { %2932 = vmatprep.subr.bf16.mxu1 %v18475_v1 }
 0xaf1   :  { %2933 = vmatpush2.bf16.msra.mxu1 %v17309_v57 }
 0xaf2   :  { %3208 = vmatprep.subr.bf16.mxu1 %v18475_v1 }
 0xaf4   :  { %2935 = vmatmul.mubr.bf16.vlgmr.msra.gmra.mxu1 %v18728_v34 }
 0xaf5   :  { %15386 = vmatprep.mubr.msk.bf16.mxu1 %vm261_vm1, %v18700_v23  ;;  %3209 = vmatpush1.bf16.msra.mxu1 %v17310_v17 }
 0xaf6   :  { %3210 = vmatprep.subr.bf16.mxu1 %v18475_v1 }
 0xaf9   :  { %3211 = vmatpush1.bf16.msra.mxu1 %v17311_v18 }
 0xafa   :  { %3212 = vmatprep.subr.bf16.mxu1 %v18475_v1 }
 0xafd   :  { %3213 = vmatpush1.bf16.msra.mxu1 %v17312_v19 }
 0xafe   :  { %3214 = vmatprep.subr.bf16.mxu1 %v18475_v1 }
 0xb01   :  { %3215 = vmatpush1.bf16.msra.mxu1 %v17313_v20 }
 0xb02   :  { %3216 = vmatprep.subr.bf16.mxu1 %v18475_v1 }
 0xb05   :  { %3217 = vmatpush1.bf16.msra.mxu1 %v17314_v22  ;;  %v3673_v22 = vlaneseq }
 0xb06   :  { %3218 = vmatprep.subr.bf16.mxu1 %v18475_v1 }
 0xb09   :  { %3219 = vmatpush1.bf16.msra.mxu1 %v17315_v26  ;;  %v19210_v26 = vshrl.u32 %v3673_v22, 7 }
 0xb0a   :  { %3220 = vmatprep.subr.bf16.mxu1 %v18475_v1 }
 0xb0b   :  { %v19217_v29 = vsub.s32 1, %v19210_v26 }
 0xb0d   :  { %3221 = vmatpush1.bf16.msra.mxu1 %v17316_v27  ;;  %v19213_v27 = vsub.s32 0, %v19210_v26 }
 0xb0e   :  { %3222 = vmatprep.subr.bf16.mxu1 %v18475_v1 }
 0xb11   :  { %3223 = vmatpush1.bf16.msra.mxu1 %v17317_v28  ;;  %v3671_v28 = vld [vmem:[%s18527_s8] sm:$0x3]  ;;  %s21264_s8 = sld [smem:[#allocation14_spill]] }
 0xb12   :  { %3230 = vmatprep.subr.bf16.mxu1 %v18475_v1 }
 0xb15   :  { %3231 = vmatpush2.bf16.msra.mxu1 %v3206_v30 }
 0xb16   :  { %3232 = vmatprep.subr.bf16.mxu1 %v18475_v1 }
 0xb19   :  { %3233 = vmatpush2.bf16.msra.mxu1 %v17319_v31  ;;  %v3676_v31 = vrot.slane %v3671_v28, %v19213_v27 }
 0xb1a   :  { %3234 = vmatprep.subr.bf16.mxu1 %v18475_v1 }
 0xb1d   :  { %3235 = vmatpush2.bf16.msra.mxu1 %v17320_v32 }
 0xb1e   :  { %3236 = vmatprep.subr.bf16.mxu1 %v18475_v1 }
 0xb21   :  { %3237 = vmatpush2.bf16.msra.mxu1 %v17321_v33  ;;  %v3680_v33 = vrot.slane %v3671_v28, %v19217_v29  ;;  %v3810_v28 = vld [vmem:[%s18542_s24 + $0x180] sm:$0xff] }
 0xb22   :  { %3238 = vmatprep.subr.bf16.mxu1 %v18475_v1 }
 0xb25   :  { %3239 = vmatpush2.bf16.msra.mxu1 %v17322_v36 }
 0xb28   :  { %3241 = vmatmul.mubr.bf16.vlgmr.msra.gmra.mxu1 %v18728_v34 }
 0xb80   :  { %v2777_v2 = vpop.f32.mrf.mxu1 }
 0xb81   :  { %v19143_v3 = vadd.f32 %v2777_v2, %v19005_v6 }
 0xb82   :  { %v2779_v5 = vpop.f32.mrf.mxu1 }
 0xb83   :  { %v19146_v7 = vadd.f32 %v2779_v5, %v19007_v8 }
 0xb84   :  { %v2781_v23 = vpop.f32.mrf.mxu1 }
 0xb85   :  { %v19149_v9 = vadd.f32 %v2781_v23, %v19009_v10  ;;  %v3619_v23 = vsel %vm1772_vm5, %v15406_v0, 0 }
 0xb86   :  { %v19151_v12 = vpop.f32.mrf.mxu1 }
 0xbb4   :  { %v2936_v14 = vpop.f32.mrf.mxu1 }
 0xbb5   :  { %v2937_v15 = vadd.f32 %v15290_v13, %v2936_v14  ;;  %v17325_v14 = vld [vmem:[%s18522_s3 + $0xc8] ss:$8 sps:$4 sm:$0xff]  }
 0xbb6   :  { %v2938_v16 = vpop.f32.mrf.mxu1 }
 0xbb7   :  { %16998 = vmatmul.mubr.msk.f32.vlgmr.msra.gmra.mxu0 %vm612_vm3, %v2937_v15  ;;  %v17330_v15 = vld [vmem:[%s18522_s3 + $0xbc] ss:$8 sps:$4 sm:$0xff]   ;;  %v17328_v16 = vld [vmem:[%s18522_s3 + $0xb8] ss:$8 sps:$4 sm:$0xff]  }
 0xbb8   :  { %17001 = vmatpush3.xpose.msk.msra.mxu0 %vm612_vm3, %v3093_v63  ;;  %v2939_v6 = vpop.f32.mrf.mxu1  ;;  %17002 = vmatprep.mubr.msk.f32.mxu0 %vm18477_vm2, %v18476_v35  ;;  %v15407_v63 = vcombine.high %v15399_v60, %v15399_v60 }
 0xbb9   :  { %v2940_v8 = vadd.f32 %v15290_v13, %v2939_v6  ;;  %17005 = vmatprep.subr.mxu0 %v18476_v35  ;;  %v17327_v13 = vld [vmem:[%s18522_s3 + $0xcc] ss:$8 sps:$4 sm:$0xff]   ;;  %v17331_v6 = vld [vmem:[%s18522_s3 + $0xa8] ss:$8 sps:$4 sm:$0xff]  }
 0xbba   :  { %v2941_v10 = vpop.f32.mrf.mxu1 }
 0xbbb   :  { %17003 = vmatmul.mubr.msk.f32.vlgmr.msra.gmra.mxu0 %vm612_vm3, %v2940_v8  ;;  %v17333_v8 = vld [vmem:[%s18522_s3 + $0xac] ss:$8 sps:$4 sm:$0xff]   ;;  %s21263_s3 = sld [smem:[#allocation13_spill]] }
 0xbbc   :  { %17007 = vmatprep.mubr.msk.f32.mxu0 %vm18477_vm2, %v18476_v35 }
 0xbe8   :  { %v3242_v25 = vpop.f32.mrf.mxu1 }
 0xbe9   :  { %v3243_v53 = vadd.f32 %v15372_v24, %v3242_v25  ;;  %v3875_v25 = vld [vmem:[%s18542_s24 + $0x388] sm:$0xff] }
 0xbea   :  { %v3244_v54 = vpop.f32.mrf.mxu1 }
 0xbeb   :  { %17006 = vmatpush3.msra.mxu0 %v3243_v53 }
 0xbec   :  { %v3245_v55 = vpop.f32.mrf.mxu1  ;;  %17010 = vmatprep.subr.mxu0 %v18476_v35 }
 0xbed   :  { %v3246_v56 = vadd.f32 %v15372_v24, %v3245_v55  ;;  %v3882_v24 = vld [vmem:[%s18542_s24 + $0x3c0] sm:$0xff]  ;;  %v3883_v55 = vld [vmem:[%s18542_s24 + $0x3c8] sm:$0xff] }
 0xbee   :  { %v3247_v57 = vpop.f32.mrf.mxu1 }
 0xbef   :  { %v3866_v57 = vld [vmem:[%s18542_s24 + $0x340] sm:$0xff] }
 0xc77   :  { %v3321_v37 = vpop.f32.mrf.mxu0 }
 0xc78   :  { %v3401_v38 = vmul.f32 0.14142136, %v3321_v37  ;;  %v1907_v37 = vadd.f32 %v19011_v11, %v19003_v4  ;;  %v18415_v4 = vld [vmem:[%s18487_s5] sm:$0xff] }
 0xc79   :  { %v16999_v39 = vpop.f32.mrf.mxu0 }
 0xc7a   :  { %v3403_v40 = vsel %vm767_vm4, %v3401_v38, -inf }
 0xc7b   :  { %3404 = vmax.xlane.f32.xlu0 %v3403_v40  ;;  %v3397_v41 = vpop.f32.mrf.mxu0 }
 0xc7c   :  { %v3402_v42 = vmul.f32 0.14142136, %v3397_v41  ;;  %v2789_v41 = vadd.f32 %v19151_v12, %v1907_v37 }
 0xc7d   :  { %v17004_v43 = vpop.f32.mrf.mxu0 }
 0xc7e   :  { %v3406_v44 = vsel %vm767_vm4, %v3402_v42, -inf }
 0xc7f   :  { %3407 = vmax.xlane.f32.xlu1 %v3406_v44 }
 0xd04   :  { %v3405_v45 = vpop.xlane.xlu0 %3404 }
 0xd05   :  { %v3409_v46 = vsub.f32 %v3401_v38, %v3405_v45 }
 0xd07   :  { %v3411_v47 = vmul.f32 1.442695, %v3409_v46 }
 0xd08   :  { %v3408_v48 = vpop.xlane.xlu1 %3407 }
 0xd09   :  { %18358 = vpow2.f32 %v3411_v47  ;;  %v3410_v49 = vsub.f32 %v3402_v42, %v3408_v48  ;;  %v18416_v48 = vld [vmem:[%s18487_s5 + $0x18] sm:$0xff] }
 0xd0b   :  { %v3413_v34 = vmul.f32 1.442695, %v3410_v49 }
 0xd0d   :  { %18360 = vpow2.f32 %v3413_v34  ;;  %v18417_v34 = vld [vmem:[%s18487_s5 + $0x10] sm:$0xff] }
 0xd16   :  { %v18359_v50 = vpop.eup %18358 }
 0xd17   :  { %v3415_v51 = vsel %vm767_vm4, %v18359_v50, 0.0 }
 0xd18   :  { %3416 = vadd.xlane.f32.xlu0 %v3415_v51 }
 0xd1a   :  { %v18361_v52 = vpop.eup %18360 }
 0xd1b   :  { %v3418_v21 = vsel %vm767_vm4, %v18361_v52, 0.0 }
 0xd1c   :  { %3419 = vadd.xlane.f32.xlu1 %v3418_v21  ;;  %v3874_v21 = vld [vmem:[%s18542_s24 + $0x380] sm:$0xff] }
 0xd1d   :  { %v15522_v53 = vcombine.low %v3874_v21, %v3882_v24  ;;  %v15523_v54 = vcombine.high %v3874_v21, %v3882_v24 }
 0xda1   :  { %v3417_v58 = vpop.xlane.xlu0 %3416 }
 0xda2   :  { %18362 = vrcp.f32 %v3417_v58  ;;  %v15524_v58 = vcombine.low %v3875_v25, %v3883_v55 }
 0xda5   :  { %v3420_v59 = vpop.xlane.xlu1 %3419 }
 0xda6   :  { %18364 = vrcp.f32 %v3420_v59  ;;  %v15525_v59 = vcombine.high %v3875_v25, %v3883_v55 }
 0xda8   :  { %5140 = vmatprep.subr.bf16.mxu1 %v15525_v59  ;;  %v3787_v59 = vld [vmem:[%s18542_s24 + $0xc8] sm:$0xff] }
 0xda9   :  { %5141 = vmatpush1.bf16.msra.mxu1 %v15524_v58 }
 0xdaf   :  { %v18363_v61 = vpop.eup %18362 }
 0xdb0   :  { %v3423_v62 = vmul.f32 %v18363_v61, %v18359_v50  ;;  %v3859_v61 = vld [vmem:[%s18542_s24 + $0x308] sm:$0xff] }
 0xdb2   :  { %17008 = vmatmul.mubr.msk.f32.vlgmr.msra.gmra.mxu0 %vm767_vm4, %v3423_v62  ;;  %v3867_v62 = vld [vmem:[%s18542_s24 + $0x348] sm:$0xff] }
 0xdb3   :  { %v18365_v2 = vpop.eup %18364  ;;  %17011 = vmatpush3.msra.mxu0 %v3246_v56  ;;  %17012 = vmatprep.mubr.msk.f32.mxu0 %vm18477_vm2, %v18476_v35  ;;  %v3858_v56 = vld [vmem:[%s18542_s24 + $0x300] sm:$0xff]  ;;  %v15509_v0 = vcombine.high %v3859_v61, %v3867_v62 }
 0xdb4   :  { %v3424_v5 = vmul.f32 %v18365_v2, %v18361_v52  ;;  %15408 = vmatprep.subr.msk.bf16.mxu0 %vm1772_vm5, %v15407_v63  ;;  %v15507_v60 = vcombine.high %v3858_v56, %v3866_v57  ;;  %v3842_v63 = vld [vmem:[%s18542_s24 + $0x280] sm:$0xff] }
 0xdb5   :  { %v3850_v2 = vld [vmem:[%s18542_s24 + $0x2c0] sm:$0xff]  ;;  %5142 = vmatprep.subr.bf16.mxu1 %v15509_v0 }
 0xdb6   :  { %17013 = vmatmul.mubr.msk.f32.vlgmr.msra.gmra.mxu0 %vm767_vm4, %v3424_v5  ;;  %v3843_v5 = vld [vmem:[%s18542_s24 + $0x288] sm:$0xff]  ;;  %v3770_v0 = vld [vmem:[%s18542_s24 + $0x40] sm:$0xff] }
 0xdb7   :  { %3633 = vmatpush1.bf16.msra.mxu0 %v3619_v23  ;;  %3656 = vmatprep.mubr.bf16.mxu0 %v18475_v1  ;;  %v3851_v23 = vld [vmem:[%s18542_s24 + $0x2c8] sm:$0xff] }
 0xdb8   :  { %3634 = vmatprep.subr.bf16.mxu0 %v17327_v13  ;;  %v15506_v13 = vcombine.low %v3858_v56, %v3866_v57  ;;  %v3778_v56 = vld [vmem:[%s18542_s24 + $0x80] sm:$0xff]  ;;  %v3779_v57 = vld [vmem:[%s18542_s24 + $0x88] sm:$0xff] }
 0xdbb   :  { %3635 = vmatpush1.bf16.msra.mxu0 %v17325_v14  ;;  %v15508_v14 = vcombine.low %v3859_v61, %v3867_v62  ;;  %v15428_v61 = vcombine.low %v3779_v57, %v3787_v59  ;;  %v15429_v62 = vcombine.high %v3779_v57, %v3787_v59  ;;  %v3884_v57 = vld [vmem:[%s18542_s24 + $0x3d0] sm:$0xff] }
 0xdbc   :  { %3636 = vmatprep.subr.bf16.mxu0 %v17330_v15  ;;  %v15491_v15 = vcombine.high %v3842_v63, %v3850_v2 }
 0xdbd   :  { %5143 = vmatpush1.bf16.msra.mxu1 %v15508_v14 }
 0xdbf   :  { %3637 = vmatpush1.bf16.msra.mxu0 %v17328_v16  ;;  %v15493_v16 = vcombine.high %v3843_v5, %v3851_v23 }
 0xdc0   :  { %3638 = vmatprep.subr.bf16.mxu0 %v17333_v8  ;;  %v3834_v8 = vld [vmem:[%s18542_s24 + $0x240] sm:$0xff] }
 0xdc1   :  { %5144 = vmatprep.subr.bf16.mxu1 %v15493_v16  ;;  %v3954_v16 = vld [vmem:[%s18542_s24 + $0x600] sm:$0xff] }
 0xdc3   :  { %3639 = vmatpush1.bf16.msra.mxu0 %v17331_v6  ;;  %v3826_v6 = vld [vmem:[%s18542_s24 + $0x200] sm:$0xff] }
 0xdc4   :  { %5097 = vmatprep.subr.bf16.mxu0 %v15523_v54 }
 0xe72   :  { %v3494_v10 = vpop.f32.mrf.mxu0 }
 0xe74   :  { %v17009_v17 = vpop.f32.mrf.mxu0 }
 0xe75   :  { %v3835_v17 = vld [vmem:[%s18542_s24 + $0x248] sm:$0xff] }
 0xe76   :  { %v3567_v18 = vpop.f32.mrf.mxu0 }
 0xe77   :  { %v3571_v19 = vpack.c.bf16 %v3567_v18, %v3494_v10  ;;  %v3827_v10 = vld [vmem:[%s18542_s24 + $0x208] sm:$0xff]  ;;  %v15490_v18 = vcombine.low %v3842_v63, %v3850_v2  ;;  %v3762_v63 = vld [vmem:[%s18542_s24] sm:$0xff] }
 0xe78   :  { %v17014_v20 = vpop.f32.mrf.mxu0  ;;  %v15477_v22 = vcombine.high %v3827_v10, %v3835_v17  ;;  %v3763_v2 = vld [vmem:[%s18542_s24 + $0x8] sm:$0xff] }
 0xe79   :  { %15409 = vmatmul.mubr.msk.bf16.vlgmr.msra.gmra.mxu0 %vm612_vm3, %v3571_v19  ;;  %v15492_v19 = vcombine.low %v3843_v5, %v3851_v23  ;;  %v15475_v20 = vcombine.high %v3826_v6, %v3834_v8  ;;  %v15411_v5 = vcombine.high %v3762_v63, %v3770_v0  ;;  %v3771_v23 = vld [vmem:[%s18542_s24 + $0x48] sm:$0xff] }
 0xe7a   :  { %5098 = vmatpush1.bf16.msra.mxu0 %v15522_v53  ;;  %v15412_v14 = vcombine.low %v3763_v2, %v3771_v23 }
 0xe7b   :  { %5099 = vmatprep.subr.bf16.mxu0 %v15507_v60  ;;  %5145 = vmatpush1.bf16.msra.mxu1 %v15492_v19 }
 0xe7c   :  { %5146 = vmatprep.subr.bf16.mxu1 %v15477_v22  ;;  %v3938_v22 = vld [vmem:[%s18542_s24 + $0x580] sm:$0xff] }
 0xe7e   :  { %5100 = vmatpush1.bf16.msra.mxu0 %v15506_v13  ;;  %v15410_v13 = vcombine.low %v3762_v63, %v3770_v0 }
 0xe7f   :  { %5101 = vmatprep.subr.bf16.mxu0 %v15491_v15  ;;  %v15413_v15 = vcombine.high %v3763_v2, %v3771_v23 }
 0xe82   :  { %5102 = vmatpush1.bf16.msra.mxu0 %v15490_v18 }
 0xe83   :  { %5103 = vmatprep.subr.bf16.mxu0 %v15475_v20 }
 0xf39   :  { %v3658_v30 = vpop.f32.mrf.mxu0 }
 0xf3a   :  { %v3667_v32 = vadd.f32 %v3658_v30, %v19143_v3  ;;  %v18414_v3 = vld [vmem:[%s18487_s5 + $0x8] sm:$0xff]  ;;  %v3818_v30 = vld [vmem:[%s18542_s24 + $0x1c0] sm:$0xff]  ;;  %s21256_s5 = sld [smem:[#allocation8_spill]] }
 0xf3b   :  { %v3660_v36 = vpop.f32.mrf.mxu0  ;;  %v15459_v37 = vcombine.high %v3810_v28, %v3818_v30 }
 0xf3c   :  { %v3668_v38 = vadd.f32 %v3660_v36, %v19146_v7  ;;  %v3683_v39 = vadd.f32 %v3676_v31, %v3667_v32  ;;  %v3819_v32 = vld [vmem:[%s18542_s24 + $0x1c8] sm:$0xff]  ;;  %v15476_v36 = vcombine.low %v3827_v10, %v3835_v17  ;;  %v15602_v17 = vcombine.low %v3954_v16, %v3954_v16 }
 0xf3d   :  { %v3662_v40 = vpop.f32.mrf.mxu0 }
 0xf3e   :  { %v3684_v42 = vadd.f32 %v3680_v33, %v3668_v38  ;;  %v3669_v43 = vadd.f32 %v3662_v40, %v19149_v9  ;;  %v19231_v11 = vadd.f32 %v18415_v4, %v3683_v39  ;;  %v3794_v39 = vld [vmem:[%s18542_s24 + $0x100] sm:$0xff]  ;;  %5147 = vmatpush1.bf16.msra.mxu1 %v15476_v36  ;;  %v5050_v19 = vsel %vm265_vm0, %v15602_v17, 0 }
 0xf3f   :  { %v3664_v44 = vpop.f32.mrf.mxu0  ;;  %v3802_v40 = vld [vmem:[%s18542_s24 + $0x140] sm:$0xff] }
 0xf40   :  { %v3670_v45 = vadd.f32 %v3664_v44, %v2789_v41  ;;  %v19228_v46 = vadd.f32 %v18414_v3, %v3684_v42  ;;  %v3685_v47 = vadd.f32 %v3676_v31, %v3669_v43  ;;  %v3811_v31 = vld [vmem:[%s18542_s24 + $0x188] sm:$0xff]  ;;  %v15458_v43 = vcombine.low %v3810_v28, %v3818_v30  ;;  %v3946_v28 = vld [vmem:[%s18542_s24 + $0x5c0] sm:$0xff] }
 0xf41   :  { %v15461_v38 = vcombine.high %v3811_v31, %v3819_v32  ;;  %v3795_v41 = vld [vmem:[%s18542_s24 + $0x108] sm:$0xff]  ;;  %v15460_v44 = vcombine.low %v3811_v31, %v3819_v32  ;;  %v15587_v31 = vcombine.high %v3938_v22, %v3946_v28 }
 0xf42   :  { %v3686_v7 = vadd.f32 %v3680_v33, %v3670_v45  ;;  %v3693_v12 = vsel %vm261_vm1, %v19228_v46, 0.0  ;;  %v19240_v50 = vadd.f32 %v18417_v34, %v3685_v47  ;;  %v15474_v33 = vcombine.low %v3826_v6, %v3834_v8  ;;  %v3803_v42 = vld [vmem:[%s18542_s24 + $0x148] sm:$0xff] }
 0xf43   :  { %v3694_v9 = vadd.f32 %v3693_v12, %v19231_v11  ;;  %v15443_v45 = vcombine.high %v3794_v39, %v3802_v40  ;;  %5148 = vmatprep.subr.bf16.mxu1 %v15461_v38  ;;  %v15445_v3 = vcombine.high %v3795_v41, %v3803_v42  ;;  %v15442_v47 = vcombine.low %v3794_v39, %v3802_v40  ;;  %v3955_v6 = vld [vmem:[%s18542_s24 + $0x608] sm:$0xff]  ;;  %v3922_v38 = vld [vmem:[%s18542_s24 + $0x500] sm:$0xff] }
 0xf44   :  { %v19237_v49 = vadd.f32 %v18416_v48, %v3686_v7  ;;  %5104 = vmatpush1.bf16.msra.mxu0 %v15474_v33  ;;  %5149 = vmatpush1.bf16.msra.mxu1 %v15460_v44  ;;  %v15444_v4 = vcombine.low %v3795_v41, %v3803_v42  ;;  %v15603_v8 = vcombine.high %v3954_v16, %v3954_v16  ;;  %v3939_v30 = vld [vmem:[%s18542_s24 + $0x588] sm:$0xff]  ;;  %v3930_v39 = vld [vmem:[%s18542_s24 + $0x540] sm:$0xff] }
 0xf45   :  { %3695 = vadd.xlane.f32.xlu0 %v3694_v9  ;;  %5105 = vmatprep.subr.bf16.mxu0 %v15459_v37  ;;  %v15605_v10 = vcombine.high %v3955_v6, %v3955_v6  ;;  %v15604_v18 = vcombine.low %v3955_v6, %v3955_v6  ;;  %v3947_v32 = vld [vmem:[%s18542_s24 + $0x5c8] sm:$0xff]  ;;  %v15586_v33 = vcombine.low %v3938_v22, %v3946_v28  ;;  %v3692_v6 = vld [vmem:[%s18537_s19] sm:$0x3]  ;;  %s21266_s19 = sld [smem:[#allocation18_spill]] }
 0xf46   :  { %v3697_v51 = vsel %vm261_vm1, %v19237_v49, 0.0  ;;  %5150 = vmatprep.subr.bf16.mxu1 %v15445_v3  ;;  %v15588_v36 = vcombine.low %v3939_v30, %v3947_v32  ;;  %v15589_v37 = vcombine.high %v3939_v30, %v3947_v32  ;;  %v3923_v40 = vld [vmem:[%s18542_s24 + $0x508] sm:$0xff]  ;;  %v15571_v41 = vcombine.high %v3922_v38, %v3930_v39  ;;  %v3906_v3 = vld [vmem:[%s18542_s24 + $0x480] sm:$0xff] }
 0xf47   :  { %v3698_v52 = vadd.f32 %v3697_v51, %v19240_v50  ;;  %v5056_v20 = vsel %vm265_vm0, %v15604_v18, 0  ;;  %v3931_v42 = vld [vmem:[%s18542_s24 + $0x548] sm:$0xff]  ;;  %v3753_v22 = vrot.slane %v3692_v6, %v19217_v29 }
 0xf48   :  { %5106 = vmatpush1.bf16.msra.mxu0 %v15458_v43  ;;  %5151 = vmatpush1.bf16.msra.mxu1 %v15444_v4  ;;  %v15570_v43 = vcombine.low %v3922_v38, %v3930_v39  ;;  %v15572_v44 = vcombine.low %v3923_v40, %v3931_v42  ;;  %v3907_v4 = vld [vmem:[%s18542_s24 + $0x488] sm:$0xff]  ;;  %v3860_v39 = vld [vmem:[%s18542_s24 + $0x310] sm:$0xff] }
 0xf49   :  { %3699 = vadd.xlane.f32.xlu1 %v3698_v52  ;;  %5107 = vmatprep.subr.bf16.mxu0 %v15443_v45  ;;  %v15573_v45 = vcombine.high %v3923_v40, %v3931_v42  ;;  %v3868_v40 = vld [vmem:[%s18542_s24 + $0x350] sm:$0xff]  ;;  %v3869_v42 = vld [vmem:[%s18542_s24 + $0x358] sm:$0xff] }
 0xf4a   :  { %5152 = vmatprep.subr.bf16.mxu1 %v15429_v62 }
 0xf4c   :  { %5108 = vmatpush1.bf16.msra.mxu0 %v15442_v47  ;;  %5153 = vmatpush1.bf16.msra.mxu1 %v15428_v61  ;;  %v3914_v47 = vld [vmem:[%s18542_s24 + $0x4c0] sm:$0xff] }
 0xf4d   :  { %5154 = vmatprep.subr.bf16.mxu1 %v15413_v15  ;;  %v3691_v15 = vld [vmem:[%s18532_s14] sm:$0x3]  ;;  %s21265_s14 = sld [smem:[#allocation15_spill]] }
 0xf50   :  { %5155 = vmatpush1.bf16.msra.mxu1 %v15412_v14 }
 0xf51   :  { %15620 = vmatprep.subr.msk.bf16.mxu1 %vm265_vm0, %v15605_v10  ;;  %v3738_v10 = vrot.slane %v3691_v15, %v19217_v29 }
 0xf54   :  { %5163 = vmatpush2.bf16.msra.mxu1 %v5056_v20  ;;  %v3749_v20 = vrot.slane %v3692_v6, %v19213_v27  ;;  %v3788_v6 = vld [vmem:[%s18542_s24 + $0xd0] sm:$0xff] }
 0xf55   :  { %5164 = vmatprep.subr.bf16.mxu1 %v15589_v37 }
 0xf58   :  { %5165 = vmatpush2.bf16.msra.mxu1 %v15588_v36 }
 0xf59   :  { %5166 = vmatprep.subr.bf16.mxu1 %v15573_v45 }
 0xf5c   :  { %5167 = vmatpush2.bf16.msra.mxu1 %v15572_v44  ;;  %v15511_v44 = vcombine.high %v3860_v39, %v3868_v40 }
 0xfce   :  { %v3696_v7 = vpop.xlane.xlu0 %3695 }
 0xfcf   :  { %v3702_v12 = vmul.f32 0.005, %v3696_v7  ;;  %v15555_v7 = vcombine.high %v3906_v3, %v3914_v47 }
 0xfd1   :  { %v19270_v9 = vsub.f32 %v19231_v11, %v3702_v12  ;;  %v19273_v48 = vsub.f32 %v19228_v46, %v3702_v12  ;;  %v3915_v12 = vld [vmem:[%s18542_s24 + $0x4c8] sm:$0xff] }
 0xfd2   :  { %v3700_v34 = vpop.xlane.xlu1 %3699 }
 0xfd3   :  { %v3703_v51 = vmul.f32 0.005, %v3700_v34  ;;  %v3708_v52 = vmul.f32 %v19270_v9, %v19270_v9  ;;  %v3709_v21 = vmul.f32 %v19273_v48, %v19273_v48  ;;  %v15554_v34 = vcombine.low %v3906_v3, %v3914_v47  ;;  %v3852_v3 = vld [vmem:[%s18542_s24 + $0x2d0] sm:$0xff]  ;;  %v3845_v47 = vld [vmem:[%s18542_s24 + $0x298] sm:$0xff] }
 0xfd5   :  { %v19280_v24 = vsub.f32 %v19240_v50, %v3703_v51  ;;  %v19283_v11 = vsub.f32 %v19237_v49, %v3703_v51  ;;  %v3712_v46 = vsel %vm261_vm1, %v3709_v21, 0.0  ;;  %v3786_v49 = vld [vmem:[%s18542_s24 + $0xc0] sm:$0xff]  ;;  %v15556_v51 = vcombine.low %v3907_v4, %v3915_v12 }
 0xfd6   :  { %v3713_v25 = vadd.f32 %v3712_v46, %v3708_v52  ;;  %v15427_v58 = vcombine.high %v3778_v56, %v3786_v49  ;;  %v15426_v60 = vcombine.low %v3778_v56, %v3786_v49  ;;  %v15557_v52 = vcombine.high %v3907_v4, %v3915_v12  ;;  %v3890_v21 = vld [vmem:[%s18542_s24 + $0x400] sm:$0xff]  ;;  %v3876_v49 = vld [vmem:[%s18542_s24 + $0x390] sm:$0xff]  ;;  %v3853_v4 = vld [vmem:[%s18542_s24 + $0x2d8] sm:$0xff] }
 0xfd7   :  { %v3710_v53 = vmul.f32 %v19280_v24, %v19280_v24  ;;  %v3711_v54 = vmul.f32 %v19283_v11, %v19283_v11  ;;  %v3898_v46 = vld [vmem:[%s18542_s24 + $0x440] sm:$0xff]  ;;  %v15527_v59 = vcombine.high %v3876_v49, %v3884_v57  ;;  %v15526_v61 = vcombine.low %v3876_v49, %v3884_v57  ;;  %v3820_v49 = vld [vmem:[%s18542_s24 + $0x1d0] sm:$0xff]  ;;  %v3813_v57 = vld [vmem:[%s18542_s24 + $0x198] sm:$0xff] }
 0xfd8   :  { %3714 = vadd.xlane.f32.xlu0 %v3713_v25  ;;  %5109 = vmatprep.subr.bf16.mxu0 %v15427_v58  ;;  %v3891_v25 = vld [vmem:[%s18542_s24 + $0x408] sm:$0xff]  ;;  %v3877_v58 = vld [vmem:[%s18542_s24 + $0x398] sm:$0xff] }
 0xfd9   :  { %v3716_v55 = vsel %vm261_vm1, %v3711_v54, 0.0  ;;  %5110 = vmatpush1.bf16.msra.mxu0 %v15426_v60  ;;  %5168 = vmatprep.subr.bf16.mxu1 %v15557_v52  ;;  %v3899_v54 = vld [vmem:[%s18542_s24 + $0x448] sm:$0xff]  ;;  %v3885_v60 = vld [vmem:[%s18542_s24 + $0x3d8] sm:$0xff]  ;;  %v3828_v52 = vld [vmem:[%s18542_s24 + $0x210] sm:$0xff] }
 0xfda   :  { %v3717_v50 = vadd.f32 %v3716_v55, %v3710_v53  ;;  %5111 = vmatprep.subr.bf16.mxu0 %v15411_v5  ;;  %5169 = vmatpush2.bf16.msra.mxu1 %v15556_v51  ;;  %v15539_v53 = vcombine.high %v3890_v21, %v3898_v46  ;;  %v15538_v55 = vcombine.low %v3890_v21, %v3898_v46  ;;  %v3836_v21 = vld [vmem:[%s18542_s24 + $0x250] sm:$0xff]  ;;  %v3829_v46 = vld [vmem:[%s18542_s24 + $0x218] sm:$0xff] }
 0xfdb   :  { %v15541_v56 = vcombine.high %v3891_v25, %v3899_v54  ;;  %v15528_v62 = vcombine.low %v3877_v58, %v3885_v60  ;;  %v15529_v63 = vcombine.high %v3877_v58, %v3885_v60  ;;  %v15497_v51 = vcombine.high %v3845_v47, %v3853_v4  ;;  %v3821_v58 = vld [vmem:[%s18542_s24 + $0x1d8] sm:$0xff] }
 0xfdc   :  { %3718 = vadd.xlane.f32.xlu1 %v3717_v50  ;;  %v15540_v50 = vcombine.low %v3891_v25, %v3899_v54  ;;  %v3837_v25 = vld [vmem:[%s18542_s24 + $0x258] sm:$0xff]  ;;  %v15496_v54 = vcombine.low %v3845_v47, %v3853_v4  ;;  %v3940_v4 = vld [vmem:[%s18542_s24 + $0x590] sm:$0xff] }
 0xfdd   :  { %5112 = vmatpush1.bf16.msra.mxu0 %v15410_v13  ;;  %5170 = vmatprep.subr.bf16.mxu1 %v15541_v56  ;;  %v3812_v56 = vld [vmem:[%s18542_s24 + $0x190] sm:$0xff]  ;;  %v15480_v60 = vcombine.low %v3829_v46, %v3837_v25 }
 0xfde   :  { %15618 = vmatprep.subr.msk.bf16.mxu0 %vm265_vm0, %v15603_v8  ;;  %5171 = vmatpush2.bf16.msra.mxu1 %v15540_v50  ;;  %v3734_v8 = vrot.slane %v3691_v15, %v19213_v27  ;;  %v15481_v50 = vcombine.high %v3829_v46, %v3837_v25  ;;  %v3924_v25 = vld [vmem:[%s18542_s24 + $0x510] sm:$0xff] }
 0xfdf   :  { %5226 = vmatprep.subr.bf16.mxu1 %v15529_v63  ;;  %v3796_v63 = vld [vmem:[%s18542_s24 + $0x110] sm:$0xff] }
 0xfe1   :  { %5120 = vmatpush2.bf16.msra.mxu0 %v5050_v19 }
 0xfe2   :  { %5121 = vmatprep.subr.bf16.mxu0 %v15587_v31 }
 0xfe5   :  { %5122 = vmatpush2.bf16.msra.mxu0 %v15586_v33 }
 0xfe6   :  { %5123 = vmatprep.subr.bf16.mxu0 %v15571_v41  ;;  %v3861_v41 = vld [vmem:[%s18542_s24 + $0x318] sm:$0xff] }
 0xfe7   :  { %v15513_v45 = vcombine.high %v3861_v41, %v3869_v42  ;;  %v15512_v12 = vcombine.low %v3861_v41, %v3869_v42  ;;  %v3957_v41 = vld [vmem:[%s18542_s24 + $0x618] sm:$0xff] }
 0xfe8   :  { %v15608_v47 = vcombine.low %v3957_v41, %v3957_v41 }
 0xfe9   :  { %5124 = vmatpush2.bf16.msra.mxu0 %v15570_v43  ;;  %v3844_v43 = vld [vmem:[%s18542_s24 + $0x290] sm:$0xff] }
 0xfea   :  { %5125 = vmatprep.subr.bf16.mxu0 %v15555_v7  ;;  %v15510_v7 = vcombine.low %v3860_v39, %v3868_v40  ;;  %v3956_v40 = vld [vmem:[%s18542_s24 + $0x610] sm:$0xff] }
 0xfed   :  { %5126 = vmatpush2.bf16.msra.mxu0 %v15554_v34  ;;  %v15495_v34 = vcombine.high %v3844_v43, %v3852_v3 }
 0xfee   :  { %5127 = vmatprep.subr.bf16.mxu0 %v15539_v53  ;;  %v15494_v53 = vcombine.low %v3844_v43, %v3852_v3  ;;  %v15606_v3 = vcombine.low %v3956_v40, %v3956_v40 }
 0xff1   :  { %5128 = vmatpush2.bf16.msra.mxu0 %v15538_v55  ;;  %v15479_v55 = vcombine.high %v3828_v52, %v3836_v21 }
 0xff2   :  { %5183 = vmatprep.subr.bf16.mxu0 %v15527_v59  ;;  %v15478_v59 = vcombine.low %v3828_v52, %v3836_v21  ;;  %v5068_v52 = vsel %vm265_vm0, %v15608_v47, 0 }
0x1061   :  { %v3715_v0 = vpop.xlane.xlu0 %3714 }
0x1062   :  { %v3720_v2 = vmul.f32 0.005, %v3715_v0  ;;  %v3804_v0 = vld [vmem:[%s18542_s24 + $0x150] sm:$0xff] }
0x1064   :  { %v3722_v5 = vadd.f32 1e-05, %v3720_v2  ;;  %v3797_v2 = vld [vmem:[%s18542_s24 + $0x118] sm:$0xff] }
0x1065   :  { %v3719_v23 = vpop.xlane.xlu1 %3718 }
0x1066   :  { %18366 = vrsqrt.f32 %v3722_v5  ;;  %v3721_v13 = vmul.f32 0.005, %v3719_v23  ;;  %v3805_v5 = vld [vmem:[%s18542_s24 + $0x158] sm:$0xff]  ;;  %v15462_v23 = vcombine.low %v3812_v56, %v3820_v49 }
0x1067   :  { %v15449_v15 = vcombine.high %v3797_v2, %v3805_v5 }
0x1068   :  { %v3723_v14 = vadd.f32 1e-05, %v3721_v13  ;;  %v15464_v13 = vcombine.low %v3813_v57, %v3821_v58 }
0x106a   :  { %18368 = vrsqrt.f32 %v3723_v14  ;;  %v15447_v14 = vcombine.high %v3796_v63, %v3804_v0 }
0x1073   :  { %v18367_v16 = vpop.eup %18366 }
0x1074   :  { %v3726_v17 = vmul.f32 %v18367_v16, %v19270_v9  ;;  %v3727_v18 = vmul.f32 %v18367_v16, %v19273_v48  ;;  %v3780_v16 = vld [vmem:[%s18542_s24 + $0x90] sm:$0xff] }
0x1076   :  { %v3741_v28 = vmul.f32 %v3734_v8, %v3726_v17  ;;  %v3742_v30 = vmul.f32 %v3738_v10, %v3727_v18  ;;  %v15446_v17 = vcombine.low %v3796_v63, %v3804_v0  ;;  %v15448_v18 = vcombine.low %v3797_v2, %v3805_v5  ;;  %v3892_v5 = vld [vmem:[%s18542_s24 + $0x410] sm:$0xff] }
0x1077   :  { %v18369_v19 = vpop.eup %18368 }
0x1078   :  { %v3728_v31 = vmul.f32 %v18369_v19, %v19280_v24  ;;  %v3729_v32 = vmul.f32 %v18369_v19, %v19283_v11  ;;  %v19335_v9 = vadd.f32 %v3749_v20, %v3741_v28  ;;  %v19337_v48 = vadd.f32 %v3753_v22, %v3742_v30  ;;  %v3772_v28 = vld [vmem:[%s18542_s24 + $0x50] sm:$0xff]  ;;  %v3765_v30 = vld [vmem:[%s18542_s24 + $0x18] sm:$0xff] }
0x1079   :  { %v15431_v19 = vcombine.high %v3780_v16, %v3788_v6 }
0x107a   :  { %v3743_v33 = vmul.f32 %v3734_v8, %v3728_v31  ;;  %v3744_v36 = vmul.f32 %v3738_v10, %v3729_v32  ;;  %v3781_v8 = vld [vmem:[%s18542_s24 + $0x98] sm:$0xff]  ;;  %v15430_v32 = vcombine.low %v3780_v16, %v3788_v6 }
0x107b   :  { %v3789_v10 = vld [vmem:[%s18542_s24 + $0xd8] sm:$0xff] }
0x107c   :  { %v19339_v37 = vadd.f32 %v3749_v20, %v3743_v33  ;;  %v19341_v38 = vadd.f32 %v3753_v22, %v3744_v36  ;;  %v15433_v20 = vcombine.high %v3781_v8, %v3789_v10  ;;  %v3764_v22 = vld [vmem:[%s18542_s24 + $0x10] sm:$0xff]  ;;  %v3773_v31 = vld [vmem:[%s18542_s24 + $0x58] sm:$0xff]  ;;  %v15432_v33 = vcombine.low %v3781_v8, %v3789_v10  ;;  %v3878_v10 = vld [vmem:[%s18542_s24 + $0x3a0] sm:$0xff] }
0x107d   :  { %v15415_v36 = vcombine.high %v3764_v22, %v3772_v28  ;;  %v15417_v39 = vcombine.high %v3765_v30, %v3773_v31  ;;  %v15414_v42 = vcombine.low %v3764_v22, %v3772_v28  ;;  %v15416_v43 = vcombine.low %v3765_v30, %v3773_v31  ;;  %v3862_v31 = vld [vmem:[%s18542_s24 + $0x320] sm:$0xff] }
0x107e   :  { %v19349_v24 = vpack.c.bf16 %v19339_v37, %v19335_v9  ;;  %v19353_v11 = vpack.c.bf16 %v19341_v38, %v19337_v48 }
0x1080   :  { %15619 = vmatprep.mubr.msk.bf16.mxu0 %vm261_vm1, %v19353_v11  ;;  %15621 = vmatprep.mubr.msk.bf16.mxu1 %vm261_vm1, %v19353_v11 }
0x1081   :  { %5130 = vmatmul.mubr.bf16.vlgmr.msra.gmra.mxu0 %v19349_v24  ;;  %5173 = vmatmul.mubr.bf16.vlgmr.msra.gmra.mxu1 %v19349_v24 }
0x1082   :  { %5184 = vmatpush1.bf16.msra.mxu0 %v15526_v61  ;;  %5227 = vmatpush1.bf16.msra.mxu1 %v15528_v62  ;;  %v15463_v61 = vcombine.high %v3812_v56, %v3820_v49  ;;  %v15465_v62 = vcombine.high %v3813_v57, %v3821_v58  ;;  %v3908_v58 = vld [vmem:[%s18542_s24 + $0x490] sm:$0xff] }
0x1083   :  { %15623 = vmatprep.mubr.msk.bf16.mxu0 %vm261_vm1, %v19353_v11  ;;  %15625 = vmatprep.mubr.msk.bf16.mxu1 %vm261_vm1, %v19353_v11 }
0x1084   :  { %5185 = vmatprep.subr.bf16.mxu0 %v15511_v44  ;;  %5228 = vmatprep.subr.bf16.mxu1 %v15513_v45  ;;  %v15607_v44 = vcombine.high %v3956_v40, %v3956_v40  ;;  %v15609_v45 = vcombine.high %v3957_v41, %v3957_v41 }
0x1086   :  { %5186 = vmatpush1.bf16.msra.mxu0 %v15510_v7  ;;  %5229 = vmatpush1.bf16.msra.mxu1 %v15512_v12  ;;  %v3948_v7 = vld [vmem:[%s18542_s24 + $0x5d0] sm:$0xff]  ;;  %v3941_v12 = vld [vmem:[%s18542_s24 + $0x598] sm:$0xff] }
0x1087   :  { %5187 = vmatprep.subr.bf16.mxu0 %v15495_v34  ;;  %5230 = vmatprep.subr.bf16.mxu1 %v15497_v51  ;;  %v3949_v34 = vld [vmem:[%s18542_s24 + $0x5d8] sm:$0xff]  ;;  %v5062_v51 = vsel %vm265_vm0, %v15606_v3, 0  ;;  %v15591_v21 = vcombine.high %v3940_v4, %v3948_v7  ;;  %v3855_v3 = vld [vmem:[%s18542_s24 + $0x2e8] sm:$0xff] }
0x1088   :  { %v15593_v46 = vcombine.high %v3941_v12, %v3949_v34  ;;  %v15592_v56 = vcombine.low %v3941_v12, %v3949_v34  ;;  %v3830_v34 = vld [vmem:[%s18542_s24 + $0x220] sm:$0xff] }
0x108a   :  { %5188 = vmatpush1.bf16.msra.mxu0 %v15494_v53  ;;  %5231 = vmatpush1.bf16.msra.mxu1 %v15496_v54  ;;  %v3932_v53 = vld [vmem:[%s18542_s24 + $0x550] sm:$0xff]  ;;  %v3925_v54 = vld [vmem:[%s18542_s24 + $0x518] sm:$0xff] }
0x108b   :  { %5189 = vmatprep.subr.bf16.mxu0 %v15479_v55  ;;  %5232 = vmatprep.subr.bf16.mxu1 %v15481_v50  ;;  %v3933_v55 = vld [vmem:[%s18542_s24 + $0x558] sm:$0xff]  ;;  %v15590_v50 = vcombine.low %v3940_v4, %v3948_v7  ;;  %v15575_v49 = vcombine.high %v3924_v25, %v3932_v53 }
0x108c   :  { %v15577_v57 = vcombine.high %v3925_v54, %v3933_v55  ;;  %v15576_v63 = vcombine.low %v3925_v54, %v3933_v55  ;;  %v3814_v55 = vld [vmem:[%s18542_s24 + $0x1a0] sm:$0xff] }
0x108e   :  { %5190 = vmatpush1.bf16.msra.mxu0 %v15478_v59  ;;  %5233 = vmatpush1.bf16.msra.mxu1 %v15480_v60  ;;  %v3916_v59 = vld [vmem:[%s18542_s24 + $0x4d0] sm:$0xff]  ;;  %v3909_v60 = vld [vmem:[%s18542_s24 + $0x498] sm:$0xff] }
0x108f   :  { %5191 = vmatprep.subr.bf16.mxu0 %v15463_v61  ;;  %5234 = vmatprep.subr.bf16.mxu1 %v15465_v62  ;;  %v3917_v61 = vld [vmem:[%s18542_s24 + $0x4d8] sm:$0xff]  ;;  %v15574_v62 = vcombine.low %v3924_v25, %v3932_v53  ;;  %v15559_v0 = vcombine.high %v3908_v58, %v3916_v59 }
0x1090   :  { %v15561_v2 = vcombine.high %v3909_v60, %v3917_v61  ;;  %v15560_v16 = vcombine.low %v3909_v60, %v3917_v61  ;;  %v3798_v61 = vld [vmem:[%s18542_s24 + $0x120] sm:$0xff] }
0x1092   :  { %5192 = vmatpush1.bf16.msra.mxu0 %v15462_v23  ;;  %5235 = vmatpush1.bf16.msra.mxu1 %v15464_v13  ;;  %v3900_v23 = vld [vmem:[%s18542_s24 + $0x450] sm:$0xff]  ;;  %v3893_v13 = vld [vmem:[%s18542_s24 + $0x418] sm:$0xff] }
0x1093   :  { %5193 = vmatprep.subr.bf16.mxu0 %v15447_v14  ;;  %5236 = vmatprep.subr.bf16.mxu1 %v15449_v15  ;;  %v3901_v14 = vld [vmem:[%s18542_s24 + $0x458] sm:$0xff]  ;;  %v15558_v15 = vcombine.low %v3908_v58, %v3916_v59  ;;  %v15543_v6 = vcombine.high %v3892_v5, %v3900_v23 }
0x1094   :  { %v15545_v8 = vcombine.high %v3893_v13, %v3901_v14  ;;  %v15544_v22 = vcombine.low %v3893_v13, %v3901_v14  ;;  %v3782_v14 = vld [vmem:[%s18542_s24 + $0xa0] sm:$0xff] }
0x1096   :  { %5194 = vmatpush1.bf16.msra.mxu0 %v15446_v17  ;;  %5237 = vmatpush1.bf16.msra.mxu1 %v15448_v18  ;;  %v3886_v17 = vld [vmem:[%s18542_s24 + $0x3e0] sm:$0xff]  ;;  %v3879_v18 = vld [vmem:[%s18542_s24 + $0x3a8] sm:$0xff] }
0x1097   :  { %5195 = vmatprep.subr.bf16.mxu0 %v15431_v19  ;;  %5238 = vmatprep.subr.bf16.mxu1 %v15433_v20  ;;  %v3887_v19 = vld [vmem:[%s18542_s24 + $0x3e8] sm:$0xff]  ;;  %v15542_v20 = vcombine.low %v3892_v5, %v3900_v23  ;;  %v15531_v28 = vcombine.high %v3878_v10, %v3886_v17 }
0x1098   :  { %v15533_v30 = vcombine.high %v3879_v18, %v3887_v19  ;;  %v15532_v40 = vcombine.low %v3879_v18, %v3887_v19  ;;  %v3766_v19 = vld [vmem:[%s18542_s24 + $0x20] sm:$0xff] }
0x109a   :  { %5196 = vmatpush1.bf16.msra.mxu0 %v15430_v32  ;;  %5239 = vmatpush1.bf16.msra.mxu1 %v15432_v33  ;;  %v3870_v32 = vld [vmem:[%s18542_s24 + $0x360] sm:$0xff]  ;;  %v3863_v33 = vld [vmem:[%s18542_s24 + $0x328] sm:$0xff] }
0x109b   :  { %5197 = vmatprep.subr.bf16.mxu0 %v15415_v36  ;;  %5240 = vmatprep.subr.bf16.mxu1 %v15417_v39  ;;  %v3871_v36 = vld [vmem:[%s18542_s24 + $0x368] sm:$0xff]  ;;  %v15530_v39 = vcombine.low %v3878_v10, %v3886_v17  ;;  %v15515_v41 = vcombine.high %v3862_v31, %v3870_v32  ;;  %v15514_v47 = vcombine.low %v3862_v31, %v3870_v32 }
0x109c   :  { %v15516_v4 = vcombine.low %v3863_v33, %v3871_v36 }
0x109e   :  { %5198 = vmatpush1.bf16.msra.mxu0 %v15414_v42  ;;  %5241 = vmatpush1.bf16.msra.mxu1 %v15416_v43  ;;  %v15517_v42 = vcombine.high %v3863_v33, %v3871_v36  ;;  %v3846_v43 = vld [vmem:[%s18542_s24 + $0x2a0] sm:$0xff] }
0x109f   :  { %15622 = vmatprep.subr.msk.bf16.mxu0 %vm265_vm0, %v15607_v44  ;;  %15624 = vmatprep.subr.msk.bf16.mxu1 %vm265_vm0, %v15609_v45  ;;  %v3854_v44 = vld [vmem:[%s18542_s24 + $0x2e0] sm:$0xff]  ;;  %v3847_v45 = vld [vmem:[%s18542_s24 + $0x2a8] sm:$0xff] }
0x10a0   :  { %v15499_v7 = vcombine.high %v3846_v43, %v3854_v44  ;;  %v15501_v12 = vcombine.high %v3847_v45, %v3855_v3  ;;  %v15500_v25 = vcombine.low %v3847_v45, %v3855_v3  ;;  %v3958_v36 = vld [vmem:[%s18542_s24 + $0x620] sm:$0xff] }
0x10a1   :  { %v3942_v3 = vld [vmem:[%s18542_s24 + $0x5a0] sm:$0xff] }
0x10a2   :  { %5206 = vmatpush2.bf16.msra.mxu0 %v5062_v51  ;;  %5249 = vmatpush2.bf16.msra.mxu1 %v5068_v52  ;;  %v3838_v51 = vld [vmem:[%s18542_s24 + $0x260] sm:$0xff]  ;;  %v3831_v52 = vld [vmem:[%s18542_s24 + $0x228] sm:$0xff] }
0x10a3   :  { %5207 = vmatprep.subr.bf16.mxu0 %v15591_v21  ;;  %5250 = vmatprep.subr.bf16.mxu1 %v15593_v46  ;;  %v3839_v21 = vld [vmem:[%s18542_s24 + $0x268] sm:$0xff]  ;;  %v15498_v46 = vcombine.low %v3846_v43, %v3854_v44  ;;  %v15483_v53 = vcombine.high %v3830_v34, %v3838_v51  ;;  %v15610_v43 = vcombine.low %v3958_v36, %v3958_v36 }
0x10a4   :  { %v15485_v54 = vcombine.high %v3831_v52, %v3839_v21  ;;  %v15484_v58 = vcombine.low %v3831_v52, %v3839_v21  ;;  %v3926_v21 = vld [vmem:[%s18542_s24 + $0x520] sm:$0xff] }
0x10a6   :  { %5208 = vmatpush2.bf16.msra.mxu0 %v15590_v50  ;;  %5251 = vmatpush2.bf16.msra.mxu1 %v15592_v56  ;;  %v3822_v50 = vld [vmem:[%s18542_s24 + $0x1e0] sm:$0xff]  ;;  %v3815_v56 = vld [vmem:[%s18542_s24 + $0x1a8] sm:$0xff] }
0x10a7   :  { %5209 = vmatprep.subr.bf16.mxu0 %v15575_v49  ;;  %5252 = vmatprep.subr.bf16.mxu1 %v15577_v57  ;;  %v3823_v49 = vld [vmem:[%s18542_s24 + $0x1e8] sm:$0xff]  ;;  %v15482_v57 = vcombine.low %v3830_v34, %v3838_v51  ;;  %v15467_v59 = vcombine.high %v3814_v55, %v3822_v50 }
0x10a8   :  { %v15469_v60 = vcombine.high %v3815_v56, %v3823_v49  ;;  %v15468_v5 = vcombine.low %v3815_v56, %v3823_v49  ;;  %v3910_v49 = vld [vmem:[%s18542_s24 + $0x4a0] sm:$0xff] }
0x10aa   :  { %5210 = vmatpush2.bf16.msra.mxu0 %v15574_v62  ;;  %5253 = vmatpush2.bf16.msra.mxu1 %v15576_v63  ;;  %v3806_v62 = vld [vmem:[%s18542_s24 + $0x160] sm:$0xff]  ;;  %v3799_v63 = vld [vmem:[%s18542_s24 + $0x128] sm:$0xff] }
0x10ab   :  { %5211 = vmatprep.subr.bf16.mxu0 %v15559_v0  ;;  %5254 = vmatprep.subr.bf16.mxu1 %v15561_v2  ;;  %v3807_v0 = vld [vmem:[%s18542_s24 + $0x168] sm:$0xff]  ;;  %v15466_v2 = vcombine.low %v3814_v55, %v3822_v50  ;;  %v15451_v23 = vcombine.high %v3798_v61, %v3806_v62 }
0x10ac   :  { %v15453_v13 = vcombine.high %v3799_v63, %v3807_v0  ;;  %v15452_v10 = vcombine.low %v3799_v63, %v3807_v0  ;;  %v3894_v0 = vld [vmem:[%s18542_s24 + $0x420] sm:$0xff] }
0x10ae   :  { %5212 = vmatpush2.bf16.msra.mxu0 %v15558_v15  ;;  %5255 = vmatpush2.bf16.msra.mxu1 %v15560_v16  ;;  %v3790_v15 = vld [vmem:[%s18542_s24 + $0xe0] sm:$0xff]  ;;  %v3783_v16 = vld [vmem:[%s18542_s24 + $0xa8] sm:$0xff] }
0x10af   :  { %5213 = vmatprep.subr.bf16.mxu0 %v15543_v6  ;;  %5256 = vmatprep.subr.bf16.mxu1 %v15545_v8  ;;  %v3791_v6 = vld [vmem:[%s18542_s24 + $0xe8] sm:$0xff]  ;;  %v15450_v8 = vcombine.low %v3798_v61, %v3806_v62  ;;  %v15435_v17 = vcombine.high %v3782_v14, %v3790_v15 }
0x10b0   :  { %v15437_v18 = vcombine.high %v3783_v16, %v3791_v6  ;;  %v15436_v31 = vcombine.low %v3783_v16, %v3791_v6  ;;  %v3880_v6 = vld [vmem:[%s18542_s24 + $0x3b0] sm:$0xff] }
0x10b2   :  { %5214 = vmatpush2.bf16.msra.mxu0 %v15542_v20  ;;  %5257 = vmatpush2.bf16.msra.mxu1 %v15544_v22  ;;  %v3774_v20 = vld [vmem:[%s18542_s24 + $0x60] sm:$0xff]  ;;  %v3767_v22 = vld [vmem:[%s18542_s24 + $0x28] sm:$0xff] }
0x10b3   :  { %5269 = vmatprep.subr.bf16.mxu0 %v15531_v28  ;;  %5312 = vmatprep.subr.bf16.mxu1 %v15533_v30  ;;  %v3775_v28 = vld [vmem:[%s18542_s24 + $0x68] sm:$0xff]  ;;  %v15434_v30 = vcombine.low %v3782_v14, %v3790_v15  ;;  %v15419_v32 = vcombine.high %v3766_v19, %v3774_v20 }
0x10b4   :  { %v15421_v33 = vcombine.high %v3767_v22, %v3775_v28 }
0x10b5   :  { %5216 = vmatmul.mubr.bf16.vlgmr.msra.gmra.mxu0 %v19349_v24  ;;  %5259 = vmatmul.mubr.bf16.vlgmr.msra.gmra.mxu1 %v19349_v24 }
0x10b6   :  { %5270 = vmatpush1.bf16.msra.mxu0 %v15530_v39  ;;  %15627 = vmatprep.mubr.msk.bf16.mxu0 %vm261_vm1, %v19353_v11  ;;  %v3959_v39 = vld [vmem:[%s18542_s24 + $0x628] sm:$0xff] }
0x10b7   :  { %5313 = vmatpush1.bf16.msra.mxu1 %v15532_v40  ;;  %15629 = vmatprep.mubr.msk.bf16.mxu1 %vm261_vm1, %v19353_v11  ;;  %v15418_v40 = vcombine.low %v3766_v19, %v3774_v20  ;;  %v15613_v44 = vcombine.high %v3959_v39, %v3959_v39  ;;  %v15612_v45 = vcombine.low %v3959_v39, %v3959_v39 }
0x10b8   :  { %5271 = vmatprep.subr.bf16.mxu0 %v15515_v41  ;;  %5314 = vmatprep.subr.bf16.mxu1 %v15517_v42  ;;  %v15420_v41 = vcombine.low %v3767_v22, %v3775_v28  ;;  %v15611_v42 = vcombine.high %v3958_v36, %v3958_v36  ;;  %v3864_v28 = vld [vmem:[%s18542_s24 + $0x330] sm:$0xff] }
0x10b9   :  { %v5080_v51 = vsel %vm265_vm0, %v15612_v45, 0 }
0x10ba   :  { %5272 = vmatpush1.bf16.msra.mxu0 %v15514_v47  ;;  %v3950_v47 = vld [vmem:[%s18542_s24 + $0x5e0] sm:$0xff] }
0x10bb   :  { %5315 = vmatpush1.bf16.msra.mxu1 %v15516_v4  ;;  %5273 = vmatprep.subr.bf16.mxu0 %v15499_v7  ;;  %v3943_v4 = vld [vmem:[%s18542_s24 + $0x5a8] sm:$0xff]  ;;  %v15595_v34 = vcombine.high %v3942_v3, %v3950_v47 }
0x10bc   :  { %5316 = vmatprep.subr.bf16.mxu1 %v15501_v12  ;;  %v3951_v7 = vld [vmem:[%s18542_s24 + $0x5e8] sm:$0xff]  ;;  %v5074_v12 = vsel %vm265_vm0, %v15610_v43, 0  ;;  %v3849_v43 = vld [vmem:[%s18542_s24 + $0x2b8] sm:$0xff] }
0x10bd   :  { %v15597_v52 = vcombine.high %v3943_v4, %v3951_v7  ;;  %v15596_v55 = vcombine.low %v3943_v4, %v3951_v7  ;;  %v3832_v7 = vld [vmem:[%s18542_s24 + $0x230] sm:$0xff] }
0x10be   :  { %5274 = vmatpush1.bf16.msra.mxu0 %v15498_v46  ;;  %v3934_v46 = vld [vmem:[%s18542_s24 + $0x560] sm:$0xff] }
0x10bf   :  { %5317 = vmatpush1.bf16.msra.mxu1 %v15500_v25  ;;  %5275 = vmatprep.subr.bf16.mxu0 %v15483_v53  ;;  %v3927_v25 = vld [vmem:[%s18542_s24 + $0x528] sm:$0xff]  ;;  %v15579_v50 = vcombine.high %v3926_v21, %v3934_v46 }
0x10c0   :  { %5318 = vmatprep.subr.bf16.mxu1 %v15485_v54  ;;  %v3935_v53 = vld [vmem:[%s18542_s24 + $0x568] sm:$0xff]  ;;  %v15594_v54 = vcombine.low %v3942_v3, %v3950_v47 }
0x10c1   :  { %v15581_v56 = vcombine.high %v3927_v25, %v3935_v53  ;;  %v15580_v61 = vcombine.low %v3927_v25, %v3935_v53  ;;  %v3816_v25 = vld [vmem:[%s18542_s24 + $0x1b0] sm:$0xff] }
0x10c2   :  { %5276 = vmatpush1.bf16.msra.mxu0 %v15482_v57  ;;  %v3918_v57 = vld [vmem:[%s18542_s24 + $0x4e0] sm:$0xff]  ;;  %v3824_v53 = vld [vmem:[%s18542_s24 + $0x1f0] sm:$0xff] }
0x10c3   :  { %5319 = vmatpush1.bf16.msra.mxu1 %v15484_v58  ;;  %5277 = vmatprep.subr.bf16.mxu0 %v15467_v59  ;;  %v3911_v58 = vld [vmem:[%s18542_s24 + $0x4a8] sm:$0xff]  ;;  %v15563_v62 = vcombine.high %v3910_v49, %v3918_v57 }
0x10c4   :  { %5320 = vmatprep.subr.bf16.mxu1 %v15469_v60  ;;  %v3919_v59 = vld [vmem:[%s18542_s24 + $0x4e8] sm:$0xff]  ;;  %v15578_v60 = vcombine.low %v3926_v21, %v3934_v46 }
0x10c5   :  { %v15565_v63 = vcombine.high %v3911_v58, %v3919_v59  ;;  %v15564_v14 = vcombine.low %v3911_v58, %v3919_v59  ;;  %v3800_v58 = vld [vmem:[%s18542_s24 + $0x130] sm:$0xff] }
0x10c6   :  { %5278 = vmatpush1.bf16.msra.mxu0 %v15466_v2  ;;  %v3902_v2 = vld [vmem:[%s18542_s24 + $0x460] sm:$0xff]  ;;  %v3808_v59 = vld [vmem:[%s18542_s24 + $0x170] sm:$0xff] }
0x10c7   :  { %5321 = vmatpush1.bf16.msra.mxu1 %v15468_v5  ;;  %5279 = vmatprep.subr.bf16.mxu0 %v15451_v23  ;;  %v3895_v5 = vld [vmem:[%s18542_s24 + $0x428] sm:$0xff]  ;;  %v15547_v15 = vcombine.high %v3894_v0, %v3902_v2 }
0x10c8   :  { %5322 = vmatprep.subr.bf16.mxu1 %v15453_v13  ;;  %v3903_v23 = vld [vmem:[%s18542_s24 + $0x468] sm:$0xff]  ;;  %v15562_v13 = vcombine.low %v3910_v49, %v3918_v57  ;;  %v15471_v49 = vcombine.high %v3816_v25, %v3824_v53 }
0x10c9   :  { %v15549_v16 = vcombine.high %v3895_v5, %v3903_v23  ;;  %v15548_v19 = vcombine.low %v3895_v5, %v3903_v23  ;;  %v3784_v5 = vld [vmem:[%s18542_s24 + $0xb0] sm:$0xff] }
0x10ca   :  { %5280 = vmatpush1.bf16.msra.mxu0 %v15450_v8  ;;  %v3888_v8 = vld [vmem:[%s18542_s24 + $0x3f0] sm:$0xff] }
0x10cb   :  { %5323 = vmatpush1.bf16.msra.mxu1 %v15452_v10  ;;  %5281 = vmatprep.subr.bf16.mxu0 %v15435_v17  ;;  %v3881_v10 = vld [vmem:[%s18542_s24 + $0x3b8] sm:$0xff]  ;;  %v15535_v20 = vcombine.high %v3880_v6, %v3888_v8  ;;  %v3792_v23 = vld [vmem:[%s18542_s24 + $0xf0] sm:$0xff] }
0x10cc   :  { %5324 = vmatprep.subr.bf16.mxu1 %v15437_v18  ;;  %v3889_v17 = vld [vmem:[%s18542_s24 + $0x3f8] sm:$0xff]  ;;  %v15546_v18 = vcombine.low %v3894_v0, %v3902_v2  ;;  %v15455_v0 = vcombine.high %v3800_v58, %v3808_v59 }
0x10cd   :  { %v15537_v22 = vcombine.high %v3881_v10, %v3889_v17  ;;  %v15536_v36 = vcombine.low %v3881_v10, %v3889_v17  ;;  %v3768_v10 = vld [vmem:[%s18542_s24 + $0x30] sm:$0xff] }
0x10ce   :  { %5282 = vmatpush1.bf16.msra.mxu0 %v15434_v30  ;;  %v3872_v30 = vld [vmem:[%s18542_s24 + $0x370] sm:$0xff] }
0x10cf   :  { %5325 = vmatpush1.bf16.msra.mxu1 %v15436_v31  ;;  %5283 = vmatprep.subr.bf16.mxu0 %v15419_v32  ;;  %v15534_v31 = vcombine.low %v3880_v6, %v3888_v8  ;;  %v3865_v32 = vld [vmem:[%s18542_s24 + $0x338] sm:$0xff]  ;;  %v15519_v39 = vcombine.high %v3864_v28, %v3872_v30  ;;  %v15518_v45 = vcombine.low %v3864_v28, %v3872_v30  ;;  %v3776_v17 = vld [vmem:[%s18542_s24 + $0x70] sm:$0xff] }
0x10d0   :  { %5326 = vmatprep.subr.bf16.mxu1 %v15421_v33  ;;  %v3873_v33 = vld [vmem:[%s18542_s24 + $0x378] sm:$0xff]  ;;  %v15439_v6 = vcombine.high %v3784_v5, %v3792_v23  ;;  %v15423_v28 = vcombine.high %v3768_v10, %v3776_v17 }
0x10d1   :  { %v15520_v3 = vcombine.low %v3865_v32, %v3873_v33 }
0x10d2   :  { %5284 = vmatpush1.bf16.msra.mxu0 %v15418_v40  ;;  %v3848_v40 = vld [vmem:[%s18542_s24 + $0x2b0] sm:$0xff] }
0x10d3   :  { %5327 = vmatpush1.bf16.msra.mxu1 %v15420_v41  ;;  %15626 = vmatprep.subr.msk.bf16.mxu0 %vm265_vm0, %v15611_v42  ;;  %v3856_v41 = vld [vmem:[%s18542_s24 + $0x2f0] sm:$0xff]  ;;  %v15521_v42 = vcombine.high %v3865_v32, %v3873_v33  ;;  %v3961_v32 = vld [vmem:[%s18542_s24 + $0x638] sm:$0xff]  ;;  %v15422_v33 = vcombine.low %v3768_v10, %v3776_v17  ;;  %v17358_v10 = vld [vmem:[%s18552_s6 + $0x64] ss:$8 sps:$4 sm:$0xff]  }
0x10d4   :  { %15628 = vmatprep.subr.msk.bf16.mxu1 %vm265_vm0, %v15613_v44  ;;  %v3857_v44 = vld [vmem:[%s18542_s24 + $0x2f8] sm:$0xff]  ;;  %v15503_v47 = vcombine.high %v3848_v40, %v3856_v41  ;;  %v17361_v17 = vld [vmem:[%s18552_s6 + $0x164] ss:$8 sps:$4 sm:$0xff]  }
0x10d5   :  { %v15505_v4 = vcombine.high %v3849_v43, %v3857_v44  ;;  %v15504_v21 = vcombine.low %v3849_v43, %v3857_v44  ;;  %v3944_v43 = vld [vmem:[%s18542_s24 + $0x5b0] sm:$0xff] }
0x10d6   :  { %5292 = vmatpush2.bf16.msra.mxu0 %v5074_v12  ;;  %v3840_v12 = vld [vmem:[%s18542_s24 + $0x270] sm:$0xff] }
0x10d7   :  { %5335 = vmatpush2.bf16.msra.mxu1 %v5080_v51  ;;  %5293 = vmatprep.subr.bf16.mxu0 %v15595_v34  ;;  %v3833_v34 = vld [vmem:[%s18542_s24 + $0x238] sm:$0xff]  ;;  %v15487_v46 = vcombine.high %v3832_v7, %v3840_v12  ;;  %v3952_v44 = vld [vmem:[%s18542_s24 + $0x5f0] sm:$0xff] }
0x10d8   :  { %5336 = vmatprep.subr.bf16.mxu1 %v15597_v52  ;;  %v3841_v51 = vld [vmem:[%s18542_s24 + $0x278] sm:$0xff]  ;;  %v15502_v52 = vcombine.low %v3848_v40, %v3856_v41  ;;  %v15617_v41 = vcombine.high %v3961_v32, %v3961_v32 }
0x10da   :  { %5294 = vmatpush2.bf16.msra.mxu0 %v15594_v54  ;;  %v3817_v54 = vld [vmem:[%s18542_s24 + $0x1b8] sm:$0xff] }
0x10db   :  { %5337 = vmatpush2.bf16.msra.mxu1 %v15596_v55  ;;  %5295 = vmatprep.subr.bf16.mxu0 %v15579_v50  ;;  %v3825_v55 = vld [vmem:[%s18542_s24 + $0x1f8] sm:$0xff]  ;;  %v15486_v50 = vcombine.low %v3832_v7, %v3840_v12 }
0x10dc   :  { %5338 = vmatprep.subr.bf16.mxu1 %v15581_v56  ;;  %v15488_v56 = vcombine.low %v3833_v34, %v3841_v51  ;;  %v15473_v57 = vcombine.high %v3817_v54, %v3825_v55 }
0x10de   :  { %5296 = vmatpush2.bf16.msra.mxu0 %v15578_v60  ;;  %v3801_v60 = vld [vmem:[%s18542_s24 + $0x138] sm:$0xff] }
0x10df   :  { %5339 = vmatpush2.bf16.msra.mxu1 %v15580_v61  ;;  %5297 = vmatprep.subr.bf16.mxu0 %v15563_v62  ;;  %v3809_v61 = vld [vmem:[%s18542_s24 + $0x178] sm:$0xff]  ;;  %v15470_v62 = vcombine.low %v3816_v25, %v3824_v53 }
0x10e0   :  { %5340 = vmatprep.subr.bf16.mxu1 %v15565_v63  ;;  %v15472_v63 = vcombine.low %v3817_v54, %v3825_v55  ;;  %v15457_v2 = vcombine.high %v3801_v60, %v3809_v61  ;;  %v3912_v54 = vld [vmem:[%s18542_s24 + $0x4b0] sm:$0xff] }
0x10e1   :  { %v3920_v55 = vld [vmem:[%s18542_s24 + $0x4f0] sm:$0xff] }
0x10e2   :  { %5298 = vmatpush2.bf16.msra.mxu0 %v15562_v13  ;;  %v3785_v13 = vld [vmem:[%s18542_s24 + $0xb8] sm:$0xff] }
0x10e3   :  { %5341 = vmatpush2.bf16.msra.mxu1 %v15564_v14  ;;  %5299 = vmatprep.subr.bf16.mxu0 %v15547_v15  ;;  %v3793_v14 = vld [vmem:[%s18542_s24 + $0xf8] sm:$0xff]  ;;  %v15454_v15 = vcombine.low %v3800_v58, %v3808_v59  ;;  %v15567_v58 = vcombine.high %v3912_v54, %v3920_v55 }
0x10e4   :  { %5342 = vmatprep.subr.bf16.mxu1 %v15549_v16  ;;  %v15456_v16 = vcombine.low %v3801_v60, %v3809_v61  ;;  %v15441_v8 = vcombine.high %v3785_v13, %v3793_v14  ;;  %v3896_v60 = vld [vmem:[%s18542_s24 + $0x430] sm:$0xff] }
0x10e5   :  { %v3904_v61 = vld [vmem:[%s18542_s24 + $0x470] sm:$0xff] }
0x10e6   :  { %5300 = vmatpush2.bf16.msra.mxu0 %v15546_v18  ;;  %v3769_v18 = vld [vmem:[%s18542_s24 + $0x38] sm:$0xff] }
0x10e7   :  { %5343 = vmatpush2.bf16.msra.mxu1 %v15548_v19  ;;  %5355 = vmatprep.subr.bf16.mxu0 %v15535_v20  ;;  %v3777_v19 = vld [vmem:[%s18542_s24 + $0x78] sm:$0xff]  ;;  %v15438_v20 = vcombine.low %v3784_v5, %v3792_v23  ;;  %v15551_v5 = vcombine.high %v3896_v60, %v3904_v61 }
0x10e8   :  { %5398 = vmatprep.subr.bf16.mxu1 %v15537_v22  ;;  %v15440_v22 = vcombine.low %v3785_v13, %v3793_v14  ;;  %v15425_v30 = vcombine.high %v3769_v18, %v3777_v19  ;;  %v15550_v13 = vcombine.low %v3896_v60, %v3904_v61 }
0x10e9   :  { %5302 = vmatmul.mubr.bf16.vlgmr.msra.gmra.mxu0 %v19349_v24 }
0x10ea   :  { %5345 = vmatmul.mubr.bf16.vlgmr.msra.gmra.mxu1 %v19349_v24  ;;  %5356 = vmatpush1.bf16.msra.mxu0 %v15534_v31  ;;  %v3960_v31 = vld [vmem:[%s18542_s24 + $0x630] sm:$0xff] }
0x10eb   :  { %15631 = vmatprep.mubr.msk.bf16.mxu0 %vm261_vm1, %v19353_v11  ;;  %5399 = vmatpush1.bf16.msra.mxu1 %v15536_v36  ;;  %v15424_v36 = vcombine.low %v3769_v18, %v3777_v19  ;;  %v15614_v40 = vcombine.low %v3960_v31, %v3960_v31  ;;  %v17356_v18 = vld [vmem:[%s18552_s6 + $0x60] ss:$8 sps:$4 sm:$0xff]  }
0x10ec   :  { %15633 = vmatprep.mubr.msk.bf16.mxu1 %vm261_vm1, %v19353_v11  ;;  %5357 = vmatprep.subr.bf16.mxu0 %v15519_v39  ;;  %v15489_v11 = vcombine.high %v3833_v34, %v3841_v51  ;;  %v15615_v39 = vcombine.high %v3960_v31, %v3960_v31  ;;  %v3928_v34 = vld [vmem:[%s18542_s24 + $0x530] sm:$0xff]  ;;  %v17359_v19 = vld [vmem:[%s18552_s6 + $0x160] ss:$8 sps:$4 sm:$0xff]   ;;  %v17373_v31 = vld [vmem:[%s18552_s6 + $0x144] ss:$8 sps:$4 sm:$0xff]  }
0x10ed   :  { %5400 = vmatprep.subr.bf16.mxu1 %v15521_v42  ;;  %v15616_v42 = vcombine.low %v3961_v32, %v3961_v32  ;;  %v3936_v51 = vld [vmem:[%s18542_s24 + $0x570] sm:$0xff]  ;;  %v17368_v32 = vld [vmem:[%s18552_s6 + $0x40] ss:$8 sps:$4 sm:$0xff]  }
0x10ee   :  { %5358 = vmatpush1.bf16.msra.mxu0 %v15518_v45  ;;  %v3945_v45 = vld [vmem:[%s18542_s24 + $0x5b8] sm:$0xff]  ;;  %v15583_v25 = vcombine.high %v3928_v34, %v3936_v51 }
0x10ef   :  { %5401 = vmatpush1.bf16.msra.mxu1 %v15520_v3  ;;  %5359 = vmatprep.subr.bf16.mxu0 %v15503_v47  ;;  %v3953_v3 = vld [vmem:[%s18542_s24 + $0x5f8] sm:$0xff]  ;;  %v5086_v47 = vsel %vm265_vm0, %v15614_v40, 0  ;;  %v5092_v7 = vsel %vm265_vm0, %v15616_v42, 0  ;;  %v17382_v42 = vld [vmem:[%s18552_s6 + $0x24] ss:$8 sps:$4 sm:$0xff]  }
0x10f0   :  { %5402 = vmatprep.subr.bf16.mxu1 %v15505_v4  ;;  %v15599_v4 = vcombine.high %v3944_v43, %v3952_v44  ;;  %v15601_v12 = vcombine.high %v3945_v45, %v3953_v3  ;;  %v17374_v40 = vld [vmem:[%s18552_s6 + $0x30] ss:$8 sps:$4 sm:$0xff]  }
0x10f2   :  { %5360 = vmatpush1.bf16.msra.mxu0 %v15502_v52  ;;  %v3929_v52 = vld [vmem:[%s18542_s24 + $0x538] sm:$0xff] }
0x10f3   :  { %5403 = vmatpush1.bf16.msra.mxu1 %v15504_v21  ;;  %5361 = vmatprep.subr.bf16.mxu0 %v15487_v46  ;;  %v3937_v21 = vld [vmem:[%s18542_s24 + $0x578] sm:$0xff]  ;;  %v15598_v46 = vcombine.low %v3944_v43, %v3952_v44  ;;  %v17385_v43 = vld [vmem:[%s18552_s6 + $0x124] ss:$8 sps:$4 sm:$0xff]   ;;  %v17380_v44 = vld [vmem:[%s18552_s6 + $0x20] ss:$8 sps:$4 sm:$0xff]  }
0x10f4   :  { %5404 = vmatprep.subr.bf16.mxu1 %v15489_v11  ;;  %v15600_v11 = vcombine.low %v3945_v45, %v3953_v3  ;;  %v15585_v53 = vcombine.high %v3929_v52, %v3937_v21  ;;  %v17383_v45 = vld [vmem:[%s18552_s6 + $0x120] ss:$8 sps:$4 sm:$0xff]   ;;  %v17388_v3 = vld [vmem:[%s18552_s6 + $0x14] ss:$8 sps:$4 sm:$0xff]  }
0x10f6   :  { %5362 = vmatpush1.bf16.msra.mxu0 %v15486_v50  ;;  %v3913_v50 = vld [vmem:[%s18542_s24 + $0x4b8] sm:$0xff] }
0x10f7   :  { %5405 = vmatpush1.bf16.msra.mxu1 %v15488_v56  ;;  %5363 = vmatprep.subr.bf16.mxu0 %v15471_v49  ;;  %v3921_v56 = vld [vmem:[%s18542_s24 + $0x4f8] sm:$0xff]  ;;  %v15582_v49 = vcombine.low %v3928_v34, %v3936_v51  ;;  %v17397_v34 = vld [vmem:[%s18552_s6 + $0x104] ss:$8 sps:$4 sm:$0xff]   ;;  %v17392_v51 = vld [vmem:[%s18552_s6] ss:$8 sps:$4 sm:$0xff]  }
0x10f8   :  { %5406 = vmatprep.subr.bf16.mxu1 %v15473_v57  ;;  %v15584_v57 = vcombine.low %v3929_v52, %v3937_v21  ;;  %v15569_v59 = vcombine.high %v3913_v50, %v3921_v56  ;;  %v17395_v52 = vld [vmem:[%s18552_s6 + $0x100] ss:$8 sps:$4 sm:$0xff]   ;;  %v17400_v21 = vld [vmem:[%s18552_s6 + $0xf4] ss:$8 sps:$4 sm:$0xff]  }
0x10fa   :  { %5364 = vmatpush1.bf16.msra.mxu0 %v15470_v62  ;;  %v3897_v62 = vld [vmem:[%s18542_s24 + $0x438] sm:$0xff] }
0x10fb   :  { %5407 = vmatpush1.bf16.msra.mxu1 %v15472_v63  ;;  %5365 = vmatprep.subr.bf16.mxu0 %v15455_v0  ;;  %v3905_v63 = vld [vmem:[%s18542_s24 + $0x478] sm:$0xff]  ;;  %v15566_v0 = vcombine.low %v3912_v54, %v3920_v55  ;;  %v17409_v54 = vld [vmem:[%s18552_s6 + $0x1e4] ss:$8 sps:$4 sm:$0xff]   ;;  %v17404_v55 = vld [vmem:[%s18552_s6 + $0xe0] ss:$8 sps:$4 sm:$0xff]   ;;  %s21267_s24 = sld [smem:[#allocation16_spill]] }
0x10fc   :  { %5408 = vmatprep.subr.bf16.mxu1 %v15457_v2  ;;  %v15568_v2 = vcombine.low %v3913_v50, %v3921_v56  ;;  %v15553_v23 = vcombine.high %v3897_v62, %v3905_v63  ;;  %v15552_v14 = vcombine.low %v3897_v62, %v3905_v63  ;;  %v19573_v50 = vsub.s32 3, %v19210_v26  ;;  %v17407_v56 = vld [vmem:[%s18552_s6 + $0x1e0] ss:$8 sps:$4 sm:$0xff]   ;;  %v17410_v63 = vld [vmem:[%s18552_s6 + $0xd0] ss:$8 sps:$4 sm:$0xff]  }
0x10fe   :  { %5366 = vmatpush1.bf16.msra.mxu0 %v15454_v15  ;;  %v17352_v15 = vld [vmem:[%s18552_s6 + $0x74] ss:$8 sps:$4 sm:$0xff]  }
0x10ff   :  { %5409 = vmatpush1.bf16.msra.mxu1 %v15456_v16  ;;  %5367 = vmatprep.subr.bf16.mxu0 %v15439_v6  ;;  %v17355_v16 = vld [vmem:[%s18552_s6 + $0x174] ss:$8 sps:$4 sm:$0xff]   ;;  %v17350_v6 = vld [vmem:[%s18552_s6 + $0x70] ss:$8 sps:$4 sm:$0xff]  }
0x1100   :  { %5410 = vmatprep.subr.bf16.mxu1 %v15441_v8  ;;  %v17353_v8 = vld [vmem:[%s18552_s6 + $0x170] ss:$8 sps:$4 sm:$0xff]  }
0x1102   :  { %5368 = vmatpush1.bf16.msra.mxu0 %v15438_v20  ;;  %v17364_v20 = vld [vmem:[%s18552_s6 + $0x54] ss:$8 sps:$4 sm:$0xff]  }
0x1103   :  { %5411 = vmatpush1.bf16.msra.mxu1 %v15440_v22  ;;  %5369 = vmatprep.subr.bf16.mxu0 %v15423_v28  ;;  %v17367_v22 = vld [vmem:[%s18552_s6 + $0x154] ss:$8 sps:$4 sm:$0xff]   ;;  %v17362_v28 = vld [vmem:[%s18552_s6 + $0x50] ss:$8 sps:$4 sm:$0xff]  }
0x1104   :  { %5412 = vmatprep.subr.bf16.mxu1 %v15425_v30  ;;  %v17365_v30 = vld [vmem:[%s18552_s6 + $0x150] ss:$8 sps:$4 sm:$0xff]  }
0x1106   :  { %5370 = vmatpush1.bf16.msra.mxu0 %v15422_v33  ;;  %v17371_v33 = vld [vmem:[%s18552_s6 + $0x140] ss:$8 sps:$4 sm:$0xff]  }
0x1107   :  { %5413 = vmatpush1.bf16.msra.mxu1 %v15424_v36  ;;  %15630 = vmatprep.subr.msk.bf16.mxu0 %vm265_vm0, %v15615_v39  ;;  %v17376_v36 = vld [vmem:[%s18552_s6 + $0x34] ss:$8 sps:$4 sm:$0xff]  }
0x1108   :  { %15632 = vmatprep.subr.msk.bf16.mxu1 %vm265_vm0, %v15617_v41  ;;  %v17379_v39 = vld [vmem:[%s18552_s6 + $0x134] ss:$8 sps:$4 sm:$0xff]   ;;  %v17377_v41 = vld [vmem:[%s18552_s6 + $0x130] ss:$8 sps:$4 sm:$0xff]  }
0x110a   :  { %5378 = vmatpush2.bf16.msra.mxu0 %v5086_v47  ;;  %v17391_v47 = vld [vmem:[%s18552_s6 + $0x114] ss:$8 sps:$4 sm:$0xff]  }
0x110b   :  { %5421 = vmatpush2.bf16.msra.mxu1 %v5092_v7  ;;  %5379 = vmatprep.subr.bf16.mxu0 %v15599_v4  ;;  %v17386_v4 = vld [vmem:[%s18552_s6 + $0x10] ss:$8 sps:$4 sm:$0xff]  }
0x110c   :  { %5422 = vmatprep.subr.bf16.mxu1 %v15601_v12  ;;  %v17389_v7 = vld [vmem:[%s18552_s6 + $0x110] ss:$8 sps:$4 sm:$0xff]   ;;  %v17394_v12 = vld [vmem:[%s18552_s6 + $0x4] ss:$8 sps:$4 sm:$0xff]  }
0x110e   :  { %5380 = vmatpush2.bf16.msra.mxu0 %v15598_v46  ;;  %v17403_v46 = vld [vmem:[%s18552_s6 + $0x1f4] ss:$8 sps:$4 sm:$0xff]  }
0x110f   :  { %5423 = vmatpush2.bf16.msra.mxu1 %v15600_v11  ;;  %5381 = vmatprep.subr.bf16.mxu0 %v15583_v25  ;;  %v17398_v11 = vld [vmem:[%s18552_s6 + $0xf0] ss:$8 sps:$4 sm:$0xff]  }
0x1110   :  { %5424 = vmatprep.subr.bf16.mxu1 %v15585_v53  ;;  %v17401_v25 = vld [vmem:[%s18552_s6 + $0x1f0] ss:$8 sps:$4 sm:$0xff]   ;;  %v17406_v53 = vld [vmem:[%s18552_s6 + $0xe4] ss:$8 sps:$4 sm:$0xff]  }
0x1112   :  { %5382 = vmatpush2.bf16.msra.mxu0 %v15582_v49  ;;  %v17412_v49 = vld [vmem:[%s18552_s6 + $0xd4] ss:$8 sps:$4 sm:$0xff]  }
0x1113   :  { %5425 = vmatpush2.bf16.msra.mxu1 %v15584_v57  ;;  %5383 = vmatprep.subr.bf16.mxu0 %v15567_v58  ;;  %v17415_v57 = vld [vmem:[%s18552_s6 + $0x1d4] ss:$8 sps:$4 sm:$0xff]   ;;  %v19579_v58 = vld [vmem:[%s18547_s30] sm:$0xff] }
0x1114   :  { %5426 = vmatprep.subr.bf16.mxu1 %v15569_v59  ;;  %v3973_v61 = vrot.slane %v19579_v58, %v19217_v29  ;;  %v3981_v62 = vrot.slane %v19579_v58, %v19573_v50 }
0x1116   :  { %5384 = vmatpush2.bf16.msra.mxu0 %v15566_v0 }
0x1117   :  { %5427 = vmatpush2.bf16.msra.mxu1 %v15568_v2  ;;  %5385 = vmatprep.subr.bf16.mxu0 %v15551_v5  ;;  %v17413_v5 = vld [vmem:[%s18552_s6 + $0x1d0] ss:$8 sps:$4 sm:$0xff]  }
0x1118   :  { %5428 = vmatprep.subr.bf16.mxu1 %v15553_v23  ;;  %v17418_v23 = vld [vmem:[%s18552_s6 + $0xc4] ss:$8 sps:$4 sm:$0xff]  }
0x111a   :  { %5386 = vmatpush2.bf16.msra.mxu0 %v15550_v13  ;;  %v17421_v13 = vld [vmem:[%s18552_s6 + $0x1c4] ss:$8 sps:$4 sm:$0xff]  }
0x111b   :  { %5429 = vmatpush2.bf16.msra.mxu1 %v15552_v14  ;;  %7037 = vmatprep.subr.bf16.mxu0 %v17352_v15 }
0x111c   :  { %7080 = vmatprep.subr.bf16.mxu1 %v17355_v16 }
0x111d   :  { %5388 = vmatmul.mubr.bf16.vlgmr.msra.gmra.mxu0 %v19349_v24 }
0x111e   :  { %5431 = vmatmul.mubr.bf16.vlgmr.msra.gmra.mxu1 %v19349_v24  ;;  %7038 = vmatpush1.bf16.msra.mxu0 %v17350_v6  ;;  %v17370_v24 = vld [vmem:[%s18552_s6 + $0x44] ss:$8 sps:$4 sm:$0xff]  }
0x111f   :  { %7081 = vmatpush1.bf16.msra.mxu1 %v17353_v8  ;;  %7039 = vmatprep.subr.bf16.mxu0 %v17358_v10  ;;  %v17416_v8 = vld [vmem:[%s18552_s6 + $0xc0] ss:$8 sps:$4 sm:$0xff]  }
0x1120   :  { %7082 = vmatprep.subr.bf16.mxu1 %v17361_v17 }
0x1122   :  { %7040 = vmatpush1.bf16.msra.mxu0 %v17356_v18  ;;  %v17419_v18 = vld [vmem:[%s18552_s6 + $0x1c0] ss:$8 sps:$4 sm:$0xff]  }
0x1123   :  { %7083 = vmatpush1.bf16.msra.mxu1 %v17359_v19  ;;  %7041 = vmatprep.subr.bf16.mxu0 %v17364_v20  ;;  %v17424_v19 = vld [vmem:[%s18552_s6 + $0xb4] ss:$8 sps:$4 sm:$0xff]  }
0x1124   :  { %7084 = vmatprep.subr.bf16.mxu1 %v17367_v22 }
0x1126   :  { %7042 = vmatpush1.bf16.msra.mxu0 %v17362_v28  ;;  %v17427_v28 = vld [vmem:[%s18552_s6 + $0x1b4] ss:$8 sps:$4 sm:$0xff]  }
0x1127   :  { %7085 = vmatpush1.bf16.msra.mxu1 %v17365_v30  ;;  %7043 = vmatprep.subr.bf16.mxu0 %v17370_v24 }
0x1128   :  { %7086 = vmatprep.subr.bf16.mxu1 %v17373_v31 }
0x112a   :  { %7044 = vmatpush1.bf16.msra.mxu0 %v17368_v32 }
0x112b   :  { %7087 = vmatpush1.bf16.msra.mxu1 %v17371_v33  ;;  %7045 = vmatprep.subr.bf16.mxu0 %v17376_v36  ;;  %v17422_v33 = vld [vmem:[%s18552_s6 + $0xb0] ss:$8 sps:$4 sm:$0xff]  }
0x112c   :  { %7088 = vmatprep.subr.bf16.mxu1 %v17379_v39  ;;  %v17425_v36 = vld [vmem:[%s18552_s6 + $0x1b0] ss:$8 sps:$4 sm:$0xff]  }
0x112e   :  { %7046 = vmatpush1.bf16.msra.mxu0 %v17374_v40 }
0x112f   :  { %7089 = vmatpush1.bf16.msra.mxu1 %v17377_v41  ;;  %7047 = vmatprep.subr.bf16.mxu0 %v17382_v42  ;;  %v17430_v41 = vld [vmem:[%s18552_s6 + $0xa4] ss:$8 sps:$4 sm:$0xff]  }
0x1130   :  { %7090 = vmatprep.subr.bf16.mxu1 %v17385_v43  ;;  %v17433_v42 = vld [vmem:[%s18552_s6 + $0x1a4] ss:$8 sps:$4 sm:$0xff]   ;;  %v19602_v43 = vsub.s32 2, %v19210_v26 }
0x1132   :  { %7048 = vmatpush1.bf16.msra.mxu0 %v17380_v44  ;;  %v17428_v44 = vld [vmem:[%s18552_s6 + $0xa0] ss:$8 sps:$4 sm:$0xff]  }
0x1133   :  { %7091 = vmatpush1.bf16.msra.mxu1 %v17383_v45  ;;  %7049 = vmatprep.subr.bf16.mxu0 %v17388_v3  ;;  %v17431_v45 = vld [vmem:[%s18552_s6 + $0x1a0] ss:$8 sps:$4 sm:$0xff]   ;;  %v17436_v3 = vld [vmem:[%s18552_s6 + $0x94] ss:$8 sps:$4 sm:$0xff]  }
0x1134   :  { %7092 = vmatprep.subr.bf16.mxu1 %v17391_v47  ;;  %v17439_v47 = vld [vmem:[%s18552_s6 + $0x194] ss:$8 sps:$4 sm:$0xff]  }
0x1136   :  { %7050 = vmatpush1.bf16.msra.mxu0 %v17386_v4  ;;  %v3969_v4 = vrot.slane %v19579_v58, %v19213_v27 }
0x1137   :  { %7093 = vmatpush1.bf16.msra.mxu1 %v17389_v7  ;;  %7051 = vmatprep.subr.bf16.mxu0 %v17394_v12  ;;  %v3977_v7 = vrot.slane %v19579_v58, %v19602_v43  ;;  %v17434_v12 = vld [vmem:[%s18552_s6 + $0x90] ss:$8 sps:$4 sm:$0xff]  }
0x1138   :  { %7094 = vmatprep.subr.bf16.mxu1 %v17397_v34 }
0x113a   :  { %7052 = vmatpush1.bf16.msra.mxu0 %v17392_v51  ;;  %v17437_v51 = vld [vmem:[%s18552_s6 + $0x190] ss:$8 sps:$4 sm:$0xff]  }
0x113b   :  { %7095 = vmatpush1.bf16.msra.mxu1 %v17395_v52  ;;  %7053 = vmatprep.subr.bf16.mxu0 %v17400_v21  ;;  %v17442_v52 = vld [vmem:[%s18552_s6 + $0x84] ss:$8 sps:$4 sm:$0xff]  }
0x113c   :  { %7096 = vmatprep.subr.bf16.mxu1 %v17403_v46  ;;  %v17445_v46 = vld [vmem:[%s18552_s6 + $0x184] ss:$8 sps:$4 sm:$0xff]  }
0x113e   :  { %7054 = vmatpush2.bf16.msra.mxu0 %v17398_v11 }
0x113f   :  { %7097 = vmatpush2.bf16.msra.mxu1 %v17401_v25  ;;  %7055 = vmatprep.subr.bf16.mxu0 %v17406_v53  ;;  %v17440_v53 = vld [vmem:[%s18552_s6 + $0x80] ss:$8 sps:$4 sm:$0xff]  }
0x1140   :  { %7098 = vmatprep.subr.bf16.mxu1 %v17409_v54 }
0x1141   :  { %v19581_v59 = vpop.f32.mrf.mxu0  ;;  %v19583_v60 = vpop.f32.mrf.mxu1 }
0x1142   :  { %7056 = vmatpush2.bf16.msra.mxu0 %v17404_v55  ;;  %v5132_v11 = vadd.f32 %v19581_v59, %v3969_v4  ;;  %v5175_v25 = vadd.f32 %v19583_v60, %v3977_v7  ;;  %v17443_v55 = vld [vmem:[%s18552_s6 + $0x180] ss:$8 sps:$4 sm:$0xff]   ;;  %v17446_v59 = vld [vmem:[%s18552_s6 + $0x270] ss:$8 sps:$4 sm:$0xff]  }
0x1143   :  { %7099 = vmatpush2.bf16.msra.mxu1 %v17407_v56  ;;  %v5133_v0 = vpop.f32.mrf.mxu0  ;;  %v5176_v2 = vpop.f32.mrf.mxu1  ;;  %7057 = vmatprep.subr.bf16.mxu0 %v17412_v49  ;;  %v17448_v56 = vld [vmem:[%s18552_s6 + $0x274] ss:$8 sps:$4 sm:$0xff]  }
0x1144   :  { %7100 = vmatprep.subr.bf16.mxu1 %v17415_v57  ;;  %v5134_v16 = vadd.f32 %v5133_v0, %v3973_v61  ;;  %v5177_v6 = vadd.f32 %v5176_v2, %v3981_v62  ;;  %v17451_v57 = vld [vmem:[%s18552_s6 + $0x374] ss:$8 sps:$4 sm:$0xff]   ;;  %v17454_v0 = vld [vmem:[%s18552_s6 + $0x264] ss:$8 sps:$4 sm:$0xff]  }
0x1145   :  { %v5135_v14 = vpop.f32.mrf.mxu0  ;;  %v5178_v15 = vpop.f32.mrf.mxu1 }
0x1146   :  { %7058 = vmatpush2.bf16.msra.mxu0 %v17410_v63  ;;  %v5442_v30 = vmax.f32 %v5134_v16, 0.0  ;;  %v5444_v24 = vmax.f32 %v5177_v6, 0.0  ;;  %v5136_v34 = vadd.f32 %v5135_v14, %v3969_v4  ;;  %v5179_v21 = vadd.f32 %v5178_v15, %v3977_v7  ;;  %v17449_v63 = vld [vmem:[%s18552_s6 + $0x370] ss:$8 sps:$4 sm:$0xff]   ;;  %v17460_v14 = vld [vmem:[%s18552_s6 + $0x254] ss:$8 sps:$4 sm:$0xff]  }
0x1147   :  { %7101 = vmatpush2.bf16.msra.mxu1 %v17413_v5  ;;  %v5137_v10 = vpop.f32.mrf.mxu0  ;;  %v5180_v17 = vpop.f32.mrf.mxu1  ;;  %7059 = vmatprep.subr.bf16.mxu0 %v17418_v23  ;;  %v17457_v5 = vld [vmem:[%s18552_s6 + $0x364] ss:$8 sps:$4 sm:$0xff]   ;;  %v17452_v23 = vld [vmem:[%s18552_s6 + $0x260] ss:$8 sps:$4 sm:$0xff]   ;;  %v17463_v15 = vld [vmem:[%s18552_s6 + $0x354] ss:$8 sps:$4 sm:$0xff]  }
0x1148   :  { %v5138_v20 = vadd.f32 %v5137_v10, %v3973_v61  ;;  %v5181_v22 = vadd.f32 %v5180_v17, %v3981_v62  ;;  %7102 = vmatprep.subr.bf16.mxu1 %v17421_v13  ;;  %v5457_v54 = vmax.f32 %v5136_v34, 0.0  ;;  %v5459_v49 = vmax.f32 %v5179_v21, 0.0  ;;  %v17455_v13 = vld [vmem:[%s18552_s6 + $0x360] ss:$8 sps:$4 sm:$0xff]   ;;  %v17458_v16 = vld [vmem:[%s18552_s6 + $0x250] ss:$8 sps:$4 sm:$0xff]  }
0x1149   :  { %v5441_v61 = vmax.f32 %v5132_v11, 0.0  ;;  %v5443_v62 = vmax.f32 %v5175_v25, 0.0  ;;  %v17461_v6 = vld [vmem:[%s18552_s6 + $0x350] ss:$8 sps:$4 sm:$0xff]   ;;  %v17469_v10 = vld [vmem:[%s18552_s6 + $0x344] ss:$8 sps:$4 sm:$0xff]  }
0x114a   :  { %v5458_v31 = vmax.f32 %v5138_v20, 0.0  ;;  %v5460_v32 = vmax.f32 %v5181_v22, 0.0  ;;  %7060 = vmatpush2.bf16.msra.mxu0 %v17416_v8  ;;  %v17466_v8 = vld [vmem:[%s18552_s6 + $0x244] ss:$8 sps:$4 sm:$0xff]   ;;  %v17464_v17 = vld [vmem:[%s18552_s6 + $0x240] ss:$8 sps:$4 sm:$0xff]  }
0x114b   :  { %7103 = vmatpush2.bf16.msra.mxu1 %v17419_v18  ;;  %7061 = vmatprep.subr.bf16.mxu0 %v17424_v19  ;;  %v5473_v60 = vpack.c.bf16 %v5457_v54, %v5441_v61  ;;  %v5475_v2 = vpack.c.bf16 %v5459_v49, %v5443_v62  ;;  %v17467_v18 = vld [vmem:[%s18552_s6 + $0x340] ss:$8 sps:$4 sm:$0xff]   ;;  %v17472_v19 = vld [vmem:[%s18552_s6 + $0x234] ss:$8 sps:$4 sm:$0xff]   ;;  %v17470_v22 = vld [vmem:[%s18552_s6 + $0x230] ss:$8 sps:$4 sm:$0xff]  }
0x114c   :  { %v5474_v39 = vpack.c.bf16 %v5458_v31, %v5442_v30  ;;  %v5476_v40 = vpack.c.bf16 %v5460_v32, %v5444_v24  ;;  %7104 = vmatprep.subr.bf16.mxu1 %v17427_v28  ;;  %v17475_v20 = vld [vmem:[%s18552_s6 + $0x334] ss:$8 sps:$4 sm:$0xff]   ;;  %v17473_v28 = vld [vmem:[%s18552_s6 + $0x330] ss:$8 sps:$4 sm:$0xff]   ;;  %v17478_v30 = vld [vmem:[%s18552_s6 + $0x224] ss:$8 sps:$4 sm:$0xff]  }
0x114d   :  { %v17481_v24 = vld [vmem:[%s18552_s6 + $0x324] ss:$8 sps:$4 sm:$0xff]   ;;  %v17476_v31 = vld [vmem:[%s18552_s6 + $0x220] ss:$8 sps:$4 sm:$0xff]   ;;  %v17496_v21 = vld [vmem:[%s18552_s6 + $0x2f4] ss:$8 sps:$4 sm:$0xff]  }
0x114e   :  { %7062 = vmatpush2.bf16.msra.mxu0 %v17422_v33  ;;  %7069 = vmatprep.mubr.bf16.mxu0 %v5474_v39  ;;  %v17479_v32 = vld [vmem:[%s18552_s6 + $0x320] ss:$8 sps:$4 sm:$0xff]   ;;  %v17484_v33 = vld [vmem:[%s18552_s6 + $0x214] ss:$8 sps:$4 sm:$0xff]   ;;  %v17482_v39 = vld [vmem:[%s18552_s6 + $0x210] ss:$8 sps:$4 sm:$0xff]  }
0x114f   :  { %7105 = vmatpush2.bf16.msra.mxu1 %v17425_v36  ;;  %7112 = vmatprep.mubr.bf16.mxu1 %v5476_v40  ;;  %v17487_v36 = vld [vmem:[%s18552_s6 + $0x314] ss:$8 sps:$4 sm:$0xff]   ;;  %v19648_v40 = vsub.s32 5, %v19210_v26  ;;  %v17502_v61 = vld [vmem:[%s18552_s6 + $0x2e4] ss:$8 sps:$4 sm:$0xff]  }
0x1150   :  { %7063 = vmatprep.subr.bf16.mxu0 %v17430_v41  ;;  %7106 = vmatprep.subr.bf16.mxu1 %v17433_v42  ;;  %v19651_v41 = vsub.s32 7, %v19210_v26  ;;  %v17485_v42 = vld [vmem:[%s18552_s6 + $0x310] ss:$8 sps:$4 sm:$0xff]  }
0x1151   :  { %v3989_v4 = vrot.slane %v19579_v58, %v19648_v40 }
0x1152   :  { %7064 = vmatpush2.bf16.msra.mxu0 %v17428_v44  ;;  %v17490_v44 = vld [vmem:[%s18552_s6 + $0x204] ss:$8 sps:$4 sm:$0xff]   ;;  %v3997_v7 = vrot.slane %v19579_v58, %v19651_v41 }
0x1153   :  { %7107 = vmatpush2.bf16.msra.mxu1 %v17431_v45  ;;  %7065 = vmatprep.subr.bf16.mxu0 %v17436_v3  ;;  %v17493_v45 = vld [vmem:[%s18552_s6 + $0x304] ss:$8 sps:$4 sm:$0xff]  }
0x1154   :  { %7108 = vmatprep.subr.bf16.mxu1 %v17439_v47 }
0x1156   :  { %7066 = vmatpush2.bf16.msra.mxu0 %v17434_v12  ;;  %v17488_v12 = vld [vmem:[%s18552_s6 + $0x200] ss:$8 sps:$4 sm:$0xff]  }
0x1157   :  { %7109 = vmatpush2.bf16.msra.mxu1 %v17437_v51  ;;  %7067 = vmatprep.subr.bf16.mxu0 %v17442_v52  ;;  %v17491_v52 = vld [vmem:[%s18552_s6 + $0x300] ss:$8 sps:$4 sm:$0xff]  }
0x1158   :  { %7110 = vmatprep.subr.bf16.mxu1 %v17445_v46  ;;  %v17499_v46 = vld [vmem:[%s18552_s6 + $0x3f4] ss:$8 sps:$4 sm:$0xff]  }
0x115a   :  { %7068 = vmatpush2.bf16.msra.mxu0 %v17440_v53 }
0x115b   :  { %7111 = vmatpush2.bf16.msra.mxu1 %v17443_v55  ;;  %7123 = vmatprep.subr.bf16.mxu0 %v17448_v56  ;;  %v17494_v55 = vld [vmem:[%s18552_s6 + $0x2f0] ss:$8 sps:$4 sm:$0xff]  }
0x115c   :  { %7166 = vmatprep.subr.bf16.mxu1 %v17451_v57  ;;  %v17497_v57 = vld [vmem:[%s18552_s6 + $0x3f0] ss:$8 sps:$4 sm:$0xff]  }
0x115d   :  { %7070 = vmatmul.mubr.bf16.vlgmr.msra.gmra.mxu0 %v5473_v60  ;;  %v17505_v60 = vld [vmem:[%s18552_s6 + $0x3e4] ss:$8 sps:$4 sm:$0xff]  }
0x115e   :  { %7113 = vmatmul.mubr.bf16.vlgmr.msra.gmra.mxu1 %v5475_v2  ;;  %7124 = vmatpush1.bf16.msra.mxu0 %v17446_v59 }
0x115f   :  { %7167 = vmatpush1.bf16.msra.mxu1 %v17449_v63  ;;  %7125 = vmatprep.subr.bf16.mxu0 %v17454_v0 }
0x1160   :  { %7168 = vmatprep.subr.bf16.mxu1 %v17457_v5 }
0x1162   :  { %7126 = vmatpush1.bf16.msra.mxu0 %v17452_v23  ;;  %v17500_v23 = vld [vmem:[%s18552_s6 + $0x2e0] ss:$8 sps:$4 sm:$0xff]  }
0x1163   :  { %7169 = vmatpush1.bf16.msra.mxu1 %v17455_v13  ;;  %7127 = vmatprep.subr.bf16.mxu0 %v17460_v14  ;;  %v17503_v13 = vld [vmem:[%s18552_s6 + $0x3e0] ss:$8 sps:$4 sm:$0xff]  }
0x1164   :  { %7170 = vmatprep.subr.bf16.mxu1 %v17463_v15 }
0x1166   :  { %7128 = vmatpush1.bf16.msra.mxu0 %v17458_v16  ;;  %v17508_v16 = vld [vmem:[%s18552_s6 + $0x2d4] ss:$8 sps:$4 sm:$0xff]  }
0x1167   :  { %7171 = vmatpush1.bf16.msra.mxu1 %v17461_v6  ;;  %7129 = vmatprep.subr.bf16.mxu0 %v17466_v8  ;;  %v17511_v6 = vld [vmem:[%s18552_s6 + $0x3d4] ss:$8 sps:$4 sm:$0xff]   ;;  %v17506_v8 = vld [vmem:[%s18552_s6 + $0x2d0] ss:$8 sps:$4 sm:$0xff]  }
0x1168   :  { %7172 = vmatprep.subr.bf16.mxu1 %v17469_v10  ;;  %v17509_v10 = vld [vmem:[%s18552_s6 + $0x3d0] ss:$8 sps:$4 sm:$0xff]  }
0x116a   :  { %7130 = vmatpush1.bf16.msra.mxu0 %v17464_v17  ;;  %v17514_v17 = vld [vmem:[%s18552_s6 + $0x2c4] ss:$8 sps:$4 sm:$0xff]  }
0x116b   :  { %7173 = vmatpush1.bf16.msra.mxu1 %v17467_v18  ;;  %7131 = vmatprep.subr.bf16.mxu0 %v17472_v19  ;;  %v17517_v18 = vld [vmem:[%s18552_s6 + $0x3c4] ss:$8 sps:$4 sm:$0xff]   ;;  %v17512_v19 = vld [vmem:[%s18552_s6 + $0x2c0] ss:$8 sps:$4 sm:$0xff]  }
0x116c   :  { %7174 = vmatprep.subr.bf16.mxu1 %v17475_v20  ;;  %v17515_v20 = vld [vmem:[%s18552_s6 + $0x3c0] ss:$8 sps:$4 sm:$0xff]  }
0x116e   :  { %7132 = vmatpush1.bf16.msra.mxu0 %v17470_v22  ;;  %v17520_v22 = vld [vmem:[%s18552_s6 + $0x2b4] ss:$8 sps:$4 sm:$0xff]  }
0x116f   :  { %7175 = vmatpush1.bf16.msra.mxu1 %v17473_v28  ;;  %7133 = vmatprep.subr.bf16.mxu0 %v17478_v30  ;;  %v17523_v28 = vld [vmem:[%s18552_s6 + $0x3b4] ss:$8 sps:$4 sm:$0xff]   ;;  %v17518_v30 = vld [vmem:[%s18552_s6 + $0x2b0] ss:$8 sps:$4 sm:$0xff]  }
0x1170   :  { %7176 = vmatprep.subr.bf16.mxu1 %v17481_v24  ;;  %v17521_v24 = vld [vmem:[%s18552_s6 + $0x3b0] ss:$8 sps:$4 sm:$0xff]  }
0x1172   :  { %7134 = vmatpush1.bf16.msra.mxu0 %v17476_v31  ;;  %v17526_v31 = vld [vmem:[%s18552_s6 + $0x2a4] ss:$8 sps:$4 sm:$0xff]  }
0x1173   :  { %7177 = vmatpush1.bf16.msra.mxu1 %v17479_v32  ;;  %7135 = vmatprep.subr.bf16.mxu0 %v17484_v33  ;;  %v17529_v32 = vld [vmem:[%s18552_s6 + $0x3a4] ss:$8 sps:$4 sm:$0xff]   ;;  %v19693_v33 = vsub.s32 4, %v19210_v26 }
0x1174   :  { %7178 = vmatprep.subr.bf16.mxu1 %v17487_v36  ;;  %v19696_v36 = vsub.s32 6, %v19210_v26  ;;  %v17530_v26 = vld [vmem:[%s18552_s6 + $0x290] ss:$8 sps:$4 sm:$0xff]  }
0x1175   :  { %v19656_v3 = vpop.f32.mrf.mxu0  ;;  %v19658_v47 = vpop.f32.mrf.mxu1 }
0x1176   :  { %7136 = vmatpush1.bf16.msra.mxu0 %v17482_v39  ;;  %v17524_v39 = vld [vmem:[%s18552_s6 + $0x2a0] ss:$8 sps:$4 sm:$0xff]  }
0x1177   :  { %7179 = vmatpush1.bf16.msra.mxu1 %v17485_v42  ;;  %v5219_v34 = vpop.f32.mrf.mxu0  ;;  %v5262_v51 = vpop.f32.mrf.mxu1  ;;  %7137 = vmatprep.subr.bf16.mxu0 %v17490_v44  ;;  %v17527_v42 = vld [vmem:[%s18552_s6 + $0x3a0] ss:$8 sps:$4 sm:$0xff]   ;;  %v17532_v44 = vld [vmem:[%s18552_s6 + $0x294] ss:$8 sps:$4 sm:$0xff]  }
0x1178   :  { %7180 = vmatprep.subr.bf16.mxu1 %v17493_v45  ;;  %v5220_v53 = vadd.f32 %v5219_v34, %v3989_v4  ;;  %v5263_v54 = vadd.f32 %v5262_v51, %v3997_v7  ;;  %v17535_v45 = vld [vmem:[%s18552_s6 + $0x394] ss:$8 sps:$4 sm:$0xff]   ;;  %v17533_v34 = vld [vmem:[%s18552_s6 + $0x390] ss:$8 sps:$4 sm:$0xff]   ;;  %v17538_v51 = vld [vmem:[%s18552_s6 + $0x284] ss:$8 sps:$4 sm:$0xff]  }
0x1179   :  { %v19668_v11 = vpop.f32.mrf.mxu0  ;;  %v19670_v25 = vpop.f32.mrf.mxu1 }
0x117a   :  { %7138 = vmatpush1.bf16.msra.mxu0 %v17488_v12  ;;  %v5446_v63 = vmax.f32 %v5220_v53, 0.0  ;;  %v5448_v0 = vmax.f32 %v5263_v54, 0.0  ;;  %v17536_v53 = vld [vmem:[%s18552_s6 + $0x280] ss:$8 sps:$4 sm:$0xff]  }
0x117b   :  { %7181 = vmatpush1.bf16.msra.mxu1 %v17491_v52  ;;  %v5223_v56 = vpop.f32.mrf.mxu0  ;;  %v5266_v49 = vpop.f32.mrf.mxu1  ;;  %7139 = vmatprep.subr.bf16.mxu0 %v17496_v21  ;;  %v17541_v21 = vld [vmem:[%s18552_s6 + $0x384] ss:$8 sps:$4 sm:$0xff]  }
0x117c   :  { %v5224_v62 = vadd.f32 %v5223_v56, %v3989_v4  ;;  %v5267_v59 = vadd.f32 %v5266_v49, %v3997_v7  ;;  %7182 = vmatprep.subr.bf16.mxu1 %v17499_v46  ;;  %v3985_v4 = vrot.slane %v19579_v58, %v19693_v33  ;;  %v3993_v7 = vrot.slane %v19579_v58, %v19696_v36 }
0x117e   :  { %v5462_v2 = vmax.f32 %v5224_v62, 0.0  ;;  %v5464_v5 = vmax.f32 %v5267_v59, 0.0  ;;  %7140 = vmatpush2.bf16.msra.mxu0 %v17494_v55  ;;  %v5222_v12 = vadd.f32 %v19668_v11, %v3985_v4  ;;  %v5265_v52 = vadd.f32 %v19670_v25, %v3993_v7  ;;  %v17539_v11 = vld [vmem:[%s18552_s6 + $0x380] ss:$8 sps:$4 sm:$0xff]   ;;  %v17544_v55 = vld [vmem:[%s18552_s6 + $0x474] ss:$8 sps:$4 sm:$0xff]  }
0x117f   :  { %7183 = vmatpush2.bf16.msra.mxu1 %v17497_v57  ;;  %7141 = vmatprep.subr.bf16.mxu0 %v17502_v61  ;;  %v5218_v46 = vadd.f32 %v19656_v3, %v3985_v4  ;;  %v5261_v58 = vadd.f32 %v19658_v47, %v3993_v7  ;;  %v17547_v25 = vld [vmem:[%s18552_s6 + $0x574] ss:$8 sps:$4 sm:$0xff]   ;;  %v17542_v3 = vld [vmem:[%s18552_s6 + $0x470] ss:$8 sps:$4 sm:$0xff]   ;;  %v17550_v62 = vld [vmem:[%s18552_s6 + $0x464] ss:$8 sps:$4 sm:$0xff]  }
0x1180   :  { %v5478_v14 = vpack.c.bf16 %v5462_v2, %v5446_v63  ;;  %v5480_v15 = vpack.c.bf16 %v5464_v5, %v5448_v0  ;;  %7184 = vmatprep.subr.bf16.mxu1 %v17505_v60  ;;  %v5461_v54 = vmax.f32 %v5222_v12, 0.0  ;;  %v5463_v56 = vmax.f32 %v5265_v52, 0.0  ;;  %v17545_v61 = vld [vmem:[%s18552_s6 + $0x570] ss:$8 sps:$4 sm:$0xff]   ;;  %v17553_v60 = vld [vmem:[%s18552_s6 + $0x564] ss:$8 sps:$4 sm:$0xff]  }
0x1181   :  { %v5445_v49 = vmax.f32 %v5218_v46, 0.0  ;;  %v5447_v57 = vmax.f32 %v5261_v58, 0.0  ;;  %v17548_v63 = vld [vmem:[%s18552_s6 + $0x460] ss:$8 sps:$4 sm:$0xff]   ;;  %v17556_v2 = vld [vmem:[%s18552_s6 + $0x454] ss:$8 sps:$4 sm:$0xff]  }
0x1182   :  { %7142 = vmatpush2.bf16.msra.mxu0 %v17500_v23  ;;  %7155 = vmatprep.mubr.bf16.mxu0 %v5478_v14  ;;  %v17551_v0 = vld [vmem:[%s18552_s6 + $0x560] ss:$8 sps:$4 sm:$0xff]   ;;  %v17559_v5 = vld [vmem:[%s18552_s6 + $0x554] ss:$8 sps:$4 sm:$0xff]   ;;  %v17554_v23 = vld [vmem:[%s18552_s6 + $0x450] ss:$8 sps:$4 sm:$0xff]  }
0x1183   :  { %7185 = vmatpush2.bf16.msra.mxu1 %v17503_v13  ;;  %7198 = vmatprep.mubr.bf16.mxu1 %v5480_v15  ;;  %v5477_v47 = vpack.c.bf16 %v5461_v54, %v5445_v49  ;;  %v5479_v59 = vpack.c.bf16 %v5463_v56, %v5447_v57  ;;  %v17557_v13 = vld [vmem:[%s18552_s6 + $0x550] ss:$8 sps:$4 sm:$0xff]   ;;  %v17562_v14 = vld [vmem:[%s18552_s6 + $0x444] ss:$8 sps:$4 sm:$0xff]   ;;  %v17572_v4 = vld [vmem:[%s18552_s6 + $0x420] ss:$8 sps:$4 sm:$0xff]  }
0x1184   :  { %7143 = vmatprep.subr.bf16.mxu0 %v17508_v16  ;;  %7186 = vmatprep.subr.bf16.mxu1 %v17511_v6  ;;  %v17565_v15 = vld [vmem:[%s18552_s6 + $0x544] ss:$8 sps:$4 sm:$0xff]   ;;  %v17560_v16 = vld [vmem:[%s18552_s6 + $0x440] ss:$8 sps:$4 sm:$0xff]   ;;  %v17578_v54 = vld [vmem:[%s18552_s6 + $0x410] ss:$8 sps:$4 sm:$0xff]  }
0x1185   :  { %v17563_v6 = vld [vmem:[%s18552_s6 + $0x540] ss:$8 sps:$4 sm:$0xff]   ;;  %v17581_v56 = vld [vmem:[%s18552_s6 + $0x510] ss:$8 sps:$4 sm:$0xff]   ;;  %v17586_v49 = vld [vmem:[%s18552_s6 + $0x404] ss:$8 sps:$4 sm:$0xff]  }
0x1186   :  { %7144 = vmatpush2.bf16.msra.mxu0 %v17506_v8  ;;  %v17568_v8 = vld [vmem:[%s18552_s6 + $0x434] ss:$8 sps:$4 sm:$0xff]   ;;  %v17575_v12 = vld [vmem:[%s18552_s6 + $0x520] ss:$8 sps:$4 sm:$0xff]   ;;  %v17589_v57 = vld [vmem:[%s18552_s6 + $0x504] ss:$8 sps:$4 sm:$0xff]  }
0x1187   :  { %7187 = vmatpush2.bf16.msra.mxu1 %v17509_v10  ;;  %7145 = vmatprep.subr.bf16.mxu0 %v17514_v17  ;;  %v17571_v10 = vld [vmem:[%s18552_s6 + $0x534] ss:$8 sps:$4 sm:$0xff]   ;;  %v19735_v17 = vld [vmem:[%s18547_s30 + $0x8] sm:$0xff]  ;;  %s21268_s30 = sld [smem:[#allocation17_spill]] }
0x1188   :  { %7188 = vmatprep.subr.bf16.mxu1 %v17517_v18 }
0x118a   :  { %7146 = vmatpush2.bf16.msra.mxu0 %v17512_v19 }
0x118b   :  { %7189 = vmatpush2.bf16.msra.mxu1 %v17515_v20  ;;  %7147 = vmatprep.subr.bf16.mxu0 %v17520_v22  ;;  %v4005_v20 = vrot.slane %v19735_v17, %v19217_v29  ;;  %v17566_v22 = vld [vmem:[%s18552_s6 + $0x430] ss:$8 sps:$4 sm:$0xff]  }
0x118c   :  { %7190 = vmatprep.subr.bf16.mxu1 %v17523_v28 }
0x118e   :  { %7148 = vmatpush2.bf16.msra.mxu0 %v17518_v30  ;;  %v4013_v30 = vrot.slane %v19735_v17, %v19573_v50 }
0x118f   :  { %7191 = vmatpush2.bf16.msra.mxu1 %v17521_v24  ;;  %7149 = vmatprep.subr.bf16.mxu0 %v17526_v31  ;;  %v17569_v24 = vld [vmem:[%s18552_s6 + $0x530] ss:$8 sps:$4 sm:$0xff]   ;;  %v17574_v31 = vld [vmem:[%s18552_s6 + $0x424] ss:$8 sps:$4 sm:$0xff]  }
0x1190   :  { %7192 = vmatprep.subr.bf16.mxu1 %v17529_v32 }
0x1192   :  { %7150 = vmatpush2.bf16.msra.mxu0 %v17524_v39  ;;  %v17577_v39 = vld [vmem:[%s18552_s6 + $0x524] ss:$8 sps:$4 sm:$0xff]  }
0x1193   :  { %7193 = vmatpush2.bf16.msra.mxu1 %v17527_v42  ;;  %7151 = vmatprep.subr.bf16.mxu0 %v17532_v44 }
0x1194   :  { %7194 = vmatprep.subr.bf16.mxu1 %v17535_v45 }
0x1196   :  { %7152 = vmatpush2.bf16.msra.mxu0 %v17530_v26 }
0x1197   :  { %7195 = vmatpush2.bf16.msra.mxu1 %v17533_v34  ;;  %7153 = vmatprep.subr.bf16.mxu0 %v17538_v51  ;;  %v17580_v34 = vld [vmem:[%s18552_s6 + $0x414] ss:$8 sps:$4 sm:$0xff]  }
0x1198   :  { %7196 = vmatprep.subr.bf16.mxu1 %v17541_v21  ;;  %v17583_v21 = vld [vmem:[%s18552_s6 + $0x514] ss:$8 sps:$4 sm:$0xff]  }
0x119a   :  { %7154 = vmatpush2.bf16.msra.mxu0 %v17536_v53 }
0x119b   :  { %7197 = vmatpush2.bf16.msra.mxu1 %v17539_v11  ;;  %7209 = vmatprep.subr.bf16.mxu0 %v17544_v55 }
0x119c   :  { %7252 = vmatprep.subr.bf16.mxu1 %v17547_v25 }
0x119d   :  { %7156 = vmatmul.mubr.bf16.vlgmr.msra.gmra.mxu0 %v5477_v47  ;;  %v17584_v47 = vld [vmem:[%s18552_s6 + $0x400] ss:$8 sps:$4 sm:$0xff]  }
0x119e   :  { %7199 = vmatmul.mubr.bf16.vlgmr.msra.gmra.mxu1 %v5479_v59  ;;  %7210 = vmatpush1.bf16.msra.mxu0 %v17542_v3  ;;  %v17595_v59 = vld [vmem:[%s18552_s6 + $0x5f4] ss:$8 sps:$4 sm:$0xff]  }
0x119f   :  { %7253 = vmatpush1.bf16.msra.mxu1 %v17545_v61  ;;  %7211 = vmatprep.subr.bf16.mxu0 %v17550_v62  ;;  %v17587_v61 = vld [vmem:[%s18552_s6 + $0x500] ss:$8 sps:$4 sm:$0xff]   ;;  %v17592_v62 = vld [vmem:[%s18552_s6 + $0x4f4] ss:$8 sps:$4 sm:$0xff]  }
0x11a0   :  { %7254 = vmatprep.subr.bf16.mxu1 %v17553_v60  ;;  %v17590_v60 = vld [vmem:[%s18552_s6 + $0x4f0] ss:$8 sps:$4 sm:$0xff]  }
0x11a2   :  { %7212 = vmatpush1.bf16.msra.mxu0 %v17548_v63  ;;  %v17593_v63 = vld [vmem:[%s18552_s6 + $0x5f0] ss:$8 sps:$4 sm:$0xff]  }
0x11a3   :  { %7255 = vmatpush1.bf16.msra.mxu1 %v17551_v0  ;;  %7213 = vmatprep.subr.bf16.mxu0 %v17556_v2  ;;  %v17598_v0 = vld [vmem:[%s18552_s6 + $0x4e4] ss:$8 sps:$4 sm:$0xff]  }
0x11a4   :  { %7256 = vmatprep.subr.bf16.mxu1 %v17559_v5  ;;  %v17601_v2 = vld [vmem:[%s18552_s6 + $0x5e4] ss:$8 sps:$4 sm:$0xff]   ;;  %v17596_v5 = vld [vmem:[%s18552_s6 + $0x4e0] ss:$8 sps:$4 sm:$0xff]  }
0x11a6   :  { %7214 = vmatpush1.bf16.msra.mxu0 %v17554_v23  ;;  %v17599_v23 = vld [vmem:[%s18552_s6 + $0x5e0] ss:$8 sps:$4 sm:$0xff]  }
0x11a7   :  { %7257 = vmatpush1.bf16.msra.mxu1 %v17557_v13  ;;  %7215 = vmatprep.subr.bf16.mxu0 %v17562_v14  ;;  %v17604_v13 = vld [vmem:[%s18552_s6 + $0x4d4] ss:$8 sps:$4 sm:$0xff]  }
0x11a8   :  { %7258 = vmatprep.subr.bf16.mxu1 %v17565_v15  ;;  %v17607_v14 = vld [vmem:[%s18552_s6 + $0x5d4] ss:$8 sps:$4 sm:$0xff]   ;;  %v17602_v15 = vld [vmem:[%s18552_s6 + $0x4d0] ss:$8 sps:$4 sm:$0xff]  }
0x11a9   :  { %v19737_v18 = vpop.f32.mrf.mxu0 }
0x11aa   :  { %v19739_v19 = vpop.f32.mrf.mxu1  ;;  %7216 = vmatpush1.bf16.msra.mxu0 %v17560_v16  ;;  %v17605_v16 = vld [vmem:[%s18552_s6 + $0x5d0] ss:$8 sps:$4 sm:$0xff]  }
0x11ab   :  { %7259 = vmatpush1.bf16.msra.mxu1 %v17563_v6  ;;  %v5305_v28 = vpop.f32.mrf.mxu0  ;;  %7217 = vmatprep.subr.bf16.mxu0 %v17568_v8  ;;  %v17610_v6 = vld [vmem:[%s18552_s6 + $0x4c4] ss:$8 sps:$4 sm:$0xff]  }
0x11ac   :  { %v5348_v32 = vpop.f32.mrf.mxu1  ;;  %7260 = vmatprep.subr.bf16.mxu1 %v17571_v10  ;;  %v5306_v44 = vadd.f32 %v5305_v28, %v4005_v20  ;;  %v17613_v8 = vld [vmem:[%s18552_s6 + $0x5c4] ss:$8 sps:$4 sm:$0xff]   ;;  %v17608_v10 = vld [vmem:[%s18552_s6 + $0x4c0] ss:$8 sps:$4 sm:$0xff]   ;;  %v17619_v28 = vld [vmem:[%s18552_s6 + $0x5b4] ss:$8 sps:$4 sm:$0xff]  }
0x11ad   :  { %v19749_v42 = vpop.f32.mrf.mxu0  ;;  %v5349_v7 = vadd.f32 %v5348_v32, %v4013_v30  ;;  %v17625_v32 = vld [vmem:[%s18552_s6 + $0x5a4] ss:$8 sps:$4 sm:$0xff]  }
0x11ae   :  { %v19751_v45 = vpop.f32.mrf.mxu1  ;;  %7218 = vmatpush1.bf16.msra.mxu0 %v17566_v22  ;;  %v5450_v58 = vmax.f32 %v5306_v44, 0.0  ;;  %v17616_v22 = vld [vmem:[%s18552_s6 + $0x4b4] ss:$8 sps:$4 sm:$0xff]   ;;  %v17623_v44 = vld [vmem:[%s18552_s6 + $0x5a0] ss:$8 sps:$4 sm:$0xff]  }
0x11af   :  { %7261 = vmatpush1.bf16.msra.mxu1 %v17569_v24  ;;  %v5309_v26 = vpop.f32.mrf.mxu0  ;;  %7219 = vmatprep.subr.bf16.mxu0 %v17574_v31  ;;  %v5452_v11 = vmax.f32 %v5349_v7, 0.0  ;;  %v17617_v24 = vld [vmem:[%s18552_s6 + $0x5b0] ss:$8 sps:$4 sm:$0xff]   ;;  %v17622_v31 = vld [vmem:[%s18552_s6 + $0x4a4] ss:$8 sps:$4 sm:$0xff]  }
0x11b0   :  { %v5310_v51 = vadd.f32 %v5309_v26, %v4005_v20  ;;  %v5352_v52 = vpop.f32.mrf.mxu1  ;;  %7262 = vmatprep.subr.bf16.mxu1 %v17577_v39  ;;  %v17611_v20 = vld [vmem:[%s18552_s6 + $0x5c0] ss:$8 sps:$4 sm:$0xff]   ;;  %v17631_v7 = vld [vmem:[%s18552_s6 + $0x594] ss:$8 sps:$4 sm:$0xff]   ;;  %v4001_v26 = vrot.slane %v19735_v17, %v19213_v27 }
0x11b1   :  { %v5353_v46 = vadd.f32 %v5352_v52, %v4013_v30  ;;  %v17614_v30 = vld [vmem:[%s18552_s6 + $0x4b0] ss:$8 sps:$4 sm:$0xff]   ;;  %v17620_v39 = vld [vmem:[%s18552_s6 + $0x4a0] ss:$8 sps:$4 sm:$0xff]  }
0x11b2   :  { %v5466_v53 = vmax.f32 %v5310_v51, 0.0  ;;  %7220 = vmatpush1.bf16.msra.mxu0 %v17572_v4  ;;  %v17628_v4 = vld [vmem:[%s18552_s6 + $0x494] ss:$8 sps:$4 sm:$0xff]   ;;  %v5308_v51 = vadd.f32 %v19749_v42, %v4001_v26  ;;  %v17629_v52 = vld [vmem:[%s18552_s6 + $0x590] ss:$8 sps:$4 sm:$0xff]  }
0x11b3   :  { %v5468_v55 = vmax.f32 %v5353_v46, 0.0  ;;  %7263 = vmatpush1.bf16.msra.mxu1 %v17575_v12  ;;  %7221 = vmatprep.subr.bf16.mxu0 %v17580_v34  ;;  %v4009_v12 = vrot.slane %v19735_v17, %v19602_v43  ;;  %v17626_v34 = vld [vmem:[%s18552_s6 + $0x490] ss:$8 sps:$4 sm:$0xff]   ;;  %v17635_v42 = vld [vmem:[%s18552_s6 + $0x580] ss:$8 sps:$4 sm:$0xff]  }
0x11b4   :  { %v5482_v25 = vpack.c.bf16 %v5466_v53, %v5450_v58  ;;  %7264 = vmatprep.subr.bf16.mxu1 %v17583_v21  ;;  %v17634_v21 = vld [vmem:[%s18552_s6 + $0x484] ss:$8 sps:$4 sm:$0xff]   ;;  %v5304_v53 = vadd.f32 %v19737_v18, %v4001_v26  ;;  %v17638_v18 = vld [vmem:[%s18552_s6 + $0x670] ss:$8 sps:$4 sm:$0xff]  }
0x11b5   :  { %v5484_v3 = vpack.c.bf16 %v5468_v55, %v5452_v11  ;;  %v5351_v46 = vadd.f32 %v19751_v45, %v4009_v12  ;;  %v17637_v58 = vld [vmem:[%s18552_s6 + $0x584] ss:$8 sps:$4 sm:$0xff]   ;;  %v17632_v11 = vld [vmem:[%s18552_s6 + $0x480] ss:$8 sps:$4 sm:$0xff]   ;;  %v5465_v55 = vmax.f32 %v5308_v51, 0.0 }
0x11b6   :  { %7222 = vmatpush1.bf16.msra.mxu0 %v17578_v54  ;;  %7241 = vmatprep.mubr.bf16.mxu0 %v5482_v25  ;;  %v5347_v54 = vadd.f32 %v19739_v19, %v4009_v12  ;;  %v17643_v45 = vld [vmem:[%s18552_s6 + $0x774] ss:$8 sps:$4 sm:$0xff]   ;;  %v17641_v19 = vld [vmem:[%s18552_s6 + $0x770] ss:$8 sps:$4 sm:$0xff]  }
0x11b7   :  { %7265 = vmatpush1.bf16.msra.mxu1 %v17581_v56  ;;  %7284 = vmatprep.mubr.bf16.mxu1 %v5484_v3  ;;  %v17640_v56 = vld [vmem:[%s18552_s6 + $0x674] ss:$8 sps:$4 sm:$0xff]   ;;  %v5467_v25 = vmax.f32 %v5351_v46, 0.0 }
0x11b8   :  { %7223 = vmatprep.subr.bf16.mxu0 %v17586_v49  ;;  %7266 = vmatprep.subr.bf16.mxu1 %v17589_v57  ;;  %v5449_v49 = vmax.f32 %v5304_v53, 0.0  ;;  %v5451_v57 = vmax.f32 %v5347_v54, 0.0  ;;  %v17665_v53 = vld [vmem:[%s18552_s6 + $0x730] ss:$8 sps:$4 sm:$0xff]   ;;  %v17670_v54 = vld [vmem:[%s18552_s6 + $0x624] ss:$8 sps:$4 sm:$0xff]  }
0x11ba   :  { %7224 = vmatpush1.bf16.msra.mxu0 %v17584_v47  ;;  %v5481_v3 = vpack.c.bf16 %v5465_v55, %v5449_v49  ;;  %v17646_v47 = vld [vmem:[%s18552_s6 + $0x664] ss:$8 sps:$4 sm:$0xff]   ;;  %v17668_v55 = vld [vmem:[%s18552_s6 + $0x620] ss:$8 sps:$4 sm:$0xff]   ;;  %v17677_v49 = vld [vmem:[%s18552_s6 + $0x710] ss:$8 sps:$4 sm:$0xff]  }
0x11bb   :  { %7267 = vmatpush1.bf16.msra.mxu1 %v17587_v61  ;;  %7225 = vmatprep.subr.bf16.mxu0 %v17592_v62  ;;  %v5483_v61 = vpack.c.bf16 %v5467_v25, %v5451_v57  ;;  %v17649_v62 = vld [vmem:[%s18552_s6 + $0x764] ss:$8 sps:$4 sm:$0xff]   ;;  %v17679_v25 = vld [vmem:[%s18552_s6 + $0x714] ss:$8 sps:$4 sm:$0xff]  }
0x11bc   :  { %7268 = vmatprep.subr.bf16.mxu1 %v17595_v59  ;;  %v17682_v57 = vld [vmem:[%s18552_s6 + $0x604] ss:$8 sps:$4 sm:$0xff]  }
0x11be   :  { %7226 = vmatpush2.bf16.msra.mxu0 %v17590_v60 }
0x11bf   :  { %7269 = vmatpush2.bf16.msra.mxu1 %v17593_v63  ;;  %7227 = vmatprep.subr.bf16.mxu0 %v17598_v0  ;;  %v4021_v63 = vrot.slane %v19735_v17, %v19648_v40  ;;  %v17644_v0 = vld [vmem:[%s18552_s6 + $0x660] ss:$8 sps:$4 sm:$0xff]  }
0x11c0   :  { %7270 = vmatprep.subr.bf16.mxu1 %v17601_v2 }
0x11c2   :  { %7228 = vmatpush2.bf16.msra.mxu0 %v17596_v5  ;;  %v4029_v5 = vrot.slane %v19735_v17, %v19651_v41 }
0x11c3   :  { %7271 = vmatpush2.bf16.msra.mxu1 %v17599_v23  ;;  %7229 = vmatprep.subr.bf16.mxu0 %v17604_v13  ;;  %v17647_v23 = vld [vmem:[%s18552_s6 + $0x760] ss:$8 sps:$4 sm:$0xff]   ;;  %v17652_v13 = vld [vmem:[%s18552_s6 + $0x654] ss:$8 sps:$4 sm:$0xff]  }
0x11c4   :  { %7272 = vmatprep.subr.bf16.mxu1 %v17607_v14 }
0x11c6   :  { %7230 = vmatpush2.bf16.msra.mxu0 %v17602_v15  ;;  %v17655_v15 = vld [vmem:[%s18552_s6 + $0x754] ss:$8 sps:$4 sm:$0xff]  }
0x11c7   :  { %7273 = vmatpush2.bf16.msra.mxu1 %v17605_v16  ;;  %7231 = vmatprep.subr.bf16.mxu0 %v17610_v6 }
0x11c8   :  { %7274 = vmatprep.subr.bf16.mxu1 %v17613_v8 }
0x11ca   :  { %7232 = vmatpush2.bf16.msra.mxu0 %v17608_v10  ;;  %v17650_v10 = vld [vmem:[%s18552_s6 + $0x650] ss:$8 sps:$4 sm:$0xff]  }
0x11cb   :  { %7275 = vmatpush2.bf16.msra.mxu1 %v17611_v20  ;;  %7233 = vmatprep.subr.bf16.mxu0 %v17616_v22 }
0x11cc   :  { %7276 = vmatprep.subr.bf16.mxu1 %v17619_v28  ;;  %v17653_v28 = vld [vmem:[%s18552_s6 + $0x750] ss:$8 sps:$4 sm:$0xff]  }
0x11ce   :  { %7234 = vmatpush2.bf16.msra.mxu0 %v17614_v30  ;;  %v17658_v30 = vld [vmem:[%s18552_s6 + $0x644] ss:$8 sps:$4 sm:$0xff]  }
0x11cf   :  { %7277 = vmatpush2.bf16.msra.mxu1 %v17617_v24  ;;  %7235 = vmatprep.subr.bf16.mxu0 %v17622_v31 }
0x11d0   :  { %7278 = vmatprep.subr.bf16.mxu1 %v17625_v32  ;;  %v17661_v32 = vld [vmem:[%s18552_s6 + $0x744] ss:$8 sps:$4 sm:$0xff]  }
0x11d2   :  { %7236 = vmatpush2.bf16.msra.mxu0 %v17620_v39 }
0x11d3   :  { %7279 = vmatpush2.bf16.msra.mxu1 %v17623_v44  ;;  %7237 = vmatprep.subr.bf16.mxu0 %v17628_v4 }
0x11d4   :  { %7280 = vmatprep.subr.bf16.mxu1 %v17631_v7  ;;  %v17656_v7 = vld [vmem:[%s18552_s6 + $0x640] ss:$8 sps:$4 sm:$0xff]  }
0x11d6   :  { %7238 = vmatpush2.bf16.msra.mxu0 %v17626_v34  ;;  %v17659_v34 = vld [vmem:[%s18552_s6 + $0x740] ss:$8 sps:$4 sm:$0xff]  }
0x11d7   :  { %7281 = vmatpush2.bf16.msra.mxu1 %v17629_v52  ;;  %7239 = vmatprep.subr.bf16.mxu0 %v17634_v21  ;;  %v17664_v52 = vld [vmem:[%s18552_s6 + $0x634] ss:$8 sps:$4 sm:$0xff]  }
0x11d8   :  { %7282 = vmatprep.subr.bf16.mxu1 %v17637_v58  ;;  %v17667_v21 = vld [vmem:[%s18552_s6 + $0x734] ss:$8 sps:$4 sm:$0xff]   ;;  %v17662_v58 = vld [vmem:[%s18552_s6 + $0x630] ss:$8 sps:$4 sm:$0xff]  }
0x11da   :  { %7240 = vmatpush2.bf16.msra.mxu0 %v17632_v11  ;;  %v17673_v11 = vld [vmem:[%s18552_s6 + $0x724] ss:$8 sps:$4 sm:$0xff]  }
0x11db   :  { %7283 = vmatpush2.bf16.msra.mxu1 %v17635_v42  ;;  %7295 = vmatprep.subr.bf16.mxu0 %v17640_v56  ;;  %v17671_v42 = vld [vmem:[%s18552_s6 + $0x720] ss:$8 sps:$4 sm:$0xff]   ;;  %v17676_v56 = vld [vmem:[%s18552_s6 + $0x614] ss:$8 sps:$4 sm:$0xff]  }
0x11dc   :  { %7338 = vmatprep.subr.bf16.mxu1 %v17643_v45  ;;  %v17674_v45 = vld [vmem:[%s18552_s6 + $0x610] ss:$8 sps:$4 sm:$0xff]  }
0x11dd   :  { %v19809_v59 = vpop.f32.mrf.mxu0  ;;  %7242 = vmatmul.mubr.bf16.vlgmr.msra.gmra.mxu0 %v5481_v3  ;;  %v17680_v3 = vld [vmem:[%s18552_s6 + $0x600] ss:$8 sps:$4 sm:$0xff]  }
0x11de   :  { %v19811_v60 = vpop.f32.mrf.mxu1  ;;  %7285 = vmatmul.mubr.bf16.vlgmr.msra.gmra.mxu1 %v5483_v61  ;;  %7296 = vmatpush1.bf16.msra.mxu0 %v17638_v18  ;;  %v17685_v18 = vld [vmem:[%s18552_s6 + $0x704] ss:$8 sps:$4 sm:$0xff]   ;;  %v17691_v61 = vld [vmem:[%s18552_s6 + $0x7f4] ss:$8 sps:$4 sm:$0xff]  }
0x11df   :  { %7339 = vmatpush1.bf16.msra.mxu1 %v17641_v19  ;;  %v5391_v2 = vpop.f32.mrf.mxu0  ;;  %7297 = vmatprep.subr.bf16.mxu0 %v17646_v47  ;;  %v17683_v19 = vld [vmem:[%s18552_s6 + $0x700] ss:$8 sps:$4 sm:$0xff]   ;;  %v17688_v47 = vld [vmem:[%s18552_s6 + $0x6f4] ss:$8 sps:$4 sm:$0xff]  }
0x11e0   :  { %v5434_v14 = vpop.f32.mrf.mxu1  ;;  %7340 = vmatprep.subr.bf16.mxu1 %v17649_v62  ;;  %v5392_v6 = vadd.f32 %v5391_v2, %v4021_v63  ;;  %v17686_v62 = vld [vmem:[%s18552_s6 + $0x6f0] ss:$8 sps:$4 sm:$0xff]   ;;  %v17697_v2 = vld [vmem:[%s18552_s6 + $0x7e4] ss:$8 sps:$4 sm:$0xff]  }
0x11e1   :  { %v19821_v16 = vpop.f32.mrf.mxu0  ;;  %v5435_v20 = vadd.f32 %v5434_v14, %v4029_v5  ;;  %v17703_v14 = vld [vmem:[%s18552_s6 + $0x7d4] ss:$8 sps:$4 sm:$0xff]  }
0x11e2   :  { %v19823_v8 = vpop.f32.mrf.mxu1  ;;  %7298 = vmatpush1.bf16.msra.mxu0 %v17644_v0  ;;  %v5454_v44 = vmax.f32 %v5392_v6, 0.0  ;;  %v17694_v0 = vld [vmem:[%s18552_s6 + $0x6e4] ss:$8 sps:$4 sm:$0xff]   ;;  %v17701_v6 = vld [vmem:[%s18552_s6 + $0x7d0] ss:$8 sps:$4 sm:$0xff]  }
0x11e3   :  { %7341 = vmatpush1.bf16.msra.mxu1 %v17647_v23  ;;  %v5395_v22 = vpop.f32.mrf.mxu0  ;;  %7299 = vmatprep.subr.bf16.mxu0 %v17652_v13  ;;  %v5456_v26 = vmax.f32 %v5435_v20, 0.0  ;;  %v17695_v23 = vld [vmem:[%s18552_s6 + $0x7e0] ss:$8 sps:$4 sm:$0xff]   ;;  %v17700_v13 = vld [vmem:[%s18552_s6 + $0x6d4] ss:$8 sps:$4 sm:$0xff]  }
0x11e4   :  { %v5396_v24 = vadd.f32 %v5395_v22, %v4021_v63  ;;  %v5438_v31 = vpop.f32.mrf.mxu1  ;;  %7342 = vmatprep.subr.bf16.mxu1 %v17655_v15  ;;  %v17689_v63 = vld [vmem:[%s18552_s6 + $0x7f0] ss:$8 sps:$4 sm:$0xff]   ;;  %v17709_v20 = vld [vmem:[%s18552_s6 + $0x7c4] ss:$8 sps:$4 sm:$0xff]   ;;  %v17704_v22 = vld [vmem:[%s18552_s6 + $0x6c0] ss:$8 sps:$4 sm:$0xff]  }
0x11e5   :  { %v5439_v39 = vadd.f32 %v5438_v31, %v4029_v5  ;;  %v17692_v5 = vld [vmem:[%s18552_s6 + $0x6e0] ss:$8 sps:$4 sm:$0xff]   ;;  %v17698_v15 = vld [vmem:[%s18552_s6 + $0x6d0] ss:$8 sps:$4 sm:$0xff]  }
0x11e6   :  { %v5470_v4 = vmax.f32 %v5396_v24, 0.0  ;;  %7300 = vmatpush1.bf16.msra.mxu0 %v17650_v10  ;;  %v17706_v10 = vld [vmem:[%s18552_s6 + $0x6c4] ss:$8 sps:$4 sm:$0xff]   ;;  %v17715_v24 = vld [vmem:[%s18552_s6 + $0x7b4] ss:$8 sps:$4 sm:$0xff]  }
0x11e7   :  { %v5472_v12 = vmax.f32 %v5439_v39, 0.0  ;;  %7343 = vmatpush1.bf16.msra.mxu1 %v17653_v28  ;;  %7301 = vmatprep.subr.bf16.mxu0 %v17658_v30  ;;  %v17707_v28 = vld [vmem:[%s18552_s6 + $0x7c0] ss:$8 sps:$4 sm:$0xff]   ;;  %v17712_v30 = vld [vmem:[%s18552_s6 + $0x6b4] ss:$8 sps:$4 sm:$0xff]  }
0x11e8   :  { %v5486_v51 = vpack.c.bf16 %v5470_v4, %v5454_v44  ;;  %7344 = vmatprep.subr.bf16.mxu1 %v17661_v32  ;;  %v17710_v31 = vld [vmem:[%s18552_s6 + $0x6b0] ss:$8 sps:$4 sm:$0xff]   ;;  %v17718_v39 = vld [vmem:[%s18552_s6 + $0x6a4] ss:$8 sps:$4 sm:$0xff]   ;;  %v17716_v4 = vld [vmem:[%s18552_s6 + $0x6a0] ss:$8 sps:$4 sm:$0xff]  }
0x11e9   :  { %v5488_v46 = vpack.c.bf16 %v5472_v12, %v5456_v26  ;;  %v17713_v32 = vld [vmem:[%s18552_s6 + $0x7b0] ss:$8 sps:$4 sm:$0xff]   ;;  %v17721_v44 = vld [vmem:[%s18552_s6 + $0x7a4] ss:$8 sps:$4 sm:$0xff]   ;;  %v17724_v26 = vld [vmem:[%s18552_s6 + $0x694] ss:$8 sps:$4 sm:$0xff]  }
0x11ea   :  { %7302 = vmatpush1.bf16.msra.mxu0 %v17656_v7  ;;  %7327 = vmatprep.mubr.bf16.mxu0 %v5486_v51  ;;  %v17719_v7 = vld [vmem:[%s18552_s6 + $0x7a0] ss:$8 sps:$4 sm:$0xff]   ;;  %v17727_v12 = vld [vmem:[%s18552_s6 + $0x794] ss:$8 sps:$4 sm:$0xff]   ;;  %v4025_v51 = vrot.slane %v19735_v17, %v19696_v36 }
0x11eb   :  { %7345 = vmatpush1.bf16.msra.mxu1 %v17659_v34  ;;  %7370 = vmatprep.mubr.bf16.mxu1 %v5488_v46  ;;  %v4017_v34 = vrot.slane %v19735_v17, %v19693_v33  ;;  %v17725_v46 = vld [vmem:[%s18552_s6 + $0x790] ss:$8 sps:$4 sm:$0xff]  }
0x11ec   :  { %7303 = vmatprep.subr.bf16.mxu0 %v17664_v52  ;;  %7346 = vmatprep.subr.bf16.mxu1 %v17667_v21  ;;  %v17722_v52 = vld [vmem:[%s18552_s6 + $0x690] ss:$8 sps:$4 sm:$0xff]  }
0x11ed   :  { %v5394_v21 = vadd.f32 %v19821_v16, %v4017_v34 }
0x11ee   :  { %7304 = vmatpush1.bf16.msra.mxu0 %v17662_v58  ;;  %v17730_v58 = vld [vmem:[%s18552_s6 + $0x684] ss:$8 sps:$4 sm:$0xff]  }
0x11ef   :  { %7347 = vmatpush1.bf16.msra.mxu1 %v17665_v53  ;;  %7305 = vmatprep.subr.bf16.mxu0 %v17670_v54  ;;  %v5437_v53 = vadd.f32 %v19823_v8, %v4025_v51  ;;  %v17733_v54 = vld [vmem:[%s18552_s6 + $0x784] ss:$8 sps:$4 sm:$0xff]   ;;  %v5469_v17 = vmax.f32 %v5394_v21, 0.0 }
0x11f0   :  { %7348 = vmatprep.subr.bf16.mxu1 %v17673_v11  ;;  %v5390_v11 = vadd.f32 %v19809_v59, %v4017_v34 }
0x11f2   :  { %7306 = vmatpush1.bf16.msra.mxu0 %v17668_v55  ;;  %v5433_v55 = vadd.f32 %v19811_v60, %v4025_v51  ;;  %v5453_v16 = vmax.f32 %v5390_v11, 0.0 }
0x11f3   :  { %7349 = vmatpush1.bf16.msra.mxu1 %v17671_v42  ;;  %7307 = vmatprep.subr.bf16.mxu0 %v17676_v56  ;;  %v17728_v42 = vld [vmem:[%s18552_s6 + $0x680] ss:$8 sps:$4 sm:$0xff]  }
0x11f4   :  { %7350 = vmatprep.subr.bf16.mxu1 %v17679_v25  ;;  %v17731_v56 = vld [vmem:[%s18552_s6 + $0x780] ss:$8 sps:$4 sm:$0xff]   ;;  %v5471_v25 = vmax.f32 %v5437_v53, 0.0  ;;  %s21269_s6 = sld [smem:[#allocation20_spill]] }
0x11f6   :  { %7308 = vmatpush1.bf16.msra.mxu0 %v17674_v45  ;;  %v5455_v45 = vmax.f32 %v5433_v55, 0.0 }
0x11f7   :  { %7351 = vmatpush1.bf16.msra.mxu1 %v17677_v49  ;;  %7309 = vmatprep.subr.bf16.mxu0 %v17682_v57  ;;  %v5485_v49 = vpack.c.bf16 %v5469_v17, %v5453_v16 }
0x11f8   :  { %7352 = vmatprep.subr.bf16.mxu1 %v17685_v18  ;;  %v5487_v8 = vpack.c.bf16 %v5471_v25, %v5455_v45 }
0x11fa   :  { %7310 = vmatpush1.bf16.msra.mxu0 %v17680_v3 }
0x11fb   :  { %7353 = vmatpush1.bf16.msra.mxu1 %v17683_v19  ;;  %7311 = vmatprep.subr.bf16.mxu0 %v17688_v47 }
0x11fc   :  { %7354 = vmatprep.subr.bf16.mxu1 %v17691_v61 }
0x11fe   :  { %7312 = vmatpush2.bf16.msra.mxu0 %v17686_v62 }
0x11ff   :  { %7355 = vmatpush2.bf16.msra.mxu1 %v17689_v63  ;;  %7313 = vmatprep.subr.bf16.mxu0 %v17694_v0  ;;  %v5745_v0 = vld [vmem:[%s21255_s0] sm:$0x3] }
0x1200   :  { %7356 = vmatprep.subr.bf16.mxu1 %v17697_v2 }
0x1202   :  { %7314 = vmatpush2.bf16.msra.mxu0 %v17692_v5 }
0x1203   :  { %7357 = vmatpush2.bf16.msra.mxu1 %v17695_v23  ;;  %7315 = vmatprep.subr.bf16.mxu0 %v17700_v13  ;;  %v5750_v23 = vrot.slane %v5745_v0, %v19213_v27 }
0x1204   :  { %7358 = vmatprep.subr.bf16.mxu1 %v17703_v14  ;;  %v5754_v14 = vrot.slane %v5745_v0, %v19217_v29 }
0x1206   :  { %7316 = vmatpush2.bf16.msra.mxu0 %v17698_v15 }
0x1207   :  { %7359 = vmatpush2.bf16.msra.mxu1 %v17701_v6  ;;  %7317 = vmatprep.subr.bf16.mxu0 %v17706_v10 }
0x1208   :  { %7360 = vmatprep.subr.bf16.mxu1 %v17709_v20 }
0x120a   :  { %7318 = vmatpush2.bf16.msra.mxu0 %v17704_v22 }
0x120b   :  { %7361 = vmatpush2.bf16.msra.mxu1 %v17707_v28  ;;  %7319 = vmatprep.subr.bf16.mxu0 %v17712_v30 }
0x120c   :  { %7362 = vmatprep.subr.bf16.mxu1 %v17715_v24 }
0x120e   :  { %7320 = vmatpush2.bf16.msra.mxu0 %v17710_v31 }
0x120f   :  { %7363 = vmatpush2.bf16.msra.mxu1 %v17713_v32  ;;  %7321 = vmatprep.subr.bf16.mxu0 %v17718_v39 }
0x1210   :  { %7364 = vmatprep.subr.bf16.mxu1 %v17721_v44 }
0x1212   :  { %7322 = vmatpush2.bf16.msra.mxu0 %v17716_v4 }
0x1213   :  { %7365 = vmatpush2.bf16.msra.mxu1 %v17719_v7  ;;  %7323 = vmatprep.subr.bf16.mxu0 %v17724_v26 }
0x1214   :  { %7366 = vmatprep.subr.bf16.mxu1 %v17727_v12 }
0x1216   :  { %7324 = vmatpush2.bf16.msra.mxu0 %v17722_v52 }
0x1217   :  { %7367 = vmatpush2.bf16.msra.mxu1 %v17725_v46  ;;  %7325 = vmatprep.subr.bf16.mxu0 %v17730_v58 }
0x1218   :  { %7368 = vmatprep.subr.bf16.mxu1 %v17733_v54 }
0x121a   :  { %7326 = vmatpush2.bf16.msra.mxu0 %v17728_v42 }
0x121b   :  { %7369 = vmatpush2.bf16.msra.mxu1 %v17731_v56  ;;  %7568 = vmatprep.subr.bf16.mxu0 %v18475_v1 }
0x121c   :  { %7719 = vmatprep.subr.bf16.mxu1 %v18475_v1 }
0x121d   :  { %7328 = vmatmul.mubr.bf16.vlgmr.msra.gmra.mxu0 %v5485_v49  ;;  %v7071_v59 = vpop.f32.mrf.mxu0 }
0x121e   :  { %7371 = vmatmul.mubr.bf16.vlgmr.msra.gmra.mxu1 %v5487_v8  ;;  %v7114_v60 = vpop.f32.mrf.mxu1  ;;  %v7072_v6 = vadd.f32 %v7071_v59, %v5750_v23 }
0x121f   :  { %v7073_v57 = vpop.f32.mrf.mxu0 }
0x1220   :  { %v7116_v18 = vpop.f32.mrf.mxu1  ;;  %v7074_v20 = vadd.f32 %v7073_v57, %v5754_v14  ;;  %v7115_v30 = vadd.f32 %v7114_v60, %v7072_v6 }
0x1221   :  { %v7075_v3 = vpop.f32.mrf.mxu0 }
0x1222   :  { %v7118_v19 = vpop.f32.mrf.mxu1  ;;  %v7076_v24 = vadd.f32 %v7075_v3, %v5750_v23  ;;  %v7117_v32 = vadd.f32 %v7116_v18, %v7074_v20 }
0x1223   :  { %v7077_v47 = vpop.f32.mrf.mxu0 }
0x1224   :  { %v7120_v61 = vpop.f32.mrf.mxu1  ;;  %v7078_v39 = vadd.f32 %v7077_v47, %v5754_v14  ;;  %v7119_v7 = vadd.f32 %v7118_v19, %v7076_v24 }
0x1226   :  { %v7121_v34 = vadd.f32 %v7120_v61, %v7078_v39  ;;  %v17737_v39 = vld [vmem:[%s21257_s9 + $0x30] sm:$0xff]  }
0x125d   :  { %v7157_v62 = vpop.f32.mrf.mxu0 }
0x125e   :  { %v7200_v63 = vpop.f32.mrf.mxu1  ;;  %v7158_v44 = vadd.f32 %v7157_v62, %v7115_v30 }
0x125f   :  { %v7159_v2 = vpop.f32.mrf.mxu0 }
0x1260   :  { %v7202_v5 = vpop.f32.mrf.mxu1  ;;  %v7160_v26 = vadd.f32 %v7159_v2, %v7117_v32  ;;  %v7201_v51 = vadd.f32 %v7200_v63, %v7158_v44  ;;  %v17736_v32 = vld [vmem:[%s21256_s5 + $0x30] sm:$0xff]   ;;  %v17740_v44 = vld [vmem:[%s21256_s5 + $0x20] sm:$0xff]  }
0x1261   :  { %v7161_v13 = vpop.f32.mrf.mxu0 }
0x1262   :  { %v7204_v15 = vpop.f32.mrf.mxu1  ;;  %v7162_v52 = vadd.f32 %v7161_v13, %v7119_v7  ;;  %v7203_v46 = vadd.f32 %v7202_v5, %v7160_v26  ;;  %v17742_v7 = vld [vmem:[%s21256_s5 + $0x18] sm:$0xff]  }
0x1263   :  { %v7163_v10 = vpop.f32.mrf.mxu0  ;;  %v17743_v26 = vld [vmem:[%s21257_s9 + $0x18] sm:$0xff]  }
0x1264   :  { %v7206_v22 = vpop.f32.mrf.mxu1  ;;  %v7164_v58 = vadd.f32 %v7163_v10, %v7121_v34  ;;  %v7205_v11 = vadd.f32 %v7204_v15, %v7162_v52 }
0x1266   :  { %v7207_v17 = vadd.f32 %v7206_v22, %v7164_v58 }
0x129d   :  { %v7243_v28 = vpop.f32.mrf.mxu0 }
0x129e   :  { %v7286_v31 = vpop.f32.mrf.mxu1  ;;  %v7244_v53 = vadd.f32 %v7243_v28, %v7201_v51 }
0x129f   :  { %v7245_v4 = vpop.f32.mrf.mxu0 }
0x12a0   :  { %v7288_v12 = vpop.f32.mrf.mxu1  ;;  %v7246_v55 = vadd.f32 %v7245_v4, %v7203_v46  ;;  %v7287_v56 = vadd.f32 %v7286_v31, %v7244_v53  ;;  %v17735_v31 = vld [vmem:[%s21257_s9 + $0x38] sm:$0xff]   ;;  %v17741_v4 = vld [vmem:[%s21257_s9 + $0x20] sm:$0xff]  }
0x12a1   :  { %v7247_v21 = vpop.f32.mrf.mxu0  ;;  %7720 = vmatpush1.bf16.msra.mxu1 %v17735_v31 }
0x12a2   :  { %v7290_v54 = vpop.f32.mrf.mxu1  ;;  %v7248_v25 = vadd.f32 %v7247_v21, %v7205_v11  ;;  %v7289_v49 = vadd.f32 %v7288_v12, %v7246_v55  ;;  %7721 = vmatprep.subr.bf16.mxu1 %v18475_v1  ;;  %v17744_v12 = vld [vmem:[%s21256_s5 + $0x10] sm:$0xff]  }
0x12a3   :  { %v7249_v42 = vpop.f32.mrf.mxu0 }
0x12a4   :  { %v7292_v16 = vpop.f32.mrf.mxu1  ;;  %v7250_v8 = vadd.f32 %v7249_v42, %v7207_v17  ;;  %v7291_v18 = vadd.f32 %v7290_v54, %v7248_v25 }
0x12a5   :  { %7722 = vmatpush1.bf16.msra.mxu1 %v17737_v39 }
0x12a6   :  { %v7293_v62 = vadd.f32 %v7292_v16, %v7250_v8  ;;  %7723 = vmatprep.subr.bf16.mxu1 %v18475_v1  ;;  %v17746_v8 = vld [vmem:[%s21256_s5 + $0x8] sm:$0xff]  }
0x12dd   :  { %v7329_v45 = vpop.f32.mrf.mxu0 }
0x12de   :  { %v7330_v59 = vadd.f32 %v7329_v45, %v7287_v56  ;;  %v7372_v60 = vpop.f32.mrf.mxu1 }
0x12df   :  { %v7331_v57 = vpop.f32.mrf.mxu0 }
0x12e0   :  { %v7332_v3 = vadd.f32 %v7331_v57, %v7289_v49  ;;  %v7374_v19 = vpop.f32.mrf.mxu1  ;;  %v7373_v47 = vadd.f32 %v7372_v60, %v7330_v59  ;;  %v17745_v49 = vld [vmem:[%s21257_s9 + $0x10] sm:$0xff]   ;;  %v17747_v59 = vld [vmem:[%s21257_s9 + $0x8] sm:$0xff]   ;;  %v17748_v60 = vld [vmem:[%s21256_s5] sm:$0xff]  }
0x12e1   :  { %v7333_v61 = vpop.f32.mrf.mxu0  ;;  %v17749_v57 = vld [vmem:[%s21257_s9] sm:$0xff]  }
0x12e2   :  { %v7375_v63 = vadd.f32 %v7374_v19, %v7332_v3  ;;  %v7334_v0 = vadd.f32 %v7333_v61, %v7291_v18  ;;  %v7376_v2 = vpop.f32.mrf.mxu1  ;;  %v7381_v14 = vadd.f32 %v7373_v47, %v19335_v9  ;;  %v17734_v9 = vld [vmem:[%s21256_s5 + $0x38] sm:$0xff]   ;;  %v17750_v18 = vld [vmem:[%s21256_s5 + $0x60] ss:$0 sps:$4 sm:$0xff]  }
0x12e3   :  { %v7335_v5 = vpop.f32.mrf.mxu0  ;;  %7569 = vmatpush1.bf16.msra.mxu0 %v17734_v9  ;;  %v17751_v3 = vld [vmem:[%s21257_s9 + $0x60] ss:$0 sps:$4 sm:$0xff]   ;;  %v7566_v19 = vsel %vm265_vm0, %v17750_v18, 0  ;;  %v17752_v61 = vld [vmem:[%s21256_s5 + $0x58] sm:$0xff]  }
0x12e4   :  { %v7382_v23 = vadd.f32 %v7375_v63, %v19337_v48  ;;  %v7336_v13 = vadd.f32 %v7335_v5, %v7293_v62  ;;  %v7377_v15 = vadd.f32 %v7376_v2, %v7334_v0  ;;  %v7378_v6 = vpop.f32.mrf.mxu1  ;;  %7570 = vmatprep.subr.bf16.mxu0 %v18475_v1  ;;  %v7717_v47 = vsel %vm265_vm0, %v17751_v3, 0  ;;  %v17753_v62 = vld [vmem:[%s21257_s9 + $0x58] sm:$0xff]   ;;  %v17754_v63 = vld [vmem:[%s21256_s5 + $0x50] sm:$0xff]   ;;  %v17756_v2 = vld [vmem:[%s21256_s5 + $0x48] sm:$0xff]  }
0x12e5   :  { %v17755_v0 = vld [vmem:[%s21257_s9 + $0x50] sm:$0xff]   ;;  %v17757_v5 = vld [vmem:[%s21257_s9 + $0x48] sm:$0xff]   ;;  %v17773_v18 = vld [vmem:[%s21257_s9 + $0x9c] sm:$0xff]  }
0x12e6   :  { %v7379_v10 = vadd.f32 %v7378_v6, %v7336_v13  ;;  %v7387_v20 = vsel %vm261_vm1, %v7382_v23, 0.0  ;;  %v7383_v30 = vadd.f32 %v7377_v15, %v19339_v37  ;;  %v17738_v37 = vld [vmem:[%s21256_s5 + $0x28] sm:$0xff]   ;;  %v17759_v13 = vld [vmem:[%s21257_s9 + $0x40] sm:$0xff]   ;;  %v17774_v3 = vld [vmem:[%s21257_s9 + $0x94] sm:$0xff]  }
0x12e7   :  { %v7388_v22 = vadd.f32 %v7387_v20, %v7381_v14  ;;  %7571 = vmatpush1.bf16.msra.mxu0 %v17736_v32 }
0x12e8   :  { %v7384_v28 = vadd.f32 %v7379_v10, %v19341_v38  ;;  %v17739_v38 = vld [vmem:[%s21257_s9 + $0x28] sm:$0xff]   ;;  %7572 = vmatprep.subr.bf16.mxu0 %v18475_v1 }
0x12e9   :  { %7389 = vadd.xlane.f32.xlu0 %v7388_v22  ;;  %7724 = vmatpush1.bf16.msra.mxu1 %v17739_v38 }
0x12ea   :  { %v7391_v48 = vsel %vm261_vm1, %v7384_v28, 0.0  ;;  %7725 = vmatprep.subr.bf16.mxu1 %v18475_v1 }
0x12eb   :  { %v7392_v24 = vadd.f32 %v7391_v48, %v7383_v30  ;;  %7573 = vmatpush1.bf16.msra.mxu0 %v17738_v37  ;;  %v7386_v48 = vld [vmem:[%s21259_s17] sm:$0x3] }
0x12ec   :  { %7574 = vmatprep.subr.bf16.mxu0 %v18475_v1  ;;  %v7442_v37 = vrot.slane %v7386_v48, %v19213_v27  ;;  %v7446_v38 = vrot.slane %v7386_v48, %v19217_v29 }
0x12ed   :  { %7393 = vadd.xlane.f32.xlu1 %v7392_v24  ;;  %7726 = vmatpush1.bf16.msra.mxu1 %v17741_v4 }
0x12ee   :  { %7727 = vmatprep.subr.bf16.mxu1 %v18475_v1 }
0x12ef   :  { %7575 = vmatpush1.bf16.msra.mxu0 %v17740_v44 }
0x12f0   :  { %7576 = vmatprep.subr.bf16.mxu0 %v18475_v1 }
0x12f1   :  { %7728 = vmatpush1.bf16.msra.mxu1 %v17743_v26 }
0x12f2   :  { %7729 = vmatprep.subr.bf16.mxu1 %v18475_v1 }
0x12f3   :  { %7577 = vmatpush1.bf16.msra.mxu0 %v17742_v7 }
0x12f4   :  { %7578 = vmatprep.subr.bf16.mxu0 %v18475_v1 }
0x12f5   :  { %7730 = vmatpush1.bf16.msra.mxu1 %v17745_v49 }
0x12f6   :  { %7731 = vmatprep.subr.bf16.mxu1 %v18475_v1 }
0x12f7   :  { %7579 = vmatpush1.bf16.msra.mxu0 %v17744_v12 }
0x12f8   :  { %7580 = vmatprep.subr.bf16.mxu0 %v18475_v1 }
0x12f9   :  { %7732 = vmatpush1.bf16.msra.mxu1 %v17747_v59  ;;  %v17770_v59 = vld [vmem:[%s21260_s21 + $0x50] sm:$0xff]  }
0x12fa   :  { %7733 = vmatprep.subr.bf16.mxu1 %v18475_v1 }
0x12fb   :  { %7581 = vmatpush1.bf16.msra.mxu0 %v17746_v8  ;;  %v17769_v8 = vld [vmem:[%s21260_s21 + $0x58] sm:$0xff]  }
0x12fc   :  { %7582 = vmatprep.subr.bf16.mxu0 %v18475_v1 }
0x12fd   :  { %7734 = vmatpush1.bf16.msra.mxu1 %v17749_v57  ;;  %v17772_v57 = vld [vmem:[%s21260_s21 + $0x40] sm:$0xff]  }
0x12fe   :  { %7741 = vmatprep.subr.bf16.mxu1 %v18475_v1 }
0x12ff   :  { %7583 = vmatpush1.bf16.msra.mxu0 %v17748_v60  ;;  %v17771_v60 = vld [vmem:[%s21260_s21 + $0x48] sm:$0xff]  }
0x1300   :  { %7590 = vmatprep.subr.bf16.mxu0 %v18475_v1 }
0x1301   :  { %7742 = vmatpush2.bf16.msra.mxu1 %v7717_v47  ;;  %v17776_v47 = vld [vmem:[%s21257_s9 + $0x84] sm:$0xff]  }
0x1302   :  { %7743 = vmatprep.subr.bf16.mxu1 %v18475_v1 }
0x1303   :  { %7591 = vmatpush2.bf16.msra.mxu0 %v7566_v19  ;;  %v17775_v19 = vld [vmem:[%s21257_s9 + $0x8c] sm:$0xff]  }
0x1304   :  { %7592 = vmatprep.subr.bf16.mxu0 %v18475_v1 }
0x1305   :  { %7744 = vmatpush2.bf16.msra.mxu1 %v17753_v62  ;;  %v17778_v62 = vld [vmem:[%s21257_s9 + $0x74] sm:$0xff]  }
0x1306   :  { %7745 = vmatprep.subr.bf16.mxu1 %v18475_v1 }
0x1307   :  { %7593 = vmatpush2.bf16.msra.mxu0 %v17752_v61  ;;  %v17777_v61 = vld [vmem:[%s21257_s9 + $0x7c] sm:$0xff]  }
0x1308   :  { %7594 = vmatprep.subr.bf16.mxu0 %v18475_v1 }
0x1309   :  { %7746 = vmatpush2.bf16.msra.mxu1 %v17755_v0  ;;  %v17780_v0 = vld [vmem:[%s21257_s9 + $0x64] sm:$0xff]  }
0x130a   :  { %7747 = vmatprep.subr.bf16.mxu1 %v18475_v1 }
0x130b   :  { %7595 = vmatpush2.bf16.msra.mxu0 %v17754_v63  ;;  %v17779_v63 = vld [vmem:[%s21257_s9 + $0x6c] sm:$0xff]  }
0x130c   :  { %7596 = vmatprep.subr.bf16.mxu0 %v18475_v1 }
0x130d   :  { %7748 = vmatpush2.bf16.msra.mxu1 %v17757_v5 }
0x130e   :  { %7749 = vmatprep.subr.bf16.mxu1 %v18475_v1 }
0x130f   :  { %7597 = vmatpush2.bf16.msra.mxu0 %v17756_v2  ;;  %v17781_v2 = vld [vmem:[%s21257_s9 + $0xc4] ss:$0 sps:$4 sm:$0xff]  }
0x1310   :  { %7598 = vmatprep.subr.bf16.mxu0 %v18475_v1  ;;  %v8504_v5 = vsel %vm265_vm0, %v17781_v2, 0 }
0x1311   :  { %7750 = vmatpush2.bf16.msra.mxu1 %v17759_v13  ;;  %v17783_v13 = vld [vmem:[%s21257_s9 + $0xb4] sm:$0xff]  }
0x1312   :  { %17015 = vmatprep.subr.mxu1 %v18476_v35 }
0x1372   :  { %v7390_v34 = vpop.xlane.xlu0 %7389 }
0x1373   :  { %v7395_v51 = vmul.f32 0.005, %v7390_v34 }
0x1375   :  { %v19920_v52 = vsub.f32 %v7381_v14, %v7395_v51  ;;  %v19922_v21 = vsub.f32 %v7382_v23, %v7395_v51  ;;  %v17758_v23 = vld [vmem:[%s21256_s5 + $0x40] sm:$0xff]  }
0x1376   :  { %v7394_v46 = vpop.xlane.xlu1 %7393  ;;  %7599 = vmatpush2.bf16.msra.mxu0 %v17758_v23  ;;  %v17782_v23 = vld [vmem:[%s21257_s9 + $0xbc] sm:$0xff]  }
0x1377   :  { %v7396_v58 = vmul.f32 0.005, %v7394_v46  ;;  %v7401_v53 = vmul.f32 %v19920_v52, %v19920_v52  ;;  %v7402_v54 = vmul.f32 %v19922_v21, %v19922_v21  ;;  %7870 = vmatprep.subr.bf16.mxu0 %v18475_v1 }
0x1379   :  { %v19928_v11 = vsub.f32 %v7383_v30, %v7396_v58  ;;  %v19930_v55 = vsub.f32 %v7384_v28, %v7396_v58  ;;  %v7405_v42 = vsel %vm261_vm1, %v7402_v54, 0.0  ;;  %v7385_v28 = vld [vmem:[%s21258_s13] sm:$0x3]  ;;  %v17760_v54 = vld [vmem:[%s21260_s21 + $0x38] sm:$0xff]  }
0x137a   :  { %v7406_v17 = vadd.f32 %v7405_v42, %v7401_v53  ;;  %v7427_v24 = vrot.slane %v7385_v28, %v19213_v27  ;;  %v7431_v9 = vrot.slane %v7385_v28, %v19217_v29  ;;  %v17763_v42 = vld [vmem:[%s21260_s21 + $0x20] sm:$0xff]  }
0x137b   :  { %v7403_v56 = vmul.f32 %v19928_v11, %v19928_v11  ;;  %v7404_v25 = vmul.f32 %v19930_v55, %v19930_v55 }
0x137c   :  { %7407 = vadd.xlane.f32.xlu0 %v7406_v17  ;;  %v17764_v17 = vld [vmem:[%s21260_s21 + $0x18] sm:$0xff]  }
0x137d   :  { %v7409_v16 = vsel %vm261_vm1, %v7404_v25, 0.0  ;;  %v17766_v25 = vld [vmem:[%s21260_s21 + $0x8] sm:$0xff]  }
0x137e   :  { %v7410_v45 = vadd.f32 %v7409_v16, %v7403_v56  ;;  %v17765_v56 = vld [vmem:[%s21260_s21 + $0x10] sm:$0xff]   ;;  %v17767_v16 = vld [vmem:[%s21260_s21] sm:$0xff]  }
0x1380   :  { %7411 = vadd.xlane.f32.xlu1 %v7410_v45  ;;  %v17768_v45 = vld [vmem:[%s21260_s21 + $0x60] ss:$0 sps:$4 sm:$0xff]  }
0x1381   :  { %v7868_v49 = vsel %vm265_vm0, %v17768_v45, 0 }
0x1405   :  { %v7408_v14 = vpop.xlane.xlu0 %7407 }
0x1406   :  { %v7413_v15 = vmul.f32 0.005, %v7408_v14  ;;  %v17784_v14 = vld [vmem:[%s21257_s9 + $0xac] sm:$0xff]  }
0x1408   :  { %v7415_v6 = vadd.f32 1e-05, %v7413_v15  ;;  %v17785_v15 = vld [vmem:[%s21257_s9 + $0xa4] sm:$0xff]  }
0x1409   :  { %v7412_v10 = vpop.xlane.xlu1 %7411 }
0x140a   :  { %18370 = vrsqrt.f32 %v7415_v6  ;;  %v7414_v20 = vmul.f32 0.005, %v7412_v10  ;;  %v15905_v6 = vld [vmem:[%s21261_s25] ss:$0 sm:$0xff] }
0x140c   :  { %v7416_v22 = vadd.f32 1e-05, %v7414_v20 }
0x140e   :  { %18372 = vrsqrt.f32 %v7416_v22  ;;  %v15890_v22 = vld [vmem:[%s21262_s29] ss:$0 sm:$0xff] }
0x1417   :  { %v18371_v30 = vpop.eup %18370 }
0x1418   :  { %v7419_v31 = vmul.f32 %v18371_v30, %v19920_v52  ;;  %v7420_v32 = vmul.f32 %v18371_v30, %v19922_v21 }
0x141a   :  { %v7434_v44 = vmul.f32 %v7427_v24, %v7419_v31  ;;  %v7435_v4 = vmul.f32 %v7431_v9, %v7420_v32 }
0x141b   :  { %v18373_v39 = vpop.eup %18372 }
0x141c   :  { %v7421_v7 = vmul.f32 %v18373_v39, %v19928_v11  ;;  %v7422_v26 = vmul.f32 %v18373_v39, %v19930_v55  ;;  %v19980_v51 = vadd.f32 %v7442_v37, %v7434_v44  ;;  %v19982_v52 = vadd.f32 %v7446_v38, %v7435_v4  ;;  %v17761_v11 = vld [vmem:[%s21260_s21 + $0x30] sm:$0xff]   ;;  %v17762_v55 = vld [vmem:[%s21260_s21 + $0x28] sm:$0xff]   ;;  %v15920_v44 = vld [vmem:[%s21263_s3] ss:$0 sm:$0xff] }
0x141e   :  { %v7436_v12 = vmul.f32 %v7427_v24, %v7421_v7  ;;  %v7437_v34 = vmul.f32 %v7431_v9, %v7422_v26 }
0x1420   :  { %v19984_v21 = vadd.f32 %v7442_v37, %v7436_v12  ;;  %v19986_v46 = vadd.f32 %v7446_v38, %v7437_v34 }
0x1422   :  { %v19990_v58 = vpack.c.bf16 %v19984_v21, %v19980_v51  ;;  %v19994_v53 = vpack.c.bf16 %v19986_v46, %v19982_v52 }
0x1424   :  { %15904 = vmatprep.mubr.msk.bf16.mxu0 %vm261_vm1, %v19994_v53  ;;  %15919 = vmatprep.mubr.msk.bf16.mxu1 %vm261_vm1, %v19994_v53 }
0x1425   :  { %7601 = vmatmul.mubr.bf16.vlgmr.msra.gmra.mxu0 %v19990_v58  ;;  %7752 = vmatmul.mubr.bf16.vlgmr.msra.gmra.mxu1 %v19990_v58 }
0x1426   :  { %7871 = vmatpush1.bf16.msra.mxu0 %v17760_v54  ;;  %15934 = vmatprep.mubr.msk.bf16.mxu0 %vm261_vm1, %v19994_v53 }
0x1427   :  { %7872 = vmatprep.subr.bf16.mxu0 %v18475_v1  ;;  %17017 = vmatprep.mubr.msk.f32.mxu1 %vm18477_vm2, %v18476_v35 }
0x142a   :  { %7873 = vmatpush1.bf16.msra.mxu0 %v17761_v11  ;;  %v16008_v11 = vld [vmem:[%s21261_s25 + $0x1] ss:$0 sm:$0xff] }
0x142b   :  { %7874 = vmatprep.subr.bf16.mxu0 %v18475_v1 }
0x142e   :  { %7875 = vmatpush1.bf16.msra.mxu0 %v17762_v55 }
0x142f   :  { %7876 = vmatprep.subr.bf16.mxu0 %v18475_v1 }
0x1432   :  { %7877 = vmatpush1.bf16.msra.mxu0 %v17763_v42 }
0x1433   :  { %7878 = vmatprep.subr.bf16.mxu0 %v18475_v1 }
0x1436   :  { %7879 = vmatpush1.bf16.msra.mxu0 %v17764_v17 }
0x1437   :  { %7880 = vmatprep.subr.bf16.mxu0 %v18475_v1 }
0x143a   :  { %7881 = vmatpush1.bf16.msra.mxu0 %v17765_v56 }
0x143b   :  { %7882 = vmatprep.subr.bf16.mxu0 %v18475_v1 }
0x143e   :  { %7883 = vmatpush1.bf16.msra.mxu0 %v17766_v25 }
0x143f   :  { %7884 = vmatprep.subr.bf16.mxu0 %v18475_v1 }
0x1442   :  { %7885 = vmatpush1.bf16.msra.mxu0 %v17767_v16 }
0x1443   :  { %7892 = vmatprep.subr.bf16.mxu0 %v18475_v1 }
0x1446   :  { %7893 = vmatpush2.bf16.msra.mxu0 %v7868_v49 }
0x1447   :  { %7894 = vmatprep.subr.bf16.mxu0 %v18475_v1 }
0x144a   :  { %7895 = vmatpush2.bf16.msra.mxu0 %v17769_v8 }
0x144b   :  { %7896 = vmatprep.subr.bf16.mxu0 %v18475_v1 }
0x144e   :  { %7897 = vmatpush2.bf16.msra.mxu0 %v17770_v59 }
0x144f   :  { %7898 = vmatprep.subr.bf16.mxu0 %v18475_v1 }
0x1452   :  { %7899 = vmatpush2.bf16.msra.mxu0 %v17771_v60 }
0x1453   :  { %7900 = vmatprep.subr.bf16.mxu0 %v18475_v1 }
0x1456   :  { %7901 = vmatpush2.bf16.msra.mxu0 %v17772_v57 }
0x1457   :  { %8506 = vmatprep.subr.bf16.mxu0 %v18475_v1 }
0x1459   :  { %7903 = vmatmul.mubr.bf16.vlgmr.msra.gmra.mxu0 %v19990_v58 }
0x145a   :  { %8507 = vmatpush1.bf16.msra.mxu0 %v17773_v18  ;;  %16022 = vmatprep.mubr.msk.bf16.mxu0 %vm261_vm1, %v19994_v53 }
0x145b   :  { %8508 = vmatprep.subr.bf16.mxu0 %v18475_v1 }
0x145e   :  { %8509 = vmatpush1.bf16.msra.mxu0 %v17774_v3 }
0x145f   :  { %8510 = vmatprep.subr.bf16.mxu0 %v18475_v1 }
0x1462   :  { %8511 = vmatpush1.bf16.msra.mxu0 %v17775_v19 }
0x1463   :  { %8512 = vmatprep.subr.bf16.mxu0 %v18475_v1 }
0x1466   :  { %8513 = vmatpush1.bf16.msra.mxu0 %v17776_v47 }
0x1467   :  { %8514 = vmatprep.subr.bf16.mxu0 %v18475_v1 }
0x146a   :  { %8515 = vmatpush1.bf16.msra.mxu0 %v17777_v61 }
0x146b   :  { %8516 = vmatprep.subr.bf16.mxu0 %v18475_v1 }
0x146e   :  { %8517 = vmatpush1.bf16.msra.mxu0 %v17778_v62 }
0x146f   :  { %8518 = vmatprep.subr.bf16.mxu0 %v18475_v1 }
0x1472   :  { %8519 = vmatpush1.bf16.msra.mxu0 %v17779_v63 }
0x1473   :  { %8520 = vmatprep.subr.bf16.mxu0 %v18475_v1 }
0x1476   :  { %8521 = vmatpush1.bf16.msra.mxu0 %v17780_v0 }
0x1477   :  { %8528 = vmatprep.subr.bf16.mxu0 %v18475_v1 }
0x147a   :  { %8529 = vmatpush2.bf16.msra.mxu0 %v8504_v5 }
0x147b   :  { %8530 = vmatprep.subr.bf16.mxu0 %v18475_v1 }
0x147e   :  { %8531 = vmatpush2.bf16.msra.mxu0 %v17782_v23 }
0x147f   :  { %8532 = vmatprep.subr.bf16.mxu0 %v18475_v1 }
0x1482   :  { %8533 = vmatpush2.bf16.msra.mxu0 %v17783_v13 }
0x1483   :  { %8534 = vmatprep.subr.bf16.mxu0 %v18475_v1 }
0x1486   :  { %8535 = vmatpush2.bf16.msra.mxu0 %v17784_v14 }
0x1487   :  { %8536 = vmatprep.subr.bf16.mxu0 %v18475_v1 }
0x148a   :  { %8537 = vmatpush2.bf16.msra.mxu0 %v17785_v15 }
0x148b   :  { %17035 = vmatprep.subr.mxu0 %v18476_v35 }
0x148d   :  { %8539 = vmatmul.mubr.bf16.vlgmr.msra.gmra.mxu0 %v19990_v58 }
0x148e   :  { %17037 = vmatprep.mubr.msk.f32.mxu0 %vm18477_vm2, %v18476_v35 }
0x14e5   :  { %v7602_v10 = vpop.f32.mrf.mxu0  ;;  %v7753_v20 = vpop.f32.mrf.mxu1 }
0x14e6   :  { %v7754_v28 = vadd.f32 %v15905_v6, %v7753_v20  ;;  %v7603_v24 = vadd.f32 %v15890_v22, %v7602_v10 }
0x14e7   :  { %v7604_v30 = vpop.f32.mrf.mxu0  ;;  %v7755_v48 = vpop.f32.mrf.mxu1 }
0x14e8   :  { %17016 = vmatpush3.xpose.msk.msra.mxu1 %vm612_vm3, %v7754_v28  ;;  %v17787_v30 = vld [vmem:[%s21256_s5 + $0x94] sm:$0xff]   ;;  %v17788_v48 = vld [vmem:[%s21256_s5 + $0x8c] sm:$0xff]  }
0x14e9   :  { %v7605_v9 = vpop.f32.mrf.mxu0  ;;  %v7756_v31 = vpop.f32.mrf.mxu1  ;;  %17020 = vmatprep.subr.mxu1 %v18476_v35 }
0x14ea   :  { %v7757_v32 = vadd.f32 %v15905_v6, %v7756_v31  ;;  %v7606_v38 = vadd.f32 %v15890_v22, %v7605_v9  ;;  %v17786_v22 = vld [vmem:[%s21256_s5 + $0x9c] sm:$0xff]   ;;  %v17791_v31 = vld [vmem:[%s21256_s5 + $0x74] sm:$0xff]  }
0x14eb   :  { %v7607_v39 = vpop.f32.mrf.mxu0  ;;  %v7758_v37 = vpop.f32.mrf.mxu1  ;;  %17018 = vmatmul.mubr.msk.f32.vlgmr.msra.gmra.mxu1 %vm612_vm3, %v7603_v24  ;;  %v17789_v24 = vld [vmem:[%s21256_s5 + $0x84] sm:$0xff]   ;;  %v17790_v9 = vld [vmem:[%s21256_s5 + $0x7c] sm:$0xff]  }
0x14ec   :  { %17021 = vmatpush3.xpose.msk.msra.mxu1 %vm612_vm3, %v7757_v32  ;;  %17022 = vmatprep.mubr.msk.f32.mxu1 %vm18477_vm2, %v18476_v35  ;;  %v17792_v32 = vld [vmem:[%s21256_s5 + $0x6c] sm:$0xff]   ;;  %v17793_v39 = vld [vmem:[%s21256_s5 + $0x64] sm:$0xff]  }
0x14ed   :  { %17025 = vmatprep.subr.mxu1 %v18476_v35  ;;  %v17794_v37 = vld [vmem:[%s21256_s5 + $0xc4] ss:$0 sps:$4 sm:$0xff]  }
0x14ef   :  { %17023 = vmatmul.mubr.msk.f32.vlgmr.msra.gmra.mxu1 %vm612_vm3, %v7606_v38  ;;  %v8351_v38 = vsel %vm265_vm0, %v17794_v37, 0  ;;  %v17834_v37 = vld [vmem:[%s21257_s9 + $0x110] sm:$0xff]  }
0x14f0   :  { %17027 = vmatprep.mubr.msk.f32.mxu1 %vm18477_vm2, %v18476_v35 }
0x1519   :  { %v7904_v4 = vpop.f32.mrf.mxu0 }
0x151a   :  { %v7905_v7 = vadd.f32 %v15920_v44, %v7904_v4  ;;  %v17796_v4 = vld [vmem:[%s21256_s5 + $0xb4] sm:$0xff]  }
0x151b   :  { %v7906_v26 = vpop.f32.mrf.mxu0 }
0x151c   :  { %17026 = vmatpush3.msra.mxu1 %v7905_v7  ;;  %v17797_v7 = vld [vmem:[%s21256_s5 + $0xac] sm:$0xff]   ;;  %v17798_v26 = vld [vmem:[%s21256_s5 + $0xa4] sm:$0xff]  }
0x151d   :  { %v7907_v12 = vpop.f32.mrf.mxu0  ;;  %17030 = vmatprep.subr.mxu1 %v18476_v35 }
0x151e   :  { %v7908_v34 = vadd.f32 %v15920_v44, %v7907_v12  ;;  %v17795_v44 = vld [vmem:[%s21256_s5 + $0xbc] sm:$0xff]  }
0x151f   :  { %v7909_v54 = vpop.f32.mrf.mxu0  ;;  %v17799_v12 = vld [vmem:[%s21260_s21 + $0x9c] sm:$0xff]  }
0x1520   :  { %v17801_v54 = vld [vmem:[%s21260_s21 + $0x8c] sm:$0xff]  }
0x154d   :  { %v8540_v55 = vpop.f32.mrf.mxu0 }
0x154e   :  { %v8541_v42 = vadd.f32 %v16008_v11, %v8540_v55  ;;  %v17803_v55 = vld [vmem:[%s21260_s21 + $0x7c] sm:$0xff]  }
0x154f   :  { %v8542_v17 = vpop.f32.mrf.mxu0 }
0x1550   :  { %17036 = vmatpush3.xpose.msk.msra.mxu0 %vm612_vm3, %v8541_v42  ;;  %v17804_v42 = vld [vmem:[%s21260_s21 + $0x74] sm:$0xff]   ;;  %v17805_v17 = vld [vmem:[%s21260_s21 + $0x6c] sm:$0xff]  }
0x1551   :  { %v8543_v56 = vpop.f32.mrf.mxu0  ;;  %17040 = vmatprep.subr.mxu0 %v18476_v35 }
0x1552   :  { %v20083_v25 = vadd.f32 %v16008_v11, %v8543_v56  ;;  %v17802_v11 = vld [vmem:[%s21260_s21 + $0x84] sm:$0xff]  }
0x1553   :  { %v8545_v16 = vpop.f32.mrf.mxu0  ;;  %v17806_v56 = vld [vmem:[%s21260_s21 + $0x64] sm:$0xff]  }
0x1554   :  { %v17807_v16 = vld [vmem:[%s21260_s21 + $0xc4] ss:$0 sps:$4 sm:$0xff]  }
0x15ab   :  { %v7983_v45 = vpop.f32.mrf.mxu1 }
0x15ac   :  { %v8063_v49 = vmul.f32 0.14142136, %v7983_v45  ;;  %v8657_v45 = vsel %vm265_vm0, %v17807_v16, 0 }
0x15ad   :  { %v17019_v8 = vpop.f32.mrf.mxu1 }
0x15ae   :  { %v8065_v59 = vsel %vm767_vm4, %v8063_v49, -inf  ;;  %v17809_v8 = vld [vmem:[%s21260_s21 + $0xb4] sm:$0xff]  }
0x15af   :  { %8066 = vmax.xlane.f32.xlu0 %v8065_v59  ;;  %v8059_v60 = vpop.f32.mrf.mxu1  ;;  %v17810_v59 = vld [vmem:[%s21260_s21 + $0xac] sm:$0xff]  }
0x15b0   :  { %v8064_v57 = vmul.f32 0.14142136, %v8059_v60  ;;  %v8240_v60 = vld [vmem:[%s21264_s8 + $0x30] sm:$0x11] }
0x15b1   :  { %v17024_v18 = vpop.f32.mrf.mxu1 }
0x15b2   :  { %v8068_v3 = vsel %vm767_vm4, %v8064_v57, -inf  ;;  %v16094_v18 = vcombine.high %v8240_v60, %v8240_v60 }
0x15b3   :  { %8069 = vmax.xlane.f32.xlu1 %v8068_v3  ;;  %v16093_v3 = vcombine.low %v8240_v60, %v8240_v60  ;;  %v16164_v60 = vld [vmem:[%s21261_s25 + $0x2] ss:$0 sm:$0xff] }
0x1638   :  { %v8067_v19 = vpop.xlane.xlu0 %8066 }
0x1639   :  { %v8071_v47 = vsub.f32 %v8063_v49, %v8067_v19  ;;  %v17808_v49 = vld [vmem:[%s21260_s21 + $0xbc] sm:$0xff]   ;;  %v9157_v19 = vsel %vm1772_vm5, %v16093_v3, 0 }
0x163b   :  { %v8073_v61 = vmul.f32 1.442695, %v8071_v47  ;;  %v17816_v47 = vld [vmem:[%s21264_s8 + $0x24] ss:$8 sps:$4 sm:$0xff]  }
0x163c   :  { %v8070_v62 = vpop.xlane.xlu1 %8069 }
0x163d   :  { %18374 = vpow2.f32 %v8073_v61  ;;  %v8072_v63 = vsub.f32 %v8064_v57, %v8070_v62  ;;  %v17811_v57 = vld [vmem:[%s21260_s21 + $0xa4] sm:$0xff]   ;;  %v17819_v62 = vld [vmem:[%s21264_s8 + $0x14] ss:$8 sps:$4 sm:$0xff]  }
0x163e   :  { %v17814_v61 = vld [vmem:[%s21264_s8 + $0x20] ss:$8 sps:$4 sm:$0xff]  }
0x163f   :  { %v8075_v0 = vmul.f32 1.442695, %v8072_v63  ;;  %v17817_v63 = vld [vmem:[%s21264_s8 + $0x10] ss:$8 sps:$4 sm:$0xff]  }
0x1641   :  { %18376 = vpow2.f32 %v8075_v0  ;;  %v17822_v0 = vld [vmem:[%s21264_s8 + $0x4] ss:$8 sps:$4 sm:$0xff]  }
0x164a   :  { %v18375_v2 = vpop.eup %18374 }
0x164b   :  { %v8077_v5 = vsel %vm767_vm4, %v18375_v2, 0.0 }
0x164c   :  { %8078 = vadd.xlane.f32.xlu0 %v8077_v5 }
0x164e   :  { %v18377_v23 = vpop.eup %18376 }
0x164f   :  { %v8080_v13 = vsel %vm767_vm4, %v18377_v23, 0.0 }
0x1650   :  { %8081 = vadd.xlane.f32.xlu1 %v8080_v13 }
0x16d5   :  { %v8079_v14 = vpop.xlane.xlu0 %8078 }
0x16d6   :  { %18378 = vrcp.f32 %v8079_v14  ;;  %v17823_v14 = vld [vmem:[%s21257_s9 + $0x100] sm:$0xff]  }
0x16d9   :  { %v8082_v15 = vpop.xlane.xlu1 %8081 }
0x16da   :  { %18380 = vrcp.f32 %v8082_v15 }
0x16e3   :  { %v18379_v6 = vpop.eup %18378 }
0x16e4   :  { %v8085_v10 = vmul.f32 %v18379_v6, %v18375_v2  ;;  %v17820_v2 = vld [vmem:[%s21264_s8] ss:$8 sps:$4 sm:$0xff]  }
0x16e6   :  { %17028 = vmatmul.mubr.msk.f32.vlgmr.msra.gmra.mxu1 %vm767_vm4, %v8085_v10  ;;  %v17824_v10 = vld [vmem:[%s21257_s9 + $0xf8] sm:$0xff]  }
0x16e7   :  { %v18381_v20 = vpop.eup %18380  ;;  %17031 = vmatpush3.msra.mxu1 %v7908_v34  ;;  %17032 = vmatprep.mubr.msk.f32.mxu1 %vm18477_vm2, %v18476_v35  ;;  %v17800_v34 = vld [vmem:[%s21260_s21 + $0x94] sm:$0xff]  }
0x16e8   :  { %8353 = vmatprep.subr.bf16.mxu1 %v18475_v1  ;;  %v8086_v28 = vmul.f32 %v18381_v20, %v18377_v23  ;;  %v17825_v20 = vld [vmem:[%s21257_s9 + $0xf0] sm:$0xff]  }
0x16ea   :  { %17033 = vmatmul.mubr.msk.f32.vlgmr.msra.gmra.mxu1 %vm767_vm4, %v8086_v28  ;;  %v17827_v28 = vld [vmem:[%s21257_s9 + $0xe0] sm:$0xff]  }
0x16eb   :  { %8354 = vmatpush1.bf16.msra.mxu1 %v17786_v22  ;;  %15981 = vmatprep.mubr.msk.bf16.mxu1 %vm261_vm1, %v19994_v53  ;;  %v17826_v22 = vld [vmem:[%s21257_s9 + $0xe8] sm:$0xff]  }
0x16ec   :  { %8355 = vmatprep.subr.bf16.mxu1 %v18475_v1 }
0x16ef   :  { %8356 = vmatpush1.bf16.msra.mxu1 %v17787_v30  ;;  %v17828_v30 = vld [vmem:[%s21257_s9 + $0xd8] sm:$0xff]  }
0x16f0   :  { %8357 = vmatprep.subr.bf16.mxu1 %v18475_v1 }
0x16f3   :  { %8358 = vmatpush1.bf16.msra.mxu1 %v17788_v48  ;;  %v17829_v48 = vld [vmem:[%s21257_s9 + $0xd0] sm:$0xff]  }
0x16f4   :  { %8359 = vmatprep.subr.bf16.mxu1 %v18475_v1 }
0x16f7   :  { %8360 = vmatpush1.bf16.msra.mxu1 %v17789_v24  ;;  %v17830_v24 = vld [vmem:[%s21257_s9 + $0xc8] sm:$0xff]  }
0x16f8   :  { %8361 = vmatprep.subr.bf16.mxu1 %v18475_v1 }
0x16fb   :  { %8362 = vmatpush1.bf16.msra.mxu1 %v17790_v9  ;;  %v17831_v9 = vld [vmem:[%s21257_s9 + $0x128] ss:$0 sps:$4 sm:$0xff]  }
0x16fc   :  { %8363 = vmatprep.subr.bf16.mxu1 %v18475_v1 }
0x16ff   :  { %8364 = vmatpush1.bf16.msra.mxu1 %v17791_v31  ;;  %v9468_v31 = vsel %vm265_vm0, %v17831_v9, 0 }
0x1700   :  { %8365 = vmatprep.subr.bf16.mxu1 %v18475_v1 }
0x1703   :  { %8366 = vmatpush1.bf16.msra.mxu1 %v17792_v32  ;;  %v17832_v32 = vld [vmem:[%s21257_s9 + $0x120] sm:$0xff]  }
0x1704   :  { %8367 = vmatprep.subr.bf16.mxu1 %v18475_v1 }
0x1707   :  { %8368 = vmatpush1.bf16.msra.mxu1 %v17793_v39  ;;  %v17833_v39 = vld [vmem:[%s21257_s9 + $0x118] sm:$0xff]  }
0x1708   :  { %8375 = vmatprep.subr.bf16.mxu1 %v18475_v1 }
0x170b   :  { %8376 = vmatpush2.bf16.msra.mxu1 %v8351_v38  ;;  %v17835_v38 = vld [vmem:[%s21257_s9 + $0x108] sm:$0xff]  }
0x170c   :  { %8377 = vmatprep.subr.bf16.mxu1 %v18475_v1 }
0x170f   :  { %8378 = vmatpush2.bf16.msra.mxu1 %v17795_v44  ;;  %v15967_v44 = vld [vmem:[%s21262_s29 + $0x1] ss:$0 sm:$0xff] }
0x1710   :  { %8379 = vmatprep.subr.bf16.mxu1 %v18475_v1 }
0x1713   :  { %8380 = vmatpush2.bf16.msra.mxu1 %v17796_v4 }
0x1714   :  { %8381 = vmatprep.subr.bf16.mxu1 %v18475_v1 }
0x1717   :  { %8382 = vmatpush2.bf16.msra.mxu1 %v17797_v7 }
0x1718   :  { %8383 = vmatprep.subr.bf16.mxu1 %v18475_v1 }
0x171b   :  { %8384 = vmatpush2.bf16.msra.mxu1 %v17798_v26 }
0x171c   :  { %8659 = vmatprep.subr.bf16.mxu1 %v18475_v1 }
0x171e   :  { %8386 = vmatmul.mubr.bf16.vlgmr.msra.gmra.mxu1 %v19990_v58 }
0x171f   :  { %8660 = vmatpush1.bf16.msra.mxu1 %v17799_v12  ;;  %16063 = vmatprep.mubr.msk.bf16.mxu1 %vm261_vm1, %v19994_v53 }
0x1720   :  { %8661 = vmatprep.subr.bf16.mxu1 %v18475_v1 }
0x1723   :  { %8662 = vmatpush1.bf16.msra.mxu1 %v17800_v34 }
0x1724   :  { %8663 = vmatprep.subr.bf16.mxu1 %v18475_v1 }
0x1727   :  { %8664 = vmatpush1.bf16.msra.mxu1 %v17801_v54 }
0x1728   :  { %8665 = vmatprep.subr.bf16.mxu1 %v18475_v1 }
0x172b   :  { %8666 = vmatpush1.bf16.msra.mxu1 %v17802_v11  ;;  %v16049_v11 = vld [vmem:[%s21263_s3 + $0x1] ss:$0 sm:$0xff] }
0x172c   :  { %8667 = vmatprep.subr.bf16.mxu1 %v18475_v1 }
0x172f   :  { %8668 = vmatpush1.bf16.msra.mxu1 %v17803_v55 }
0x1730   :  { %8669 = vmatprep.subr.bf16.mxu1 %v18475_v1 }
0x1733   :  { %8670 = vmatpush1.bf16.msra.mxu1 %v17804_v42 }
0x1734   :  { %8671 = vmatprep.subr.bf16.mxu1 %v18475_v1 }
0x1737   :  { %8672 = vmatpush1.bf16.msra.mxu1 %v17805_v17 }
0x1738   :  { %8673 = vmatprep.subr.bf16.mxu1 %v18475_v1 }
0x173b   :  { %8674 = vmatpush1.bf16.msra.mxu1 %v17806_v56 }
0x173c   :  { %8681 = vmatprep.subr.bf16.mxu1 %v18475_v1 }
0x173f   :  { %8682 = vmatpush2.bf16.msra.mxu1 %v8657_v45 }
0x1740   :  { %8683 = vmatprep.subr.bf16.mxu1 %v18475_v1 }
0x1743   :  { %8684 = vmatpush2.bf16.msra.mxu1 %v17808_v49 }
0x1744   :  { %8685 = vmatprep.subr.bf16.mxu1 %v18475_v1 }
0x1747   :  { %8686 = vmatpush2.bf16.msra.mxu1 %v17809_v8 }
0x1748   :  { %8687 = vmatprep.subr.bf16.mxu1 %v18475_v1 }
0x174b   :  { %8688 = vmatpush2.bf16.msra.mxu1 %v17810_v59 }
0x174c   :  { %8689 = vmatprep.subr.bf16.mxu1 %v18475_v1 }
0x174f   :  { %8690 = vmatpush2.bf16.msra.mxu1 %v17811_v57 }
0x1750   :  { %16095 = vmatprep.subr.msk.bf16.mxu1 %vm1772_vm5, %v16094_v18 }
0x1752   :  { %8692 = vmatmul.mubr.bf16.vlgmr.msra.gmra.mxu1 %v19990_v58 }
0x1753   :  { %9171 = vmatpush1.bf16.msra.mxu1 %v9157_v19  ;;  %9194 = vmatprep.mubr.bf16.mxu1 %v18475_v1 }
0x1754   :  { %9172 = vmatprep.subr.bf16.mxu1 %v17816_v47 }
0x1757   :  { %9173 = vmatpush1.bf16.msra.mxu1 %v17814_v61 }
0x1758   :  { %9174 = vmatprep.subr.bf16.mxu1 %v17819_v62 }
0x175b   :  { %9175 = vmatpush1.bf16.msra.mxu1 %v17817_v63 }
0x175c   :  { %9176 = vmatprep.subr.bf16.mxu1 %v17822_v0 }
0x175f   :  { %9177 = vmatpush1.bf16.msra.mxu1 %v17820_v2 }
0x1760   :  { %9470 = vmatprep.subr.bf16.mxu1 %v18475_v1 }
0x17a6   :  { %v8156_v5 = vpop.f32.mrf.mxu1 }
0x17a8   :  { %v17029_v23 = vpop.f32.mrf.mxu1 }
0x17aa   :  { %v8229_v13 = vpop.f32.mrf.mxu1 }
0x17ab   :  { %v8233_v15 = vpack.c.bf16 %v8229_v13, %v8156_v5 }
0x17ac   :  { %v17034_v6 = vpop.f32.mrf.mxu1 }
0x17ad   :  { %16096 = vmatmul.mubr.msk.bf16.vlgmr.msra.gmra.mxu1 %vm612_vm3, %v8233_v15 }
0x17ae   :  { %9471 = vmatpush1.bf16.msra.mxu1 %v17823_v14  ;;  %16178 = vmatprep.mubr.msk.bf16.mxu1 %vm261_vm1, %v19994_v53 }
0x17af   :  { %9472 = vmatprep.subr.bf16.mxu1 %v18475_v1 }
0x17b2   :  { %9473 = vmatpush1.bf16.msra.mxu1 %v17824_v10 }
0x17b3   :  { %9474 = vmatprep.subr.bf16.mxu1 %v18475_v1 }
0x17b6   :  { %9475 = vmatpush1.bf16.msra.mxu1 %v17825_v20 }
0x17b7   :  { %9476 = vmatprep.subr.bf16.mxu1 %v18475_v1 }
0x17ba   :  { %9477 = vmatpush1.bf16.msra.mxu1 %v17826_v22 }
0x17bb   :  { %9478 = vmatprep.subr.bf16.mxu1 %v18475_v1 }
0x17be   :  { %9479 = vmatpush1.bf16.msra.mxu1 %v17827_v28 }
0x17bf   :  { %9480 = vmatprep.subr.bf16.mxu1 %v18475_v1 }
0x17c2   :  { %9481 = vmatpush1.bf16.msra.mxu1 %v17828_v30 }
0x17c3   :  { %9482 = vmatprep.subr.bf16.mxu1 %v18475_v1 }
0x17c6   :  { %9483 = vmatpush1.bf16.msra.mxu1 %v17829_v48 }
0x17c7   :  { %9484 = vmatprep.subr.bf16.mxu1 %v18475_v1 }
0x17ca   :  { %9485 = vmatpush1.bf16.msra.mxu1 %v17830_v24 }
0x17cb   :  { %9492 = vmatprep.subr.bf16.mxu1 %v18475_v1 }
0x17ce   :  { %9493 = vmatpush2.bf16.msra.mxu1 %v9468_v31 }
0x17cf   :  { %9494 = vmatprep.subr.bf16.mxu1 %v18475_v1 }
0x17d2   :  { %9495 = vmatpush2.bf16.msra.mxu1 %v17832_v32 }
0x17d3   :  { %9496 = vmatprep.subr.bf16.mxu1 %v18475_v1 }
0x17d6   :  { %9497 = vmatpush2.bf16.msra.mxu1 %v17833_v39  ;;  %v16076_v39 = vld [vmem:[%s21264_s8 + $0x68] sm:$0x11] }
0x17d7   :  { %9498 = vmatprep.subr.bf16.mxu1 %v18475_v1 }
0x17da   :  { %9499 = vmatpush2.bf16.msra.mxu1 %v17834_v37 }
0x17db   :  { %9500 = vmatprep.subr.bf16.mxu1 %v18475_v1 }
0x17de   :  { %v8387_v4 = vpop.f32.mrf.mxu1  ;;  %9501 = vmatpush2.bf16.msra.mxu1 %v17835_v38 }
0x17df   :  { %v8388_v7 = vadd.f32 %v15967_v44, %v8387_v4  ;;  %17055 = vmatprep.subr.mxu1 %v18476_v35  ;;  %v16083_v4 = vcombine.low %v16076_v39, %v16076_v39 }
0x17e0   :  { %v8389_v26 = vpop.f32.mrf.mxu1 }
0x17e1   :  { %17038 = vmatmul.mubr.msk.f32.vlgmr.msra.gmra.mxu0 %vm612_vm3, %v8388_v7  ;;  %9503 = vmatmul.mubr.bf16.vlgmr.msra.gmra.mxu1 %v19990_v58 }
0x17e2   :  { %17041 = vmatpush3.xpose.msk.msra.mxu0 %vm612_vm3, %v20083_v25  ;;  %v8390_v12 = vpop.f32.mrf.mxu1  ;;  %17042 = vmatprep.mubr.msk.f32.mxu0 %vm18477_vm2, %v18476_v35 }
0x17e3   :  { %v8391_v34 = vadd.f32 %v15967_v44, %v8390_v12  ;;  %17045 = vmatprep.subr.mxu0 %v18476_v35  ;;  %17057 = vmatprep.mubr.msk.f32.mxu1 %vm18477_vm2, %v18476_v35  ;;  %v16084_v44 = vcombine.high %v16076_v39, %v16076_v39  ;;  %v9070_v12 = vsel %vm1772_vm5, %v16083_v4, 0  ;;  %v17869_v39 = vld [vmem:[%s21260_s21 + $0x120] sm:$0xff]  }
0x17e4   :  { %v8392_v54 = vpop.f32.mrf.mxu1  ;;  %v17873_v4 = vld [vmem:[%s21257_s9 + $0x164] sm:$0xff]  }
0x17e5   :  { %17043 = vmatmul.mubr.msk.f32.vlgmr.msra.gmra.mxu0 %vm612_vm3, %v8391_v34  ;;  %v17840_v34 = vld [vmem:[%s21264_s8 + $0x5c] ss:$8 sps:$4 sm:$0xff]   ;;  %v17838_v54 = vld [vmem:[%s21264_s8 + $0x58] ss:$8 sps:$4 sm:$0xff]  }
0x17e6   :  { %17047 = vmatprep.mubr.msk.f32.mxu0 %vm18477_vm2, %v18476_v35 }
0x1812   :  { %v8693_v55 = vpop.f32.mrf.mxu1 }
0x1813   :  { %v8694_v25 = vadd.f32 %v16049_v11, %v8693_v55  ;;  %v17841_v55 = vld [vmem:[%s21264_s8 + $0x48] ss:$8 sps:$4 sm:$0xff]  }
0x1814   :  { %v8695_v42 = vpop.f32.mrf.mxu1 }
0x1815   :  { %17046 = vmatpush3.msra.mxu0 %v8694_v25  ;;  %v17846_v25 = vld [vmem:[%s21264_s8 + $0x3c] ss:$8 sps:$4 sm:$0xff]   ;;  %v17844_v42 = vld [vmem:[%s21264_s8 + $0x38] ss:$8 sps:$4 sm:$0xff]  }
0x1816   :  { %v8696_v17 = vpop.f32.mrf.mxu1  ;;  %17050 = vmatprep.subr.mxu0 %v18476_v35 }
0x1817   :  { %v8697_v56 = vadd.f32 %v16049_v11, %v8696_v17  ;;  %v17843_v11 = vld [vmem:[%s21264_s8 + $0x4c] ss:$8 sps:$4 sm:$0xff]  }
0x1818   :  { %v8698_v16 = vpop.f32.mrf.mxu1 }
0x186d   :  { %v20209_v45 = vpop.f32.mrf.mxu1 }
0x186f   :  { %v20211_v49 = vpop.f32.mrf.mxu1 }
0x1871   :  { %v20213_v8 = vpop.f32.mrf.mxu1 }
0x1873   :  { %v20215_v59 = vpop.f32.mrf.mxu1 }
0x18a1   :  { %v8772_v57 = vpop.f32.mrf.mxu0  ;;  %v9504_v18 = vpop.f32.mrf.mxu1 }
0x18a2   :  { %v8852_v3 = vmul.f32 0.14142136, %v8772_v57  ;;  %v9505_v19 = vadd.f32 %v16164_v60, %v9504_v18 }
0x18a3   :  { %v17039_v47 = vpop.f32.mrf.mxu0  ;;  %v9506_v61 = vpop.f32.mrf.mxu1 }
0x18a4   :  { %17056 = vmatpush3.xpose.msk.msra.mxu1 %vm612_vm3, %v9505_v19  ;;  %v8854_v62 = vsel %vm767_vm4, %v8852_v3, -inf  ;;  %v17849_v19 = vld [vmem:[%s21256_s5 + $0xf0] sm:$0xff]   ;;  %v17850_v47 = vld [vmem:[%s21256_s5 + $0xe8] sm:$0xff]   ;;  %v17851_v61 = vld [vmem:[%s21256_s5 + $0xe0] sm:$0xff]  }
0x18a5   :  { %v9507_v63 = vpop.f32.mrf.mxu1  ;;  %8855 = vmax.xlane.f32.xlu0 %v8854_v62  ;;  %v8848_v0 = vpop.f32.mrf.mxu0  ;;  %17060 = vmatprep.subr.mxu1 %v18476_v35  ;;  %v17852_v62 = vld [vmem:[%s21256_s5 + $0xd8] sm:$0xff]  }
0x18a6   :  { %v20221_v2 = vadd.f32 %v16164_v60, %v9507_v63  ;;  %v8853_v5 = vmul.f32 0.14142136, %v8848_v0  ;;  %v17847_v60 = vld [vmem:[%s21256_s5 + $0x100] sm:$0xff]   ;;  %v17853_v63 = vld [vmem:[%s21256_s5 + $0xd0] sm:$0xff]   ;;  %v17854_v0 = vld [vmem:[%s21256_s5 + $0xc8] sm:$0xff]  }
0x18a7   :  { %v17044_v23 = vpop.f32.mrf.mxu0  ;;  %v9509_v13 = vpop.f32.mrf.mxu1 }
0x18a8   :  { %v8857_v14 = vsel %vm767_vm4, %v8853_v5, -inf  ;;  %v17856_v13 = vld [vmem:[%s21256_s5 + $0x120] sm:$0xff]  }
0x18a9   :  { %8858 = vmax.xlane.f32.xlu1 %v8857_v14  ;;  %v17857_v14 = vld [vmem:[%s21256_s5 + $0x118] sm:$0xff]  }
0x192e   :  { %v8856_v15 = vpop.xlane.xlu0 %8855 }
0x192f   :  { %v8860_v6 = vsub.f32 %v8852_v3, %v8856_v15  ;;  %v17848_v3 = vld [vmem:[%s21256_s5 + $0xf8] sm:$0xff]   ;;  %v17858_v15 = vld [vmem:[%s21256_s5 + $0x110] sm:$0xff]  }
0x1931   :  { %v8862_v10 = vmul.f32 1.442695, %v8860_v6  ;;  %v17859_v6 = vld [vmem:[%s21256_s5 + $0x108] sm:$0xff]  }
0x1932   :  { %v8859_v20 = vpop.xlane.xlu1 %8858 }
0x1933   :  { %18382 = vpow2.f32 %v8862_v10  ;;  %v8861_v22 = vsub.f32 %v8853_v5, %v8859_v20  ;;  %v17855_v5 = vld [vmem:[%s21256_s5 + $0x128] ss:$0 sps:$4 sm:$0xff]   ;;  %v17860_v10 = vld [vmem:[%s21260_s21 + $0x100] sm:$0xff]   ;;  %v17861_v20 = vld [vmem:[%s21260_s21 + $0xf8] sm:$0xff]  }
0x1934   :  { %v9315_v23 = vsel %vm265_vm0, %v17855_v5, 0 }
0x1935   :  { %v8864_v28 = vmul.f32 1.442695, %v8861_v22  ;;  %v17862_v22 = vld [vmem:[%s21260_s21 + $0xf0] sm:$0xff]  }
0x1937   :  { %18384 = vpow2.f32 %v8864_v28  ;;  %v17863_v28 = vld [vmem:[%s21260_s21 + $0xe8] sm:$0xff]  }
0x1940   :  { %v18383_v30 = vpop.eup %18382 }
0x1941   :  { %v8866_v48 = vsel %vm767_vm4, %v18383_v30, 0.0 }
0x1942   :  { %8867 = vadd.xlane.f32.xlu0 %v8866_v48  ;;  %v17865_v48 = vld [vmem:[%s21260_s21 + $0xd8] sm:$0xff]  }
0x1944   :  { %v18385_v24 = vpop.eup %18384 }
0x1945   :  { %v8869_v9 = vsel %vm767_vm4, %v18385_v24, 0.0 }
0x1946   :  { %8870 = vadd.xlane.f32.xlu1 %v8869_v9  ;;  %v17867_v9 = vld [vmem:[%s21260_s21 + $0xc8] sm:$0xff]  }
0x19cb   :  { %v8868_v31 = vpop.xlane.xlu0 %8867 }
0x19cc   :  { %18386 = vrcp.f32 %v8868_v31  ;;  %v17868_v31 = vld [vmem:[%s21260_s21 + $0x128] ss:$0 sps:$4 sm:$0xff]  }
0x19cf   :  { %v8871_v32 = vpop.xlane.xlu1 %8870 }
0x19d0   :  { %18388 = vrcp.f32 %v8871_v32  ;;  %v9621_v32 = vsel %vm265_vm0, %v17868_v31, 0 }
0x19d9   :  { %v18387_v37 = vpop.eup %18386 }
0x19da   :  { %v8874_v38 = vmul.f32 %v18387_v37, %v18383_v30  ;;  %v17864_v30 = vld [vmem:[%s21260_s21 + $0xe0] sm:$0xff]   ;;  %v17870_v37 = vld [vmem:[%s21260_s21 + $0x118] sm:$0xff]  }
0x19dc   :  { %17048 = vmatmul.mubr.msk.f32.vlgmr.msra.gmra.mxu0 %vm767_vm4, %v8874_v38  ;;  %v17871_v38 = vld [vmem:[%s21260_s21 + $0x110] sm:$0xff]  }
0x19dd   :  { %v18389_v7 = vpop.eup %18388  ;;  %17051 = vmatpush3.msra.mxu0 %v8697_v56  ;;  %17052 = vmatprep.mubr.msk.f32.mxu0 %vm18477_vm2, %v18476_v35 }
0x19de   :  { %v8875_v26 = vmul.f32 %v18389_v7, %v18385_v24  ;;  %16085 = vmatprep.subr.msk.bf16.mxu0 %vm1772_vm5, %v16084_v44  ;;  %v17866_v24 = vld [vmem:[%s21260_s21 + $0xd0] sm:$0xff]   ;;  %v17872_v44 = vld [vmem:[%s21260_s21 + $0x108] sm:$0xff]   ;;  %v17874_v7 = vld [vmem:[%s21257_s9 + $0x15c] sm:$0xff]  }
0x19e0   :  { %17053 = vmatmul.mubr.msk.f32.vlgmr.msra.gmra.mxu0 %vm767_vm4, %v8875_v26  ;;  %v17875_v26 = vld [vmem:[%s21257_s9 + $0x154] sm:$0xff]  }
0x19e1   :  { %9084 = vmatpush1.bf16.msra.mxu0 %v9070_v12  ;;  %9107 = vmatprep.mubr.bf16.mxu0 %v18475_v1  ;;  %v17876_v12 = vld [vmem:[%s21257_s9 + $0x14c] sm:$0xff]  }
0x19e2   :  { %9085 = vmatprep.subr.bf16.mxu0 %v17840_v34  ;;  %v17877_v34 = vld [vmem:[%s21257_s9 + $0x144] sm:$0xff]  }
0x19e5   :  { %9086 = vmatpush1.bf16.msra.mxu0 %v17838_v54  ;;  %v17878_v54 = vld [vmem:[%s21257_s9 + $0x13c] sm:$0xff]  }
0x19e6   :  { %9087 = vmatprep.subr.bf16.mxu0 %v17843_v11  ;;  %v17879_v11 = vld [vmem:[%s21257_s9 + $0x134] sm:$0xff]  }
0x19e9   :  { %9088 = vmatpush1.bf16.msra.mxu0 %v17841_v55  ;;  %v17880_v55 = vld [vmem:[%s21257_s9 + $0x12c] sm:$0xff]  }
0x19ea   :  { %9089 = vmatprep.subr.bf16.mxu0 %v17846_v25  ;;  %v17881_v25 = vld [vmem:[%s21257_s9 + $0x18c] ss:$0 sps:$4 sm:$0xff]  }
0x19ed   :  { %9090 = vmatpush1.bf16.msra.mxu0 %v17844_v42  ;;  %v10349_v42 = vsel %vm265_vm0, %v17881_v25, 0 }
0x19ee   :  { %9317 = vmatprep.subr.bf16.mxu0 %v18475_v1 }
0x1a9c   :  { %v8945_v17 = vpop.f32.mrf.mxu0 }
0x1a9e   :  { %v17049_v56 = vpop.f32.mrf.mxu0 }
0x1a9f   :  { %v17883_v56 = vld [vmem:[%s21257_s9 + $0x17c] sm:$0xff]  }
0x1aa0   :  { %v9018_v16 = vpop.f32.mrf.mxu0 }
0x1aa1   :  { %v9022_v57 = vpack.c.bf16 %v9018_v16, %v8945_v17  ;;  %v17882_v17 = vld [vmem:[%s21257_s9 + $0x184] sm:$0xff]   ;;  %v17884_v16 = vld [vmem:[%s21257_s9 + $0x174] sm:$0xff]  }
0x1aa2   :  { %v17054_v18 = vpop.f32.mrf.mxu0 }
0x1aa3   :  { %16086 = vmatmul.mubr.msk.bf16.vlgmr.msra.gmra.mxu0 %vm612_vm3, %v9022_v57 }
0x1aa4   :  { %9318 = vmatpush1.bf16.msra.mxu0 %v17847_v60  ;;  %16137 = vmatprep.mubr.msk.bf16.mxu0 %vm261_vm1, %v19994_v53  ;;  %v17885_v60 = vld [vmem:[%s21257_s9 + $0x16c] sm:$0xff]  }
0x1aa5   :  { %9319 = vmatprep.subr.bf16.mxu0 %v18475_v1 }
0x1aa8   :  { %9320 = vmatpush1.bf16.msra.mxu0 %v17848_v3 }
0x1aa9   :  { %9321 = vmatprep.subr.bf16.mxu0 %v18475_v1 }
0x1aac   :  { %9322 = vmatpush1.bf16.msra.mxu0 %v17849_v19 }
0x1aad   :  { %9323 = vmatprep.subr.bf16.mxu0 %v18475_v1 }
0x1ab0   :  { %9324 = vmatpush1.bf16.msra.mxu0 %v17850_v47  ;;  %v16123_v47 = vld [vmem:[%s21262_s29 + $0x2] ss:$0 sm:$0xff] }
0x1ab1   :  { %9325 = vmatprep.subr.bf16.mxu0 %v18475_v1 }
0x1ab4   :  { %9326 = vmatpush1.bf16.msra.mxu0 %v17851_v61 }
0x1ab5   :  { %9327 = vmatprep.subr.bf16.mxu0 %v18475_v1 }
0x1ab8   :  { %9328 = vmatpush1.bf16.msra.mxu0 %v17852_v62 }
0x1ab9   :  { %9329 = vmatprep.subr.bf16.mxu0 %v18475_v1 }
0x1abc   :  { %9330 = vmatpush1.bf16.msra.mxu0 %v17853_v63 }
0x1abd   :  { %9331 = vmatprep.subr.bf16.mxu0 %v18475_v1 }
0x1ac0   :  { %9332 = vmatpush1.bf16.msra.mxu0 %v17854_v0 }
0x1ac1   :  { %9339 = vmatprep.subr.bf16.mxu0 %v18475_v1 }
0x1ac4   :  { %9340 = vmatpush2.bf16.msra.mxu0 %v9315_v23 }
0x1ac5   :  { %9341 = vmatprep.subr.bf16.mxu0 %v18475_v1 }
0x1ac8   :  { %9342 = vmatpush2.bf16.msra.mxu0 %v17856_v13  ;;  %v16205_v13 = vld [vmem:[%s21263_s3 + $0x2] ss:$0 sm:$0xff] }
0x1ac9   :  { %9343 = vmatprep.subr.bf16.mxu0 %v18475_v1 }
0x1acc   :  { %9344 = vmatpush2.bf16.msra.mxu0 %v17857_v14 }
0x1acd   :  { %9345 = vmatprep.subr.bf16.mxu0 %v18475_v1 }
0x1ad0   :  { %9346 = vmatpush2.bf16.msra.mxu0 %v17858_v15 }
0x1ad1   :  { %9347 = vmatprep.subr.bf16.mxu0 %v18475_v1 }
0x1ad4   :  { %9348 = vmatpush2.bf16.msra.mxu0 %v17859_v6 }
0x1ad5   :  { %9623 = vmatprep.subr.bf16.mxu0 %v18475_v1 }
0x1ad7   :  { %9350 = vmatmul.mubr.bf16.vlgmr.msra.gmra.mxu0 %v19990_v58 }
0x1ad8   :  { %9624 = vmatpush1.bf16.msra.mxu0 %v17860_v10  ;;  %16219 = vmatprep.mubr.msk.bf16.mxu0 %vm261_vm1, %v19994_v53 }
0x1ad9   :  { %9625 = vmatprep.subr.bf16.mxu0 %v18475_v1 }
0x1adc   :  { %9626 = vmatpush1.bf16.msra.mxu0 %v17861_v20 }
0x1add   :  { %9627 = vmatprep.subr.bf16.mxu0 %v18475_v1 }
0x1ae0   :  { %9628 = vmatpush1.bf16.msra.mxu0 %v17862_v22  ;;  %v16310_v22 = vld [vmem:[%s21261_s25 + $0x3] ss:$0 sm:$0xff] }
0x1ae1   :  { %9629 = vmatprep.subr.bf16.mxu0 %v18475_v1 }
0x1ae4   :  { %9630 = vmatpush1.bf16.msra.mxu0 %v17863_v28 }
0x1ae5   :  { %9631 = vmatprep.subr.bf16.mxu0 %v18475_v1 }
0x1ae8   :  { %9632 = vmatpush1.bf16.msra.mxu0 %v17864_v30 }
0x1ae9   :  { %9633 = vmatprep.subr.bf16.mxu0 %v18475_v1 }
0x1aec   :  { %9634 = vmatpush1.bf16.msra.mxu0 %v17865_v48 }
0x1aed   :  { %9635 = vmatprep.subr.bf16.mxu0 %v18475_v1 }
0x1af0   :  { %9636 = vmatpush1.bf16.msra.mxu0 %v17866_v24 }
0x1af1   :  { %9637 = vmatprep.subr.bf16.mxu0 %v18475_v1 }
0x1af4   :  { %9638 = vmatpush1.bf16.msra.mxu0 %v17867_v9 }
0x1af5   :  { %9645 = vmatprep.subr.bf16.mxu0 %v18475_v1 }
0x1af8   :  { %9646 = vmatpush2.bf16.msra.mxu0 %v9621_v32 }
0x1af9   :  { %9647 = vmatprep.subr.bf16.mxu0 %v18475_v1 }
0x1afc   :  { %9648 = vmatpush2.bf16.msra.mxu0 %v17869_v39 }
0x1afd   :  { %9649 = vmatprep.subr.bf16.mxu0 %v18475_v1 }
0x1b00   :  { %9650 = vmatpush2.bf16.msra.mxu0 %v17870_v37 }
0x1b01   :  { %9651 = vmatprep.subr.bf16.mxu0 %v18475_v1 }
0x1b04   :  { %9652 = vmatpush2.bf16.msra.mxu0 %v17871_v38 }
0x1b05   :  { %9653 = vmatprep.subr.bf16.mxu0 %v18475_v1 }
0x1b08   :  { %9654 = vmatpush2.bf16.msra.mxu0 %v17872_v44 }
0x1b09   :  { %10351 = vmatprep.subr.bf16.mxu0 %v18475_v1 }
0x1b0b   :  { %9656 = vmatmul.mubr.bf16.vlgmr.msra.gmra.mxu0 %v19990_v58 }
0x1b0c   :  { %10352 = vmatpush1.bf16.msra.mxu0 %v17873_v4  ;;  %16324 = vmatprep.mubr.msk.bf16.mxu0 %vm261_vm1, %v19994_v53 }
0x1b0d   :  { %10353 = vmatprep.subr.bf16.mxu0 %v18475_v1 }
0x1b10   :  { %10354 = vmatpush1.bf16.msra.mxu0 %v17874_v7 }
0x1b11   :  { %10355 = vmatprep.subr.bf16.mxu0 %v18475_v1 }
0x1b14   :  { %10356 = vmatpush1.bf16.msra.mxu0 %v17875_v26 }
0x1b15   :  { %10357 = vmatprep.subr.bf16.mxu0 %v18475_v1 }
0x1b18   :  { %10358 = vmatpush1.bf16.msra.mxu0 %v17876_v12 }
0x1b19   :  { %10359 = vmatprep.subr.bf16.mxu0 %v18475_v1 }
0x1b1c   :  { %10360 = vmatpush1.bf16.msra.mxu0 %v17877_v34 }
0x1b1d   :  { %10361 = vmatprep.subr.bf16.mxu0 %v18475_v1 }
0x1b20   :  { %10362 = vmatpush1.bf16.msra.mxu0 %v17878_v54 }
0x1b21   :  { %10363 = vmatprep.subr.bf16.mxu0 %v18475_v1 }
0x1b24   :  { %10364 = vmatpush1.bf16.msra.mxu0 %v17879_v11 }
0x1b25   :  { %10365 = vmatprep.subr.bf16.mxu0 %v18475_v1 }
0x1b28   :  { %10366 = vmatpush1.bf16.msra.mxu0 %v17880_v55 }
0x1b29   :  { %10373 = vmatprep.subr.bf16.mxu0 %v18475_v1 }
0x1b2c   :  { %10374 = vmatpush2.bf16.msra.mxu0 %v10349_v42 }
0x1b2d   :  { %10375 = vmatprep.subr.bf16.mxu0 %v18475_v1 }
0x1b30   :  { %10376 = vmatpush2.bf16.msra.mxu0 %v17882_v17 }
0x1b31   :  { %10377 = vmatprep.subr.bf16.mxu0 %v18475_v1 }
0x1b34   :  { %10378 = vmatpush2.bf16.msra.mxu0 %v17883_v56 }
0x1b35   :  { %10379 = vmatprep.subr.bf16.mxu0 %v18475_v1 }
0x1b38   :  { %10380 = vmatpush2.bf16.msra.mxu0 %v17884_v16 }
0x1b39   :  { %10381 = vmatprep.subr.bf16.mxu0 %v18475_v1 }
0x1b3c   :  { %10382 = vmatpush2.bf16.msra.mxu0 %v17885_v60 }
0x1b3d   :  { %17075 = vmatprep.subr.mxu0 %v18476_v35 }
0x1b3f   :  { %10384 = vmatmul.mubr.bf16.vlgmr.msra.gmra.mxu0 %v19990_v58 }
0x1b40   :  { %17077 = vmatprep.mubr.msk.f32.mxu0 %vm18477_vm2, %v18476_v35 }
0x1b63   :  { %v20334_v57 = vpop.f32.mrf.mxu0 }
0x1b65   :  { %v20336_v18 = vpop.f32.mrf.mxu0 }
0x1b67   :  { %v20338_v3 = vpop.f32.mrf.mxu0 }
0x1b69   :  { %v20340_v19 = vpop.f32.mrf.mxu0 }
0x1b97   :  { %v9351_v61 = vpop.f32.mrf.mxu0 }
0x1b98   :  { %v9352_v62 = vadd.f32 %v16123_v47, %v9351_v61  ;;  %v16232_v61 = vld [vmem:[%s21264_s8 + $0xa0] sm:$0x11] }
0x1b99   :  { %v9353_v63 = vpop.f32.mrf.mxu0 }
0x1b9a   :  { %17058 = vmatmul.mubr.msk.f32.vlgmr.msra.gmra.mxu1 %vm612_vm3, %v9352_v62 }
0x1b9b   :  { %17061 = vmatpush3.xpose.msk.msra.mxu1 %vm612_vm3, %v20221_v2  ;;  %v9354_v0 = vpop.f32.mrf.mxu0  ;;  %17062 = vmatprep.mubr.msk.f32.mxu1 %vm18477_vm2, %v18476_v35 }
0x1b9c   :  { %v9355_v5 = vadd.f32 %v16123_v47, %v9354_v0  ;;  %17065 = vmatprep.subr.mxu1 %v18476_v35  ;;  %v16240_v0 = vcombine.high %v16232_v61, %v16232_v61 }
0x1b9d   :  { %v9356_v23 = vpop.f32.mrf.mxu0 }
0x1b9e   :  { %17063 = vmatmul.mubr.msk.f32.vlgmr.msra.gmra.mxu1 %vm612_vm3, %v9355_v5  ;;  %v16239_v5 = vcombine.low %v16232_v61, %v16232_v61  ;;  %v17917_v61 = vld [vmem:[%s21260_s21 + $0x12c] sm:$0xff]  }
0x1b9f   :  { %17067 = vmatprep.mubr.msk.f32.mxu1 %vm18477_vm2, %v18476_v35 }
0x1bcb   :  { %v9657_v14 = vpop.f32.mrf.mxu0 }
0x1bcc   :  { %v9658_v15 = vadd.f32 %v16205_v13, %v9657_v14  ;;  %v10034_v14 = vsel %vm1772_vm5, %v16239_v5, 0  ;;  %v17920_v5 = vld [vmem:[%s21260_s21 + $0x17c] sm:$0xff]  }
0x1bcd   :  { %v9659_v6 = vpop.f32.mrf.mxu0 }
0x1bce   :  { %17066 = vmatpush3.msra.mxu1 %v9658_v15  ;;  %v17890_v15 = vld [vmem:[%s21264_s8 + $0x94] ss:$8 sps:$4 sm:$0xff]   ;;  %v17888_v6 = vld [vmem:[%s21264_s8 + $0x90] ss:$8 sps:$4 sm:$0xff]  }
0x1bcf   :  { %v9660_v2 = vpop.f32.mrf.mxu0  ;;  %17070 = vmatprep.subr.mxu1 %v18476_v35 }
0x1bd0   :  { %v9661_v10 = vadd.f32 %v16205_v13, %v9660_v2  ;;  %v17893_v2 = vld [vmem:[%s21264_s8 + $0x84] ss:$8 sps:$4 sm:$0xff]  }
0x1bd1   :  { %v9662_v20 = vpop.f32.mrf.mxu0 }
0x1bd2   :  { %v17896_v20 = vld [vmem:[%s21264_s8 + $0x74] ss:$8 sps:$4 sm:$0xff]  }
0x1bff   :  { %v10385_v28 = vpop.f32.mrf.mxu0 }
0x1c00   :  { %v10386_v30 = vadd.f32 %v16310_v22, %v10385_v28 }
0x1c01   :  { %v10387_v48 = vpop.f32.mrf.mxu0 }
0x1c02   :  { %17076 = vmatpush3.xpose.msk.msra.mxu0 %vm612_vm3, %v10386_v30 }
0x1c03   :  { %v10388_v24 = vpop.f32.mrf.mxu0  ;;  %17080 = vmatprep.subr.mxu0 %v18476_v35 }
0x1c04   :  { %v20357_v9 = vadd.f32 %v16310_v22, %v10388_v24  ;;  %v17894_v22 = vld [vmem:[%s21264_s8 + $0x70] ss:$8 sps:$4 sm:$0xff]   ;;  %v17897_v24 = vld [vmem:[%s21256_s5 + $0x164] sm:$0xff]  }
0x1c05   :  { %v10390_v31 = vpop.f32.mrf.mxu0 }
0x1c5a   :  { %v9736_v32 = vpop.f32.mrf.mxu1 }
0x1c5b   :  { %v9816_v39 = vmul.f32 0.14142136, %v9736_v32 }
0x1c5c   :  { %v17059_v37 = vpop.f32.mrf.mxu1 }
0x1c5d   :  { %v9818_v38 = vsel %vm767_vm4, %v9816_v39, -inf  ;;  %v17899_v37 = vld [vmem:[%s21256_s5 + $0x154] sm:$0xff]  }
0x1c5e   :  { %9819 = vmax.xlane.f32.xlu0 %v9818_v38  ;;  %v9812_v44 = vpop.f32.mrf.mxu1  ;;  %v17900_v38 = vld [vmem:[%s21256_s5 + $0x14c] sm:$0xff]  }
0x1c5f   :  { %v9817_v4 = vmul.f32 0.14142136, %v9812_v44  ;;  %v17901_v44 = vld [vmem:[%s21256_s5 + $0x144] sm:$0xff]  }
0x1c60   :  { %v17064_v7 = vpop.f32.mrf.mxu1 }
0x1c61   :  { %v9821_v26 = vsel %vm767_vm4, %v9817_v4, -inf  ;;  %v17903_v7 = vld [vmem:[%s21256_s5 + $0x134] sm:$0xff]  }
0x1c62   :  { %9822 = vmax.xlane.f32.xlu1 %v9821_v26  ;;  %v17904_v26 = vld [vmem:[%s21256_s5 + $0x12c] sm:$0xff]  }
0x1ce7   :  { %v9820_v12 = vpop.xlane.xlu0 %9819 }
0x1ce8   :  { %v9824_v34 = vsub.f32 %v9816_v39, %v9820_v12  ;;  %v17898_v39 = vld [vmem:[%s21256_s5 + $0x15c] sm:$0xff]   ;;  %v17905_v12 = vld [vmem:[%s21256_s5 + $0x18c] ss:$0 sps:$4 sm:$0xff]  }
0x1cea   :  { %v9826_v54 = vmul.f32 1.442695, %v9824_v34  ;;  %v10196_v34 = vsel %vm265_vm0, %v17905_v12, 0 }
0x1ceb   :  { %v9823_v11 = vpop.xlane.xlu1 %9822 }
0x1cec   :  { %18390 = vpow2.f32 %v9826_v54  ;;  %v9825_v55 = vsub.f32 %v9817_v4, %v9823_v11  ;;  %v17902_v4 = vld [vmem:[%s21256_s5 + $0x13c] sm:$0xff]   ;;  %v17906_v54 = vld [vmem:[%s21256_s5 + $0x184] sm:$0xff]  }
0x1ced   :  { %v17907_v11 = vld [vmem:[%s21256_s5 + $0x17c] sm:$0xff]  }
0x1cee   :  { %v9828_v25 = vmul.f32 1.442695, %v9825_v55  ;;  %v17908_v55 = vld [vmem:[%s21256_s5 + $0x174] sm:$0xff]  }
0x1cf0   :  { %18392 = vpow2.f32 %v9828_v25  ;;  %v17909_v25 = vld [vmem:[%s21256_s5 + $0x16c] sm:$0xff]  }
0x1cf9   :  { %v18391_v42 = vpop.eup %18390 }
0x1cfa   :  { %v9830_v17 = vsel %vm767_vm4, %v18391_v42, 0.0 }
0x1cfb   :  { %9831 = vadd.xlane.f32.xlu0 %v9830_v17  ;;  %v17911_v17 = vld [vmem:[%s21260_s21 + $0x15c] sm:$0xff]  }
0x1cfd   :  { %v18393_v56 = vpop.eup %18392 }
0x1cfe   :  { %v9833_v16 = vsel %vm767_vm4, %v18393_v56, 0.0 }
0x1cff   :  { %9834 = vadd.xlane.f32.xlu1 %v9833_v16  ;;  %v17913_v16 = vld [vmem:[%s21260_s21 + $0x14c] sm:$0xff]  }
0x1d84   :  { %v9832_v60 = vpop.xlane.xlu0 %9831 }
0x1d85   :  { %18394 = vrcp.f32 %v9832_v60  ;;  %v17914_v60 = vld [vmem:[%s21260_s21 + $0x144] sm:$0xff]  }
0x1d88   :  { %v9835_v47 = vpop.xlane.xlu1 %9834 }
0x1d89   :  { %18396 = vrcp.f32 %v9835_v47  ;;  %v17916_v47 = vld [vmem:[%s21260_s21 + $0x134] sm:$0xff]  }
0x1d92   :  { %v18395_v62 = vpop.eup %18394 }
0x1d93   :  { %v9838_v63 = vmul.f32 %v18395_v62, %v18391_v42  ;;  %v17910_v42 = vld [vmem:[%s21260_s21 + $0x164] sm:$0xff]   ;;  %v17918_v62 = vld [vmem:[%s21260_s21 + $0x18c] ss:$0 sps:$4 sm:$0xff]  }
0x1d95   :  { %17068 = vmatmul.mubr.msk.f32.vlgmr.msra.gmra.mxu1 %vm767_vm4, %v9838_v63  ;;  %v10502_v63 = vsel %vm265_vm0, %v17918_v62, 0 }
0x1d96   :  { %v18397_v23 = vpop.eup %18396  ;;  %17071 = vmatpush3.msra.mxu1 %v9661_v10  ;;  %17072 = vmatprep.mubr.msk.f32.mxu1 %vm18477_vm2, %v18476_v35  ;;  %v17891_v10 = vld [vmem:[%s21264_s8 + $0x80] ss:$8 sps:$4 sm:$0xff]  }
0x1d97   :  { %v9839_v13 = vmul.f32 %v18397_v23, %v18393_v56  ;;  %16241 = vmatprep.subr.msk.bf16.mxu1 %vm1772_vm5, %v16240_v0  ;;  %v17912_v56 = vld [vmem:[%s21260_s21 + $0x154] sm:$0xff]   ;;  %v17919_v0 = vld [vmem:[%s21260_s21 + $0x184] sm:$0xff]  }
0x1d98   :  { %v17921_v23 = vld [vmem:[%s21260_s21 + $0x174] sm:$0xff]  }
0x1d99   :  { %17073 = vmatmul.mubr.msk.f32.vlgmr.msra.gmra.mxu1 %vm767_vm4, %v9839_v13  ;;  %v17922_v13 = vld [vmem:[%s21260_s21 + $0x16c] sm:$0xff]  }
0x1d9a   :  { %10048 = vmatpush1.bf16.msra.mxu1 %v10034_v14  ;;  %10071 = vmatprep.mubr.bf16.mxu1 %v18475_v1  ;;  %v9197_v14 = vadd.f32 %v20209_v45, %v20334_v57 }
0x1d9b   :  { %10049 = vmatprep.subr.bf16.mxu1 %v17890_v15 }
0x1d9e   :  { %10050 = vmatpush1.bf16.msra.mxu1 %v17888_v6  ;;  %v9199_v6 = vadd.f32 %v20211_v49, %v20336_v18 }
0x1d9f   :  { %10051 = vmatprep.subr.bf16.mxu1 %v17893_v2 }
0x1da2   :  { %10052 = vmatpush1.bf16.msra.mxu1 %v17891_v10 }
0x1da3   :  { %10053 = vmatprep.subr.bf16.mxu1 %v17896_v20  ;;  %v9201_v20 = vadd.f32 %v20213_v8, %v20338_v3 }
0x1da6   :  { %10054 = vmatpush1.bf16.msra.mxu1 %v17894_v22 }
0x1da7   :  { %10198 = vmatprep.subr.bf16.mxu1 %v18475_v1 }
0x1e55   :  { %v9909_v28 = vpop.f32.mrf.mxu1 }
0x1e57   :  { %v17069_v30 = vpop.f32.mrf.mxu1 }
0x1e58   :  { %v9203_v30 = vadd.f32 %v20215_v59, %v20340_v19  ;;  %v16351_v19 = vld [vmem:[%s21263_s3 + $0x3] ss:$0 sm:$0xff] }
0x1e59   :  { %v9982_v48 = vpop.f32.mrf.mxu1 }
0x1e5a   :  { %v9986_v31 = vpack.c.bf16 %v9982_v48, %v9909_v28  ;;  %v16269_v48 = vld [vmem:[%s21262_s29 + $0x3] ss:$0 sm:$0xff] }
0x1e5b   :  { %v17074_v32 = vpop.f32.mrf.mxu1 }
0x1e5c   :  { %16242 = vmatmul.mubr.msk.bf16.vlgmr.msra.gmra.mxu1 %vm612_vm3, %v9986_v31 }
0x1e5d   :  { %10199 = vmatpush1.bf16.msra.mxu1 %v17897_v24  ;;  %16283 = vmatprep.mubr.msk.bf16.mxu1 %vm261_vm1, %v19994_v53 }
0x1e5e   :  { %10200 = vmatprep.subr.bf16.mxu1 %v18475_v1 }
0x1e61   :  { %10201 = vmatpush1.bf16.msra.mxu1 %v17898_v39 }
0x1e62   :  { %10202 = vmatprep.subr.bf16.mxu1 %v18475_v1 }
0x1e65   :  { %10203 = vmatpush1.bf16.msra.mxu1 %v17899_v37 }
0x1e66   :  { %10204 = vmatprep.subr.bf16.mxu1 %v18475_v1 }
0x1e69   :  { %10205 = vmatpush1.bf16.msra.mxu1 %v17900_v38 }
0x1e6a   :  { %10206 = vmatprep.subr.bf16.mxu1 %v18475_v1 }
0x1e6d   :  { %10207 = vmatpush1.bf16.msra.mxu1 %v17901_v44 }
0x1e6e   :  { %10208 = vmatprep.subr.bf16.mxu1 %v18475_v1 }
0x1e71   :  { %10209 = vmatpush1.bf16.msra.mxu1 %v17902_v4 }
0x1e72   :  { %10210 = vmatprep.subr.bf16.mxu1 %v18475_v1 }
0x1e75   :  { %10211 = vmatpush1.bf16.msra.mxu1 %v17903_v7 }
0x1e76   :  { %10212 = vmatprep.subr.bf16.mxu1 %v18475_v1 }
0x1e79   :  { %10213 = vmatpush1.bf16.msra.mxu1 %v17904_v26 }
0x1e7a   :  { %10220 = vmatprep.subr.bf16.mxu1 %v18475_v1 }
0x1e7d   :  { %10221 = vmatpush2.bf16.msra.mxu1 %v10196_v34 }
0x1e7e   :  { %10222 = vmatprep.subr.bf16.mxu1 %v18475_v1 }
0x1e81   :  { %10223 = vmatpush2.bf16.msra.mxu1 %v17906_v54 }
0x1e82   :  { %10224 = vmatprep.subr.bf16.mxu1 %v18475_v1 }
0x1e85   :  { %10225 = vmatpush2.bf16.msra.mxu1 %v17907_v11 }
0x1e86   :  { %10226 = vmatprep.subr.bf16.mxu1 %v18475_v1 }
0x1e89   :  { %10227 = vmatpush2.bf16.msra.mxu1 %v17908_v55 }
0x1e8a   :  { %10228 = vmatprep.subr.bf16.mxu1 %v18475_v1 }
0x1e8d   :  { %10229 = vmatpush2.bf16.msra.mxu1 %v17909_v25 }
0x1e8e   :  { %10504 = vmatprep.subr.bf16.mxu1 %v18475_v1 }
0x1e90   :  { %10231 = vmatmul.mubr.bf16.vlgmr.msra.gmra.mxu1 %v19990_v58 }
0x1e91   :  { %10505 = vmatpush1.bf16.msra.mxu1 %v17910_v42  ;;  %16365 = vmatprep.mubr.msk.bf16.mxu1 %vm261_vm1, %v19994_v53  ;;  %v17915_v53 = vld [vmem:[%s21260_s21 + $0x13c] sm:$0xff]  }
0x1e92   :  { %10506 = vmatprep.subr.bf16.mxu1 %v18475_v1 }
0x1e95   :  { %10507 = vmatpush1.bf16.msra.mxu1 %v17911_v17 }
0x1e96   :  { %10508 = vmatprep.subr.bf16.mxu1 %v18475_v1 }
0x1e99   :  { %10509 = vmatpush1.bf16.msra.mxu1 %v17912_v56 }
0x1e9a   :  { %10510 = vmatprep.subr.bf16.mxu1 %v18475_v1 }
0x1e9d   :  { %10511 = vmatpush1.bf16.msra.mxu1 %v17913_v16 }
0x1e9e   :  { %10512 = vmatprep.subr.bf16.mxu1 %v18475_v1 }
0x1ea1   :  { %10513 = vmatpush1.bf16.msra.mxu1 %v17914_v60 }
0x1ea2   :  { %10514 = vmatprep.subr.bf16.mxu1 %v18475_v1 }
0x1ea5   :  { %10515 = vmatpush1.bf16.msra.mxu1 %v17915_v53 }
0x1ea6   :  { %10516 = vmatprep.subr.bf16.mxu1 %v18475_v1 }
0x1ea9   :  { %10517 = vmatpush1.bf16.msra.mxu1 %v17916_v47 }
0x1eaa   :  { %10518 = vmatprep.subr.bf16.mxu1 %v18475_v1 }
0x1ead   :  { %10519 = vmatpush1.bf16.msra.mxu1 %v17917_v61 }
0x1eae   :  { %10526 = vmatprep.subr.bf16.mxu1 %v18475_v1 }
0x1eb1   :  { %10527 = vmatpush2.bf16.msra.mxu1 %v10502_v63 }
0x1eb2   :  { %10528 = vmatprep.subr.bf16.mxu1 %v18475_v1 }
0x1eb5   :  { %10529 = vmatpush2.bf16.msra.mxu1 %v17919_v0  ;;  %v16378_v0 = vld [vmem:[%s21264_s8 + $0xd8] sm:$0x11] }
0x1eb6   :  { %10530 = vmatprep.subr.bf16.mxu1 %v18475_v1 }
0x1eb9   :  { %10531 = vmatpush2.bf16.msra.mxu1 %v17920_v5 }
0x1eba   :  { %10532 = vmatprep.subr.bf16.mxu1 %v18475_v1 }
0x1ebd   :  { %10533 = vmatpush2.bf16.msra.mxu1 %v17921_v23 }
0x1ebe   :  { %10534 = vmatprep.subr.bf16.mxu1 %v18475_v1 }
0x1ec1   :  { %10535 = vmatpush2.bf16.msra.mxu1 %v17922_v13  ;;  %v16386_v13 = vcombine.high %v16378_v0, %v16378_v0 }
0x1ec4   :  { %10537 = vmatmul.mubr.bf16.vlgmr.msra.gmra.mxu1 %v19990_v58 }
0x1f1c   :  { %v10073_v15 = vpop.f32.mrf.mxu1 }
0x1f1d   :  { %v20442_v2 = vadd.f32 %v10073_v15, %v9197_v14  ;;  %v16385_v14 = vcombine.low %v16378_v0, %v16378_v0  ;;  %v11137_v0 = vld [vmem:[%s21266_s19 + $0x280] sm:$0xff] }
0x1f1e   :  { %v10075_v10 = vpop.f32.mrf.mxu1 }
0x1f1f   :  { %v20446_v22 = vadd.f32 %v10075_v10, %v9199_v6  ;;  %v10915_v10 = vsel %vm1772_vm5, %v16385_v14, 0  ;;  %v11146_v14 = vld [vmem:[%s21266_s19 + $0x2c8] sm:$0xff] }
0x1f20   :  { %v10077_v28 = vpop.f32.mrf.mxu1 }
0x1f21   :  { %v20450_v58 = vadd.f32 %v10077_v28, %v9201_v20  ;;  %v17927_v20 = vld [vmem:[%s21264_s8 + $0xcc] ss:$8 sps:$4 sm:$0xff]   ;;  %v17925_v28 = vld [vmem:[%s21264_s8 + $0xc8] ss:$8 sps:$4 sm:$0xff]  }
0x1f22   :  { %v10079_v45 = vpop.f32.mrf.mxu1 }
0x1f23   :  { %v20452_v57 = vadd.f32 %v10079_v45, %v9203_v30  ;;  %v17930_v30 = vld [vmem:[%s21264_s8 + $0xbc] ss:$8 sps:$4 sm:$0xff]   ;;  %v17928_v45 = vld [vmem:[%s21264_s8 + $0xb8] ss:$8 sps:$4 sm:$0xff]  }
0x1f50   :  { %v10232_v49 = vpop.f32.mrf.mxu1 }
0x1f51   :  { %v10233_v18 = vadd.f32 %v16269_v48, %v10232_v49  ;;  %v17933_v49 = vld [vmem:[%s21264_s8 + $0xac] ss:$8 sps:$4 sm:$0xff]  }
0x1f52   :  { %v10234_v24 = vpop.f32.mrf.mxu1 }
0x1f53   :  { %17078 = vmatmul.mubr.msk.f32.vlgmr.msra.gmra.mxu0 %vm612_vm3, %v10233_v18 }
0x1f54   :  { %17081 = vmatpush3.xpose.msk.msra.mxu0 %vm612_vm3, %v20357_v9  ;;  %v10235_v8 = vpop.f32.mrf.mxu1  ;;  %17082 = vmatprep.mubr.msk.f32.mxu0 %vm18477_vm2, %v18476_v35 }
0x1f55   :  { %v10236_v59 = vadd.f32 %v16269_v48, %v10235_v8  ;;  %17085 = vmatprep.subr.mxu0 %v18476_v35  ;;  %v17931_v48 = vld [vmem:[%s21264_s8 + $0xa8] ss:$8 sps:$4 sm:$0xff]  }
0x1f56   :  { %v10237_v3 = vpop.f32.mrf.mxu1 }
0x1f57   :  { %17083 = vmatmul.mubr.msk.f32.vlgmr.msra.gmra.mxu0 %vm612_vm3, %v10236_v59 }
0x1f58   :  { %17087 = vmatprep.mubr.msk.f32.mxu0 %vm18477_vm2, %v18476_v35 }
0x1f84   :  { %v10538_v31 = vpop.f32.mrf.mxu1 }
0x1f85   :  { %v10539_v32 = vadd.f32 %v16351_v19, %v10538_v31 }
0x1f86   :  { %v10540_v39 = vpop.f32.mrf.mxu1 }
0x1f87   :  { %17086 = vmatpush3.msra.mxu0 %v10539_v32 }
0x1f88   :  { %v10541_v37 = vpop.f32.mrf.mxu1  ;;  %17090 = vmatprep.subr.mxu0 %v18476_v35 }
0x1f89   :  { %v10542_v9 = vadd.f32 %v16351_v19, %v10541_v37  ;;  %v10967_v19 = vld [vmem:[%s21265_s14] sm:$0x3] }
0x1f8a   :  { %v10543_v38 = vpop.f32.mrf.mxu1  ;;  %v10972_v31 = vrot.slane %v10967_v19, %v19213_v27  ;;  %v10976_v39 = vrot.slane %v10967_v19, %v19217_v29  ;;  %v11106_v19 = vld [vmem:[%s21266_s19 + $0x188] sm:$0xff] }
0x2013   :  { %v10617_v44 = vpop.f32.mrf.mxu0 }
0x2014   :  { %v10697_v4 = vmul.f32 0.14142136, %v10617_v44 }
0x2015   :  { %v17079_v7 = vpop.f32.mrf.mxu0 }
0x2016   :  { %v10699_v26 = vsel %vm767_vm4, %v10697_v4, -inf }
0x2017   :  { %10700 = vmax.xlane.f32.xlu0 %v10699_v26  ;;  %v10693_v12 = vpop.f32.mrf.mxu0 }
0x2018   :  { %v10698_v34 = vmul.f32 0.14142136, %v10693_v12 }
0x2019   :  { %v17084_v54 = vpop.f32.mrf.mxu0 }
0x201a   :  { %v10702_v11 = vsel %vm767_vm4, %v10698_v34, -inf }
0x201b   :  { %10703 = vmax.xlane.f32.xlu1 %v10702_v11 }
0x20a0   :  { %v10701_v55 = vpop.xlane.xlu0 %10700 }
0x20a1   :  { %v10705_v25 = vsub.f32 %v10697_v4, %v10701_v55 }
0x20a3   :  { %v10707_v42 = vmul.f32 1.442695, %v10705_v25  ;;  %v11169_v25 = vld [vmem:[%s21266_s19 + $0x380] sm:$0xff] }
0x20a4   :  { %v10704_v17 = vpop.xlane.xlu1 %10703 }
0x20a5   :  { %18398 = vpow2.f32 %v10707_v42  ;;  %v10706_v56 = vsub.f32 %v10698_v34, %v10704_v17  ;;  %v11177_v42 = vld [vmem:[%s21266_s19 + $0x3c0] sm:$0xff]  ;;  %v11170_v17 = vld [vmem:[%s21266_s19 + $0x388] sm:$0xff] }
0x20a7   :  { %v10709_v16 = vmul.f32 1.442695, %v10706_v56  ;;  %v16502_v56 = vcombine.high %v11169_v25, %v11177_v42 }
0x20a9   :  { %18400 = vpow2.f32 %v10709_v16  ;;  %v11178_v16 = vld [vmem:[%s21266_s19 + $0x3c8] sm:$0xff] }
0x20b2   :  { %v18399_v60 = vpop.eup %18398 }
0x20b3   :  { %v10711_v53 = vsel %vm767_vm4, %v18399_v60, 0.0 }
0x20b4   :  { %10712 = vadd.xlane.f32.xlu0 %v10711_v53  ;;  %v16503_v53 = vcombine.low %v11170_v17, %v11178_v16 }
0x20b6   :  { %v18401_v47 = vpop.eup %18400 }
0x20b7   :  { %v10714_v61 = vsel %vm767_vm4, %v18401_v47, 0.0 }
0x20b8   :  { %10715 = vadd.xlane.f32.xlu1 %v10714_v61 }
0x213d   :  { %v10713_v62 = vpop.xlane.xlu0 %10712 }
0x213e   :  { %18402 = vrcp.f32 %v10713_v62  ;;  %v11154_v62 = vld [vmem:[%s21266_s19 + $0x308] sm:$0xff] }
0x2141   :  { %v10716_v63 = vpop.xlane.xlu1 %10715 }
0x2142   :  { %18404 = vrcp.f32 %v10716_v63  ;;  %v11162_v63 = vld [vmem:[%s21266_s19 + $0x348] sm:$0xff] }
0x214b   :  { %v18403_v5 = vpop.eup %18402 }
0x214c   :  { %v10719_v23 = vmul.f32 %v18403_v5, %v18399_v60  ;;  %v11153_v60 = vld [vmem:[%s21266_s19 + $0x300] sm:$0xff]  ;;  %v16488_v5 = vcombine.high %v11154_v62, %v11162_v63 }
0x214e   :  { %17088 = vmatmul.mubr.msk.f32.vlgmr.msra.gmra.mxu0 %vm767_vm4, %v10719_v23  ;;  %v11145_v23 = vld [vmem:[%s21266_s19 + $0x2c0] sm:$0xff] }
0x214f   :  { %v18405_v15 = vpop.eup %18404  ;;  %17091 = vmatpush3.msra.mxu0 %v10542_v9  ;;  %17092 = vmatprep.mubr.msk.f32.mxu0 %vm18477_vm2, %v18476_v35 }
0x2150   :  { %v10720_v6 = vmul.f32 %v18405_v15, %v18401_v47  ;;  %16387 = vmatprep.subr.msk.bf16.mxu0 %vm1772_vm5, %v16386_v13  ;;  %v16504_v47 = vcombine.high %v11170_v17, %v11178_v16  ;;  %v11138_v13 = vld [vmem:[%s21266_s19 + $0x288] sm:$0xff] }
0x2152   :  { %17093 = vmatmul.mubr.msk.f32.vlgmr.msra.gmra.mxu0 %vm767_vm4, %v10720_v6  ;;  %12435 = vmatprep.subr.bf16.mxu1 %v16504_v47  ;;  %v16487_v6 = vcombine.low %v11154_v62, %v11162_v63  ;;  %v11074_v62 = vld [vmem:[%s21266_s19 + $0x88] sm:$0xff] }
0x2153   :  { %10929 = vmatpush1.bf16.msra.mxu0 %v10915_v10  ;;  %10952 = vmatprep.mubr.bf16.mxu0 %v18475_v1  ;;  %v16470_v10 = vcombine.high %v11137_v0, %v11145_v23 }
0x2154   :  { %10930 = vmatprep.subr.bf16.mxu0 %v17927_v20  ;;  %12436 = vmatpush1.bf16.msra.mxu1 %v16503_v53  ;;  %v16472_v20 = vcombine.high %v11138_v13, %v11146_v14 }
0x2155   :  { %12437 = vmatprep.subr.bf16.mxu1 %v16488_v5 }
0x2157   :  { %10931 = vmatpush1.bf16.msra.mxu0 %v17925_v28  ;;  %v11121_v28 = vld [vmem:[%s21266_s19 + $0x200] sm:$0xff] }
0x2158   :  { %10932 = vmatprep.subr.bf16.mxu0 %v17930_v30  ;;  %v11129_v30 = vld [vmem:[%s21266_s19 + $0x240] sm:$0xff]  ;;  %12438 = vmatpush1.bf16.msra.mxu1 %v16487_v6  ;;  %v11058_v6 = vld [vmem:[%s21266_s19 + $0x8] sm:$0xff] }
0x2159   :  { %12439 = vmatprep.subr.bf16.mxu1 %v16472_v20  ;;  %v11066_v20 = vld [vmem:[%s21266_s19 + $0x48] sm:$0xff] }
0x215b   :  { %10933 = vmatpush1.bf16.msra.mxu0 %v17928_v45  ;;  %v11122_v45 = vld [vmem:[%s21266_s19 + $0x208] sm:$0xff] }
0x215c   :  { %10934 = vmatprep.subr.bf16.mxu0 %v17933_v49  ;;  %v16469_v49 = vcombine.low %v11137_v0, %v11145_v23  ;;  %v11082_v0 = vld [vmem:[%s21266_s19 + $0xc8] sm:$0xff] }
0x215d   :  { %v16407_v23 = vcombine.low %v11074_v62, %v11082_v0 }
0x215f   :  { %10935 = vmatpush1.bf16.msra.mxu0 %v17931_v48  ;;  %v11130_v48 = vld [vmem:[%s21266_s19 + $0x248] sm:$0xff] }
0x2160   :  { %12392 = vmatprep.subr.bf16.mxu0 %v16502_v56 }
0x220e   :  { %v10790_v18 = vpop.f32.mrf.mxu0 }
0x2210   :  { %v17089_v24 = vpop.f32.mrf.mxu0 }
0x2211   :  { %v16454_v24 = vcombine.high %v11121_v28, %v11129_v30 }
0x2212   :  { %v10863_v8 = vpop.f32.mrf.mxu0 }
0x2213   :  { %v10867_v59 = vpack.c.bf16 %v10863_v8, %v10790_v18  ;;  %v16471_v18 = vcombine.low %v11138_v13, %v11146_v14  ;;  %v16456_v8 = vcombine.high %v11122_v45, %v11130_v48  ;;  %v16408_v13 = vcombine.high %v11074_v62, %v11082_v0  ;;  %v11057_v14 = vld [vmem:[%s21266_s19] sm:$0xff] }
0x2214   :  { %v17094_v3 = vpop.f32.mrf.mxu0 }
0x2215   :  { %16388 = vmatmul.mubr.msk.bf16.vlgmr.msra.gmra.mxu0 %vm612_vm3, %v10867_v59  ;;  %v11105_v59 = vld [vmem:[%s21266_s19 + $0x180] sm:$0xff]  ;;  %12440 = vmatpush1.bf16.msra.mxu1 %v16471_v18 }
0x2216   :  { %v11113_v3 = vld [vmem:[%s21266_s19 + $0x1c0] sm:$0xff]  ;;  %12441 = vmatprep.subr.bf16.mxu1 %v16456_v8 }
0x22d5   :  { %v10954_v1 = vpop.f32.mrf.mxu0 }
0x22d6   :  { %v10963_v32 = vadd.f32 %v10954_v1, %v20442_v2  ;;  %v11114_v1 = vld [vmem:[%s21266_s19 + $0x1c8] sm:$0xff] }
0x22d7   :  { %v10956_v37 = vpop.f32.mrf.mxu0 }
0x22d8   :  { %v10964_v9 = vadd.f32 %v10956_v37, %v20446_v22  ;;  %v10979_v38 = vadd.f32 %v10972_v31, %v10963_v32  ;;  %v16455_v32 = vcombine.low %v11122_v45, %v11130_v48  ;;  %v16440_v37 = vcombine.high %v11106_v19, %v11114_v1  ;;  %v11249_v48 = vld [vmem:[%s21266_s19 + $0x600] sm:$0xff] }
0x22d9   :  { %v10958_v44 = vpop.f32.mrf.mxu0  ;;  %v16392_v45 = vcombine.high %v11058_v6, %v11066_v20  ;;  %v16582_v18 = vcombine.high %v11249_v48, %v11249_v48  ;;  %v16581_v8 = vcombine.low %v11249_v48, %v11249_v48 }
0x22da   :  { %v10980_v4 = vadd.f32 %v10976_v39, %v10964_v9  ;;  %v10965_v7 = vadd.f32 %v10958_v44, %v20450_v58  ;;  %v20496_v54 = vadd.f32 %v10979_v38, %v19980_v51  ;;  %v11089_v9 = vld [vmem:[%s21266_s19 + $0x100] sm:$0xff]  ;;  %v11090_v44 = vld [vmem:[%s21266_s19 + $0x108] sm:$0xff]  ;;  %12442 = vmatpush1.bf16.msra.mxu1 %v16455_v32 }
0x22db   :  { %v10960_v26 = vpop.f32.mrf.mxu0  ;;  %v11097_v38 = vld [vmem:[%s21266_s19 + $0x140] sm:$0xff]  ;;  %12443 = vmatprep.subr.bf16.mxu1 %v16440_v37  ;;  %v11234_v32 = vld [vmem:[%s21266_s19 + $0x588] sm:$0xff] }
0x22dc   :  { %v10966_v12 = vadd.f32 %v10960_v26, %v20452_v57  ;;  %v20493_v34 = vadd.f32 %v10980_v4, %v19982_v52  ;;  %v10981_v2 = vadd.f32 %v10972_v31, %v10965_v7  ;;  %v16453_v31 = vcombine.low %v11121_v28, %v11129_v30  ;;  %v11098_v4 = vld [vmem:[%s21266_s19 + $0x148] sm:$0xff] }
0x22dd   :  { %v16437_v7 = vcombine.low %v11105_v59, %v11113_v3  ;;  %v16439_v26 = vcombine.low %v11106_v19, %v11114_v1  ;;  %v16391_v30 = vcombine.low %v11058_v6, %v11066_v20  ;;  %v11233_v1 = vld [vmem:[%s21266_s19 + $0x580] sm:$0xff]  ;;  %v11242_v37 = vld [vmem:[%s21266_s19 + $0x5c8] sm:$0xff] }
0x22de   :  { %v10982_v22 = vadd.f32 %v10976_v39, %v10966_v12  ;;  %v10989_v11 = vsel %vm261_vm1, %v20493_v34, 0.0  ;;  %v20505_v52 = vadd.f32 %v10981_v2, %v19984_v21  ;;  %v11161_v21 = vld [vmem:[%s21266_s19 + $0x340] sm:$0xff]  ;;  %v16438_v39 = vcombine.high %v11105_v59, %v11113_v3 }
0x22df   :  { %v10990_v58 = vadd.f32 %v10989_v11, %v20496_v54  ;;  %v16486_v61 = vcombine.high %v11153_v60, %v11161_v21  ;;  %v16485_v15 = vcombine.low %v11153_v60, %v11161_v21  ;;  %v16422_v12 = vcombine.high %v11089_v9, %v11097_v38  ;;  %12444 = vmatpush1.bf16.msra.mxu1 %v16439_v26  ;;  %v11218_v26 = vld [vmem:[%s21266_s19 + $0x508] sm:$0xff] }
0x22e0   :  { %v20502_v55 = vadd.f32 %v10982_v22, %v19986_v46  ;;  %v16501_v46 = vcombine.low %v11169_v25, %v11177_v42  ;;  %v16424_v2 = vcombine.high %v11090_v44, %v11098_v4  ;;  %v16421_v22 = vcombine.low %v11089_v9, %v11097_v38 }
0x22e1   :  { %10991 = vadd.xlane.f32.xlu0 %v10990_v58  ;;  %v16423_v11 = vcombine.low %v11090_v44, %v11098_v4  ;;  %v12345_v3 = vsel %vm265_vm0, %v16581_v8, 0  ;;  %v16567_v38 = vcombine.low %v11234_v32, %v11242_v37  ;;  %v16568_v44 = vcombine.high %v11234_v32, %v11242_v37  ;;  %v11217_v4 = vld [vmem:[%s21266_s19 + $0x500] sm:$0xff] }
0x22e2   :  { %v10993_v51 = vsel %vm261_vm1, %v20502_v55, 0.0  ;;  %12393 = vmatpush1.bf16.msra.mxu0 %v16501_v46  ;;  %12445 = vmatprep.subr.bf16.mxu1 %v16424_v2  ;;  %v11226_v2 = vld [vmem:[%s21266_s19 + $0x548] sm:$0xff] }
0x22e3   :  { %v10994_v57 = vadd.f32 %v10993_v51, %v20505_v52  ;;  %12394 = vmatprep.subr.bf16.mxu0 %v16486_v61  ;;  %12446 = vmatpush1.bf16.msra.mxu1 %v16423_v11  ;;  %v11073_v61 = vld [vmem:[%s21266_s19 + $0x80] sm:$0xff]  ;;  %v16551_v11 = vcombine.low %v11218_v26, %v11226_v2 }
0x22e4   :  { %12447 = vmatprep.subr.bf16.mxu1 %v16408_v13  ;;  %v11172_v13 = vld [vmem:[%s21266_s19 + $0x398] sm:$0xff] }
0x22e5   :  { %10995 = vadd.xlane.f32.xlu1 %v10994_v57 }
0x22e6   :  { %12395 = vmatpush1.bf16.msra.mxu0 %v16485_v15  ;;  %v11065_v15 = vld [vmem:[%s21266_s19 + $0x40] sm:$0xff] }
0x22e7   :  { %12396 = vmatprep.subr.bf16.mxu0 %v16470_v10  ;;  %12448 = vmatpush1.bf16.msra.mxu1 %v16407_v23  ;;  %v16390_v10 = vcombine.high %v11057_v14, %v11065_v15  ;;  %v16389_v28 = vcombine.low %v11057_v14, %v11065_v15  ;;  %v11179_v23 = vld [vmem:[%s21266_s19 + $0x3d0] sm:$0xff]  ;;  %v11180_v15 = vld [vmem:[%s21266_s19 + $0x3d8] sm:$0xff] }
0x22e8   :  { %12449 = vmatprep.subr.bf16.mxu1 %v16392_v45  ;;  %v16508_v20 = vcombine.high %v11172_v13, %v11180_v15 }
0x22ea   :  { %12397 = vmatpush1.bf16.msra.mxu0 %v16469_v49  ;;  %v11250_v49 = vld [vmem:[%s21266_s19 + $0x608] sm:$0xff] }
0x22eb   :  { %12398 = vmatprep.subr.bf16.mxu0 %v16454_v24  ;;  %12450 = vmatpush1.bf16.msra.mxu1 %v16391_v30  ;;  %v16584_v24 = vcombine.high %v11250_v49, %v11250_v49  ;;  %v16583_v59 = vcombine.low %v11250_v49, %v11250_v49 }
0x22ed   :  { %16599 = vmatprep.subr.msk.bf16.mxu1 %vm265_vm0, %v16584_v24  ;;  %v12351_v19 = vsel %vm265_vm0, %v16583_v59, 0  ;;  %v10987_v24 = vld [vmem:[%s21267_s24] sm:$0x3] }
0x22ee   :  { %12399 = vmatpush1.bf16.msra.mxu0 %v16453_v31  ;;  %v11241_v31 = vld [vmem:[%s21266_s19 + $0x5c0] sm:$0xff] }
0x22ef   :  { %12400 = vmatprep.subr.bf16.mxu0 %v16438_v39  ;;  %12458 = vmatpush2.bf16.msra.mxu1 %v12351_v19  ;;  %v16566_v39 = vcombine.high %v11233_v1, %v11241_v31  ;;  %v16565_v9 = vcombine.low %v11233_v1, %v11241_v31  ;;  %v10988_v59 = vld [vmem:[%s21268_s30] sm:$0x3]  ;;  %v11033_v19 = vrot.slane %v10987_v24, %v19217_v29 }
0x22f0   :  { %12459 = vmatprep.subr.bf16.mxu1 %v16568_v44  ;;  %v11048_v37 = vrot.slane %v10988_v59, %v19217_v29 }
0x22f2   :  { %12401 = vmatpush1.bf16.msra.mxu0 %v16437_v7  ;;  %v11225_v7 = vld [vmem:[%s21266_s19 + $0x540] sm:$0xff] }
0x22f3   :  { %12402 = vmatprep.subr.bf16.mxu0 %v16422_v12  ;;  %12460 = vmatpush2.bf16.msra.mxu1 %v16567_v38  ;;  %v16550_v12 = vcombine.high %v11217_v4, %v11225_v7 }
0x22f6   :  { %12403 = vmatpush1.bf16.msra.mxu0 %v16421_v22  ;;  %v16549_v22 = vcombine.low %v11217_v4, %v11225_v7 }
0x236a   :  { %v10992_v58 = vpop.xlane.xlu0 %10991 }
0x236b   :  { %v10997_v51 = vmul.f32 0.005, %v10992_v58  ;;  %v16552_v58 = vcombine.high %v11218_v26, %v11226_v2 }
0x236d   :  { %v20535_v57 = vsub.f32 %v20496_v54, %v10997_v51  ;;  %v20538_v25 = vsub.f32 %v20493_v34, %v10997_v51  ;;  %12461 = vmatprep.subr.bf16.mxu1 %v16552_v58  ;;  %v11201_v51 = vld [vmem:[%s21266_s19 + $0x480] sm:$0xff]  ;;  %v11156_v58 = vld [vmem:[%s21266_s19 + $0x318] sm:$0xff] }
0x236e   :  { %v10996_v42 = vpop.xlane.xlu1 %10995  ;;  %12462 = vmatpush2.bf16.msra.mxu1 %v16551_v11  ;;  %v11163_v11 = vld [vmem:[%s21266_s19 + $0x350] sm:$0xff] }
0x236f   :  { %v10998_v17 = vmul.f32 0.005, %v10996_v42  ;;  %v11003_v46 = vmul.f32 %v20535_v57, %v20535_v57  ;;  %v11004_v56 = vmul.f32 %v20538_v25, %v20538_v25  ;;  %v11209_v42 = vld [vmem:[%s21266_s19 + $0x4c0] sm:$0xff] }
0x2371   :  { %v20545_v16 = vsub.f32 %v20505_v52, %v10998_v17  ;;  %v20548_v54 = vsub.f32 %v20502_v55, %v10998_v17  ;;  %v11007_v34 = vsel %vm261_vm1, %v11004_v56, 0.0  ;;  %v11081_v55 = vld [vmem:[%s21266_s19 + $0xc0] sm:$0xff]  ;;  %v11202_v17 = vld [vmem:[%s21266_s19 + $0x488] sm:$0xff] }
0x2372   :  { %v11008_v60 = vadd.f32 %v11007_v34, %v11003_v46  ;;  %v16406_v63 = vcombine.high %v11073_v61, %v11081_v55  ;;  %v16405_v5 = vcombine.low %v11073_v61, %v11081_v55  ;;  %v16534_v46 = vcombine.high %v11201_v51, %v11209_v42  ;;  %v11210_v56 = vld [vmem:[%s21266_s19 + $0x4c8] sm:$0xff] }
0x2373   :  { %v11005_v21 = vmul.f32 %v20545_v16, %v20545_v16  ;;  %v11006_v53 = vmul.f32 %v20548_v54, %v20548_v54  ;;  %v16533_v34 = vcombine.low %v11201_v51, %v11209_v42  ;;  %v11194_v55 = vld [vmem:[%s21266_s19 + $0x448] sm:$0xff]  ;;  %v11164_v51 = vld [vmem:[%s21266_s19 + $0x358] sm:$0xff]  ;;  %v11139_v42 = vld [vmem:[%s21266_s19 + $0x290] sm:$0xff] }
0x2374   :  { %11009 = vadd.xlane.f32.xlu0 %v11008_v60  ;;  %12404 = vmatprep.subr.bf16.mxu0 %v16406_v63  ;;  %v16535_v60 = vcombine.low %v11202_v17, %v11210_v56 }
0x2375   :  { %v11011_v47 = vsel %vm261_vm1, %v11006_v53, 0.0  ;;  %12405 = vmatpush1.bf16.msra.mxu0 %v16405_v5  ;;  %v11185_v53 = vld [vmem:[%s21266_s19 + $0x400] sm:$0xff]  ;;  %v11171_v5 = vld [vmem:[%s21266_s19 + $0x390] sm:$0xff] }
0x2376   :  { %v11012_v52 = vadd.f32 %v11011_v47, %v11005_v21  ;;  %12406 = vmatprep.subr.bf16.mxu0 %v16390_v10  ;;  %v16536_v21 = vcombine.high %v11202_v17, %v11210_v56  ;;  %v11193_v47 = vld [vmem:[%s21266_s19 + $0x440] sm:$0xff]  ;;  %v16506_v14 = vcombine.high %v11171_v5, %v11179_v23  ;;  %v16505_v6 = vcombine.low %v11171_v5, %v11179_v23  ;;  %v11147_v56 = vld [vmem:[%s21266_s19 + $0x2d0] sm:$0xff] }
0x2377   :  { %v16518_v61 = vcombine.high %v11185_v53, %v11193_v47  ;;  %v16517_v62 = vcombine.low %v11185_v53, %v11193_v47  ;;  %v16507_v10 = vcombine.low %v11172_v13, %v11180_v15  ;;  %v16491_v53 = vcombine.low %v11156_v58, %v11164_v51  ;;  %v11115_v15 = vld [vmem:[%s21266_s19 + $0x1d0] sm:$0xff] }
0x2378   :  { %11013 = vadd.xlane.f32.xlu1 %v11012_v52  ;;  %12463 = vmatprep.subr.bf16.mxu1 %v16536_v21  ;;  %v11186_v52 = vld [vmem:[%s21266_s19 + $0x408] sm:$0xff]  ;;  %v16474_v47 = vcombine.high %v11139_v42, %v11147_v56 }
0x2379   :  { %12407 = vmatpush1.bf16.msra.mxu0 %v16389_v28  ;;  %12464 = vmatpush2.bf16.msra.mxu1 %v16535_v60  ;;  %v16519_v63 = vcombine.low %v11186_v52, %v11194_v55  ;;  %v16520_v0 = vcombine.high %v11186_v52, %v11194_v55  ;;  %v11148_v60 = vld [vmem:[%s21266_s19 + $0x2d8] sm:$0xff]  ;;  %v11131_v55 = vld [vmem:[%s21266_s19 + $0x250] sm:$0xff] }
0x237a   :  { %16597 = vmatprep.subr.msk.bf16.mxu0 %vm265_vm0, %v16582_v18 }
0x237b   :  { %12465 = vmatprep.subr.bf16.mxu1 %v16520_v0  ;;  %v16473_v0 = vcombine.low %v11139_v42, %v11147_v56 }
0x237d   :  { %12415 = vmatpush2.bf16.msra.mxu0 %v12345_v3  ;;  %12466 = vmatpush2.bf16.msra.mxu1 %v16519_v63  ;;  %v11029_v3 = vrot.slane %v10987_v24, %v19213_v27  ;;  %v11132_v63 = vld [vmem:[%s21266_s19 + $0x258] sm:$0xff] }
0x237e   :  { %12416 = vmatprep.subr.bf16.mxu0 %v16566_v39  ;;  %12521 = vmatprep.subr.bf16.mxu1 %v16508_v20  ;;  %v11044_v39 = vrot.slane %v10988_v59, %v19213_v27  ;;  %v11100_v24 = vld [vmem:[%s21266_s19 + $0x158] sm:$0xff] }
0x2381   :  { %12417 = vmatpush2.bf16.msra.mxu0 %v16565_v9 }
0x2382   :  { %12418 = vmatprep.subr.bf16.mxu0 %v16550_v12 }
0x2385   :  { %12419 = vmatpush2.bf16.msra.mxu0 %v16549_v22  ;;  %v11155_v22 = vld [vmem:[%s21266_s19 + $0x310] sm:$0xff] }
0x2386   :  { %12420 = vmatprep.subr.bf16.mxu0 %v16534_v46  ;;  %v16490_v17 = vcombine.high %v11155_v22, %v11163_v11  ;;  %v16492_v46 = vcombine.high %v11156_v58, %v11164_v51  ;;  %v16489_v21 = vcombine.low %v11155_v22, %v11163_v11  ;;  %v11068_v22 = vld [vmem:[%s21266_s19 + $0x58] sm:$0xff] }
0x2389   :  { %12421 = vmatpush2.bf16.msra.mxu0 %v16533_v34  ;;  %v11140_v34 = vld [vmem:[%s21266_s19 + $0x298] sm:$0xff] }
0x238a   :  { %12422 = vmatprep.subr.bf16.mxu0 %v16518_v61  ;;  %v16476_v52 = vcombine.high %v11140_v34, %v11148_v60  ;;  %v11123_v61 = vld [vmem:[%s21266_s19 + $0x210] sm:$0xff]  ;;  %v16475_v5 = vcombine.low %v11140_v34, %v11148_v60 }
0x238b   :  { %v16458_v23 = vcombine.high %v11123_v61, %v11131_v55  ;;  %v16457_v20 = vcombine.low %v11123_v61, %v11131_v55  ;;  %v11243_v61 = vld [vmem:[%s21266_s19 + $0x5d0] sm:$0xff]  ;;  %v11236_v55 = vld [vmem:[%s21266_s19 + $0x598] sm:$0xff] }
0x238d   :  { %12423 = vmatpush2.bf16.msra.mxu0 %v16517_v62  ;;  %v11124_v62 = vld [vmem:[%s21266_s19 + $0x218] sm:$0xff] }
0x238e   :  { %12478 = vmatprep.subr.bf16.mxu0 %v16506_v14  ;;  %v16460_v13 = vcombine.high %v11124_v62, %v11132_v63  ;;  %v11107_v14 = vld [vmem:[%s21266_s19 + $0x190] sm:$0xff] }
0x23fd   :  { %v11010_v28 = vpop.xlane.xlu0 %11009 }
0x23fe   :  { %v11015_v30 = vmul.f32 0.005, %v11010_v28  ;;  %v16459_v28 = vcombine.low %v11124_v62, %v11132_v63  ;;  %v11244_v62 = vld [vmem:[%s21266_s19 + $0x5d8] sm:$0xff] }
0x2400   :  { %v11017_v45 = vadd.f32 1e-05, %v11015_v30  ;;  %v16442_v30 = vcombine.high %v11107_v14, %v11115_v15 }
0x2401   :  { %v11014_v48 = vpop.xlane.xlu1 %11013 }
0x2402   :  { %18406 = vrsqrt.f32 %v11017_v45  ;;  %v11016_v49 = vmul.f32 0.005, %v11014_v48  ;;  %v11091_v48 = vld [vmem:[%s21266_s19 + $0x110] sm:$0xff] }
0x2404   :  { %v11018_v18 = vadd.f32 1e-05, %v11016_v49  ;;  %v11099_v49 = vld [vmem:[%s21266_s19 + $0x150] sm:$0xff] }
0x2406   :  { %18408 = vrsqrt.f32 %v11018_v18  ;;  %v11092_v18 = vld [vmem:[%s21266_s19 + $0x118] sm:$0xff] }
0x240f   :  { %v18407_v8 = vpop.eup %18406 }
0x2410   :  { %v11021_v1 = vmul.f32 %v18407_v8, %v20535_v57  ;;  %v11022_v31 = vmul.f32 %v18407_v8, %v20538_v25  ;;  %v16441_v8 = vcombine.low %v11107_v14, %v11115_v15  ;;  %v11227_v14 = vld [vmem:[%s21266_s19 + $0x550] sm:$0xff]  ;;  %v11220_v15 = vld [vmem:[%s21266_s19 + $0x518] sm:$0xff] }
0x2412   :  { %v11036_v9 = vmul.f32 %v11029_v3, %v11021_v1  ;;  %v11037_v38 = vmul.f32 %v11033_v19, %v11022_v31  ;;  %v11075_v1 = vld [vmem:[%s21266_s19 + $0x90] sm:$0xff] }
0x2413   :  { %v18409_v32 = vpop.eup %18408  ;;  %v11083_v31 = vld [vmem:[%s21266_s19 + $0xd0] sm:$0xff] }
0x2414   :  { %v11023_v44 = vmul.f32 %v18409_v32, %v20545_v16  ;;  %v11024_v4 = vmul.f32 %v18409_v32, %v20548_v54  ;;  %v20600_v57 = vadd.f32 %v11044_v39, %v11036_v9  ;;  %v20602_v25 = vadd.f32 %v11048_v37, %v11037_v38  ;;  %v11076_v32 = vld [vmem:[%s21266_s19 + $0x98] sm:$0xff] }
0x2415   :  { %v16427_v9 = vcombine.low %v11092_v18, %v11100_v24  ;;  %v16410_v38 = vcombine.high %v11075_v1, %v11083_v31  ;;  %v16409_v11 = vcombine.low %v11075_v1, %v11083_v31  ;;  %v11195_v1 = vld [vmem:[%s21266_s19 + $0x450] sm:$0xff]  ;;  %v11188_v31 = vld [vmem:[%s21266_s19 + $0x418] sm:$0xff] }
0x2416   :  { %v11038_v7 = vmul.f32 %v11029_v3, %v11023_v44  ;;  %v11039_v26 = vmul.f32 %v11033_v19, %v11024_v4  ;;  %v16426_v3 = vcombine.high %v11091_v48, %v11099_v49  ;;  %v16428_v19 = vcombine.high %v11092_v18, %v11100_v24  ;;  %v11059_v4 = vld [vmem:[%s21266_s19 + $0x10] sm:$0xff]  ;;  %v11212_v18 = vld [vmem:[%s21266_s19 + $0x4d8] sm:$0xff] }
0x2418   :  { %v20604_v12 = vadd.f32 %v11044_v39, %v11038_v7  ;;  %v20606_v2 = vadd.f32 %v11048_v37, %v11039_v26  ;;  %v11084_v39 = vld [vmem:[%s21266_s19 + $0xd8] sm:$0xff]  ;;  %v16425_v37 = vcombine.low %v11091_v48, %v11099_v49  ;;  %v11067_v7 = vld [vmem:[%s21266_s19 + $0x50] sm:$0xff] }
0x2419   :  { %v16412_v44 = vcombine.high %v11076_v32, %v11084_v39  ;;  %v11060_v26 = vld [vmem:[%s21266_s19 + $0x18] sm:$0xff]  ;;  %v16411_v58 = vcombine.low %v11076_v32, %v11084_v39  ;;  %v16394_v51 = vcombine.high %v11059_v4, %v11067_v7  ;;  %v16393_v56 = vcombine.low %v11059_v4, %v11067_v7  ;;  %v11211_v48 = vld [vmem:[%s21266_s19 + $0x4d0] sm:$0xff]  ;;  %v11181_v4 = vld [vmem:[%s21266_s19 + $0x3e0] sm:$0xff] }
0x241a   :  { %v20614_v16 = vpack.c.bf16 %v20604_v12, %v20600_v57  ;;  %v20618_v54 = vpack.c.bf16 %v20606_v2, %v20602_v25  ;;  %v16396_v42 = vcombine.high %v11060_v26, %v11068_v22  ;;  %v16395_v34 = vcombine.low %v11060_v26, %v11068_v22  ;;  %v11204_v49 = vld [vmem:[%s21266_s19 + $0x498] sm:$0xff]  ;;  %v11174_v7 = vld [vmem:[%s21266_s19 + $0x3a8] sm:$0xff] }
0x241b   :  { %v11196_v32 = vld [vmem:[%s21266_s19 + $0x458] sm:$0xff]  ;;  %v11182_v26 = vld [vmem:[%s21266_s19 + $0x3e8] sm:$0xff] }
0x241c   :  { %16598 = vmatprep.mubr.msk.bf16.mxu0 %vm261_vm1, %v20618_v54  ;;  %16600 = vmatprep.mubr.msk.bf16.mxu1 %vm261_vm1, %v20618_v54 }
0x241d   :  { %12425 = vmatmul.mubr.bf16.vlgmr.msra.gmra.mxu0 %v20614_v16  ;;  %12468 = vmatmul.mubr.bf16.vlgmr.msra.gmra.mxu1 %v20614_v16 }
0x241e   :  { %12479 = vmatpush1.bf16.msra.mxu0 %v16505_v6  ;;  %12522 = vmatpush1.bf16.msra.mxu1 %v16507_v10  ;;  %v11108_v6 = vld [vmem:[%s21266_s19 + $0x198] sm:$0xff] }
0x241f   :  { %16602 = vmatprep.mubr.msk.bf16.mxu0 %vm261_vm1, %v20618_v54  ;;  %16604 = vmatprep.mubr.msk.bf16.mxu1 %vm261_vm1, %v20618_v54  ;;  %v11116_v10 = vld [vmem:[%s21266_s19 + $0x1d8] sm:$0xff] }
0x2420   :  { %12480 = vmatprep.subr.bf16.mxu0 %v16490_v17  ;;  %12523 = vmatprep.subr.bf16.mxu1 %v16492_v46  ;;  %v16444_v45 = vcombine.high %v11108_v6, %v11116_v10  ;;  %v16443_v59 = vcombine.low %v11108_v6, %v11116_v10  ;;  %v11251_v17 = vld [vmem:[%s21266_s19 + $0x610] sm:$0xff]  ;;  %v11252_v46 = vld [vmem:[%s21266_s19 + $0x618] sm:$0xff] }
0x2421   :  { %v16586_v60 = vcombine.high %v11251_v17, %v11251_v17  ;;  %v11228_v6 = vld [vmem:[%s21266_s19 + $0x558] sm:$0xff] }
0x2422   :  { %12481 = vmatpush1.bf16.msra.mxu0 %v16489_v21  ;;  %12524 = vmatpush1.bf16.msra.mxu1 %v16491_v53  ;;  %v16588_v21 = vcombine.high %v11252_v46, %v11252_v46  ;;  %v16585_v53 = vcombine.low %v11251_v17, %v11251_v17  ;;  %v11165_v17 = vld [vmem:[%s21266_s19 + $0x360] sm:$0xff] }
0x2423   :  { %12482 = vmatprep.subr.bf16.mxu0 %v16474_v47  ;;  %12525 = vmatprep.subr.bf16.mxu1 %v16476_v52  ;;  %v16587_v47 = vcombine.low %v11252_v46, %v11252_v46  ;;  %v11235_v52 = vld [vmem:[%s21266_s19 + $0x590] sm:$0xff]  ;;  %v11158_v46 = vld [vmem:[%s21266_s19 + $0x328] sm:$0xff] }
0x2424   :  { %v12357_v63 = vsel %vm265_vm0, %v16585_v53, 0  ;;  %v16569_v10 = vcombine.low %v11235_v52, %v11243_v61 }
0x2426   :  { %12483 = vmatpush1.bf16.msra.mxu0 %v16473_v0  ;;  %12526 = vmatpush1.bf16.msra.mxu1 %v16475_v5  ;;  %v12363_v0 = vsel %vm265_vm0, %v16587_v47, 0  ;;  %v16570_v5 = vcombine.high %v11235_v52, %v11243_v61  ;;  %v11141_v47 = vld [vmem:[%s21266_s19 + $0x2a0] sm:$0xff]  ;;  %v11142_v61 = vld [vmem:[%s21266_s19 + $0x2a8] sm:$0xff] }
0x2427   :  { %12484 = vmatprep.subr.bf16.mxu0 %v16458_v23  ;;  %12527 = vmatprep.subr.bf16.mxu1 %v16460_v13  ;;  %v16572_v23 = vcombine.high %v11236_v55, %v11244_v62  ;;  %v11219_v13 = vld [vmem:[%s21266_s19 + $0x510] sm:$0xff]  ;;  %v11149_v52 = vld [vmem:[%s21266_s19 + $0x2e0] sm:$0xff] }
0x2428   :  { %v16553_v24 = vcombine.low %v11219_v13, %v11227_v14 }
0x242a   :  { %12485 = vmatpush1.bf16.msra.mxu0 %v16457_v20  ;;  %12528 = vmatpush1.bf16.msra.mxu1 %v16459_v28  ;;  %v16571_v20 = vcombine.low %v11236_v55, %v11244_v62  ;;  %v16554_v28 = vcombine.high %v11219_v13, %v11227_v14  ;;  %v11150_v55 = vld [vmem:[%s21266_s19 + $0x2e8] sm:$0xff]  ;;  %v11133_v13 = vld [vmem:[%s21266_s19 + $0x260] sm:$0xff] }
0x242b   :  { %12486 = vmatprep.subr.bf16.mxu0 %v16442_v30  ;;  %12529 = vmatprep.subr.bf16.mxu1 %v16444_v45  ;;  %v16556_v30 = vcombine.high %v11220_v15, %v11228_v6  ;;  %v11203_v45 = vld [vmem:[%s21266_s19 + $0x490] sm:$0xff]  ;;  %v11126_v14 = vld [vmem:[%s21266_s19 + $0x228] sm:$0xff] }
0x242c   :  { %v16537_v39 = vcombine.low %v11203_v45, %v11211_v48 }
0x242e   :  { %12487 = vmatpush1.bf16.msra.mxu0 %v16441_v8  ;;  %12530 = vmatpush1.bf16.msra.mxu1 %v16443_v59  ;;  %v16555_v8 = vcombine.low %v11220_v15, %v11228_v6  ;;  %v16538_v59 = vcombine.high %v11203_v45, %v11211_v48  ;;  %v11134_v15 = vld [vmem:[%s21266_s19 + $0x268] sm:$0xff]  ;;  %v16477_v6 = vcombine.low %v11141_v47, %v11149_v52  ;;  %v11117_v45 = vld [vmem:[%s21266_s19 + $0x1e0] sm:$0xff] }
0x242f   :  { %12488 = vmatprep.subr.bf16.mxu0 %v16426_v3  ;;  %12531 = vmatprep.subr.bf16.mxu1 %v16428_v19  ;;  %v16540_v3 = vcombine.high %v11204_v49, %v11212_v18  ;;  %v11187_v19 = vld [vmem:[%s21266_s19 + $0x410] sm:$0xff]  ;;  %v11110_v48 = vld [vmem:[%s21266_s19 + $0x1a8] sm:$0xff] }
0x2430   :  { %v16521_v22 = vcombine.low %v11187_v19, %v11195_v1 }
0x2432   :  { %12489 = vmatpush1.bf16.msra.mxu0 %v16425_v37  ;;  %12532 = vmatpush1.bf16.msra.mxu1 %v16427_v9  ;;  %v16539_v37 = vcombine.low %v11204_v49, %v11212_v18  ;;  %v16522_v9 = vcombine.high %v11187_v19, %v11195_v1  ;;  %v11118_v49 = vld [vmem:[%s21266_s19 + $0x1e8] sm:$0xff]  ;;  %v11101_v19 = vld [vmem:[%s21266_s19 + $0x160] sm:$0xff] }
0x2433   :  { %12490 = vmatprep.subr.bf16.mxu0 %v16410_v38  ;;  %12533 = vmatprep.subr.bf16.mxu1 %v16412_v44  ;;  %v16524_v38 = vcombine.high %v11188_v31, %v11196_v32  ;;  %v11173_v44 = vld [vmem:[%s21266_s19 + $0x3a0] sm:$0xff]  ;;  %v11094_v1 = vld [vmem:[%s21266_s19 + $0x128] sm:$0xff] }
0x2436   :  { %12491 = vmatpush1.bf16.msra.mxu0 %v16409_v11  ;;  %12534 = vmatpush1.bf16.msra.mxu1 %v16411_v58  ;;  %v16523_v11 = vcombine.low %v11188_v31, %v11196_v32  ;;  %v16510_v58 = vcombine.high %v11173_v44, %v11181_v4  ;;  %v11102_v31 = vld [vmem:[%s21266_s19 + $0x168] sm:$0xff] }
0x2437   :  { %12492 = vmatprep.subr.bf16.mxu0 %v16394_v51  ;;  %12535 = vmatprep.subr.bf16.mxu1 %v16396_v42  ;;  %v16512_v51 = vcombine.high %v11174_v7, %v11182_v26  ;;  %v11157_v42 = vld [vmem:[%s21266_s19 + $0x320] sm:$0xff] }
0x2438   :  { %v16493_v62 = vcombine.low %v11157_v42, %v11165_v17 }
0x243a   :  { %12493 = vmatpush1.bf16.msra.mxu0 %v16393_v56  ;;  %12536 = vmatpush1.bf16.msra.mxu1 %v16395_v34  ;;  %v11166_v56 = vld [vmem:[%s21266_s19 + $0x368] sm:$0xff]  ;;  %v16509_v34 = vcombine.low %v11173_v44, %v11181_v4  ;;  %v11085_v44 = vld [vmem:[%s21266_s19 + $0xe0] sm:$0xff] }
0x243b   :  { %16601 = vmatprep.subr.msk.bf16.mxu0 %vm265_vm0, %v16586_v60  ;;  %16603 = vmatprep.subr.msk.bf16.mxu1 %vm265_vm0, %v16588_v21  ;;  %v16511_v60 = vcombine.low %v11174_v7, %v11182_v26  ;;  %v16494_v21 = vcombine.high %v11157_v42, %v11165_v17  ;;  %v16496_v53 = vcombine.high %v11158_v46, %v11166_v56  ;;  %v11078_v4 = vld [vmem:[%s21266_s19 + $0xa8] sm:$0xff]  ;;  %v11069_v42 = vld [vmem:[%s21266_s19 + $0x60] sm:$0xff] }
0x243c   :  { %v11086_v7 = vld [vmem:[%s21266_s19 + $0xe8] sm:$0xff] }
0x243d   :  { %v11062_v17 = vld [vmem:[%s21266_s19 + $0x28] sm:$0xff] }
0x243e   :  { %12501 = vmatpush2.bf16.msra.mxu0 %v12357_v63  ;;  %12544 = vmatpush2.bf16.msra.mxu1 %v12363_v0  ;;  %v16495_v63 = vcombine.low %v11158_v46, %v11166_v56  ;;  %v16478_v0 = vcombine.high %v11141_v47, %v11149_v52  ;;  %v11070_v46 = vld [vmem:[%s21266_s19 + $0x68] sm:$0xff] }
0x243f   :  { %12502 = vmatprep.subr.bf16.mxu0 %v16570_v5  ;;  %12545 = vmatprep.subr.bf16.mxu1 %v16572_v23  ;;  %v16480_v5 = vcombine.high %v11142_v61, %v11150_v55  ;;  %v11125_v23 = vld [vmem:[%s21266_s19 + $0x220] sm:$0xff]  ;;  %v11254_v47 = vld [vmem:[%s21266_s19 + $0x628] sm:$0xff] }
0x2440   :  { %v16461_v18 = vcombine.low %v11125_v23, %v11133_v13 }
0x2442   :  { %12503 = vmatpush2.bf16.msra.mxu0 %v16569_v10  ;;  %12546 = vmatpush2.bf16.msra.mxu1 %v16571_v20  ;;  %v16479_v10 = vcombine.low %v11142_v61, %v11150_v55  ;;  %v16462_v20 = vcombine.high %v11125_v23, %v11133_v13  ;;  %v16399_v61 = vcombine.low %v11062_v17, %v11070_v46  ;;  %v11245_v23 = vld [vmem:[%s21266_s19 + $0x5e0] sm:$0xff]  ;;  %v11238_v13 = vld [vmem:[%s21266_s19 + $0x5a8] sm:$0xff] }
0x2443   :  { %12504 = vmatprep.subr.bf16.mxu0 %v16554_v28  ;;  %12547 = vmatprep.subr.bf16.mxu1 %v16556_v30  ;;  %v16464_v28 = vcombine.high %v11126_v14, %v11134_v15  ;;  %v11109_v30 = vld [vmem:[%s21266_s19 + $0x1a0] sm:$0xff] }
0x2444   :  { %v16445_v32 = vcombine.low %v11109_v30, %v11117_v45 }
0x2446   :  { %12505 = vmatpush2.bf16.msra.mxu0 %v16553_v24  ;;  %12548 = vmatpush2.bf16.msra.mxu1 %v16555_v8  ;;  %v16463_v24 = vcombine.low %v11126_v14, %v11134_v15  ;;  %v16446_v8 = vcombine.high %v11109_v30, %v11117_v45  ;;  %v11246_v14 = vld [vmem:[%s21266_s19 + $0x5e8] sm:$0xff]  ;;  %v11229_v30 = vld [vmem:[%s21266_s19 + $0x560] sm:$0xff] }
0x2447   :  { %12506 = vmatprep.subr.bf16.mxu0 %v16538_v59  ;;  %12549 = vmatprep.subr.bf16.mxu1 %v16540_v3  ;;  %v16448_v59 = vcombine.high %v11110_v48, %v11118_v49  ;;  %v11093_v3 = vld [vmem:[%s21266_s19 + $0x120] sm:$0xff]  ;;  %v11222_v45 = vld [vmem:[%s21266_s19 + $0x528] sm:$0xff] }
0x2448   :  { %v16429_v26 = vcombine.low %v11093_v3, %v11101_v19 }
0x244a   :  { %12507 = vmatpush2.bf16.msra.mxu0 %v16537_v39  ;;  %12550 = vmatpush2.bf16.msra.mxu1 %v16539_v37  ;;  %v16447_v39 = vcombine.low %v11110_v48, %v11118_v49  ;;  %v16430_v37 = vcombine.high %v11093_v3, %v11101_v19  ;;  %v11230_v48 = vld [vmem:[%s21266_s19 + $0x568] sm:$0xff]  ;;  %v11213_v3 = vld [vmem:[%s21266_s19 + $0x4e0] sm:$0xff] }
0x244b   :  { %12508 = vmatprep.subr.bf16.mxu0 %v16522_v9  ;;  %12551 = vmatprep.subr.bf16.mxu1 %v16524_v38  ;;  %v16432_v9 = vcombine.high %v11094_v1, %v11102_v31  ;;  %v11077_v38 = vld [vmem:[%s21266_s19 + $0xa0] sm:$0xff]  ;;  %v11206_v19 = vld [vmem:[%s21266_s19 + $0x4a8] sm:$0xff] }
0x244c   :  { %v16413_v56 = vcombine.low %v11077_v38, %v11085_v44 }
0x244e   :  { %12509 = vmatpush2.bf16.msra.mxu0 %v16521_v22  ;;  %12552 = vmatpush2.bf16.msra.mxu1 %v16523_v11  ;;  %v16431_v22 = vcombine.low %v11094_v1, %v11102_v31  ;;  %v16414_v11 = vcombine.high %v11077_v38, %v11085_v44  ;;  %v11214_v1 = vld [vmem:[%s21266_s19 + $0x4e8] sm:$0xff]  ;;  %v11197_v38 = vld [vmem:[%s21266_s19 + $0x460] sm:$0xff] }
0x244f   :  { %12564 = vmatprep.subr.bf16.mxu0 %v16510_v58  ;;  %12607 = vmatprep.subr.bf16.mxu1 %v16512_v51  ;;  %v16416_v58 = vcombine.high %v11078_v4, %v11086_v7  ;;  %v11061_v51 = vld [vmem:[%s21266_s19 + $0x20] sm:$0xff]  ;;  %v11190_v44 = vld [vmem:[%s21266_s19 + $0x428] sm:$0xff] }
0x2450   :  { %v16397_v52 = vcombine.low %v11061_v51, %v11069_v42 }
0x2451   :  { %12511 = vmatmul.mubr.bf16.vlgmr.msra.gmra.mxu0 %v20614_v16  ;;  %12554 = vmatmul.mubr.bf16.vlgmr.msra.gmra.mxu1 %v20614_v16 }
0x2452   :  { %12565 = vmatpush1.bf16.msra.mxu0 %v16509_v34  ;;  %16606 = vmatprep.mubr.msk.bf16.mxu0 %vm261_vm1, %v20618_v54  ;;  %v16415_v34 = vcombine.low %v11078_v4, %v11086_v7  ;;  %v11198_v4 = vld [vmem:[%s21266_s19 + $0x468] sm:$0xff] }
0x2453   :  { %12608 = vmatpush1.bf16.msra.mxu1 %v16511_v60  ;;  %16608 = vmatprep.mubr.msk.bf16.mxu1 %vm261_vm1, %v20618_v54  ;;  %v16398_v60 = vcombine.high %v11061_v51, %v11069_v42  ;;  %v11183_v51 = vld [vmem:[%s21266_s19 + $0x3f0] sm:$0xff]  ;;  %v11176_v42 = vld [vmem:[%s21266_s19 + $0x3b8] sm:$0xff] }
0x2454   :  { %12566 = vmatprep.subr.bf16.mxu0 %v16494_v21  ;;  %12609 = vmatprep.subr.bf16.mxu1 %v16496_v53  ;;  %v16400_v21 = vcombine.high %v11062_v17, %v11070_v46  ;;  %v11253_v53 = vld [vmem:[%s21266_s19 + $0x620] sm:$0xff]  ;;  %v11184_v17 = vld [vmem:[%s21266_s19 + $0x3f8] sm:$0xff] }
0x2455   :  { %v16590_v55 = vcombine.high %v11253_v53, %v11253_v53 }
0x2456   :  { %12567 = vmatpush1.bf16.msra.mxu0 %v16493_v62  ;;  %v16589_v62 = vcombine.low %v11253_v53, %v11253_v53  ;;  %v11167_v53 = vld [vmem:[%s21266_s19 + $0x370] sm:$0xff] }
0x2457   :  { %12610 = vmatpush1.bf16.msra.mxu1 %v16495_v63  ;;  %12568 = vmatprep.subr.bf16.mxu0 %v16478_v0  ;;  %v16592_v63 = vcombine.high %v11254_v47, %v11254_v47  ;;  %v16591_v0 = vcombine.low %v11254_v47, %v11254_v47 }
0x2458   :  { %12611 = vmatprep.subr.bf16.mxu1 %v16480_v5  ;;  %v11237_v5 = vld [vmem:[%s21266_s19 + $0x5a0] sm:$0xff]  ;;  %v12369_v15 = vsel %vm265_vm0, %v16589_v62, 0 }
0x2459   :  { %v16573_v49 = vcombine.low %v11237_v5, %v11245_v23 }
0x245a   :  { %12569 = vmatpush1.bf16.msra.mxu0 %v16477_v6  ;;  %v16574_v6 = vcombine.high %v11237_v5, %v11245_v23  ;;  %v11144_v23 = vld [vmem:[%s21266_s19 + $0x2b8] sm:$0xff] }
0x245b   :  { %12612 = vmatpush1.bf16.msra.mxu1 %v16479_v10  ;;  %12570 = vmatprep.subr.bf16.mxu0 %v16462_v20  ;;  %v12375_v10 = vsel %vm265_vm0, %v16591_v0, 0  ;;  %v16576_v20 = vcombine.high %v11238_v13, %v11246_v14  ;;  %v11151_v0 = vld [vmem:[%s21266_s19 + $0x2f0] sm:$0xff] }
0x245c   :  { %12613 = vmatprep.subr.bf16.mxu1 %v16464_v28  ;;  %v11221_v28 = vld [vmem:[%s21266_s19 + $0x520] sm:$0xff] }
0x245d   :  { %v16557_v31 = vcombine.low %v11221_v28, %v11229_v30 }
0x245e   :  { %12571 = vmatpush1.bf16.msra.mxu0 %v16461_v18  ;;  %v16575_v18 = vcombine.low %v11238_v13, %v11246_v14  ;;  %v11152_v13 = vld [vmem:[%s21266_s19 + $0x2f8] sm:$0xff] }
0x245f   :  { %12614 = vmatpush1.bf16.msra.mxu1 %v16463_v24  ;;  %12572 = vmatprep.subr.bf16.mxu0 %v16446_v8  ;;  %v16558_v24 = vcombine.high %v11221_v28, %v11229_v30  ;;  %v16560_v8 = vcombine.high %v11222_v45, %v11230_v48  ;;  %v11135_v28 = vld [vmem:[%s21266_s19 + $0x270] sm:$0xff]  ;;  %v11128_v30 = vld [vmem:[%s21266_s19 + $0x238] sm:$0xff] }
0x2460   :  { %12615 = vmatprep.subr.bf16.mxu1 %v16448_v59  ;;  %v11205_v59 = vld [vmem:[%s21266_s19 + $0x4a0] sm:$0xff] }
0x2461   :  { %v16541_v7 = vcombine.low %v11205_v59, %v11213_v3 }
0x2462   :  { %12573 = vmatpush1.bf16.msra.mxu0 %v16445_v32  ;;  %v16559_v32 = vcombine.low %v11222_v45, %v11230_v48  ;;  %v11136_v45 = vld [vmem:[%s21266_s19 + $0x278] sm:$0xff] }
0x2463   :  { %12616 = vmatpush1.bf16.msra.mxu1 %v16447_v39  ;;  %12574 = vmatprep.subr.bf16.mxu0 %v16430_v37  ;;  %v16542_v39 = vcombine.high %v11205_v59, %v11213_v3  ;;  %v16544_v37 = vcombine.high %v11206_v19, %v11214_v1  ;;  %v11112_v59 = vld [vmem:[%s21266_s19 + $0x1b8] sm:$0xff] }
0x2464   :  { %12617 = vmatprep.subr.bf16.mxu1 %v16432_v9  ;;  %v11189_v9 = vld [vmem:[%s21266_s19 + $0x420] sm:$0xff]  ;;  %v11120_v3 = vld [vmem:[%s21266_s19 + $0x1f8] sm:$0xff] }
0x2465   :  { %v16525_v46 = vcombine.low %v11189_v9, %v11197_v38 }
0x2466   :  { %12575 = vmatpush1.bf16.msra.mxu0 %v16429_v26  ;;  %v16543_v26 = vcombine.low %v11206_v19, %v11214_v1  ;;  %v16467_v1 = vcombine.low %v11128_v30, %v11136_v45 }
0x2467   :  { %12618 = vmatpush1.bf16.msra.mxu1 %v16431_v22  ;;  %12576 = vmatprep.subr.bf16.mxu0 %v16414_v11  ;;  %v16526_v22 = vcombine.high %v11189_v9, %v11197_v38  ;;  %v16528_v11 = vcombine.high %v11190_v44, %v11198_v4  ;;  %v11096_v9 = vld [vmem:[%s21266_s19 + $0x138] sm:$0xff] }
0x2468   :  { %12619 = vmatprep.subr.bf16.mxu1 %v16416_v58  ;;  %v11175_v58 = vld [vmem:[%s21266_s19 + $0x3b0] sm:$0xff]  ;;  %v11104_v38 = vld [vmem:[%s21266_s19 + $0x178] sm:$0xff] }
0x2469   :  { %v16513_v47 = vcombine.low %v11175_v58, %v11183_v51 }
0x246a   :  { %12577 = vmatpush1.bf16.msra.mxu0 %v16413_v56  ;;  %v16527_v56 = vcombine.low %v11190_v44, %v11198_v4  ;;  %v16451_v4 = vcombine.low %v11112_v59, %v11120_v3 }
0x246b   :  { %12620 = vmatpush1.bf16.msra.mxu1 %v16415_v34  ;;  %12578 = vmatprep.subr.bf16.mxu0 %v16398_v60  ;;  %v16514_v34 = vcombine.high %v11175_v58, %v11183_v51  ;;  %v16516_v60 = vcombine.high %v11176_v42, %v11184_v17  ;;  %v11080_v58 = vld [vmem:[%s21266_s19 + $0xb8] sm:$0xff] }
0x246c   :  { %12621 = vmatprep.subr.bf16.mxu1 %v16400_v21  ;;  %v11159_v21 = vld [vmem:[%s21266_s19 + $0x330] sm:$0xff]  ;;  %v11088_v51 = vld [vmem:[%s21266_s19 + $0xf8] sm:$0xff] }
0x246d   :  { %v16498_v62 = vcombine.high %v11159_v21, %v11167_v53  ;;  %v16497_v14 = vcombine.low %v11159_v21, %v11167_v53  ;;  %v11064_v21 = vld [vmem:[%s21266_s19 + $0x38] sm:$0xff] }
0x246e   :  { %12579 = vmatpush1.bf16.msra.mxu0 %v16397_v52  ;;  %v11160_v52 = vld [vmem:[%s21266_s19 + $0x338] sm:$0xff] }
0x246f   :  { %12622 = vmatpush1.bf16.msra.mxu1 %v16399_v61  ;;  %16605 = vmatprep.subr.msk.bf16.mxu0 %vm265_vm0, %v16590_v55  ;;  %v11168_v61 = vld [vmem:[%s21266_s19 + $0x378] sm:$0xff]  ;;  %v16515_v55 = vcombine.low %v11176_v42, %v11184_v17  ;;  %v16435_v17 = vcombine.low %v11096_v9, %v11104_v38 }
0x2470   :  { %16607 = vmatprep.subr.msk.bf16.mxu1 %vm265_vm0, %v16592_v63  ;;  %v11143_v63 = vld [vmem:[%s21266_s19 + $0x2b0] sm:$0xff]  ;;  %v16500_v5 = vcombine.high %v11160_v52, %v11168_v61  ;;  %v11072_v53 = vld [vmem:[%s21266_s19 + $0x78] sm:$0xff] }
0x2471   :  { %v16481_v48 = vcombine.low %v11143_v63, %v11151_v0 }
0x2472   :  { %12587 = vmatpush2.bf16.msra.mxu0 %v12369_v15  ;;  %v16499_v15 = vcombine.low %v11160_v52, %v11168_v61  ;;  %v16419_v52 = vcombine.low %v11080_v58, %v11088_v51 }
0x2473   :  { %12630 = vmatpush2.bf16.msra.mxu1 %v12375_v10  ;;  %12588 = vmatprep.subr.bf16.mxu0 %v16574_v6  ;;  %v16482_v6 = vcombine.high %v11143_v63, %v11151_v0  ;;  %v16484_v10 = vcombine.high %v11144_v23, %v11152_v13  ;;  %v11256_v63 = vld [vmem:[%s21266_s19 + $0x638] sm:$0xff] }
0x2474   :  { %12631 = vmatprep.subr.bf16.mxu1 %v16576_v20  ;;  %v11127_v20 = vld [vmem:[%s21266_s19 + $0x230] sm:$0xff] }
0x2475   :  { %v16465_v19 = vcombine.low %v11127_v20, %v11135_v28 }
0x2476   :  { %12589 = vmatpush2.bf16.msra.mxu0 %v16573_v49  ;;  %v16483_v49 = vcombine.low %v11144_v23, %v11152_v13 }
0x2477   :  { %12632 = vmatpush2.bf16.msra.mxu1 %v16575_v18  ;;  %12590 = vmatprep.subr.bf16.mxu0 %v16558_v24  ;;  %v16466_v18 = vcombine.high %v11127_v20, %v11135_v28  ;;  %v11111_v24 = vld [vmem:[%s21266_s19 + $0x1b0] sm:$0xff]  ;;  %v11240_v20 = vld [vmem:[%s21266_s19 + $0x5b8] sm:$0xff] }
0x2478   :  { %12633 = vmatprep.subr.bf16.mxu1 %v16560_v8  ;;  %v11119_v8 = vld [vmem:[%s21266_s19 + $0x1f0] sm:$0xff]  ;;  %v11248_v28 = vld [vmem:[%s21266_s19 + $0x5f8] sm:$0xff] }
0x2479   :  { %v16449_v44 = vcombine.low %v11111_v24, %v11119_v8 }
0x247a   :  { %12591 = vmatpush2.bf16.msra.mxu0 %v16557_v31  ;;  %v16450_v31 = vcombine.high %v11111_v24, %v11119_v8  ;;  %v11224_v24 = vld [vmem:[%s21266_s19 + $0x538] sm:$0xff] }
0x247b   :  { %12634 = vmatpush2.bf16.msra.mxu1 %v16559_v32  ;;  %12592 = vmatprep.subr.bf16.mxu0 %v16542_v39  ;;  %v16452_v32 = vcombine.high %v11112_v59, %v11120_v3  ;;  %v11095_v39 = vld [vmem:[%s21266_s19 + $0x130] sm:$0xff]  ;;  %v11232_v8 = vld [vmem:[%s21266_s19 + $0x578] sm:$0xff]  ;;  %v16579_v3 = vcombine.low %v11240_v20, %v11248_v28 }
0x247c   :  { %12635 = vmatprep.subr.bf16.mxu1 %v16544_v37  ;;  %v11103_v37 = vld [vmem:[%s21266_s19 + $0x170] sm:$0xff] }
0x247d   :  { %v16433_v42 = vcombine.low %v11095_v39, %v11103_v37 }
0x247e   :  { %12593 = vmatpush2.bf16.msra.mxu0 %v16541_v7  ;;  %v16434_v7 = vcombine.high %v11095_v39, %v11103_v37  ;;  %v11208_v39 = vld [vmem:[%s21266_s19 + $0x4b8] sm:$0xff] }
0x247f   :  { %12636 = vmatpush2.bf16.msra.mxu1 %v16543_v26  ;;  %12594 = vmatprep.subr.bf16.mxu0 %v16526_v22  ;;  %v16436_v26 = vcombine.high %v11096_v9, %v11104_v38  ;;  %v11079_v22 = vld [vmem:[%s21266_s19 + $0xb0] sm:$0xff]  ;;  %v11216_v37 = vld [vmem:[%s21266_s19 + $0x4f8] sm:$0xff]  ;;  %v16563_v38 = vcombine.low %v11224_v24, %v11232_v8 }
0x2480   :  { %12637 = vmatprep.subr.bf16.mxu1 %v16528_v11  ;;  %v11087_v11 = vld [vmem:[%s21266_s19 + $0xf0] sm:$0xff] }
0x2482   :  { %12595 = vmatpush2.bf16.msra.mxu0 %v16525_v46  ;;  %v16418_v46 = vcombine.high %v11079_v22, %v11087_v11 }
0x2483   :  { %12638 = vmatpush2.bf16.msra.mxu1 %v16527_v56  ;;  %12650 = vmatprep.subr.bf16.mxu0 %v16514_v34  ;;  %v16420_v56 = vcombine.high %v11080_v58, %v11088_v51  ;;  %v11063_v34 = vld [vmem:[%s21266_s19 + $0x30] sm:$0xff]  ;;  %v16547_v51 = vcombine.low %v11208_v39, %v11216_v37 }
0x2484   :  { %12693 = vmatprep.subr.bf16.mxu1 %v16516_v60  ;;  %v11071_v60 = vld [vmem:[%s21266_s19 + $0x70] sm:$0xff] }
0x2485   :  { %12597 = vmatmul.mubr.bf16.vlgmr.msra.gmra.mxu0 %v20614_v16  ;;  %v16402_v61 = vcombine.high %v11063_v34, %v11071_v60  ;;  %v16401_v0 = vcombine.low %v11063_v34, %v11071_v60  ;;  %v17952_v34 = vld [vmem:[%s21269_s6 + $0x74] ss:$8 sps:$4 sm:$0xff]  }
0x2486   :  { %12640 = vmatmul.mubr.bf16.vlgmr.msra.gmra.mxu1 %v20614_v16  ;;  %12651 = vmatpush1.bf16.msra.mxu0 %v16513_v47  ;;  %v16417_v47 = vcombine.low %v11079_v22, %v11087_v11  ;;  %v11192_v22 = vld [vmem:[%s21266_s19 + $0x438] sm:$0xff] }
0x2487   :  { %16610 = vmatprep.mubr.msk.bf16.mxu0 %vm261_vm1, %v20618_v54  ;;  %12694 = vmatpush1.bf16.msra.mxu1 %v16515_v55  ;;  %v16404_v55 = vcombine.high %v11064_v21, %v11072_v53  ;;  %v11200_v11 = vld [vmem:[%s21266_s19 + $0x478] sm:$0xff] }
0x2488   :  { %16612 = vmatprep.mubr.msk.bf16.mxu1 %vm261_vm1, %v20618_v54  ;;  %12652 = vmatprep.subr.bf16.mxu0 %v16498_v62  ;;  %v16468_v54 = vcombine.high %v11128_v30, %v11136_v45  ;;  %v11255_v62 = vld [vmem:[%s21266_s19 + $0x630] sm:$0xff] }
0x2489   :  { %12695 = vmatprep.subr.bf16.mxu1 %v16500_v5  ;;  %v16403_v5 = vcombine.low %v11064_v21, %v11072_v53  ;;  %v16594_v23 = vcombine.high %v11255_v62, %v11255_v62  ;;  %v16593_v13 = vcombine.low %v11255_v62, %v11255_v62  ;;  %v17955_v60 = vld [vmem:[%s21269_s6 + $0x174] ss:$8 sps:$4 sm:$0xff]   ;;  %v17950_v21 = vld [vmem:[%s21269_s6 + $0x70] ss:$8 sps:$4 sm:$0xff]  }
0x248a   :  { %12653 = vmatpush1.bf16.msra.mxu0 %v16497_v14  ;;  %v16596_v14 = vcombine.high %v11256_v63, %v11256_v63  ;;  %v17953_v53 = vld [vmem:[%s21269_s6 + $0x170] ss:$8 sps:$4 sm:$0xff]   ;;  %v17964_v62 = vld [vmem:[%s21269_s6 + $0x54] ss:$8 sps:$4 sm:$0xff]  }
0x248b   :  { %12696 = vmatpush1.bf16.msra.mxu1 %v16499_v15  ;;  %12654 = vmatprep.subr.bf16.mxu0 %v16482_v6  ;;  %v16595_v15 = vcombine.low %v11256_v63, %v11256_v63  ;;  %v11239_v6 = vld [vmem:[%s21266_s19 + $0x5b0] sm:$0xff]  ;;  %v12381_v30 = vsel %vm265_vm0, %v16593_v13, 0  ;;  %v17968_v13 = vld [vmem:[%s21269_s6 + $0x40] ss:$8 sps:$4 sm:$0xff]  }
0x248c   :  { %12697 = vmatprep.subr.bf16.mxu1 %v16484_v10  ;;  %v11247_v10 = vld [vmem:[%s21266_s19 + $0x5f0] sm:$0xff] }
0x248d   :  { %v16578_v45 = vcombine.high %v11239_v6, %v11247_v10  ;;  %v16577_v59 = vcombine.low %v11239_v6, %v11247_v10  ;;  %v17967_v63 = vld [vmem:[%s21269_s6 + $0x154] ss:$8 sps:$4 sm:$0xff]   ;;  %v17974_v10 = vld [vmem:[%s21269_s6 + $0x30] ss:$8 sps:$4 sm:$0xff]  }
0x248e   :  { %12655 = vmatpush1.bf16.msra.mxu0 %v16481_v48  ;;  %v12387_v48 = vsel %vm265_vm0, %v16595_v15, 0  ;;  %v17976_v15 = vld [vmem:[%s21269_s6 + $0x34] ss:$8 sps:$4 sm:$0xff]  }
0x248f   :  { %12698 = vmatpush1.bf16.msra.mxu1 %v16483_v49  ;;  %12656 = vmatprep.subr.bf16.mxu0 %v16466_v18  ;;  %v16580_v49 = vcombine.high %v11240_v20, %v11248_v28  ;;  %v11223_v18 = vld [vmem:[%s21266_s19 + $0x530] sm:$0xff]  ;;  %v17982_v28 = vld [vmem:[%s21269_s6 + $0x24] ss:$8 sps:$4 sm:$0xff]  }
0x2490   :  { %12699 = vmatprep.subr.bf16.mxu1 %v16468_v54  ;;  %v11231_v54 = vld [vmem:[%s21266_s19 + $0x570] sm:$0xff] }
0x2491   :  { %v16561_v9 = vcombine.low %v11223_v18, %v11231_v54  ;;  %v17979_v6 = vld [vmem:[%s21269_s6 + $0x134] ss:$8 sps:$4 sm:$0xff]   ;;  %v17977_v20 = vld [vmem:[%s21269_s6 + $0x130] ss:$8 sps:$4 sm:$0xff]  }
0x2492   :  { %12657 = vmatpush1.bf16.msra.mxu0 %v16465_v19  ;;  %v16562_v19 = vcombine.high %v11223_v18, %v11231_v54  ;;  %v17991_v18 = vld [vmem:[%s21269_s6 + $0x114] ss:$8 sps:$4 sm:$0xff]   ;;  %v17986_v54 = vld [vmem:[%s21269_s6 + $0x10] ss:$8 sps:$4 sm:$0xff]  }
0x2493   :  { %12700 = vmatpush1.bf16.msra.mxu1 %v16467_v1  ;;  %12658 = vmatprep.subr.bf16.mxu0 %v16450_v31  ;;  %v16564_v1 = vcombine.high %v11224_v24, %v11232_v8  ;;  %v11207_v31 = vld [vmem:[%s21266_s19 + $0x4b0] sm:$0xff]  ;;  %v17994_v8 = vld [vmem:[%s21269_s6 + $0x4] ss:$8 sps:$4 sm:$0xff]  }
0x2494   :  { %12701 = vmatprep.subr.bf16.mxu1 %v16452_v32  ;;  %v11215_v32 = vld [vmem:[%s21266_s19 + $0x4f0] sm:$0xff] }
0x2495   :  { %v16545_v58 = vcombine.low %v11207_v31, %v11215_v32  ;;  %v17989_v24 = vld [vmem:[%s21269_s6 + $0x110] ss:$8 sps:$4 sm:$0xff]  }
0x2496   :  { %12659 = vmatpush1.bf16.msra.mxu0 %v16449_v44  ;;  %v16546_v44 = vcombine.high %v11207_v31, %v11215_v32  ;;  %v18003_v31 = vld [vmem:[%s21269_s6 + $0x1f4] ss:$8 sps:$4 sm:$0xff]   ;;  %v17998_v32 = vld [vmem:[%s21269_s6 + $0xf0] ss:$8 sps:$4 sm:$0xff]  }
0x2497   :  { %12702 = vmatpush1.bf16.msra.mxu1 %v16451_v4  ;;  %12660 = vmatprep.subr.bf16.mxu0 %v16434_v7  ;;  %v16548_v4 = vcombine.high %v11208_v39, %v11216_v37  ;;  %v11191_v7 = vld [vmem:[%s21266_s19 + $0x430] sm:$0xff]  ;;  %v18006_v37 = vld [vmem:[%s21269_s6 + $0xe4] ss:$8 sps:$4 sm:$0xff]  }
0x2498   :  { %12703 = vmatprep.subr.bf16.mxu1 %v16436_v26  ;;  %v11199_v26 = vld [vmem:[%s21266_s19 + $0x470] sm:$0xff] }
0x2499   :  { %v18001_v39 = vld [vmem:[%s21269_s6 + $0x1f0] ss:$8 sps:$4 sm:$0xff]  }
0x249a   :  { %12661 = vmatpush1.bf16.msra.mxu0 %v16433_v42  ;;  %v16530_v42 = vcombine.high %v11191_v7, %v11199_v26 }
0x249b   :  { %12704 = vmatpush1.bf16.msra.mxu1 %v16435_v17  ;;  %12662 = vmatprep.subr.bf16.mxu0 %v16418_v46  ;;  %v16532_v17 = vcombine.high %v11192_v22, %v11200_v11  ;;  %v16529_v46 = vcombine.low %v11191_v7, %v11199_v26  ;;  %v18015_v7 = vld [vmem:[%s21269_s6 + $0x1d4] ss:$8 sps:$4 sm:$0xff]   ;;  %v20841_v26 = vld [vmem:[%s21270_s22] sm:$0xff] }
0x249c   :  { %12705 = vmatprep.subr.bf16.mxu1 %v16420_v56  ;;  %v16531_v56 = vcombine.low %v11192_v22, %v11200_v11 }
0x249e   :  { %12663 = vmatpush1.bf16.msra.mxu0 %v16417_v47  ;;  %v17958_v47 = vld [vmem:[%s21269_s6 + $0x64] ss:$8 sps:$4 sm:$0xff]  }
0x249f   :  { %12706 = vmatpush1.bf16.msra.mxu1 %v16419_v52  ;;  %12664 = vmatprep.subr.bf16.mxu0 %v16402_v61  ;;  %v17961_v52 = vld [vmem:[%s21269_s6 + $0x164] ss:$8 sps:$4 sm:$0xff]   ;;  %v17956_v61 = vld [vmem:[%s21269_s6 + $0x60] ss:$8 sps:$4 sm:$0xff]  }
0x24a0   :  { %12707 = vmatprep.subr.bf16.mxu1 %v16404_v55  ;;  %v17959_v55 = vld [vmem:[%s21269_s6 + $0x160] ss:$8 sps:$4 sm:$0xff]  }
0x24a2   :  { %12665 = vmatpush1.bf16.msra.mxu0 %v16401_v0  ;;  %v17962_v0 = vld [vmem:[%s21269_s6 + $0x50] ss:$8 sps:$4 sm:$0xff]  }
0x24a3   :  { %12708 = vmatpush1.bf16.msra.mxu1 %v16403_v5  ;;  %16609 = vmatprep.subr.msk.bf16.mxu0 %vm265_vm0, %v16594_v23  ;;  %v17965_v5 = vld [vmem:[%s21269_s6 + $0x150] ss:$8 sps:$4 sm:$0xff]   ;;  %v17973_v23 = vld [vmem:[%s21269_s6 + $0x144] ss:$8 sps:$4 sm:$0xff]  }
0x24a4   :  { %16611 = vmatprep.subr.msk.bf16.mxu1 %vm265_vm0, %v16596_v14  ;;  %v17971_v14 = vld [vmem:[%s21269_s6 + $0x140] ss:$8 sps:$4 sm:$0xff]  }
0x24a6   :  { %12673 = vmatpush2.bf16.msra.mxu0 %v12381_v30  ;;  %v17985_v30 = vld [vmem:[%s21269_s6 + $0x124] ss:$8 sps:$4 sm:$0xff]  }
0x24a7   :  { %12716 = vmatpush2.bf16.msra.mxu1 %v12387_v48  ;;  %12674 = vmatprep.subr.bf16.mxu0 %v16578_v45  ;;  %v17980_v45 = vld [vmem:[%s21269_s6 + $0x20] ss:$8 sps:$4 sm:$0xff]  }
0x24a8   :  { %12717 = vmatprep.subr.bf16.mxu1 %v16580_v49  ;;  %v17983_v48 = vld [vmem:[%s21269_s6 + $0x120] ss:$8 sps:$4 sm:$0xff]   ;;  %v17988_v49 = vld [vmem:[%s21269_s6 + $0x14] ss:$8 sps:$4 sm:$0xff]  }
0x24aa   :  { %12675 = vmatpush2.bf16.msra.mxu0 %v16577_v59  ;;  %v17997_v59 = vld [vmem:[%s21269_s6 + $0x104] ss:$8 sps:$4 sm:$0xff]  }
0x24ab   :  { %12718 = vmatpush2.bf16.msra.mxu1 %v16579_v3  ;;  %12676 = vmatprep.subr.bf16.mxu0 %v16562_v19  ;;  %v17992_v3 = vld [vmem:[%s21269_s6] ss:$8 sps:$4 sm:$0xff]  }
0x24ac   :  { %12719 = vmatprep.subr.bf16.mxu1 %v16564_v1  ;;  %v17995_v19 = vld [vmem:[%s21269_s6 + $0x100] ss:$8 sps:$4 sm:$0xff]   ;;  %v18000_v1 = vld [vmem:[%s21269_s6 + $0xf4] ss:$8 sps:$4 sm:$0xff]  }
0x24ae   :  { %12677 = vmatpush2.bf16.msra.mxu0 %v16561_v9  ;;  %v18009_v9 = vld [vmem:[%s21269_s6 + $0x1e4] ss:$8 sps:$4 sm:$0xff]  }
0x24af   :  { %12720 = vmatpush2.bf16.msra.mxu1 %v16563_v38  ;;  %12678 = vmatprep.subr.bf16.mxu0 %v16546_v44  ;;  %v18004_v38 = vld [vmem:[%s21269_s6 + $0xe0] ss:$8 sps:$4 sm:$0xff]  }
0x24b0   :  { %12721 = vmatprep.subr.bf16.mxu1 %v16548_v4  ;;  %v18007_v44 = vld [vmem:[%s21269_s6 + $0x1e0] ss:$8 sps:$4 sm:$0xff]   ;;  %v18012_v4 = vld [vmem:[%s21269_s6 + $0xd4] ss:$8 sps:$4 sm:$0xff]  }
0x24b2   :  { %12679 = vmatpush2.bf16.msra.mxu0 %v16545_v58  ;;  %v11268_v58 = vrot.slane %v20841_v26, %v19217_v29 }
0x24b3   :  { %12722 = vmatpush2.bf16.msra.mxu1 %v16547_v51  ;;  %12680 = vmatprep.subr.bf16.mxu0 %v16530_v42  ;;  %v11276_v51 = vrot.slane %v20841_v26, %v19573_v50  ;;  %v18010_v42 = vld [vmem:[%s21269_s6 + $0xd0] ss:$8 sps:$4 sm:$0xff]  }
0x24b4   :  { %12723 = vmatprep.subr.bf16.mxu1 %v16532_v17 }
0x24b6   :  { %12681 = vmatpush2.bf16.msra.mxu0 %v16529_v46 }
0x24b7   :  { %12724 = vmatpush2.bf16.msra.mxu1 %v16531_v56  ;;  %14332 = vmatprep.subr.bf16.mxu0 %v17952_v34  ;;  %v18013_v56 = vld [vmem:[%s21269_s6 + $0x1d0] ss:$8 sps:$4 sm:$0xff]   ;;  %v18018_v34 = vld [vmem:[%s21269_s6 + $0xc4] ss:$8 sps:$4 sm:$0xff]  }
0x24b8   :  { %14375 = vmatprep.subr.bf16.mxu1 %v17955_v60  ;;  %v18021_v60 = vld [vmem:[%s21269_s6 + $0x1c4] ss:$8 sps:$4 sm:$0xff]  }
0x24b9   :  { %12683 = vmatmul.mubr.bf16.vlgmr.msra.gmra.mxu0 %v20614_v16 }
0x24ba   :  { %12726 = vmatmul.mubr.bf16.vlgmr.msra.gmra.mxu1 %v20614_v16  ;;  %14333 = vmatpush1.bf16.msra.mxu0 %v17950_v21  ;;  %v17970_v16 = vld [vmem:[%s21269_s6 + $0x44] ss:$8 sps:$4 sm:$0xff]  }
0x24bb   :  { %14376 = vmatpush1.bf16.msra.mxu1 %v17953_v53  ;;  %14334 = vmatprep.subr.bf16.mxu0 %v17958_v47 }
0x24bc   :  { %14377 = vmatprep.subr.bf16.mxu1 %v17961_v52 }
0x24be   :  { %14335 = vmatpush1.bf16.msra.mxu0 %v17956_v61  ;;  %v18016_v61 = vld [vmem:[%s21269_s6 + $0xc0] ss:$8 sps:$4 sm:$0xff]  }
0x24bf   :  { %14378 = vmatpush1.bf16.msra.mxu1 %v17959_v55  ;;  %14336 = vmatprep.subr.bf16.mxu0 %v17964_v62 }
0x24c0   :  { %14379 = vmatprep.subr.bf16.mxu1 %v17967_v63  ;;  %v18019_v63 = vld [vmem:[%s21269_s6 + $0x1c0] ss:$8 sps:$4 sm:$0xff]  }
0x24c2   :  { %14337 = vmatpush1.bf16.msra.mxu0 %v17962_v0  ;;  %v18024_v0 = vld [vmem:[%s21269_s6 + $0xb4] ss:$8 sps:$4 sm:$0xff]  }
0x24c3   :  { %14380 = vmatpush1.bf16.msra.mxu1 %v17965_v5  ;;  %14338 = vmatprep.subr.bf16.mxu0 %v17970_v16 }
0x24c4   :  { %14381 = vmatprep.subr.bf16.mxu1 %v17973_v23  ;;  %v18027_v23 = vld [vmem:[%s21269_s6 + $0x1b4] ss:$8 sps:$4 sm:$0xff]  }
0x24c6   :  { %14339 = vmatpush1.bf16.msra.mxu0 %v17968_v13 }
0x24c7   :  { %14382 = vmatpush1.bf16.msra.mxu1 %v17971_v14  ;;  %14340 = vmatprep.subr.bf16.mxu0 %v17976_v15 }
0x24c8   :  { %14383 = vmatprep.subr.bf16.mxu1 %v17979_v6 }
0x24ca   :  { %14341 = vmatpush1.bf16.msra.mxu0 %v17974_v10  ;;  %v18022_v10 = vld [vmem:[%s21269_s6 + $0xb0] ss:$8 sps:$4 sm:$0xff]  }
0x24cb   :  { %14384 = vmatpush1.bf16.msra.mxu1 %v17977_v20  ;;  %14342 = vmatprep.subr.bf16.mxu0 %v17982_v28  ;;  %v18025_v20 = vld [vmem:[%s21269_s6 + $0x1b0] ss:$8 sps:$4 sm:$0xff]  }
0x24cc   :  { %14385 = vmatprep.subr.bf16.mxu1 %v17985_v30 }
0x24ce   :  { %14343 = vmatpush1.bf16.msra.mxu0 %v17980_v45  ;;  %v18030_v45 = vld [vmem:[%s21269_s6 + $0xa4] ss:$8 sps:$4 sm:$0xff]  }
0x24cf   :  { %14386 = vmatpush1.bf16.msra.mxu1 %v17983_v48  ;;  %14344 = vmatprep.subr.bf16.mxu0 %v17988_v49  ;;  %v18033_v48 = vld [vmem:[%s21269_s6 + $0x1a4] ss:$8 sps:$4 sm:$0xff]   ;;  %v18028_v49 = vld [vmem:[%s21269_s6 + $0xa0] ss:$8 sps:$4 sm:$0xff]  }
0x24d0   :  { %14387 = vmatprep.subr.bf16.mxu1 %v17991_v18  ;;  %v18031_v18 = vld [vmem:[%s21269_s6 + $0x1a0] ss:$8 sps:$4 sm:$0xff]  }
0x24d2   :  { %14345 = vmatpush1.bf16.msra.mxu0 %v17986_v54  ;;  %v18036_v54 = vld [vmem:[%s21269_s6 + $0x94] ss:$8 sps:$4 sm:$0xff]  }
0x24d3   :  { %14388 = vmatpush1.bf16.msra.mxu1 %v17989_v24  ;;  %14346 = vmatprep.subr.bf16.mxu0 %v17994_v8  ;;  %v18039_v24 = vld [vmem:[%s21269_s6 + $0x194] ss:$8 sps:$4 sm:$0xff]   ;;  %v11264_v8 = vrot.slane %v20841_v26, %v19213_v27 }
0x24d4   :  { %14389 = vmatprep.subr.bf16.mxu1 %v17997_v59  ;;  %v11272_v59 = vrot.slane %v20841_v26, %v19602_v43 }
0x24d6   :  { %14347 = vmatpush1.bf16.msra.mxu0 %v17992_v3  ;;  %v18034_v3 = vld [vmem:[%s21269_s6 + $0x90] ss:$8 sps:$4 sm:$0xff]  }
0x24d7   :  { %14390 = vmatpush1.bf16.msra.mxu1 %v17995_v19  ;;  %14348 = vmatprep.subr.bf16.mxu0 %v18000_v1  ;;  %v18037_v1 = vld [vmem:[%s21269_s6 + $0x190] ss:$8 sps:$4 sm:$0xff]  }
0x24d8   :  { %14391 = vmatprep.subr.bf16.mxu1 %v18003_v31  ;;  %v18042_v31 = vld [vmem:[%s21269_s6 + $0x84] ss:$8 sps:$4 sm:$0xff]  }
0x24da   :  { %14349 = vmatpush2.bf16.msra.mxu0 %v17998_v32 }
0x24db   :  { %14392 = vmatpush2.bf16.msra.mxu1 %v18001_v39  ;;  %14350 = vmatprep.subr.bf16.mxu0 %v18006_v37  ;;  %v18045_v39 = vld [vmem:[%s21269_s6 + $0x184] ss:$8 sps:$4 sm:$0xff]  }
0x24dc   :  { %14393 = vmatprep.subr.bf16.mxu1 %v18009_v9 }
0x24dd   :  { %v20843_v22 = vpop.f32.mrf.mxu0  ;;  %v20845_v11 = vpop.f32.mrf.mxu1 }
0x24de   :  { %14351 = vmatpush2.bf16.msra.mxu0 %v18004_v38  ;;  %v12427_v37 = vadd.f32 %v20843_v22, %v11264_v8  ;;  %v12470_v9 = vadd.f32 %v20845_v11, %v11272_v59  ;;  %v18040_v38 = vld [vmem:[%s21269_s6 + $0x80] ss:$8 sps:$4 sm:$0xff]   ;;  %v18046_v22 = vld [vmem:[%s21269_s6 + $0x270] ss:$8 sps:$4 sm:$0xff]  }
0x24df   :  { %14394 = vmatpush2.bf16.msra.mxu1 %v18007_v44  ;;  %v12428_v17 = vpop.f32.mrf.mxu0  ;;  %v12471_v46 = vpop.f32.mrf.mxu1  ;;  %14352 = vmatprep.subr.bf16.mxu0 %v18012_v4  ;;  %v18043_v4 = vld [vmem:[%s21269_s6 + $0x180] ss:$8 sps:$4 sm:$0xff]  }
0x24e0   :  { %14395 = vmatprep.subr.bf16.mxu1 %v18015_v7  ;;  %v12429_v47 = vadd.f32 %v12428_v17, %v11268_v58  ;;  %v12472_v52 = vadd.f32 %v12471_v46, %v11276_v51  ;;  %v18048_v7 = vld [vmem:[%s21269_s6 + $0x274] ss:$8 sps:$4 sm:$0xff]   ;;  %v12738_v17 = vmax.f32 %v12470_v9, 0.0  ;;  %v18049_v46 = vld [vmem:[%s21269_s6 + $0x370] ss:$8 sps:$4 sm:$0xff]  }
0x24e1   :  { %v12430_v21 = vpop.f32.mrf.mxu0  ;;  %v12473_v53 = vpop.f32.mrf.mxu1 }
0x24e2   :  { %14353 = vmatpush2.bf16.msra.mxu0 %v18010_v42  ;;  %v12737_v13 = vmax.f32 %v12429_v47, 0.0  ;;  %v12739_v14 = vmax.f32 %v12472_v52, 0.0  ;;  %v12431_v19 = vadd.f32 %v12430_v21, %v11264_v8  ;;  %v12474_v32 = vadd.f32 %v12473_v53, %v11272_v59  ;;  %v18052_v21 = vld [vmem:[%s21269_s6 + $0x260] ss:$8 sps:$4 sm:$0xff]   ;;  %v18060_v47 = vld [vmem:[%s21269_s6 + $0x254] ss:$8 sps:$4 sm:$0xff]  }
0x24e3   :  { %14396 = vmatpush2.bf16.msra.mxu1 %v18013_v56  ;;  %v12432_v55 = vpop.f32.mrf.mxu0  ;;  %v12475_v62 = vpop.f32.mrf.mxu1  ;;  %14354 = vmatprep.subr.bf16.mxu0 %v18018_v34  ;;  %v12736_v42 = vmax.f32 %v12427_v37, 0.0  ;;  %v18054_v56 = vld [vmem:[%s21269_s6 + $0x264] ss:$8 sps:$4 sm:$0xff]   ;;  %v18055_v53 = vld [vmem:[%s21269_s6 + $0x360] ss:$8 sps:$4 sm:$0xff]   ;;  %v11284_v8 = vrot.slane %v20841_v26, %v19648_v40  ;;  %v11292_v59 = vrot.slane %v20841_v26, %v19651_v41 }
0x24e4   :  { %v12433_v5 = vadd.f32 %v12432_v55, %v11268_v58  ;;  %v12476_v16 = vadd.f32 %v12475_v62, %v11276_v51  ;;  %14397 = vmatprep.subr.bf16.mxu1 %v18021_v60  ;;  %v12752_v44 = vmax.f32 %v12431_v19, 0.0  ;;  %v12754_v58 = vmax.f32 %v12474_v32, 0.0  ;;  %v18051_v51 = vld [vmem:[%s21269_s6 + $0x374] ss:$8 sps:$4 sm:$0xff]   ;;  %v18057_v60 = vld [vmem:[%s21269_s6 + $0x364] ss:$8 sps:$4 sm:$0xff]  }
0x24e5   :  { %v18063_v52 = vld [vmem:[%s21269_s6 + $0x354] ss:$8 sps:$4 sm:$0xff]   ;;  %v18061_v55 = vld [vmem:[%s21269_s6 + $0x350] ss:$8 sps:$4 sm:$0xff]   ;;  %v18066_v62 = vld [vmem:[%s21269_s6 + $0x244] ss:$8 sps:$4 sm:$0xff]  }
0x24e6   :  { %v12753_v15 = vmax.f32 %v12433_v5, 0.0  ;;  %v12755_v6 = vmax.f32 %v12476_v16, 0.0  ;;  %14355 = vmatpush2.bf16.msra.mxu0 %v18016_v61  ;;  %v12768_v11 = vpack.c.bf16 %v12752_v44, %v12736_v42  ;;  %v12770_v34 = vpack.c.bf16 %v12754_v58, %v12738_v17  ;;  %v18058_v61 = vld [vmem:[%s21269_s6 + $0x250] ss:$8 sps:$4 sm:$0xff]   ;;  %v18067_v5 = vld [vmem:[%s21269_s6 + $0x340] ss:$8 sps:$4 sm:$0xff]  }
0x24e7   :  { %14398 = vmatpush2.bf16.msra.mxu1 %v18019_v63  ;;  %14356 = vmatprep.subr.bf16.mxu0 %v18024_v0  ;;  %v18069_v63 = vld [vmem:[%s21269_s6 + $0x344] ss:$8 sps:$4 sm:$0xff]   ;;  %v18064_v0 = vld [vmem:[%s21269_s6 + $0x240] ss:$8 sps:$4 sm:$0xff]   ;;  %v18072_v16 = vld [vmem:[%s21269_s6 + $0x234] ss:$8 sps:$4 sm:$0xff]  }
0x24e8   :  { %v12769_v28 = vpack.c.bf16 %v12753_v15, %v12737_v13  ;;  %v12771_v30 = vpack.c.bf16 %v12755_v6, %v12739_v14  ;;  %14399 = vmatprep.subr.bf16.mxu1 %v18027_v23  ;;  %v18075_v23 = vld [vmem:[%s21269_s6 + $0x334] ss:$8 sps:$4 sm:$0xff]   ;;  %v18070_v13 = vld [vmem:[%s21269_s6 + $0x230] ss:$8 sps:$4 sm:$0xff]   ;;  %v18078_v15 = vld [vmem:[%s21269_s6 + $0x224] ss:$8 sps:$4 sm:$0xff]  }
0x24e9   :  { %v18073_v14 = vld [vmem:[%s21269_s6 + $0x330] ss:$8 sps:$4 sm:$0xff]   ;;  %v18081_v6 = vld [vmem:[%s21269_s6 + $0x324] ss:$8 sps:$4 sm:$0xff]   ;;  %v18096_v32 = vld [vmem:[%s21269_s6 + $0x2f4] ss:$8 sps:$4 sm:$0xff]  }
0x24ea   :  { %14357 = vmatpush2.bf16.msra.mxu0 %v18022_v10  ;;  %14364 = vmatprep.mubr.bf16.mxu0 %v12769_v28  ;;  %v18076_v10 = vld [vmem:[%s21269_s6 + $0x220] ss:$8 sps:$4 sm:$0xff]   ;;  %v18084_v28 = vld [vmem:[%s21269_s6 + $0x214] ss:$8 sps:$4 sm:$0xff]   ;;  %v18102_v42 = vld [vmem:[%s21269_s6 + $0x2e4] ss:$8 sps:$4 sm:$0xff]  }
0x24eb   :  { %14400 = vmatpush2.bf16.msra.mxu1 %v18025_v20  ;;  %14407 = vmatprep.mubr.bf16.mxu1 %v12771_v30  ;;  %v18079_v20 = vld [vmem:[%s21269_s6 + $0x320] ss:$8 sps:$4 sm:$0xff]   ;;  %v18087_v30 = vld [vmem:[%s21269_s6 + $0x314] ss:$8 sps:$4 sm:$0xff]  }
0x24ec   :  { %14358 = vmatprep.subr.bf16.mxu0 %v18030_v45  ;;  %14401 = vmatprep.subr.bf16.mxu1 %v18033_v48  ;;  %v18082_v45 = vld [vmem:[%s21269_s6 + $0x210] ss:$8 sps:$4 sm:$0xff]  }
0x24ed   :  { %v18085_v48 = vld [vmem:[%s21269_s6 + $0x310] ss:$8 sps:$4 sm:$0xff]  }
0x24ee   :  { %14359 = vmatpush2.bf16.msra.mxu0 %v18028_v49  ;;  %v18090_v49 = vld [vmem:[%s21269_s6 + $0x204] ss:$8 sps:$4 sm:$0xff]  }
0x24ef   :  { %14402 = vmatpush2.bf16.msra.mxu1 %v18031_v18  ;;  %14360 = vmatprep.subr.bf16.mxu0 %v18036_v54  ;;  %v18093_v18 = vld [vmem:[%s21269_s6 + $0x304] ss:$8 sps:$4 sm:$0xff]  }
0x24f0   :  { %14403 = vmatprep.subr.bf16.mxu1 %v18039_v24 }
0x24f2   :  { %14361 = vmatpush2.bf16.msra.mxu0 %v18034_v3  ;;  %v18088_v3 = vld [vmem:[%s21269_s6 + $0x200] ss:$8 sps:$4 sm:$0xff]  }
0x24f3   :  { %14404 = vmatpush2.bf16.msra.mxu1 %v18037_v1  ;;  %14362 = vmatprep.subr.bf16.mxu0 %v18042_v31  ;;  %v18091_v31 = vld [vmem:[%s21269_s6 + $0x300] ss:$8 sps:$4 sm:$0xff]  }
0x24f4   :  { %14405 = vmatprep.subr.bf16.mxu1 %v18045_v39  ;;  %v18099_v39 = vld [vmem:[%s21269_s6 + $0x3f4] ss:$8 sps:$4 sm:$0xff]  }
0x24f6   :  { %14363 = vmatpush2.bf16.msra.mxu0 %v18040_v38 }
0x24f7   :  { %14406 = vmatpush2.bf16.msra.mxu1 %v18043_v4  ;;  %14418 = vmatprep.subr.bf16.mxu0 %v18048_v7  ;;  %v18094_v4 = vld [vmem:[%s21269_s6 + $0x2f0] ss:$8 sps:$4 sm:$0xff]  }
0x24f8   :  { %14461 = vmatprep.subr.bf16.mxu1 %v18051_v51  ;;  %v18097_v51 = vld [vmem:[%s21269_s6 + $0x3f0] ss:$8 sps:$4 sm:$0xff]  }
0x24f9   :  { %14365 = vmatmul.mubr.bf16.vlgmr.msra.gmra.mxu0 %v12768_v11  ;;  %v18105_v11 = vld [vmem:[%s21269_s6 + $0x3e4] ss:$8 sps:$4 sm:$0xff]  }
0x24fa   :  { %14408 = vmatmul.mubr.bf16.vlgmr.msra.gmra.mxu1 %v12770_v34  ;;  %14419 = vmatpush1.bf16.msra.mxu0 %v18046_v22 }
0x24fb   :  { %14462 = vmatpush1.bf16.msra.mxu1 %v18049_v46  ;;  %14420 = vmatprep.subr.bf16.mxu0 %v18054_v56 }
0x24fc   :  { %14463 = vmatprep.subr.bf16.mxu1 %v18057_v60 }
0x24fe   :  { %14421 = vmatpush1.bf16.msra.mxu0 %v18052_v21  ;;  %v18100_v21 = vld [vmem:[%s21269_s6 + $0x2e0] ss:$8 sps:$4 sm:$0xff]  }
0x24ff   :  { %14464 = vmatpush1.bf16.msra.mxu1 %v18055_v53  ;;  %14422 = vmatprep.subr.bf16.mxu0 %v18060_v47  ;;  %v18103_v53 = vld [vmem:[%s21269_s6 + $0x3e0] ss:$8 sps:$4 sm:$0xff]  }
0x2500   :  { %14465 = vmatprep.subr.bf16.mxu1 %v18063_v52 }
0x2502   :  { %14423 = vmatpush1.bf16.msra.mxu0 %v18058_v61  ;;  %v18108_v61 = vld [vmem:[%s21269_s6 + $0x2d4] ss:$8 sps:$4 sm:$0xff]  }
0x2503   :  { %14466 = vmatpush1.bf16.msra.mxu1 %v18061_v55  ;;  %14424 = vmatprep.subr.bf16.mxu0 %v18066_v62  ;;  %v18111_v55 = vld [vmem:[%s21269_s6 + $0x3d4] ss:$8 sps:$4 sm:$0xff]   ;;  %v18106_v62 = vld [vmem:[%s21269_s6 + $0x2d0] ss:$8 sps:$4 sm:$0xff]  }
0x2504   :  { %14467 = vmatprep.subr.bf16.mxu1 %v18069_v63  ;;  %v18109_v63 = vld [vmem:[%s21269_s6 + $0x3d0] ss:$8 sps:$4 sm:$0xff]  }
0x2506   :  { %14425 = vmatpush1.bf16.msra.mxu0 %v18064_v0  ;;  %v18114_v0 = vld [vmem:[%s21269_s6 + $0x2c4] ss:$8 sps:$4 sm:$0xff]  }
0x2507   :  { %14468 = vmatpush1.bf16.msra.mxu1 %v18067_v5  ;;  %14426 = vmatprep.subr.bf16.mxu0 %v18072_v16  ;;  %v18117_v5 = vld [vmem:[%s21269_s6 + $0x3c4] ss:$8 sps:$4 sm:$0xff]   ;;  %v18112_v16 = vld [vmem:[%s21269_s6 + $0x2c0] ss:$8 sps:$4 sm:$0xff]  }
0x2508   :  { %14469 = vmatprep.subr.bf16.mxu1 %v18075_v23  ;;  %v18115_v23 = vld [vmem:[%s21269_s6 + $0x3c0] ss:$8 sps:$4 sm:$0xff]  }
0x250a   :  { %14427 = vmatpush1.bf16.msra.mxu0 %v18070_v13  ;;  %v18120_v13 = vld [vmem:[%s21269_s6 + $0x2b4] ss:$8 sps:$4 sm:$0xff]  }
0x250b   :  { %14470 = vmatpush1.bf16.msra.mxu1 %v18073_v14  ;;  %14428 = vmatprep.subr.bf16.mxu0 %v18078_v15  ;;  %v18123_v14 = vld [vmem:[%s21269_s6 + $0x3b4] ss:$8 sps:$4 sm:$0xff]   ;;  %v18118_v15 = vld [vmem:[%s21269_s6 + $0x2b0] ss:$8 sps:$4 sm:$0xff]  }
0x250c   :  { %14471 = vmatprep.subr.bf16.mxu1 %v18081_v6  ;;  %v18121_v6 = vld [vmem:[%s21269_s6 + $0x3b0] ss:$8 sps:$4 sm:$0xff]  }
0x250e   :  { %14429 = vmatpush1.bf16.msra.mxu0 %v18076_v10  ;;  %v18126_v10 = vld [vmem:[%s21269_s6 + $0x2a4] ss:$8 sps:$4 sm:$0xff]  }
0x250f   :  { %14472 = vmatpush1.bf16.msra.mxu1 %v18079_v20  ;;  %14430 = vmatprep.subr.bf16.mxu0 %v18084_v28  ;;  %v18129_v20 = vld [vmem:[%s21269_s6 + $0x3a4] ss:$8 sps:$4 sm:$0xff]   ;;  %v18124_v28 = vld [vmem:[%s21269_s6 + $0x2a0] ss:$8 sps:$4 sm:$0xff]  }
0x2510   :  { %14473 = vmatprep.subr.bf16.mxu1 %v18087_v30  ;;  %v18127_v30 = vld [vmem:[%s21269_s6 + $0x3a0] ss:$8 sps:$4 sm:$0xff]  }
0x2511   :  { %v20909_v54 = vpop.f32.mrf.mxu0  ;;  %v20911_v24 = vpop.f32.mrf.mxu1 }
0x2512   :  { %14431 = vmatpush1.bf16.msra.mxu0 %v18082_v45  ;;  %v18132_v45 = vld [vmem:[%s21269_s6 + $0x294] ss:$8 sps:$4 sm:$0xff]  }
0x2513   :  { %14474 = vmatpush1.bf16.msra.mxu1 %v18085_v48  ;;  %v12514_v19 = vpop.f32.mrf.mxu0  ;;  %v12557_v1 = vpop.f32.mrf.mxu1  ;;  %14432 = vmatprep.subr.bf16.mxu0 %v18090_v49  ;;  %v18135_v48 = vld [vmem:[%s21269_s6 + $0x394] ss:$8 sps:$4 sm:$0xff]   ;;  %v11280_v49 = vrot.slane %v20841_v26, %v19693_v33 }
0x2514   :  { %14475 = vmatprep.subr.bf16.mxu1 %v18093_v18  ;;  %v12515_v38 = vadd.f32 %v12514_v19, %v11284_v8  ;;  %v12558_v44 = vadd.f32 %v12557_v1, %v11292_v59  ;;  %v11288_v18 = vrot.slane %v20841_v26, %v19696_v36  ;;  %v18138_v19 = vld [vmem:[%s21269_s6 + $0x284] ss:$8 sps:$4 sm:$0xff]  }
0x2515   :  { %v20921_v37 = vpop.f32.mrf.mxu0  ;;  %v20923_v9 = vpop.f32.mrf.mxu1 }
0x2516   :  { %14433 = vmatpush1.bf16.msra.mxu0 %v18088_v3  ;;  %v12741_v46 = vmax.f32 %v12515_v38, 0.0  ;;  %v12743_v56 = vmax.f32 %v12558_v44, 0.0  ;;  %v18133_v3 = vld [vmem:[%s21269_s6 + $0x390] ss:$8 sps:$4 sm:$0xff]   ;;  %v12560_v1 = vadd.f32 %v20923_v9, %v11288_v18  ;;  %v12556_v26 = vadd.f32 %v20911_v24, %v11288_v18  ;;  %v18144_v44 = vld [vmem:[%s21269_s6 + $0x474] ss:$8 sps:$4 sm:$0xff]  }
0x2517   :  { %14476 = vmatpush1.bf16.msra.mxu1 %v18091_v31  ;;  %v12518_v7 = vpop.f32.mrf.mxu0  ;;  %v12561_v58 = vpop.f32.mrf.mxu1  ;;  %14434 = vmatprep.subr.bf16.mxu0 %v18096_v32  ;;  %v18141_v31 = vld [vmem:[%s21269_s6 + $0x384] ss:$8 sps:$4 sm:$0xff]   ;;  %v12513_v32 = vadd.f32 %v20909_v54, %v11280_v49  ;;  %v18147_v9 = vld [vmem:[%s21269_s6 + $0x574] ss:$8 sps:$4 sm:$0xff]   ;;  %v18142_v54 = vld [vmem:[%s21269_s6 + $0x470] ss:$8 sps:$4 sm:$0xff]  }
0x2518   :  { %v12519_v17 = vadd.f32 %v12518_v7, %v11284_v8  ;;  %v12562_v22 = vadd.f32 %v12561_v58, %v11292_v59  ;;  %14477 = vmatprep.subr.bf16.mxu1 %v18099_v39  ;;  %v18130_v8 = vld [vmem:[%s21269_s6 + $0x290] ss:$8 sps:$4 sm:$0xff]   ;;  %v12517_v59 = vadd.f32 %v20921_v37, %v11280_v49  ;;  %v18136_v39 = vld [vmem:[%s21269_s6 + $0x280] ss:$8 sps:$4 sm:$0xff]   ;;  %v12742_v58 = vmax.f32 %v12556_v26, 0.0 }
0x2519   :  { %v18139_v37 = vld [vmem:[%s21269_s6 + $0x380] ss:$8 sps:$4 sm:$0xff]   ;;  %v12740_v7 = vmax.f32 %v12513_v32, 0.0  ;;  %v18178_v26 = vld [vmem:[%s21269_s6 + $0x410] ss:$8 sps:$4 sm:$0xff]  }
0x251a   :  { %v12757_v34 = vmax.f32 %v12519_v17, 0.0  ;;  %v12759_v60 = vmax.f32 %v12562_v22, 0.0  ;;  %14435 = vmatpush2.bf16.msra.mxu0 %v18094_v4  ;;  %v12756_v38 = vmax.f32 %v12517_v59, 0.0  ;;  %v12758_v4 = vmax.f32 %v12560_v1, 0.0  ;;  %v18153_v22 = vld [vmem:[%s21269_s6 + $0x564] ss:$8 sps:$4 sm:$0xff]  }
0x251b   :  { %14478 = vmatpush2.bf16.msra.mxu1 %v18097_v51  ;;  %14436 = vmatprep.subr.bf16.mxu0 %v18102_v42  ;;  %v18145_v51 = vld [vmem:[%s21269_s6 + $0x570] ss:$8 sps:$4 sm:$0xff]   ;;  %v18150_v42 = vld [vmem:[%s21269_s6 + $0x464] ss:$8 sps:$4 sm:$0xff]   ;;  %v18175_v18 = vld [vmem:[%s21269_s6 + $0x520] ss:$8 sps:$4 sm:$0xff]  }
0x251c   :  { %v12773_v47 = vpack.c.bf16 %v12757_v34, %v12741_v46  ;;  %v12775_v52 = vpack.c.bf16 %v12759_v60, %v12743_v56  ;;  %14479 = vmatprep.subr.bf16.mxu1 %v18105_v11  ;;  %v12772_v24 = vpack.c.bf16 %v12756_v38, %v12740_v7  ;;  %v12774_v17 = vpack.c.bf16 %v12758_v4, %v12742_v58  ;;  %v18148_v11 = vld [vmem:[%s21269_s6 + $0x460] ss:$8 sps:$4 sm:$0xff]   ;;  %v18156_v56 = vld [vmem:[%s21269_s6 + $0x454] ss:$8 sps:$4 sm:$0xff]   ;;  %v18154_v60 = vld [vmem:[%s21269_s6 + $0x450] ss:$8 sps:$4 sm:$0xff]  }
0x251d   :  { %v18151_v46 = vld [vmem:[%s21269_s6 + $0x560] ss:$8 sps:$4 sm:$0xff]   ;;  %v18159_v34 = vld [vmem:[%s21269_s6 + $0x554] ss:$8 sps:$4 sm:$0xff]   ;;  %v18186_v4 = vld [vmem:[%s21269_s6 + $0x404] ss:$8 sps:$4 sm:$0xff]  }
0x251e   :  { %14437 = vmatpush2.bf16.msra.mxu0 %v18100_v21  ;;  %14450 = vmatprep.mubr.bf16.mxu0 %v12773_v47  ;;  %v18157_v21 = vld [vmem:[%s21269_s6 + $0x550] ss:$8 sps:$4 sm:$0xff]   ;;  %v18165_v47 = vld [vmem:[%s21269_s6 + $0x544] ss:$8 sps:$4 sm:$0xff]   ;;  %v18184_v58 = vld [vmem:[%s21269_s6 + $0x400] ss:$8 sps:$4 sm:$0xff]  }
0x251f   :  { %14480 = vmatpush2.bf16.msra.mxu1 %v18103_v53  ;;  %14493 = vmatprep.mubr.bf16.mxu1 %v12775_v52  ;;  %v18162_v53 = vld [vmem:[%s21269_s6 + $0x444] ss:$8 sps:$4 sm:$0xff]   ;;  %v18160_v52 = vld [vmem:[%s21269_s6 + $0x440] ss:$8 sps:$4 sm:$0xff]  }
0x2520   :  { %14438 = vmatprep.subr.bf16.mxu0 %v18108_v61  ;;  %14481 = vmatprep.subr.bf16.mxu1 %v18111_v55  ;;  %v18163_v61 = vld [vmem:[%s21269_s6 + $0x540] ss:$8 sps:$4 sm:$0xff]   ;;  %v18168_v55 = vld [vmem:[%s21269_s6 + $0x434] ss:$8 sps:$4 sm:$0xff]  }
0x2522   :  { %14439 = vmatpush2.bf16.msra.mxu0 %v18106_v62  ;;  %v18171_v62 = vld [vmem:[%s21269_s6 + $0x534] ss:$8 sps:$4 sm:$0xff]  }
0x2523   :  { %14482 = vmatpush2.bf16.msra.mxu1 %v18109_v63  ;;  %14440 = vmatprep.subr.bf16.mxu0 %v18114_v0  ;;  %v20982_v63 = vld [vmem:[%s21270_s22 + $0x8] sm:$0xff] }
0x2524   :  { %14483 = vmatprep.subr.bf16.mxu1 %v18117_v5 }
0x2526   :  { %14441 = vmatpush2.bf16.msra.mxu0 %v18112_v16  ;;  %v11300_v16 = vrot.slane %v20982_v63, %v19217_v29 }
0x2527   :  { %14484 = vmatpush2.bf16.msra.mxu1 %v18115_v23  ;;  %14442 = vmatprep.subr.bf16.mxu0 %v18120_v13  ;;  %v18166_v23 = vld [vmem:[%s21269_s6 + $0x430] ss:$8 sps:$4 sm:$0xff]  }
0x2528   :  { %14485 = vmatprep.subr.bf16.mxu1 %v18123_v14  ;;  %v11308_v14 = vrot.slane %v20982_v63, %v19573_v50 }
0x252a   :  { %14443 = vmatpush2.bf16.msra.mxu0 %v18118_v15  ;;  %v18169_v15 = vld [vmem:[%s21269_s6 + $0x530] ss:$8 sps:$4 sm:$0xff]  }
0x252b   :  { %14486 = vmatpush2.bf16.msra.mxu1 %v18121_v6  ;;  %14444 = vmatprep.subr.bf16.mxu0 %v18126_v10  ;;  %v18174_v6 = vld [vmem:[%s21269_s6 + $0x424] ss:$8 sps:$4 sm:$0xff]  }
0x252c   :  { %14487 = vmatprep.subr.bf16.mxu1 %v18129_v20  ;;  %v18177_v20 = vld [vmem:[%s21269_s6 + $0x524] ss:$8 sps:$4 sm:$0xff]  }
0x252e   :  { %14445 = vmatpush2.bf16.msra.mxu0 %v18124_v28 }
0x252f   :  { %14488 = vmatpush2.bf16.msra.mxu1 %v18127_v30  ;;  %14446 = vmatprep.subr.bf16.mxu0 %v18132_v45 }
0x2530   :  { %14489 = vmatprep.subr.bf16.mxu1 %v18135_v48  ;;  %v18172_v48 = vld [vmem:[%s21269_s6 + $0x420] ss:$8 sps:$4 sm:$0xff]  }
0x2532   :  { %14447 = vmatpush2.bf16.msra.mxu0 %v18130_v8  ;;  %v18180_v8 = vld [vmem:[%s21269_s6 + $0x414] ss:$8 sps:$4 sm:$0xff]  }
0x2533   :  { %14490 = vmatpush2.bf16.msra.mxu1 %v18133_v3  ;;  %14448 = vmatprep.subr.bf16.mxu0 %v18138_v19  ;;  %v18183_v19 = vld [vmem:[%s21269_s6 + $0x514] ss:$8 sps:$4 sm:$0xff]  }
0x2534   :  { %14491 = vmatprep.subr.bf16.mxu1 %v18141_v31 }
0x2536   :  { %14449 = vmatpush2.bf16.msra.mxu0 %v18136_v39 }
0x2537   :  { %14492 = vmatpush2.bf16.msra.mxu1 %v18139_v37  ;;  %14504 = vmatprep.subr.bf16.mxu0 %v18144_v44  ;;  %v18181_v37 = vld [vmem:[%s21269_s6 + $0x510] ss:$8 sps:$4 sm:$0xff]  }
0x2538   :  { %14547 = vmatprep.subr.bf16.mxu1 %v18147_v9  ;;  %v18189_v9 = vld [vmem:[%s21269_s6 + $0x504] ss:$8 sps:$4 sm:$0xff]  }
0x2539   :  { %14451 = vmatmul.mubr.bf16.vlgmr.msra.gmra.mxu0 %v12772_v24  ;;  %v18192_v24 = vld [vmem:[%s21269_s6 + $0x4f4] ss:$8 sps:$4 sm:$0xff]  }
0x253a   :  { %14494 = vmatmul.mubr.bf16.vlgmr.msra.gmra.mxu1 %v12774_v17  ;;  %14505 = vmatpush1.bf16.msra.mxu0 %v18142_v54  ;;  %v18187_v54 = vld [vmem:[%s21269_s6 + $0x500] ss:$8 sps:$4 sm:$0xff]   ;;  %v18193_v17 = vld [vmem:[%s21269_s6 + $0x5f0] ss:$8 sps:$4 sm:$0xff]  }
0x253b   :  { %14548 = vmatpush1.bf16.msra.mxu1 %v18145_v51  ;;  %14506 = vmatprep.subr.bf16.mxu0 %v18150_v42  ;;  %v18195_v51 = vld [vmem:[%s21269_s6 + $0x5f4] ss:$8 sps:$4 sm:$0xff]   ;;  %v18190_v42 = vld [vmem:[%s21269_s6 + $0x4f0] ss:$8 sps:$4 sm:$0xff]  }
0x253c   :  { %14549 = vmatprep.subr.bf16.mxu1 %v18153_v22  ;;  %v18198_v22 = vld [vmem:[%s21269_s6 + $0x4e4] ss:$8 sps:$4 sm:$0xff]  }
0x253e   :  { %14507 = vmatpush1.bf16.msra.mxu0 %v18148_v11  ;;  %v18201_v11 = vld [vmem:[%s21269_s6 + $0x5e4] ss:$8 sps:$4 sm:$0xff]  }
0x253f   :  { %14550 = vmatpush1.bf16.msra.mxu1 %v18151_v46  ;;  %14508 = vmatprep.subr.bf16.mxu0 %v18156_v56  ;;  %v18196_v46 = vld [vmem:[%s21269_s6 + $0x4e0] ss:$8 sps:$4 sm:$0xff]  }
0x2540   :  { %14551 = vmatprep.subr.bf16.mxu1 %v18159_v34  ;;  %v18199_v56 = vld [vmem:[%s21269_s6 + $0x5e0] ss:$8 sps:$4 sm:$0xff]   ;;  %v18204_v34 = vld [vmem:[%s21269_s6 + $0x4d4] ss:$8 sps:$4 sm:$0xff]  }
0x2542   :  { %14509 = vmatpush1.bf16.msra.mxu0 %v18154_v60  ;;  %v18207_v60 = vld [vmem:[%s21269_s6 + $0x5d4] ss:$8 sps:$4 sm:$0xff]  }
0x2543   :  { %14552 = vmatpush1.bf16.msra.mxu1 %v18157_v21  ;;  %14510 = vmatprep.subr.bf16.mxu0 %v18162_v53  ;;  %v18202_v21 = vld [vmem:[%s21269_s6 + $0x4d0] ss:$8 sps:$4 sm:$0xff]  }
0x2544   :  { %14553 = vmatprep.subr.bf16.mxu1 %v18165_v47  ;;  %v18205_v53 = vld [vmem:[%s21269_s6 + $0x5d0] ss:$8 sps:$4 sm:$0xff]   ;;  %v18210_v47 = vld [vmem:[%s21269_s6 + $0x4c4] ss:$8 sps:$4 sm:$0xff]  }
0x2545   :  { %v20984_v0 = vpop.f32.mrf.mxu0 }
0x2546   :  { %v20986_v5 = vpop.f32.mrf.mxu1  ;;  %14511 = vmatpush1.bf16.msra.mxu0 %v18160_v52  ;;  %v18213_v52 = vld [vmem:[%s21269_s6 + $0x5c4] ss:$8 sps:$4 sm:$0xff]  }
0x2547   :  { %14554 = vmatpush1.bf16.msra.mxu1 %v18163_v61  ;;  %v12600_v13 = vpop.f32.mrf.mxu0  ;;  %14512 = vmatprep.subr.bf16.mxu0 %v18168_v55  ;;  %v18208_v61 = vld [vmem:[%s21269_s6 + $0x4c0] ss:$8 sps:$4 sm:$0xff]  }
0x2548   :  { %v12643_v10 = vpop.f32.mrf.mxu1  ;;  %14555 = vmatprep.subr.bf16.mxu1 %v18171_v62  ;;  %v12601_v30 = vadd.f32 %v12600_v13, %v11300_v16  ;;  %v18211_v55 = vld [vmem:[%s21269_s6 + $0x5c0] ss:$8 sps:$4 sm:$0xff]   ;;  %v18216_v62 = vld [vmem:[%s21269_s6 + $0x4b4] ss:$8 sps:$4 sm:$0xff]   ;;  %v18217_v13 = vld [vmem:[%s21269_s6 + $0x5b0] ss:$8 sps:$4 sm:$0xff]  }
0x2549   :  { %v20996_v28 = vpop.f32.mrf.mxu0  ;;  %v12644_v49 = vadd.f32 %v12643_v10, %v11308_v14  ;;  %v18223_v10 = vld [vmem:[%s21269_s6 + $0x5a0] ss:$8 sps:$4 sm:$0xff]  }
0x254a   :  { %v20998_v45 = vpop.f32.mrf.mxu1  ;;  %14513 = vmatpush1.bf16.msra.mxu0 %v18166_v23  ;;  %v12745_v31 = vmax.f32 %v12601_v30, 0.0  ;;  %v18214_v23 = vld [vmem:[%s21269_s6 + $0x4b0] ss:$8 sps:$4 sm:$0xff]   ;;  %v18231_v30 = vld [vmem:[%s21269_s6 + $0x594] ss:$8 sps:$4 sm:$0xff]  }
0x254b   :  { %14556 = vmatpush1.bf16.msra.mxu1 %v18169_v15  ;;  %v12604_v50 = vpop.f32.mrf.mxu0  ;;  %14514 = vmatprep.subr.bf16.mxu0 %v18174_v6  ;;  %v12747_v39 = vmax.f32 %v12644_v49, 0.0  ;;  %v18225_v15 = vld [vmem:[%s21269_s6 + $0x5a4] ss:$8 sps:$4 sm:$0xff]   ;;  %v18220_v6 = vld [vmem:[%s21269_s6 + $0x4a0] ss:$8 sps:$4 sm:$0xff]   ;;  %v11304_v49 = vrot.slane %v20982_v63, %v19602_v43 }
0x254c   :  { %v12605_v59 = vadd.f32 %v12604_v50, %v11300_v16  ;;  %v12647_v3 = vpop.f32.mrf.mxu1  ;;  %14557 = vmatprep.subr.bf16.mxu1 %v18177_v20  ;;  %v18219_v16 = vld [vmem:[%s21269_s6 + $0x5b4] ss:$8 sps:$4 sm:$0xff]   ;;  %v18226_v50 = vld [vmem:[%s21269_s6 + $0x490] ss:$8 sps:$4 sm:$0xff]  }
0x254d   :  { %v12648_v1 = vadd.f32 %v12647_v3, %v11308_v14  ;;  %v18222_v14 = vld [vmem:[%s21269_s6 + $0x4a4] ss:$8 sps:$4 sm:$0xff]   ;;  %v18228_v20 = vld [vmem:[%s21269_s6 + $0x494] ss:$8 sps:$4 sm:$0xff]   ;;  %v12646_v3 = vadd.f32 %v20998_v45, %v11304_v49  ;;  %v12642_v43 = vadd.f32 %v20986_v5, %v11304_v49  ;;  %v18241_v5 = vld [vmem:[%s21269_s6 + $0x770] ss:$8 sps:$4 sm:$0xff]  }
0x254e   :  { %v12761_v32 = vmax.f32 %v12605_v59, 0.0  ;;  %14515 = vmatpush1.bf16.msra.mxu0 %v18172_v48  ;;  %v11296_v48 = vrot.slane %v20982_v63, %v19213_v27  ;;  %v18234_v59 = vld [vmem:[%s21269_s6 + $0x484] ss:$8 sps:$4 sm:$0xff]   ;;  %v18243_v45 = vld [vmem:[%s21269_s6 + $0x774] ss:$8 sps:$4 sm:$0xff]  }
0x254f   :  { %v12763_v38 = vmax.f32 %v12648_v1, 0.0  ;;  %14558 = vmatpush1.bf16.msra.mxu1 %v18175_v18  ;;  %14516 = vmatprep.subr.bf16.mxu0 %v18180_v8  ;;  %v18229_v8 = vld [vmem:[%s21269_s6 + $0x590] ss:$8 sps:$4 sm:$0xff]  }
0x2550   :  { %v12777_v44 = vpack.c.bf16 %v12761_v32, %v12745_v31  ;;  %14559 = vmatprep.subr.bf16.mxu1 %v18183_v19  ;;  %v12603_v18 = vadd.f32 %v20996_v28, %v11296_v48  ;;  %v18237_v19 = vld [vmem:[%s21269_s6 + $0x584] ss:$8 sps:$4 sm:$0xff]   ;;  %v12599_v1 = vadd.f32 %v20984_v0, %v11296_v48  ;;  %v18232_v31 = vld [vmem:[%s21269_s6 + $0x480] ss:$8 sps:$4 sm:$0xff]   ;;  %v18238_v0 = vld [vmem:[%s21269_s6 + $0x670] ss:$8 sps:$4 sm:$0xff]  }
0x2551   :  { %v12779_v7 = vpack.c.bf16 %v12763_v38, %v12747_v39  ;;  %v18235_v28 = vld [vmem:[%s21269_s6 + $0x580] ss:$8 sps:$4 sm:$0xff]   ;;  %v12762_v39 = vmax.f32 %v12646_v3, 0.0  ;;  %v18267_v48 = vld [vmem:[%s21269_s6 + $0x734] ss:$8 sps:$4 sm:$0xff]  }
0x2552   :  { %14517 = vmatpush1.bf16.msra.mxu0 %v18178_v26  ;;  %14536 = vmatprep.mubr.bf16.mxu0 %v12777_v44  ;;  %v12760_v32 = vmax.f32 %v12603_v18, 0.0  ;;  %v18240_v26 = vld [vmem:[%s21269_s6 + $0x674] ss:$8 sps:$4 sm:$0xff]   ;;  %v12744_v38 = vmax.f32 %v12599_v1, 0.0  ;;  %v18265_v18 = vld [vmem:[%s21269_s6 + $0x730] ss:$8 sps:$4 sm:$0xff]  }
0x2553   :  { %14560 = vmatpush1.bf16.msra.mxu1 %v18181_v37  ;;  %14579 = vmatprep.mubr.bf16.mxu1 %v12779_v7  ;;  %v12746_v37 = vmax.f32 %v12642_v43, 0.0  ;;  %v18249_v7 = vld [vmem:[%s21269_s6 + $0x764] ss:$8 sps:$4 sm:$0xff]   ;;  %v18268_v3 = vld [vmem:[%s21269_s6 + $0x620] ss:$8 sps:$4 sm:$0xff]  }
0x2554   :  { %14518 = vmatprep.subr.bf16.mxu0 %v18186_v4  ;;  %14561 = vmatprep.subr.bf16.mxu1 %v18189_v9  ;;  %v12776_v44 = vpack.c.bf16 %v12760_v32, %v12744_v38  ;;  %v18246_v4 = vld [vmem:[%s21269_s6 + $0x664] ss:$8 sps:$4 sm:$0xff]   ;;  %v18276_v1 = vld [vmem:[%s21269_s6 + $0x614] ss:$8 sps:$4 sm:$0xff]   ;;  %v18277_v32 = vld [vmem:[%s21269_s6 + $0x710] ss:$8 sps:$4 sm:$0xff]  }
0x2555   :  { %v12778_v9 = vpack.c.bf16 %v12762_v39, %v12746_v37  ;;  %v18279_v43 = vld [vmem:[%s21269_s6 + $0x714] ss:$8 sps:$4 sm:$0xff]   ;;  %v18280_v39 = vld [vmem:[%s21269_s6 + $0x600] ss:$8 sps:$4 sm:$0xff]  }
0x2556   :  { %14519 = vmatpush1.bf16.msra.mxu0 %v18184_v58  ;;  %v18288_v38 = vld [vmem:[%s21269_s6 + $0x6f4] ss:$8 sps:$4 sm:$0xff]  }
0x2557   :  { %14562 = vmatpush1.bf16.msra.mxu1 %v18187_v54  ;;  %14520 = vmatprep.subr.bf16.mxu0 %v18192_v24  ;;  %v11316_v24 = vrot.slane %v20982_v63, %v19648_v40  ;;  %v18250_v40 = vld [vmem:[%s21269_s6 + $0x650] ss:$8 sps:$4 sm:$0xff]   ;;  %v18291_v37 = vld [vmem:[%s21269_s6 + $0x7f4] ss:$8 sps:$4 sm:$0xff]  }
0x2558   :  { %14563 = vmatprep.subr.bf16.mxu1 %v18195_v51  ;;  %v18244_v51 = vld [vmem:[%s21269_s6 + $0x660] ss:$8 sps:$4 sm:$0xff]  }
0x255a   :  { %14521 = vmatpush2.bf16.msra.mxu0 %v18190_v42 }
0x255b   :  { %14564 = vmatpush2.bf16.msra.mxu1 %v18193_v17  ;;  %14522 = vmatprep.subr.bf16.mxu0 %v18198_v22  ;;  %v11324_v17 = vrot.slane %v20982_v63, %v19651_v41  ;;  %v18247_v22 = vld [vmem:[%s21269_s6 + $0x760] ss:$8 sps:$4 sm:$0xff]  }
0x255c   :  { %14565 = vmatprep.subr.bf16.mxu1 %v18201_v11  ;;  %v18252_v11 = vld [vmem:[%s21269_s6 + $0x654] ss:$8 sps:$4 sm:$0xff]  }
0x255e   :  { %14523 = vmatpush2.bf16.msra.mxu0 %v18196_v46 }
0x255f   :  { %14566 = vmatpush2.bf16.msra.mxu1 %v18199_v56  ;;  %14524 = vmatprep.subr.bf16.mxu0 %v18204_v34  ;;  %v18255_v56 = vld [vmem:[%s21269_s6 + $0x754] ss:$8 sps:$4 sm:$0xff]  }
0x2560   :  { %14567 = vmatprep.subr.bf16.mxu1 %v18207_v60 }
0x2562   :  { %14525 = vmatpush2.bf16.msra.mxu0 %v18202_v21 }
0x2563   :  { %14568 = vmatpush2.bf16.msra.mxu1 %v18205_v53  ;;  %14526 = vmatprep.subr.bf16.mxu0 %v18210_v47  ;;  %v18253_v47 = vld [vmem:[%s21269_s6 + $0x750] ss:$8 sps:$4 sm:$0xff]  }
0x2564   :  { %14569 = vmatprep.subr.bf16.mxu1 %v18213_v52  ;;  %v18258_v52 = vld [vmem:[%s21269_s6 + $0x644] ss:$8 sps:$4 sm:$0xff]  }
0x2566   :  { %14527 = vmatpush2.bf16.msra.mxu0 %v18208_v61 }
0x2567   :  { %14570 = vmatpush2.bf16.msra.mxu1 %v18211_v55  ;;  %14528 = vmatprep.subr.bf16.mxu0 %v18216_v62  ;;  %v18261_v62 = vld [vmem:[%s21269_s6 + $0x744] ss:$8 sps:$4 sm:$0xff]  }
0x2568   :  { %14571 = vmatprep.subr.bf16.mxu1 %v18219_v16 }
0x256a   :  { %14529 = vmatpush2.bf16.msra.mxu0 %v18214_v23 }
0x256b   :  { %14572 = vmatpush2.bf16.msra.mxu1 %v18217_v13  ;;  %14530 = vmatprep.subr.bf16.mxu0 %v18222_v14  ;;  %v18256_v14 = vld [vmem:[%s21269_s6 + $0x640] ss:$8 sps:$4 sm:$0xff]  }
0x256c   :  { %14573 = vmatprep.subr.bf16.mxu1 %v18225_v15 }
0x256e   :  { %14531 = vmatpush2.bf16.msra.mxu0 %v18220_v6 }
0x256f   :  { %14574 = vmatpush2.bf16.msra.mxu1 %v18223_v10  ;;  %14532 = vmatprep.subr.bf16.mxu0 %v18228_v20  ;;  %v18259_v10 = vld [vmem:[%s21269_s6 + $0x740] ss:$8 sps:$4 sm:$0xff]  }
0x2570   :  { %14575 = vmatprep.subr.bf16.mxu1 %v18231_v30  ;;  %v18264_v30 = vld [vmem:[%s21269_s6 + $0x634] ss:$8 sps:$4 sm:$0xff]  }
0x2572   :  { %14533 = vmatpush2.bf16.msra.mxu0 %v18226_v50  ;;  %v18262_v50 = vld [vmem:[%s21269_s6 + $0x630] ss:$8 sps:$4 sm:$0xff]  }
0x2573   :  { %14576 = vmatpush2.bf16.msra.mxu1 %v18229_v8  ;;  %14534 = vmatprep.subr.bf16.mxu0 %v18234_v59  ;;  %v18270_v8 = vld [vmem:[%s21269_s6 + $0x624] ss:$8 sps:$4 sm:$0xff]  }
0x2574   :  { %14577 = vmatprep.subr.bf16.mxu1 %v18237_v19  ;;  %v18273_v59 = vld [vmem:[%s21269_s6 + $0x724] ss:$8 sps:$4 sm:$0xff]   ;;  %v18271_v19 = vld [vmem:[%s21269_s6 + $0x720] ss:$8 sps:$4 sm:$0xff]  }
0x2576   :  { %14535 = vmatpush2.bf16.msra.mxu0 %v18232_v31  ;;  %v18274_v31 = vld [vmem:[%s21269_s6 + $0x610] ss:$8 sps:$4 sm:$0xff]  }
0x2577   :  { %14578 = vmatpush2.bf16.msra.mxu1 %v18235_v28  ;;  %14590 = vmatprep.subr.bf16.mxu0 %v18240_v26  ;;  %v18282_v28 = vld [vmem:[%s21269_s6 + $0x604] ss:$8 sps:$4 sm:$0xff]  }
0x2578   :  { %14633 = vmatprep.subr.bf16.mxu1 %v18243_v45  ;;  %v18285_v26 = vld [vmem:[%s21269_s6 + $0x704] ss:$8 sps:$4 sm:$0xff]   ;;  %v18283_v45 = vld [vmem:[%s21269_s6 + $0x700] ss:$8 sps:$4 sm:$0xff]  }
0x2579   :  { %v21056_v58 = vpop.f32.mrf.mxu0  ;;  %14537 = vmatmul.mubr.bf16.vlgmr.msra.gmra.mxu0 %v12776_v44  ;;  %v18289_v44 = vld [vmem:[%s21269_s6 + $0x7f0] ss:$8 sps:$4 sm:$0xff]  }
0x257a   :  { %v21058_v54 = vpop.f32.mrf.mxu1  ;;  %14580 = vmatmul.mubr.bf16.vlgmr.msra.gmra.mxu1 %v12778_v9  ;;  %14591 = vmatpush1.bf16.msra.mxu0 %v18238_v0  ;;  %v18286_v0 = vld [vmem:[%s21269_s6 + $0x6f0] ss:$8 sps:$4 sm:$0xff]   ;;  %v18292_v9 = vld [vmem:[%s21269_s6 + $0x6e0] ss:$8 sps:$4 sm:$0xff]  }
0x257b   :  { %14634 = vmatpush1.bf16.msra.mxu1 %v18241_v5  ;;  %v12686_v42 = vpop.f32.mrf.mxu0  ;;  %14592 = vmatprep.subr.bf16.mxu0 %v18246_v4  ;;  %v18294_v5 = vld [vmem:[%s21269_s6 + $0x6e4] ss:$8 sps:$4 sm:$0xff]  }
0x257c   :  { %v12729_v46 = vpop.f32.mrf.mxu1  ;;  %14635 = vmatprep.subr.bf16.mxu1 %v18249_v7  ;;  %v12687_v60 = vadd.f32 %v12686_v42, %v11316_v24  ;;  %v18297_v4 = vld [vmem:[%s21269_s6 + $0x7e4] ss:$8 sps:$4 sm:$0xff]   ;;  %v18295_v7 = vld [vmem:[%s21269_s6 + $0x7e0] ss:$8 sps:$4 sm:$0xff]   ;;  %v18298_v42 = vld [vmem:[%s21269_s6 + $0x6d0] ss:$8 sps:$4 sm:$0xff]  }
0x257d   :  { %v21068_v34 = vpop.f32.mrf.mxu0  ;;  %v12730_v53 = vadd.f32 %v12729_v46, %v11324_v17  ;;  %v18304_v46 = vld [vmem:[%s21269_s6 + $0x6c0] ss:$8 sps:$4 sm:$0xff]  }
0x257e   :  { %v21070_v21 = vpop.f32.mrf.mxu1  ;;  %14593 = vmatpush1.bf16.msra.mxu0 %v18244_v51  ;;  %v12749_v23 = vmax.f32 %v12687_v60, 0.0  ;;  %v18303_v51 = vld [vmem:[%s21269_s6 + $0x7d4] ss:$8 sps:$4 sm:$0xff]  }
0x257f   :  { %14636 = vmatpush1.bf16.msra.mxu1 %v18247_v22  ;;  %v12690_v41 = vpop.f32.mrf.mxu0  ;;  %14594 = vmatprep.subr.bf16.mxu0 %v18252_v11  ;;  %v12751_v15 = vmax.f32 %v12730_v53, 0.0  ;;  %v18306_v22 = vld [vmem:[%s21269_s6 + $0x6c4] ss:$8 sps:$4 sm:$0xff]   ;;  %v18312_v60 = vld [vmem:[%s21269_s6 + $0x6b4] ss:$8 sps:$4 sm:$0xff]  }
0x2580   :  { %v12691_v61 = vadd.f32 %v12690_v41, %v11316_v24  ;;  %v12733_v55 = vpop.f32.mrf.mxu1  ;;  %14637 = vmatprep.subr.bf16.mxu1 %v18255_v56  ;;  %v18300_v24 = vld [vmem:[%s21269_s6 + $0x6d4] ss:$8 sps:$4 sm:$0xff]   ;;  %v18309_v11 = vld [vmem:[%s21269_s6 + $0x7c4] ss:$8 sps:$4 sm:$0xff]   ;;  %v18307_v56 = vld [vmem:[%s21269_s6 + $0x7c0] ss:$8 sps:$4 sm:$0xff]  }
0x2581   :  { %v12734_v16 = vadd.f32 %v12733_v55, %v11324_v17  ;;  %v18301_v17 = vld [vmem:[%s21269_s6 + $0x7d0] ss:$8 sps:$4 sm:$0xff]   ;;  %v18319_v55 = vld [vmem:[%s21269_s6 + $0x7a0] ss:$8 sps:$4 sm:$0xff]  }
0x2582   :  { %v12765_v13 = vmax.f32 %v12691_v61, 0.0  ;;  %14595 = vmatpush1.bf16.msra.mxu0 %v18250_v40  ;;  %v18315_v40 = vld [vmem:[%s21269_s6 + $0x7b4] ss:$8 sps:$4 sm:$0xff]   ;;  %v18310_v53 = vld [vmem:[%s21269_s6 + $0x6b0] ss:$8 sps:$4 sm:$0xff]  }
0x2583   :  { %v12767_v6 = vmax.f32 %v12734_v16, 0.0  ;;  %14638 = vmatpush1.bf16.msra.mxu1 %v18253_v47  ;;  %14596 = vmatprep.subr.bf16.mxu0 %v18258_v52  ;;  %v18313_v41 = vld [vmem:[%s21269_s6 + $0x7b0] ss:$8 sps:$4 sm:$0xff]   ;;  %v18318_v47 = vld [vmem:[%s21269_s6 + $0x6a4] ss:$8 sps:$4 sm:$0xff]  }
0x2584   :  { %v12781_v20 = vpack.c.bf16 %v12765_v13, %v12749_v23  ;;  %14639 = vmatprep.subr.bf16.mxu1 %v18261_v62  ;;  %v18321_v52 = vld [vmem:[%s21269_s6 + $0x7a4] ss:$8 sps:$4 sm:$0xff]   ;;  %v18316_v61 = vld [vmem:[%s21269_s6 + $0x6a0] ss:$8 sps:$4 sm:$0xff]   ;;  %v18324_v62 = vld [vmem:[%s21269_s6 + $0x694] ss:$8 sps:$4 sm:$0xff]   ;;  %v11312_v23 = vrot.slane %v20982_v63, %v19693_v33  ;;  %v11320_v13 = vrot.slane %v20982_v63, %v19696_v36 }
0x2585   :  { %v12783_v49 = vpack.c.bf16 %v12767_v6, %v12751_v15  ;;  %v18327_v16 = vld [vmem:[%s21269_s6 + $0x794] ss:$8 sps:$4 sm:$0xff]   ;;  %v18325_v6 = vld [vmem:[%s21269_s6 + $0x790] ss:$8 sps:$4 sm:$0xff]   ;;  %v18331_v63 = vld [vmem:[%s21269_s6 + $0x780] ss:$8 sps:$4 sm:$0xff]  }
0x2586   :  { %14597 = vmatpush1.bf16.msra.mxu0 %v18256_v14  ;;  %14622 = vmatprep.mubr.bf16.mxu0 %v12781_v20  ;;  %v18322_v14 = vld [vmem:[%s21269_s6 + $0x690] ss:$8 sps:$4 sm:$0xff]   ;;  %v12689_v15 = vadd.f32 %v21068_v34, %v11312_v23  ;;  %v12732_v20 = vadd.f32 %v21070_v21, %v11320_v13  ;;  %v12728_v33 = vadd.f32 %v21058_v54, %v11320_v13 }
0x2587   :  { %14640 = vmatpush1.bf16.msra.mxu1 %v18259_v10  ;;  %14665 = vmatprep.mubr.bf16.mxu1 %v12783_v49  ;;  %v18330_v10 = vld [vmem:[%s21269_s6 + $0x684] ss:$8 sps:$4 sm:$0xff]   ;;  %v18328_v49 = vld [vmem:[%s21269_s6 + $0x680] ss:$8 sps:$4 sm:$0xff]  }
0x2588   :  { %14598 = vmatprep.subr.bf16.mxu0 %v18264_v30  ;;  %14641 = vmatprep.subr.bf16.mxu1 %v18267_v48  ;;  %v18333_v30 = vld [vmem:[%s21269_s6 + $0x784] ss:$8 sps:$4 sm:$0xff]   ;;  %v12685_v48 = vadd.f32 %v21056_v58, %v11312_v23  ;;  %v12764_v36 = vmax.f32 %v12689_v15, 0.0 }
0x258a   :  { %14599 = vmatpush1.bf16.msra.mxu0 %v18262_v50  ;;  %v12766_v50 = vmax.f32 %v12732_v20, 0.0  ;;  %v12748_v34 = vmax.f32 %v12685_v48, 0.0 }
0x258b   :  { %14642 = vmatpush1.bf16.msra.mxu1 %v18265_v18  ;;  %14600 = vmatprep.subr.bf16.mxu0 %v18270_v8  ;;  %v12750_v18 = vmax.f32 %v12728_v33, 0.0 }
0x258c   :  { %14643 = vmatprep.subr.bf16.mxu1 %v18273_v59  ;;  %v12780_v8 = vpack.c.bf16 %v12764_v36, %v12748_v34 }
0x258d   :  { %v12782_v21 = vpack.c.bf16 %v12766_v50, %v12750_v18 }
0x258e   :  { %14601 = vmatpush1.bf16.msra.mxu0 %v18268_v3 }
0x258f   :  { %14644 = vmatpush1.bf16.msra.mxu1 %v18271_v19  ;;  %14602 = vmatprep.subr.bf16.mxu0 %v18276_v1 }
0x2590   :  { %14645 = vmatprep.subr.bf16.mxu1 %v18279_v43 }
0x2592   :  { %14603 = vmatpush1.bf16.msra.mxu0 %v18274_v31 }
0x2593   :  { %14646 = vmatpush1.bf16.msra.mxu1 %v18277_v32  ;;  %14604 = vmatprep.subr.bf16.mxu0 %v18282_v28 }
0x2594   :  { %14647 = vmatprep.subr.bf16.mxu1 %v18285_v26  ;;  %v13040_v26 = vld [vmem:[%s21271_s23] sm:$0x3] }
0x2596   :  { %14605 = vmatpush1.bf16.msra.mxu0 %v18280_v39 }
0x2597   :  { %14648 = vmatpush1.bf16.msra.mxu1 %v18283_v45  ;;  %14606 = vmatprep.subr.bf16.mxu0 %v18288_v38  ;;  %v13045_v38 = vrot.slane %v13040_v26, %v19213_v27 }
0x2598   :  { %14649 = vmatprep.subr.bf16.mxu1 %v18291_v37 }
0x259a   :  { %14607 = vmatpush2.bf16.msra.mxu0 %v18286_v0  ;;  %v13049_v0 = vrot.slane %v13040_v26, %v19217_v29 }
0x259b   :  { %14650 = vmatpush2.bf16.msra.mxu1 %v18289_v44  ;;  %14608 = vmatprep.subr.bf16.mxu0 %v18294_v5 }
0x259c   :  { %14651 = vmatprep.subr.bf16.mxu1 %v18297_v4 }
0x259e   :  { %14609 = vmatpush2.bf16.msra.mxu0 %v18292_v9 }
0x259f   :  { %14652 = vmatpush2.bf16.msra.mxu1 %v18295_v7  ;;  %14610 = vmatprep.subr.bf16.mxu0 %v18300_v24 }
0x25a0   :  { %14653 = vmatprep.subr.bf16.mxu1 %v18303_v51 }
0x25a2   :  { %14611 = vmatpush2.bf16.msra.mxu0 %v18298_v42 }
0x25a3   :  { %14654 = vmatpush2.bf16.msra.mxu1 %v18301_v17  ;;  %14612 = vmatprep.subr.bf16.mxu0 %v18306_v22 }
0x25a4   :  { %14655 = vmatprep.subr.bf16.mxu1 %v18309_v11 }
0x25a6   :  { %14613 = vmatpush2.bf16.msra.mxu0 %v18304_v46 }
0x25a7   :  { %14656 = vmatpush2.bf16.msra.mxu1 %v18307_v56  ;;  %14614 = vmatprep.subr.bf16.mxu0 %v18312_v60 }
0x25a8   :  { %14657 = vmatprep.subr.bf16.mxu1 %v18315_v40 }
0x25aa   :  { %14615 = vmatpush2.bf16.msra.mxu0 %v18310_v53 }
0x25ab   :  { %14658 = vmatpush2.bf16.msra.mxu1 %v18313_v41  ;;  %14616 = vmatprep.subr.bf16.mxu0 %v18318_v47 }
0x25ac   :  { %14659 = vmatprep.subr.bf16.mxu1 %v18321_v52 }
0x25ae   :  { %14617 = vmatpush2.bf16.msra.mxu0 %v18316_v61 }
0x25af   :  { %14660 = vmatpush2.bf16.msra.mxu1 %v18319_v55  ;;  %14618 = vmatprep.subr.bf16.mxu0 %v18324_v62 }
0x25b0   :  { %14661 = vmatprep.subr.bf16.mxu1 %v18327_v16 }
0x25b2   :  { %14619 = vmatpush2.bf16.msra.mxu0 %v18322_v14 }
0x25b3   :  { %14662 = vmatpush2.bf16.msra.mxu1 %v18325_v6  ;;  %14620 = vmatprep.subr.bf16.mxu0 %v18330_v10 }
0x25b4   :  { %14663 = vmatprep.subr.bf16.mxu1 %v18333_v30 }
0x25b6   :  { %14621 = vmatpush2.bf16.msra.mxu0 %v18328_v49 }
0x25b7   :  { %14664 = vmatpush2.bf16.msra.mxu1 %v18331_v63  ;;  %14790 = vmatprep.subr.mxu0 %v18476_v35 }
0x25b9   :  { %14623 = vmatmul.mubr.bf16.vlgmr.msra.gmra.mxu0 %v12780_v8  ;;  %v14366_v58 = vpop.f32.mrf.mxu0 }
0x25ba   :  { %14666 = vmatmul.mubr.bf16.vlgmr.msra.gmra.mxu1 %v12782_v21  ;;  %v14409_v54 = vpop.f32.mrf.mxu1  ;;  %v14367_v5 = vadd.f32 %v14366_v58, %v13045_v38 }
0x25bb   :  { %v14368_v59 = vpop.f32.mrf.mxu0 }
0x25bc   :  { %v14411_v3 = vpop.f32.mrf.mxu1  ;;  %v14369_v9 = vadd.f32 %v14368_v59, %v13049_v0  ;;  %v14410_v51 = vadd.f32 %v14409_v54, %v14367_v5  ;;  %v14769_v5 = vld [vmem:[%s18652_s4 + $0x70] sm:$0xff] }
0x25bd   :  { %v14370_v19 = vpop.f32.mrf.mxu0 }
0x25be   :  { %v14413_v1 = vpop.f32.mrf.mxu1  ;;  %v14371_v42 = vadd.f32 %v14370_v19, %v13045_v38  ;;  %v14412_v22 = vadd.f32 %v14411_v3, %v14369_v9  ;;  %v14765_v9 = vld [vmem:[%s18652_s4 + $0x50] sm:$0xff] }
0x25bf   :  { %v14372_v43 = vpop.f32.mrf.mxu0 }
0x25c0   :  { %v14415_v31 = vpop.f32.mrf.mxu1  ;;  %v14373_v11 = vadd.f32 %v14372_v43, %v13049_v0  ;;  %v14414_v60 = vadd.f32 %v14413_v1, %v14371_v42 }
0x25c2   :  { %v14416_v41 = vadd.f32 %v14415_v31, %v14373_v11 }
0x25f9   :  { %v14452_v32 = vpop.f32.mrf.mxu0 }
0x25fa   :  { %v14495_v28 = vpop.f32.mrf.mxu1  ;;  %v14453_v46 = vadd.f32 %v14452_v32, %v14410_v51 }
0x25fb   :  { %v14454_v39 = vpop.f32.mrf.mxu0 }
0x25fc   :  { %v14497_v45 = vpop.f32.mrf.mxu1  ;;  %v14455_v40 = vadd.f32 %v14454_v39, %v14412_v22  ;;  %v14496_v47 = vadd.f32 %v14495_v28, %v14453_v46 }
0x25fd   :  { %v14456_v37 = vpop.f32.mrf.mxu0 }
0x25fe   :  { %v14499_v44 = vpop.f32.mrf.mxu1  ;;  %v14457_v52 = vadd.f32 %v14456_v37, %v14414_v60  ;;  %v14498_v55 = vadd.f32 %v14497_v45, %v14455_v40 }
0x25ff   :  { %v14458_v4 = vpop.f32.mrf.mxu0 }
0x2600   :  { %v14501_v7 = vpop.f32.mrf.mxu1  ;;  %v14459_v62 = vadd.f32 %v14458_v4, %v14416_v41  ;;  %v14500_v13 = vadd.f32 %v14499_v44, %v14457_v52  ;;  %v14768_v4 = vld [vmem:[%s18652_s4 + $0x68] sm:$0xff] }
0x2602   :  { %v14502_v6 = vadd.f32 %v14501_v7, %v14459_v62  ;;  %v14764_v7 = vld [vmem:[%s18652_s4 + $0x48] sm:$0xff] }
0x2639   :  { %v14538_v24 = vpop.f32.mrf.mxu0 }
0x263a   :  { %v14581_v17 = vpop.f32.mrf.mxu1  ;;  %v14539_v16 = vadd.f32 %v14538_v24, %v14496_v47  ;;  %v14763_v24 = vld [vmem:[%s18652_s4 + $0x40] sm:$0xff] }
0x263b   :  { %v14540_v56 = vpop.f32.mrf.mxu0 }
0x263c   :  { %v14583_v53 = vpop.f32.mrf.mxu1  ;;  %v14541_v14 = vadd.f32 %v14540_v56, %v14498_v55  ;;  %v14582_v10 = vadd.f32 %v14581_v17, %v14539_v16  ;;  %v14762_v16 = vld [vmem:[%s18652_s4 + $0x38] sm:$0xff] }
0x263d   :  { %v14542_v61 = vpop.f32.mrf.mxu0 }
0x263e   :  { %v14585_v23 = vpop.f32.mrf.mxu1  ;;  %v14543_v20 = vadd.f32 %v14542_v61, %v14500_v13  ;;  %v14584_v33 = vadd.f32 %v14583_v53, %v14541_v14  ;;  %v14760_v13 = vld [vmem:[%s18652_s4 + $0x28] sm:$0xff]  ;;  %v14759_v14 = vld [vmem:[%s18652_s4 + $0x20] sm:$0xff] }
0x263f   :  { %v14544_v15 = vpop.f32.mrf.mxu0 }
0x2640   :  { %v14587_v30 = vpop.f32.mrf.mxu1  ;;  %v14545_v49 = vadd.f32 %v14544_v15, %v14502_v6  ;;  %v14586_v34 = vadd.f32 %v14585_v23, %v14543_v20  ;;  %v14761_v23 = vld [vmem:[%s18652_s4 + $0x30] sm:$0xff]  ;;  %v14758_v15 = vld [vmem:[%s18652_s4 + $0x18] sm:$0xff]  ;;  %v14755_v20 = vld [vmem:[%s18652_s4] sm:$0xff] }
0x2641   :  { %v14757_v6 = vld [vmem:[%s18652_s4 + $0x10] sm:$0xff] }
0x2642   :  { %v14588_v54 = vadd.f32 %v14587_v30, %v14545_v49  ;;  %v14779_v30 = vld [vmem:[%s18652_s4 + $0xc0] sm:$0xff]  ;;  %v14776_v49 = vld [vmem:[%s18652_s4 + $0xa8] sm:$0xff] }
0x2679   :  { %v14624_v48 = vpop.f32.mrf.mxu0 }
0x267a   :  { %v14625_v36 = vadd.f32 %v14624_v48, %v14582_v10  ;;  %v14667_v63 = vpop.f32.mrf.mxu1  ;;  %v14756_v10 = vld [vmem:[%s18652_s4 + $0x8] sm:$0xff]  ;;  %v14778_v48 = vld [vmem:[%s18652_s4 + $0xb8] sm:$0xff] }
0x267b   :  { %v14626_v50 = vpop.f32.mrf.mxu0 }
0x267c   :  { %v14627_v18 = vadd.f32 %v14626_v50, %v14584_v33  ;;  %v14669_v8 = vpop.f32.mrf.mxu1  ;;  %v14668_v21 = vadd.f32 %v14667_v63, %v14625_v36  ;;  %v14777_v33 = vld [vmem:[%s18652_s4 + $0xb0] sm:$0xff]  ;;  %v14775_v36 = vld [vmem:[%s18652_s4 + $0xa0] sm:$0xff]  ;;  %v14774_v63 = vld [vmem:[%s18652_s4 + $0x98] sm:$0xff] }
0x267d   :  { %v14628_v58 = vpop.f32.mrf.mxu0  ;;  %v14773_v50 = vld [vmem:[%s18652_s4 + $0x90] sm:$0xff] }
0x267e   :  { %v14670_v59 = vadd.f32 %v14669_v8, %v14627_v18  ;;  %v14629_v3 = vadd.f32 %v14628_v58, %v14586_v34  ;;  %v14671_v19 = vpop.f32.mrf.mxu1  ;;  %v14676_v32 = vadd.f32 %v14668_v21, %v20600_v57  ;;  %v14770_v57 = vld [vmem:[%s18652_s4 + $0x78] sm:$0xff]  ;;  %v14772_v34 = vld [vmem:[%s18652_s4 + $0x88] sm:$0xff]  ;;  %v14771_v18 = vld [vmem:[%s18652_s4 + $0x80] sm:$0xff] }
0x267f   :  { %v14630_v1 = vpop.f32.mrf.mxu0  ;;  %14791 = vmatpush1.msra.mxu0 %v14770_v57 }
0x2680   :  { %v14677_v43 = vadd.f32 %v14670_v59, %v20602_v25  ;;  %v14631_v31 = vadd.f32 %v14630_v1, %v14588_v54  ;;  %v14672_v28 = vadd.f32 %v14671_v19, %v14629_v3  ;;  %v14673_v26 = vpop.f32.mrf.mxu1  ;;  %14792 = vmatprep.subr.mxu0 %v18476_v35  ;;  %v14680_v19 = vld [vmem:[%s21272_s26] sm:$0x3] }
0x2681   :  { %14793 = vmatpush1.msra.mxu0 %v14769_v5  ;;  %v14726_v1 = vrot.slane %v14680_v19, %v19217_v29 }
0x2682   :  { %v14674_v39 = vadd.f32 %v14673_v26, %v14631_v31  ;;  %v14682_v45 = vsel %vm261_vm1, %v14677_v43, 0.0  ;;  %v14678_v0 = vadd.f32 %v14672_v28, %v20604_v12  ;;  %14794 = vmatprep.subr.mxu0 %v18476_v35  ;;  %v14766_v12 = vld [vmem:[%s18652_s4 + $0x58] sm:$0xff]  ;;  %v14681_v31 = vld [vmem:[%s18647_s27] sm:$0x3]  ;;  %s18478_s27 = smov [#allocation2]  }
0x2683   :  { %v14683_v38 = vadd.f32 %v14682_v45, %v14676_v32  ;;  %14795 = vmatpush1.msra.mxu0 %v14768_v4 }
0x2684   :  { %v14679_v37 = vadd.f32 %v14674_v39, %v20606_v2  ;;  %v14767_v2 = vld [vmem:[%s18652_s4 + $0x60] sm:$0xff]  ;;  %14796 = vmatprep.subr.mxu0 %v18476_v35  ;;  %v14741_v39 = vrot.slane %v14681_v31, %v19217_v29  ;;  %s14868_s4 = sshll.u32 %s18478_s27, 4  ;;  %s14869_s4 = int_to_ptr.vmem [resolvable:$true] %s14868_s4 }
0x2685   :  { %14684 = vadd.xlane.f32.xlu0 %v14683_v38  ;;  %14797 = vmatpush1.msra.mxu0 %v14767_v2  ;;  %s18418_s28 = scalar_lea.vmem %s14869_s4, 128  ;;  %p18423_p1 = scmp.lt.s32.totalorder %s14869_s4, %s14869_s4 }
0x2686   :  { %v14686_v44 = vsel %vm261_vm1, %v14679_v37, 0.0  ;;  %14798 = vmatprep.subr.mxu0 %v18476_v35  ;;  %p18419_p0 = scmp.ne.s32.totalorder %s14869_s4, %s18418_s28  ;;  %p18424_p2 = scmp.lt.s32.totalorder %s18418_s28, %s18418_s28 }
0x2687   :  { %v14687_v25 = vadd.f32 %v14686_v44, %v14678_v0  ;;  %14799 = vmatpush1.msra.mxu0 %v14766_v12 }
0x2688   :  { %14800 = vmatprep.subr.mxu0 %v18476_v35  ;;  %p18425_p3 = por %p18424_p2, %p18423_p1 }
0x2689   :  { %14688 = vadd.xlane.f32.xlu1 %v14687_v25  ;;  %14801 = vmatpush1.msra.mxu0 %v14765_v9 }
0x268a   :  { %14802 = vmatprep.subr.mxu0 %v18476_v35  ;;  %p18426_p4 = pnand %p18425_p3, %p18419_p0 }
0x268b   :  { %14803 = vmatpush1.msra.mxu0 %v14764_v7 }
0x268c   :  { %14804 = vmatprep.subr.mxu0 %v18476_v35 }
0x268d   :  { %14805 = vmatpush1.msra.mxu0 %v14763_v24 }
0x268e   :  { %14806 = vmatprep.subr.mxu0 %v18476_v35 }
0x268f   :  { %14807 = vmatpush1.msra.mxu0 %v14762_v16 }
0x2690   :  { %14808 = vmatprep.subr.mxu0 %v18476_v35 }
0x2691   :  { %14809 = vmatpush1.msra.mxu0 %v14761_v23 }
0x2692   :  { %14810 = vmatprep.subr.mxu0 %v18476_v35 }
0x2693   :  { %14811 = vmatpush1.msra.mxu0 %v14760_v13 }
0x2694   :  { %14812 = vmatprep.subr.mxu0 %v18476_v35 }
0x2695   :  { %14813 = vmatpush1.msra.mxu0 %v14759_v14 }
0x2696   :  { %14814 = vmatprep.subr.mxu0 %v18476_v35 }
0x2697   :  { %14815 = vmatpush1.msra.mxu0 %v14758_v15 }
0x2698   :  { %14816 = vmatprep.subr.mxu0 %v18476_v35 }
0x2699   :  { %14817 = vmatpush1.msra.mxu0 %v14757_v6 }
0x269a   :  { %14818 = vmatprep.subr.mxu0 %v18476_v35 }
0x269b   :  { %14819 = vmatpush1.msra.mxu0 %v14756_v10 }
0x269c   :  { %14820 = vmatprep.subr.mxu0 %v18476_v35 }
0x269d   :  { %14821 = vmatpush1.msra.mxu0 %v14755_v20 }
0x269e   :  { %14836 = vmatprep.subr.mxu0 %v18476_v35 }
0x269f   :  { %14837 = vmatpush2.msra.mxu0 %v14779_v30 }
0x26a0   :  { %14838 = vmatprep.subr.mxu0 %v18476_v35 }
0x26a1   :  { %14839 = vmatpush2.msra.mxu0 %v14778_v48 }
0x26a2   :  { %14840 = vmatprep.subr.mxu0 %v18476_v35 }
0x26a3   :  { %14841 = vmatpush2.msra.mxu0 %v14777_v33 }
0x26a4   :  { %14842 = vmatprep.subr.mxu0 %v18476_v35 }
0x26a5   :  { %14843 = vmatpush2.msra.mxu0 %v14776_v49 }
0x26a6   :  { %14844 = vmatprep.subr.mxu0 %v18476_v35 }
0x26a7   :  { %14845 = vmatpush2.msra.mxu0 %v14775_v36 }
0x26a8   :  { %14846 = vmatprep.subr.mxu0 %v18476_v35 }
0x26a9   :  { %14847 = vmatpush2.msra.mxu0 %v14774_v63 }
0x26aa   :  { %14848 = vmatprep.subr.mxu0 %v18476_v35 }
0x26ab   :  { %14849 = vmatpush2.msra.mxu0 %v14773_v50 }
0x26ac   :  { %14850 = vmatprep.subr.mxu0 %v18476_v35 }
0x26ad   :  { %14851 = vmatpush2.msra.mxu0 %v14772_v34 }
0x26ae   :  { %14852 = vmatprep.subr.mxu0 %v18476_v35  ;;  %v14722_v35 = vrot.slane %v14680_v19, %v19213_v27 }
0x26af   :  { %14853 = vmatpush2.msra.mxu0 %v14771_v18 }
0x270e   :  { %v14685_v51 = vpop.xlane.xlu0 %14684 }
0x270f   :  { %v14690_v42 = vmul.f32 0.005, %v14685_v51 }
0x2711   :  { %v21160_v17 = vsub.f32 %v14676_v32, %v14690_v42  ;;  %v21162_v22 = vsub.f32 %v14677_v43, %v14690_v42 }
0x2712   :  { %v14689_v11 = vpop.xlane.xlu1 %14688 }
0x2713   :  { %v14691_v46 = vmul.f32 0.005, %v14689_v11  ;;  %v14696_v56 = vmul.f32 %v21160_v17, %v21160_v17  ;;  %v14697_v60 = vmul.f32 %v21162_v22, %v21162_v22 }
0x2715   :  { %v21168_v40 = vsub.f32 %v14678_v0, %v14691_v46  ;;  %v21170_v53 = vsub.f32 %v14679_v37, %v14691_v46  ;;  %v14700_v41 = vsel %vm261_vm1, %v14697_v60, 0.0  ;;  %v14737_v0 = vrot.slane %v14681_v31, %v19213_v27  ;;  %v16869_v27 = vld [vmem:[%s18657_s12] ss:$0 sm:$0xff] }
0x2716   :  { %v14701_v47 = vadd.f32 %v14700_v41, %v14696_v56 }
0x2717   :  { %v14698_v52 = vmul.f32 %v21168_v40, %v21168_v40  ;;  %v14699_v61 = vmul.f32 %v21170_v53, %v21170_v53 }
0x2718   :  { %14702 = vadd.xlane.f32.xlu0 %v14701_v47 }
0x2719   :  { %v14704_v55 = vsel %vm261_vm1, %v14699_v61, 0.0 }
0x271a   :  { %v14705_v62 = vadd.f32 %v14704_v55, %v14698_v52 }
0x271c   :  { %14706 = vadd.xlane.f32.xlu1 %v14705_v62 }
0x27a1   :  { %v14703_v8 = vpop.xlane.xlu0 %14702 }
0x27a2   :  { %v14708_v21 = vmul.f32 0.005, %v14703_v8 }
0x27a4   :  { %v14710_v58 = vadd.f32 1e-05, %v14708_v21 }
0x27a5   :  { %v14707_v54 = vpop.xlane.xlu1 %14706 }
0x27a6   :  { %18410 = vrsqrt.f32 %v14710_v58  ;;  %v14709_v59 = vmul.f32 0.005, %v14707_v54 }
0x27a8   :  { %v14711_v3 = vadd.f32 1e-05, %v14709_v59 }
0x27aa   :  { %18412 = vrsqrt.f32 %v14711_v3 }
0x27b3   :  { %v18411_v43 = vpop.eup %18410 }
0x27b4   :  { %v14714_v32 = vmul.f32 %v18411_v43, %v21160_v17  ;;  %v14715_v28 = vmul.f32 %v18411_v43, %v21162_v22 }
0x27b6   :  { %v14730_v26 = vmul.f32 %v14726_v1, %v14715_v28  ;;  %v14729_v44 = vmul.f32 %v14722_v35, %v14714_v32 }
0x27b7   :  { %v18413_v45 = vpop.eup %18412 }
0x27b8   :  { %v14716_v38 = vmul.f32 %v18413_v45, %v21168_v40  ;;  %v14717_v37 = vmul.f32 %v18413_v45, %v21170_v53  ;;  %v14745_v57 = vadd.f32 %v14741_v39, %v14730_v26  ;;  %v14744_v2 = vadd.f32 %v14737_v0, %v14729_v44 }
0x27ba   :  { %v14732_v25 = vmul.f32 %v14726_v1, %v14717_v37  ;;  %v14731_v5 = vmul.f32 %v14722_v35, %v14716_v38  ;;  %v14749_v9 = vsel %vm261_vm1, %v14745_v57, 0.0 }
0x27bc   :  { %v14747_v4 = vadd.f32 %v14741_v39, %v14732_v25  ;;  %v14746_v12 = vadd.f32 %v14737_v0, %v14731_v5 }
0x27be   :  { %v14750_v7 = vsel %vm261_vm1, %v14747_v4, 0.0  ;;  %v14748_v29 = vadd.f32 %v14746_v12, %v14744_v2 }
0x27bf   :  { %v14751_v24 = vadd.f32 %v14750_v7, %v14749_v9 }
0x27c0   :  { %v14753_v42 = vmul.f32 0.5, %v14748_v29 }
0x27c1   :  { %v14754_v51 = vmul.f32 0.5, %v14751_v24 }
0x27c3   :  { %16870 = vmatprep.mubr.msk.f32.mxu0 %vm261_vm1, %v14754_v51 }
0x27c4   :  { %14855 = vmatmul.mubr.f32.vlgmr.msra.gmra.mxu0 %v14753_v42 }
0x2884   :  { %v14856_v17 = vpop.f32.mrf.mxu0 }
0x2885   :  { %v14857_v22 = vadd.f32 %v16869_v27, %v14856_v17 }
0x2886   :  { %v14858_v11 = vpop.f32.mrf.mxu0 }
0x2887   :  { %14861 = vst.msk [vmem:[#allocation2] sm:$0xff] %vm14860_vm6, %v14857_v22 }
0x2888   :  { %18429 = shalt.err (!%p18426_p4)
}
0x2889   :  { %14871 = dma.vmem_to_hbm [thread:$0]  %s14869_s4, 128, %s18662_s20, [#allocation3]  }
0x288a   :  { %18438 = dma.done.wait [#allocation3], 128  }
0x288b   :  { %18439 = vsyncadd [#allocation3], 4294967168 }
0x288c   :  { %14875 = vsyncpa [#allocation3], 1 }

</bundles_post_ra>
